<compile_context>
chip_gen: v5e
topology: v5e:2x2
jax: 0.10.0
libtpu: 0.0.40
codegen_flags: <defaults>
</compile_context>

<pallas_src>
import functools

import jax
import jax.numpy as jnp
from jax.experimental import pallas as pl
from jax.experimental.pallas import tpu as pltpu


_VMEM_LIMIT = 32 * 1024 * 1024  # explicit scoped-VMEM limit (safe on v5e/v6e/v7x)


def _round_up(x, m):
    return (x + m - 1) // m * m


# ---------------------------------------------------------------------------
# Stage 1: Conv2d(3->64, k4, s2, p1) + MaxPool(4,4) + BN1(eval) + ReLU, fused.
# The im2col patches are grouped by pooling-window position; the pool is a
# max-accumulation over the last grid axis.
# ---------------------------------------------------------------------------

def _stage1_kernel(a_ref, w_ref, sc_ref, sh_ref, o_ref, acc_ref):
    """a_ref: (1, 4, tm, 48) bf16 (one window-column group, 4 window-row offsets)
    w_ref: (48, 64) bf16; sc/sh: (1, 64) f32 (conv bias folded into shift)
    o_ref: (tm, 64) bf16 pooled activation; acc_ref: (tm, 64) f32 running max."""
    win = pl.program_id(1)
    m = jnp.dot(a_ref[0, 0], w_ref[...], preferred_element_type=jnp.float32)
    for dh in range(1, a_ref.shape[1]):
        y = jnp.dot(a_ref[0, dh], w_ref[...], preferred_element_type=jnp.float32)
        m = jnp.maximum(m, y)

    @pl.when(win == 0)
    def _():
        acc_ref[...] = m

    @pl.when(win > 0)
    def _():
        acc_ref[...] = jnp.maximum(acc_ref[...], m)

    @pl.when(win == pl.num_programs(1) - 1)
    def _():
        y = acc_ref[...] * sc_ref[...] + sh_ref[...]   # BatchNorm (eval) affine
        o_ref[...] = jnp.maximum(y, 0.0).astype(o_ref.dtype)


def conv1_pool_bn_relu(x_nhwc, w1m, scale1, shift1):
    N, H, W, C = x_nhwc.shape
    Hc = (H + 2 - 4) // 2 + 1
    Wc = (W + 2 - 4) // 2 + 1
    assert Hc % 4 == 0 and Wc % 4 == 0, "architecture implies a 224x224 input"
    Hp, Wp = Hc // 4, Wc // 4
    K = 16 * C  # 4x4 conv patch

    # im2col grouped by pooling-window position: conv position (4ho+dh, 4wo+dw)
    # reads padded input at (8ho + 2dh+di, 8wo + 2dw+dj).  One XLA gather pass.
    xp = jnp.pad(x_nhwc, ((0, 0), (1, 1), (1, 1), (0, 0)))
    dw_groups = []
    for dw in range(4):
        dh_groups = []
        for dh in range(4):
            pats = []
            for di in range(4):
                for dj in range(4):
                    r0, c0 = 2 * dh + di, 2 * dw + dj
                    pats.append(xp[:, r0:r0 + 8 * (Hp - 1) + 1:8,
                                    c0:c0 + 8 * (Wp - 1) + 1:8, :])
            dh_groups.append(jnp.stack(pats, axis=3))       # (N, Hp, Wp, 16, C)
        dw_groups.append(jnp.stack(dh_groups, axis=0))       # (4, N, Hp, Wp, 16, C)
    a = jnp.stack(dw_groups, axis=0).reshape(4, 4, N * Hp * Wp, K)

    M = N * Hp * Wp
    tm = Hp * Wp                         # one image per row tile (784 for 224 input)
    assert tm % 8 == 0
    grid = (M // tm, 4)                  # (batch, window-columns): even step count

    cost = pl.CostEstimate(
        flops=2 * 16 * M * K * 64,
        transcendentals=0,
        bytes_accessed=16 * M * K * 2 + M * 64 * 2 + K * 64 * 2,
    )
    out = pl.pallas_call(
        _stage1_kernel,
        out_shape=jax.ShapeDtypeStruct((M, 64), jnp.bfloat16),
        grid=grid,
        in_specs=[
            pl.BlockSpec((1, 4, tm, K), lambda i, w: (w, 0, i, 0)),
            pl.BlockSpec((K, 64), lambda i, w: (0, 0)),
            pl.BlockSpec((1, 64), lambda i, w: (0, 0)),
            pl.BlockSpec((1, 64), lambda i, w: (0, 0)),
        ],
        out_specs=pl.BlockSpec((tm, 64), lambda i, w: (i, 0)),
        scratch_shapes=[pltpu.VMEM((tm, 64), jnp.float32)],
        compiler_params=pltpu.CompilerParams(
            dimension_semantics=("parallel", "arbitrary"),
            vmem_limit_bytes=_VMEM_LIMIT),
        cost_estimate=cost,
    )(a, w1m, scale1, shift1)
    return out.reshape(N, Hp, Wp, 64)


# ---------------------------------------------------------------------------
# Tail A: Conv2d(64->128, k2, s2, p1) + MaxPool(3,3) + BN2(eval) + ReLU
# (single VMEM-resident kernel; max over the 9 window-grouped matmuls)
# ---------------------------------------------------------------------------

def _tail_a_kernel(a_ref, w_ref, sc_ref, sh_ref, o_ref):
    m = jnp.dot(a_ref[0], w_ref[...], preferred_element_type=jnp.float32)
    for win in range(1, a_ref.shape[0]):
        y = jnp.dot(a_ref[win], w_ref[...], preferred_element_type=jnp.float32)
        m = jnp.maximum(m, y)
    y = m * sc_ref[...] + sh_ref[...]
    o_ref[...] = jnp.maximum(y, 0.0).astype(o_ref.dtype)


def conv2_pool_bn_relu(p1, w2m, scale2, shift2):
    N, Hp1, Wp1, C1 = p1.shape
    assert Hp1 == Wp1
    Hc2 = (Hp1 + 2 - 2) // 2 + 1          # conv2 output size (15 for 28 input)
    assert Hc2 % 3 == 0
    Ho2 = Hc2 // 3                        # pooled output size (5)

    p1p = jnp.pad(p1, ((0, 0), (1, 1), (1, 1), (0, 0)))
    wins = []
    for dh in range(3):
        for dw in range(3):
            pats = []
            for di in range(2):
                for dj in range(2):
                    r0, c0 = 2 * dh + di, 2 * dw + dj
                    pats.append(p1p[:, r0:r0 + 6 * (Ho2 - 1) + 1:6,
                                    c0:c0 + 6 * (Ho2 - 1) + 1:6, :])
            wins.append(jnp.stack(pats, axis=3))            # (N, 5, 5, 4, C1)
    a2 = jnp.stack(wins, axis=0).reshape(9, N * Ho2 * Ho2, 4 * C1)

    out = pl.pallas_call(
        _tail_a_kernel,
        out_shape=jax.ShapeDtypeStruct((N * Ho2 * Ho2, 128), jnp.bfloat16),
        compiler_params=pltpu.CompilerParams(vmem_limit_bytes=_VMEM_LIMIT),
    )(a2, w2m, scale2, shift2)
    return out.reshape(N, Ho2, Ho2, 128)


# ---------------------------------------------------------------------------
# Tail B: Conv2d(128->256, k2, s1, p1) + MaxPool(6) + BN3(eval) + ReLU
#         + fc1/ReLU + fc2/ReLU + fc3, all in one VMEM-resident kernel.
# ---------------------------------------------------------------------------

def _tail_b_kernel(a_ref, w3_ref, sc_ref, sh_ref,
                   w1_ref, b1_ref, w2_ref, b2_ref, wl_ref, bl_ref, o_ref):
    rows = []
    for n in range(a_ref.shape[0]):
        y = jnp.dot(a_ref[n], w3_ref[...], preferred_element_type=jnp.float32)  # (36, 256)
        rows.append(jnp.max(y, axis=0, keepdims=True))       # 6x6 global max-pool
    m = jnp.concatenate(rows, axis=0)                         # (N, 256)
    h = jnp.maximum(m * sc_ref[...] + sh_ref[...], 0.0).astype(jnp.bfloat16)     # BN3 + ReLU
    h = jnp.dot(h, w1_ref[...], preferred_element_type=jnp.float32) + b1_ref[...]
    h = jnp.maximum(h, 0.0).astype(jnp.bfloat16)              # fc1 + ReLU
    h = jnp.dot(h, w2_ref[...], preferred_element_type=jnp.float32) + b2_ref[...]
    h = jnp.maximum(h, 0.0).astype(jnp.bfloat16)              # fc2 + ReLU
    o_ref[...] = jnp.dot(h, wl_ref[...], preferred_element_type=jnp.float32) + bl_ref[...]


def conv3_pool_bn_relu_fc(h2, q):
    N, Ho2, Wo2, C2 = h2.shape
    Ho3 = Ho2 + 1                         # conv3 out (k=2, s=1, p=1): 5 -> 6
    assert Ho3 == 6, "MaxPool(6) requires a 6x6 conv3 output"

    h2p = jnp.pad(h2, ((0, 0), (1, 1), (1, 1), (0, 0)))       # (N, 7, 7, 128)
    pats = [h2p[:, di:di + Ho3, dj:dj + Ho3, :] for di in range(2) for dj in range(2)]
    a3 = jnp.stack(pats, axis=3).reshape(N, Ho3 * Ho3, 4 * C2)   # (N, 36, 512)

    out = pl.pallas_call(
        _tail_b_kernel,
        out_shape=jax.ShapeDtypeStruct((N, q["fc3_w"].shape[1]), jnp.float32),
        compiler_params=pltpu.CompilerParams(vmem_limit_bytes=_VMEM_LIMIT),
    )(a3, q["conv3_w"], q["bn3_scale"], q["bn3_shift"],
      q["fc1_w"], q["fc1_b"], q["fc2_w"], q["fc2_b"], q["fc3_w"], q["fc3_b"])
    return out


# ---------------------------------------------------------------------------
# Full forward pass (3 pallas_calls)
# ---------------------------------------------------------------------------

def chess_classifier_forward(x_nchw, q, *, num_labels):
    x = jnp.transpose(x_nchw, (0, 2, 3, 1)).astype(jnp.bfloat16)   # NCHW -> NHWC, bf16
    p1 = conv1_pool_bn_relu(x, q["conv1_w"], q["bn1_scale"], q["bn1_shift"])
    h2 = conv2_pool_bn_relu(p1, q["conv2_w"], q["bn2_scale"], q["bn2_shift"])
    logits = conv3_pool_bn_relu_fc(h2, q)                           # (N, 128) f32
    return logits[:, :num_labels]


# ---------------------------------------------------------------------------
# Parameter init (PyTorch-shaped) + one-time layout / folding preparation
# ---------------------------------------------------------------------------

def init_params(key, num_labels):
    ks = list(jax.random.split(key, 24))
    nxt = iter(ks).__next__

    def nrm(shape, scale):
        return jax.random.normal(nxt(), shape, jnp.float32) * scale

    def bn(c):
        return (1.0 + 0.1 * jax.random.normal(nxt(), (c,), jnp.float32),           # gamma
                0.1 * jax.random.normal(nxt(), (c,), jnp.float32),                 # beta
                0.1 * jax.random.normal(nxt(), (c,), jnp.float32),                 # running_mean
                1.0 + 0.1 * jnp.abs(jax.random.normal(nxt(), (c,), jnp.float32)))  # running_var

    p = {}
    p["conv1_w"] = nrm((64, 3, 4, 4), (2.0 / (3 * 4 * 4)) ** 0.5)
    p["conv1_b"] = nrm((64,), 0.01)
    p["bn1_g"], p["bn1_b"], p["bn1_m"], p["bn1_v"] = bn(64)

    p["conv2_w"] = nrm((128, 64, 2, 2), (2.0 / (64 * 2 * 2)) ** 0.5)
    p["conv2_b"] = nrm((128,), 0.01)
    p["bn2_g"], p["bn2_b"], p["bn2_m"], p["bn2_v"] = bn(128)

    p["conv3_w"] = nrm((256, 128, 2, 2), (2.0 / (128 * 2 * 2)) ** 0.5)
    p["conv3_b"] = nrm((256,), 0.01)
    p["bn3_g"], p["bn3_b"], p["bn3_m"], p["bn3_v"] = bn(256)

    p["fc1_w"] = nrm((512, 256), (2.0 / 256) ** 0.5)   # PyTorch Linear: (out, in)
    p["fc1_b"] = nrm((512,), 0.01)
    p["fc2_w"] = nrm((256, 512), (2.0 / 512) ** 0.5)
    p["fc2_b"] = nrm((256,), 0.01)
    p["fc3_w"] = nrm((num_labels, 256), (1.0 / 256) ** 0.5)
    p["fc3_b"] = nrm((num_labels,), 0.01)
    return p


def prepare_params(p, eps=1e-5):
    """One-time layout plumbing: conv weight -> (k*k*Cin, Cout) bf16, fc weight
    transpose -> (in, out) bf16, BN(eval) + conv bias folded into per-channel
    affine (a per-channel bias commutes with max-pool), fc3 padded to 128 lanes."""
    def conv_w(w):
        Cout, Cin, kh, kw = w.shape
        return jnp.transpose(w, (2, 3, 1, 0)).reshape(kh * kw * Cin, Cout).astype(jnp.bfloat16)

    def bn_fold(g, b, m, v, conv_bias):
        inv = 1.0 / jnp.sqrt(v + eps)
        scale = g * inv
        shift = b - m * scale + conv_bias * scale       # BN(max(conv)+bias)
        return (scale.reshape(1, -1).astype(jnp.float32),
                shift.reshape(1, -1).astype(jnp.float32))

    L = p["fc3_w"].shape[0]
    Lp = _round_up(L, 128)
    fc3_w = p["fc3_w"].T.astype(jnp.bfloat16)
    fc3_b = p["fc3_b"].astype(jnp.float32)
    if Lp != L:
        fc3_w = jnp.pad(fc3_w, ((0, 0), (0, Lp - L)))
        fc3_b = jnp.pad(fc3_b, ((0, Lp - L),))

    q = {
        "conv1_w": conv_w(p["conv1_w"]),
        "conv2_w": conv_w(p["conv2_w"]),
        "conv3_w": conv_w(p["conv3_w"]),
        "fc1_w": p["fc1_w"].T.astype(jnp.bfloat16),
        "fc1_b": p["fc1_b"].reshape(1, -1).astype(jnp.float32),
        "fc2_w": p["fc2_w"].T.astype(jnp.bfloat16),
        "fc2_b": p["fc2_b"].reshape(1, -1).astype(jnp.float32),
        "fc3_w": fc3_w,
        "fc3_b": fc3_b.reshape(1, -1),
    }
    q["bn1_scale"], q["bn1_shift"] = bn_fold(p["bn1_g"], p["bn1_b"], p["bn1_m"], p["bn1_v"], p["conv1_b"])
    q["bn2_scale"], q["bn2_shift"] = bn_fold(p["bn2_g"], p["bn2_b"], p["bn2_m"], p["bn2_v"], p["conv2_b"])
    q["bn3_scale"], q["bn3_shift"] = bn_fold(p["bn3_g"], p["bn3_b"], p["bn3_m"], p["bn3_v"], p["conv3_b"])
    return q


if __name__ == "__main__":
    num_labels = 13  # 6 white + 6 black pieces + empty square
    key = jax.random.PRNGKey(0)
    pkey, xkey = jax.random.split(key)

    params = init_params(pkey, num_labels)
    prepped = prepare_params(params)

    # The architecture (Linear(256*1*1, ...) after the 6x6 pool) implies 224x224 RGB input.
    x = jax.random.normal(xkey, (2, 3, 224, 224), jnp.float32)  # NCHW like PyTorch

    fwd = jax.jit(functools.partial(chess_classifier_forward, num_labels=num_labels))
    out = fwd(x, prepped)
    out = jax.block_until_ready(out)
    assert out.shape == (2, num_labels), out.shape
    assert bool(jnp.all(jnp.isfinite(out)))
    print("KERNEL_OK")
</pallas_src>

<mosaic_0001>
module attributes {stable_mosaic.version = 11 : i64} {
  func.func @_stage1_kernel(%arg0: i32, %arg1: i32, %arg2: memref<1x4x784x48xbf16, #tpu.memory_space<vmem>>, %arg3: memref<48x64xbf16, #tpu.memory_space<vmem>>, %arg4: memref<1x64xf32, #tpu.memory_space<vmem>>, %arg5: memref<1x64xf32, #tpu.memory_space<vmem>>, %arg6: memref<784x64xbf16, #tpu.memory_space<vmem>>, %arg7: memref<784x64xf32, #tpu.memory_space<vmem>>) attributes {dimension_semantics = [#tpu.dimension_semantics<parallel>, #tpu.dimension_semantics<arbitrary>], iteration_bounds = array<i64: 2, 4>, scalar_prefetch = 0 : i64, scratch_operands = 1 : i64, tpu.core_type = #tpu.core_type<tc>, window_params = [{transform_indices = @transform_0, window_bounds = array<i64: 1, 4, 784, 48>}, {pipeline_mode = #tpu.pipeline_mode<synchronous>, transform_indices = @transform_1, window_bounds = array<i64: 48, 64>}, {pipeline_mode = #tpu.pipeline_mode<synchronous>, transform_indices = @transform_2, window_bounds = array<i64: 1, 64>}, {pipeline_mode = #tpu.pipeline_mode<synchronous>, transform_indices = @transform_3, window_bounds = array<i64: 1, 64>}, {transform_indices = @transform_4, window_bounds = array<i64: 784, 64>}]} {
    %c0 = arith.constant 0 : index
    %c0_0 = arith.constant 0 : index
    %c0_1 = arith.constant 0 : index
    %c0_2 = arith.constant 0 : index
    %0 = vector.load %arg2[%c0, %c0_0, %c0_1, %c0_2] : memref<1x4x784x48xbf16, #tpu.memory_space<vmem>>, vector<1x1x784x48xbf16>
    %1 = vector.shape_cast %0 : vector<1x1x784x48xbf16> to vector<784x48xbf16>
    %c0_3 = arith.constant 0 : index
    %c0_4 = arith.constant 0 : index
    %2 = vector.load %arg3[%c0_3, %c0_4] : memref<48x64xbf16, #tpu.memory_space<vmem>>, vector<48x64xbf16>
    %cst = arith.constant dense<0.000000e+00> : vector<784x64xf32>
    %3 = tpu.matmul %1, %2, %cst {dimension_numbers = #tpu.dot_dimension_numbers<[1], [0], [0], [1], [0, 0, 1, 1], [], []>} : vector<784x48xbf16>, vector<48x64xbf16>, vector<784x64xf32> -> vector<784x64xf32>
    %c0_5 = arith.constant 0 : index
    %c1 = arith.constant 1 : index
    %c0_6 = arith.constant 0 : index
    %c0_7 = arith.constant 0 : index
    %4 = vector.load %arg2[%c0_5, %c1, %c0_6, %c0_7] : memref<1x4x784x48xbf16, #tpu.memory_space<vmem>>, vector<1x1x784x48xbf16>
    %5 = vector.shape_cast %4 : vector<1x1x784x48xbf16> to vector<784x48xbf16>
    %c0_8 = arith.constant 0 : index
    %c0_9 = arith.constant 0 : index
    %6 = vector.load %arg3[%c0_8, %c0_9] : memref<48x64xbf16, #tpu.memory_space<vmem>>, vector<48x64xbf16>
    %cst_10 = arith.constant dense<0.000000e+00> : vector<784x64xf32>
    %7 = tpu.matmul %5, %6, %cst_10 {dimension_numbers = #tpu.dot_dimension_numbers<[1], [0], [0], [1], [0, 0, 1, 1], [], []>} : vector<784x48xbf16>, vector<48x64xbf16>, vector<784x64xf32> -> vector<784x64xf32>
    %8 = arith.maximumf %3, %7 : vector<784x64xf32>
    %c0_11 = arith.constant 0 : index
    %c2 = arith.constant 2 : index
    %c0_12 = arith.constant 0 : index
    %c0_13 = arith.constant 0 : index
    %9 = vector.load %arg2[%c0_11, %c2, %c0_12, %c0_13] : memref<1x4x784x48xbf16, #tpu.memory_space<vmem>>, vector<1x1x784x48xbf16>
    %10 = vector.shape_cast %9 : vector<1x1x784x48xbf16> to vector<784x48xbf16>
    %c0_14 = arith.constant 0 : index
    %c0_15 = arith.constant 0 : index
    %11 = vector.load %arg3[%c0_14, %c0_15] : memref<48x64xbf16, #tpu.memory_space<vmem>>, vector<48x64xbf16>
    %cst_16 = arith.constant dense<0.000000e+00> : vector<784x64xf32>
    %12 = tpu.matmul %10, %11, %cst_16 {dimension_numbers = #tpu.dot_dimension_numbers<[1], [0], [0], [1], [0, 0, 1, 1], [], []>} : vector<784x48xbf16>, vector<48x64xbf16>, vector<784x64xf32> -> vector<784x64xf32>
    %13 = arith.maximumf %8, %12 : vector<784x64xf32>
    %c0_17 = arith.constant 0 : index
    %c3 = arith.constant 3 : index
    %c0_18 = arith.constant 0 : index
    %c0_19 = arith.constant 0 : index
    %14 = vector.load %arg2[%c0_17, %c3, %c0_18, %c0_19] : memref<1x4x784x48xbf16, #tpu.memory_space<vmem>>, vector<1x1x784x48xbf16>
    %15 = vector.shape_cast %14 : vector<1x1x784x48xbf16> to vector<784x48xbf16>
    %c0_20 = arith.constant 0 : index
    %c0_21 = arith.constant 0 : index
    %16 = vector.load %arg3[%c0_20, %c0_21] : memref<48x64xbf16, #tpu.memory_space<vmem>>, vector<48x64xbf16>
    %cst_22 = arith.constant dense<0.000000e+00> : vector<784x64xf32>
    %17 = tpu.matmul %15, %16, %cst_22 {dimension_numbers = #tpu.dot_dimension_numbers<[1], [0], [0], [1], [0, 0, 1, 1], [], []>} : vector<784x48xbf16>, vector<48x64xbf16>, vector<784x64xf32> -> vector<784x64xf32>
    %18 = arith.maximumf %13, %17 : vector<784x64xf32>
    %c0_i32 = arith.constant 0 : i32
    %19 = arith.cmpi eq, %arg1, %c0_i32 : i32
    %20 = arith.extui %19 : i1 to i32
    %c0_i32_23 = arith.constant 0 : i32
    %21 = arith.cmpi ne, %20, %c0_i32_23 : i32
    scf.if %21 {
      %c0_27 = arith.constant 0 : index
      %c0_28 = arith.constant 0 : index
      %28 = vector.load %arg7[%c0_27, %c0_28] : memref<784x64xf32, #tpu.memory_space<vmem>>, vector<784x64xf32>
      tpu.vector_store %arg7[%c0_27, %c0_28], %18 {strides = array<i32>} : memref<784x64xf32, #tpu.memory_space<vmem>>, vector<784x64xf32>,
    } else {
    }
    %c0_i32_24 = arith.constant 0 : i32
    %22 = arith.cmpi sgt, %arg1, %c0_i32_24 : i32
    %23 = arith.extui %22 : i1 to i32
    %c0_i32_25 = arith.constant 0 : i32
    %24 = arith.cmpi ne, %23, %c0_i32_25 : i32
    scf.if %24 {
      %c0_27 = arith.constant 0 : index
      %c0_28 = arith.constant 0 : index
      %28 = vector.load %arg7[%c0_27, %c0_28] : memref<784x64xf32, #tpu.memory_space<vmem>>, vector<784x64xf32>
      %29 = arith.maximumf %28, %18 : vector<784x64xf32>
      %c0_29 = arith.constant 0 : index
      %c0_30 = arith.constant 0 : index
      %30 = vector.load %arg7[%c0_29, %c0_30] : memref<784x64xf32, #tpu.memory_space<vmem>>, vector<784x64xf32>
      tpu.vector_store %arg7[%c0_29, %c0_30], %29 {strides = array<i32>} : memref<784x64xf32, #tpu.memory_space<vmem>>, vector<784x64xf32>,
    } else {
    }
    %c3_i32 = arith.constant 3 : i32
    %25 = arith.cmpi eq, %arg1, %c3_i32 : i32
    %26 = arith.extui %25 : i1 to i32
    %c0_i32_26 = arith.constant 0 : i32
    %27 = arith.cmpi ne, %26, %c0_i32_26 : i32
    scf.if %27 {
      %c0_27 = arith.constant 0 : index
      %c0_28 = arith.constant 0 : index
      %28 = vector.load %arg7[%c0_27, %c0_28] : memref<784x64xf32, #tpu.memory_space<vmem>>, vector<784x64xf32>
      %c0_29 = arith.constant 0 : index
      %c0_30 = arith.constant 0 : index
      %29 = vector.load %arg4[%c0_29, %c0_30] : memref<1x64xf32, #tpu.memory_space<vmem>>, vector<1x64xf32>
      %30 = vector.broadcast %29 : vector<1x64xf32> to vector<784x64xf32>
      %31 = arith.mulf %28, %30 : vector<784x64xf32>
      %c0_31 = arith.constant 0 : index
      %c0_32 = arith.constant 0 : index
      %32 = vector.load %arg5[%c0_31, %c0_32] : memref<1x64xf32, #tpu.memory_space<vmem>>, vector<1x64xf32>
      %33 = vector.broadcast %32 : vector<1x64xf32> to vector<784x64xf32>
      %34 = arith.addf %31, %33 : vector<784x64xf32>
      %cst_33 = arith.constant 0.000000e+00 : f32
      %35 = vector.broadcast %cst_33 : f32 to vector<784x64xf32>
      %36 = arith.maximumf %34, %35 : vector<784x64xf32>
      %37 = arith.truncf %36 : vector<784x64xf32> to vector<784x64xbf16>
      %c0_34 = arith.constant 0 : index
      %c0_35 = arith.constant 0 : index
      %38 = vector.load %arg6[%c0_34, %c0_35] : memref<784x64xbf16, #tpu.memory_space<vmem>>, vector<784x64xbf16>
      tpu.vector_store %arg6[%c0_34, %c0_35], %37 {strides = array<i32>} : memref<784x64xbf16, #tpu.memory_space<vmem>>, vector<784x64xbf16>,
    } else {
    }
    return
  }
  func.func @transform_0(%arg0: i32, %arg1: i32) -> (i32, i32, i32, i32) {
    %c0_i32 = arith.constant 0 : i32
    %c0_i32_0 = arith.constant 0 : i32
    %c0_i32_1 = arith.constant 0 : i32
    return %arg1, %c0_i32, %arg0, %c0_i32_0 : i32, i32, i32, i32
  }
  func.func @transform_1(%arg0: i32, %arg1: i32) -> (i32, i32) {
    %c0_i32 = arith.constant 0 : i32
    %c0_i32_0 = arith.constant 0 : i32
    %c0_i32_1 = arith.constant 0 : i32
    return %c0_i32, %c0_i32_0 : i32, i32
  }
  func.func @transform_2(%arg0: i32, %arg1: i32) -> (i32, i32) {
    %c0_i32 = arith.constant 0 : i32
    %c0_i32_0 = arith.constant 0 : i32
    %c0_i32_1 = arith.constant 0 : i32
    return %c0_i32, %c0_i32_0 : i32, i32
  }
  func.func @transform_3(%arg0: i32, %arg1: i32) -> (i32, i32) {
    %c0_i32 = arith.constant 0 : i32
    %c0_i32_0 = arith.constant 0 : i32
    %c0_i32_1 = arith.constant 0 : i32
    return %c0_i32, %c0_i32_0 : i32, i32
  }
  func.func @transform_4(%arg0: i32, %arg1: i32) -> (i32, i32) {
    %c0_i32 = arith.constant 0 : i32
    %c0_i32_0 = arith.constant 0 : i32
    return %arg0, %c0_i32 : i32, i32
  }
}

module attributes {stable_mosaic.version = 11 : i64} {
  func.func @_tail_a_kernel(%arg0: memref<9x50x256xbf16, #tpu.memory_space<vmem>>, %arg1: memref<256x128xbf16, #tpu.memory_space<vmem>>, %arg2: memref<1x128xf32, #tpu.memory_space<vmem>>, %arg3: memref<1x128xf32, #tpu.memory_space<vmem>>, %arg4: memref<50x128xbf16, #tpu.memory_space<vmem>>) attributes {dimension_semantics = [], scalar_prefetch = 0 : i64, scratch_operands = 0 : i64, tpu.core_type = #tpu.core_type<tc>} {
    %c0 = arith.constant 0 : index
    %c0_0 = arith.constant 0 : index
    %c0_1 = arith.constant 0 : index
    %0 = vector.load %arg0[%c0, %c0_0, %c0_1] : memref<9x50x256xbf16, #tpu.memory_space<vmem>>, vector<1x50x256xbf16>
    %1 = vector.shape_cast %0 : vector<1x50x256xbf16> to vector<50x256xbf16>
    %c0_2 = arith.constant 0 : index
    %c0_3 = arith.constant 0 : index
    %2 = vector.load %arg1[%c0_2, %c0_3] : memref<256x128xbf16, #tpu.memory_space<vmem>>, vector<256x128xbf16>
    %cst = arith.constant dense<0.000000e+00> : vector<50x128xf32>
    %3 = tpu.matmul %1, %2, %cst {dimension_numbers = #tpu.dot_dimension_numbers<[1], [0], [0], [1], [0, 0, 1, 1], [], []>} : vector<50x256xbf16>, vector<256x128xbf16>, vector<50x128xf32> -> vector<50x128xf32>
    %c1 = arith.constant 1 : index
    %c0_4 = arith.constant 0 : index
    %c0_5 = arith.constant 0 : index
    %4 = vector.load %arg0[%c1, %c0_4, %c0_5] : memref<9x50x256xbf16, #tpu.memory_space<vmem>>, vector<1x50x256xbf16>
    %5 = vector.shape_cast %4 : vector<1x50x256xbf16> to vector<50x256xbf16>
    %c0_6 = arith.constant 0 : index
    %c0_7 = arith.constant 0 : index
    %6 = vector.load %arg1[%c0_6, %c0_7] : memref<256x128xbf16, #tpu.memory_space<vmem>>, vector<256x128xbf16>
    %cst_8 = arith.constant dense<0.000000e+00> : vector<50x128xf32>
    %7 = tpu.matmul %5, %6, %cst_8 {dimension_numbers = #tpu.dot_dimension_numbers<[1], [0], [0], [1], [0, 0, 1, 1], [], []>} : vector<50x256xbf16>, vector<256x128xbf16>, vector<50x128xf32> -> vector<50x128xf32>
    %8 = arith.maximumf %3, %7 : vector<50x128xf32>
    %c2 = arith.constant 2 : index
    %c0_9 = arith.constant 0 : index
    %c0_10 = arith.constant 0 : index
    %9 = vector.load %arg0[%c2, %c0_9, %c0_10] : memref<9x50x256xbf16, #tpu.memory_space<vmem>>, vector<1x50x256xbf16>
    %10 = vector.shape_cast %9 : vector<1x50x256xbf16> to vector<50x256xbf16>
    %c0_11 = arith.constant 0 : index
    %c0_12 = arith.constant 0 : index
    %11 = vector.load %arg1[%c0_11, %c0_12] : memref<256x128xbf16, #tpu.memory_space<vmem>>, vector<256x128xbf16>
    %cst_13 = arith.constant dense<0.000000e+00> : vector<50x128xf32>
    %12 = tpu.matmul %10, %11, %cst_13 {dimension_numbers = #tpu.dot_dimension_numbers<[1], [0], [0], [1], [0, 0, 1, 1], [], []>} : vector<50x256xbf16>, vector<256x128xbf16>, vector<50x128xf32> -> vector<50x128xf32>
    %13 = arith.maximumf %8, %12 : vector<50x128xf32>
    %c3 = arith.constant 3 : index
    %c0_14 = arith.constant 0 : index
    %c0_15 = arith.constant 0 : index
    %14 = vector.load %arg0[%c3, %c0_14, %c0_15] : memref<9x50x256xbf16, #tpu.memory_space<vmem>>, vector<1x50x256xbf16>
    %15 = vector.shape_cast %14 : vector<1x50x256xbf16> to vector<50x256xbf16>
    %c0_16 = arith.constant 0 : index
    %c0_17 = arith.constant 0 : index
    %16 = vector.load %arg1[%c0_16, %c0_17] : memref<256x128xbf16, #tpu.memory_space<vmem>>, vector<256x128xbf16>
    %cst_18 = arith.constant dense<0.000000e+00> : vector<50x128xf32>
    %17 = tpu.matmul %15, %16, %cst_18 {dimension_numbers = #tpu.dot_dimension_numbers<[1], [0], [0], [1], [0, 0, 1, 1], [], []>} : vector<50x256xbf16>, vector<256x128xbf16>, vector<50x128xf32> -> vector<50x128xf32>
    %18 = arith.maximumf %13, %17 : vector<50x128xf32>
    %c4 = arith.constant 4 : index
    %c0_19 = arith.constant 0 : index
    %c0_20 = arith.constant 0 : index
    %19 = vector.load %arg0[%c4, %c0_19, %c0_20] : memref<9x50x256xbf16, #tpu.memory_space<vmem>>, vector<1x50x256xbf16>
    %20 = vector.shape_cast %19 : vector<1x50x256xbf16> to vector<50x256xbf16>
    %c0_21 = arith.constant 0 : index
    %c0_22 = arith.constant 0 : index
    %21 = vector.load %arg1[%c0_21, %c0_22] : memref<256x128xbf16, #tpu.memory_space<vmem>>, vector<256x128xbf16>
    %cst_23 = arith.constant dense<0.000000e+00> : vector<50x128xf32>
    %22 = tpu.matmul %20, %21, %cst_23 {dimension_numbers = #tpu.dot_dimension_numbers<[1], [0], [0], [1], [0, 0, 1, 1], [], []>} : vector<50x256xbf16>, vector<256x128xbf16>, vector<50x128xf32> -> vector<50x128xf32>
    %23 = arith.maximumf %18, %22 : vector<50x128xf32>
    %c5 = arith.constant 5 : index
    %c0_24 = arith.constant 0 : index
    %c0_25 = arith.constant 0 : index
    %24 = vector.load %arg0[%c5, %c0_24, %c0_25] : memref<9x50x256xbf16, #tpu.memory_space<vmem>>, vector<1x50x256xbf16>
    %25 = vector.shape_cast %24 : vector<1x50x256xbf16> to vector<50x256xbf16>
    %c0_26 = arith.constant 0 : index
    %c0_27 = arith.constant 0 : index
    %26 = vector.load %arg1[%c0_26, %c0_27] : memref<256x128xbf16, #tpu.memory_space<vmem>>, vector<256x128xbf16>
    %cst_28 = arith.constant dense<0.000000e+00> : vector<50x128xf32>
    %27 = tpu.matmul %25, %26, %cst_28 {dimension_numbers = #tpu.dot_dimension_numbers<[1], [0], [0], [1], [0, 0, 1, 1], [], []>} : vector<50x256xbf16>, vector<256x128xbf16>, vector<50x128xf32> -> vector<50x128xf32>
    %28 = arith.maximumf %23, %27 : vector<50x128xf32>
    %c6 = arith.constant 6 : index
    %c0_29 = arith.constant 0 : index
    %c0_30 = arith.constant 0 : index
    %29 = vector.load %arg0[%c6, %c0_29, %c0_30] : memref<9x50x256xbf16, #tpu.memory_space<vmem>>, vector<1x50x256xbf16>
    %30 = vector.shape_cast %29 : vector<1x50x256xbf16> to vector<50x256xbf16>
    %c0_31 = arith.constant 0 : index
    %c0_32 = arith.constant 0 : index
    %31 = vector.load %arg1[%c0_31, %c0_32] : memref<256x128xbf16, #tpu.memory_space<vmem>>, vector<256x128xbf16>
    %cst_33 = arith.constant dense<0.000000e+00> : vector<50x128xf32>
    %32 = tpu.matmul %30, %31, %cst_33 {dimension_numbers = #tpu.dot_dimension_numbers<[1], [0], [0], [1], [0, 0, 1, 1], [], []>} : vector<50x256xbf16>, vector<256x128xbf16>, vector<50x128xf32> -> vector<50x128xf32>
    %33 = arith.maximumf %28, %32 : vector<50x128xf32>
    %c7 = arith.constant 7 : index
    %c0_34 = arith.constant 0 : index
    %c0_35 = arith.constant 0 : index
    %34 = vector.load %arg0[%c7, %c0_34, %c0_35] : memref<9x50x256xbf16, #tpu.memory_space<vmem>>, vector<1x50x256xbf16>
    %35 = vector.shape_cast %34 : vector<1x50x256xbf16> to vector<50x256xbf16>
    %c0_36 = arith.constant 0 : index
    %c0_37 = arith.constant 0 : index
    %36 = vector.load %arg1[%c0_36, %c0_37] : memref<256x128xbf16, #tpu.memory_space<vmem>>, vector<256x128xbf16>
    %cst_38 = arith.constant dense<0.000000e+00> : vector<50x128xf32>
    %37 = tpu.matmul %35, %36, %cst_38 {dimension_numbers = #tpu.dot_dimension_numbers<[1], [0], [0], [1], [0, 0, 1, 1], [], []>} : vector<50x256xbf16>, vector<256x128xbf16>, vector<50x128xf32> -> vector<50x128xf32>
    %38 = arith.maximumf %33, %37 : vector<50x128xf32>
    %c8 = arith.constant 8 : index
    %c0_39 = arith.constant 0 : index
    %c0_40 = arith.constant 0 : index
    %39 = vector.load %arg0[%c8, %c0_39, %c0_40] : memref<9x50x256xbf16, #tpu.memory_space<vmem>>, vector<1x50x256xbf16>
    %40 = vector.shape_cast %39 : vector<1x50x256xbf16> to vector<50x256xbf16>
    %c0_41 = arith.constant 0 : index
    %c0_42 = arith.constant 0 : index
    %41 = vector.load %arg1[%c0_41, %c0_42] : memref<256x128xbf16, #tpu.memory_space<vmem>>, vector<256x128xbf16>
    %cst_43 = arith.constant dense<0.000000e+00> : vector<50x128xf32>
    %42 = tpu.matmul %40, %41, %cst_43 {dimension_numbers = #tpu.dot_dimension_numbers<[1], [0], [0], [1], [0, 0, 1, 1], [], []>} : vector<50x256xbf16>, vector<256x128xbf16>, vector<50x128xf32> -> vector<50x128xf32>
    %43 = arith.maximumf %38, %42 : vector<50x128xf32>
    %c0_44 = arith.constant 0 : index
    %c0_45 = arith.constant 0 : index
    %44 = vector.load %arg2[%c0_44, %c0_45] : memref<1x128xf32, #tpu.memory_space<vmem>>, vector<1x128xf32>
    %45 = vector.broadcast %44 : vector<1x128xf32> to vector<50x128xf32>
    %46 = arith.mulf %43, %45 : vector<50x128xf32>
    %c0_46 = arith.constant 0 : index
    %c0_47 = arith.constant 0 : index
    %47 = vector.load %arg3[%c0_46, %c0_47] : memref<1x128xf32, #tpu.memory_space<vmem>>, vector<1x128xf32>
    %48 = vector.broadcast %47 : vector<1x128xf32> to vector<50x128xf32>
    %49 = arith.addf %46, %48 : vector<50x128xf32>
    %cst_48 = arith.constant 0.000000e+00 : f32
    %50 = vector.broadcast %cst_48 : f32 to vector<50x128xf32>
    %51 = arith.maximumf %49, %50 : vector<50x128xf32>
    %52 = arith.truncf %51 : vector<50x128xf32> to vector<50x128xbf16>
    %c0_49 = arith.constant 0 : index
    %c0_50 = arith.constant 0 : index
    %53 = vector.load %arg4[%c0_49, %c0_50] : memref<50x128xbf16, #tpu.memory_space<vmem>>, vector<50x128xbf16>
    tpu.vector_store %arg4[%c0_49, %c0_50], %52 {strides = array<i32>} : memref<50x128xbf16, #tpu.memory_space<vmem>>, vector<50x128xbf16>,
    return
  }
}

module attributes {stable_mosaic.version = 11 : i64} {
  func.func @_tail_b_kernel(%arg0: memref<2x36x512xbf16, #tpu.memory_space<vmem>>, %arg1: memref<512x256xbf16, #tpu.memory_space<vmem>>, %arg2: memref<1x256xf32, #tpu.memory_space<vmem>>, %arg3: memref<1x256xf32, #tpu.memory_space<vmem>>, %arg4: memref<256x512xbf16, #tpu.memory_space<vmem>>, %arg5: memref<1x512xf32, #tpu.memory_space<vmem>>, %arg6: memref<512x256xbf16, #tpu.memory_space<vmem>>, %arg7: memref<1x256xf32, #tpu.memory_space<vmem>>, %arg8: memref<256x128xbf16, #tpu.memory_space<vmem>>, %arg9: memref<1x128xf32, #tpu.memory_space<vmem>>, %arg10: memref<2x128xf32, #tpu.memory_space<vmem>>) attributes {dimension_semantics = [], scalar_prefetch = 0 : i64, scratch_operands = 0 : i64, tpu.core_type = #tpu.core_type<tc>} {
    %c0 = arith.constant 0 : index
    %c0_0 = arith.constant 0 : index
    %c0_1 = arith.constant 0 : index
    %0 = vector.load %arg0[%c0, %c0_0, %c0_1] : memref<2x36x512xbf16, #tpu.memory_space<vmem>>, vector<1x36x512xbf16>
    %1 = vector.shape_cast %0 : vector<1x36x512xbf16> to vector<36x512xbf16>
    %c0_2 = arith.constant 0 : index
    %c0_3 = arith.constant 0 : index
    %2 = vector.load %arg1[%c0_2, %c0_3] : memref<512x256xbf16, #tpu.memory_space<vmem>>, vector<512x256xbf16>
    %cst = arith.constant dense<0.000000e+00> : vector<36x256xf32>
    %3 = tpu.matmul %1, %2, %cst {dimension_numbers = #tpu.dot_dimension_numbers<[1], [0], [0], [1], [0, 0, 1, 1], [], []>} : vector<36x512xbf16>, vector<512x256xbf16>, vector<36x256xf32> -> vector<36x256xf32>
    %cst_4 = arith.constant dense<0xFF800000> : vector<256xf32>
    %4 = vector.multi_reduction <maximumf>, %3, %cst_4 [0] : vector<36x256xf32> to vector<256xf32>
    %5 = vector.shape_cast %4 : vector<256xf32> to vector<1x256xf32>
    %c1 = arith.constant 1 : index
    %c0_5 = arith.constant 0 : index
    %c0_6 = arith.constant 0 : index
    %6 = vector.load %arg0[%c1, %c0_5, %c0_6] : memref<2x36x512xbf16, #tpu.memory_space<vmem>>, vector<1x36x512xbf16>
    %7 = vector.shape_cast %6 : vector<1x36x512xbf16> to vector<36x512xbf16>
    %c0_7 = arith.constant 0 : index
    %c0_8 = arith.constant 0 : index
    %8 = vector.load %arg1[%c0_7, %c0_8] : memref<512x256xbf16, #tpu.memory_space<vmem>>, vector<512x256xbf16>
    %cst_9 = arith.constant dense<0.000000e+00> : vector<36x256xf32>
    %9 = tpu.matmul %7, %8, %cst_9 {dimension_numbers = #tpu.dot_dimension_numbers<[1], [0], [0], [1], [0, 0, 1, 1], [], []>} : vector<36x512xbf16>, vector<512x256xbf16>, vector<36x256xf32> -> vector<36x256xf32>
    %cst_10 = arith.constant dense<0xFF800000> : vector<256xf32>
    %10 = vector.multi_reduction <maximumf>, %9, %cst_10 [0] : vector<36x256xf32> to vector<256xf32>
    %11 = vector.shape_cast %10 : vector<256xf32> to vector<1x256xf32>
    %12 = tpu.concatenate %5, %11 in 0 : vector<1x256xf32>, vector<1x256xf32> -> vector<2x256xf32>
    %c0_11 = arith.constant 0 : index
    %c0_12 = arith.constant 0 : index
    %13 = vector.load %arg2[%c0_11, %c0_12] : memref<1x256xf32, #tpu.memory_space<vmem>>, vector<1x256xf32>
    %14 = vector.broadcast %13 : vector<1x256xf32> to vector<2x256xf32>
    %15 = arith.mulf %12, %14 : vector<2x256xf32>
    %c0_13 = arith.constant 0 : index
    %c0_14 = arith.constant 0 : index
    %16 = vector.load %arg3[%c0_13, %c0_14] : memref<1x256xf32, #tpu.memory_space<vmem>>, vector<1x256xf32>
    %17 = vector.broadcast %16 : vector<1x256xf32> to vector<2x256xf32>
    %18 = arith.addf %15, %17 : vector<2x256xf32>
    %cst_15 = arith.constant 0.000000e+00 : f32
    %19 = vector.broadcast %cst_15 : f32 to vector<2x256xf32>
    %20 = arith.maximumf %18, %19 : vector<2x256xf32>
    %21 = arith.truncf %20 : vector<2x256xf32> to vector<2x256xbf16>
    %c0_16 = arith.constant 0 : index
    %c0_17 = arith.constant 0 : index
    %22 = vector.load %arg4[%c0_16, %c0_17] : memref<256x512xbf16, #tpu.memory_space<vmem>>, vector<256x512xbf16>
    %cst_18 = arith.constant dense<0.000000e+00> : vector<2x512xf32>
    %23 = tpu.matmul %21, %22, %cst_18 {dimension_numbers = #tpu.dot_dimension_numbers<[1], [0], [0], [1], [0, 0, 1, 1], [], []>} : vector<2x256xbf16>, vector<256x512xbf16>, vector<2x512xf32> -> vector<2x512xf32>
    %c0_19 = arith.constant 0 : index
    %c0_20 = arith.constant 0 : index
    %24 = vector.load %arg5[%c0_19, %c0_20] : memref<1x512xf32, #tpu.memory_space<vmem>>, vector<1x512xf32>
    %25 = vector.broadcast %24 : vector<1x512xf32> to vector<2x512xf32>
    %26 = arith.addf %23, %25 : vector<2x512xf32>
    %cst_21 = arith.constant 0.000000e+00 : f32
    %27 = vector.broadcast %cst_21 : f32 to vector<2x512xf32>
    %28 = arith.maximumf %26, %27 : vector<2x512xf32>
    %29 = arith.truncf %28 : vector<2x512xf32> to vector<2x512xbf16>
    %c0_22 = arith.constant 0 : index
    %c0_23 = arith.constant 0 : index
    %30 = vector.load %arg6[%c0_22, %c0_23] : memref<512x256xbf16, #tpu.memory_space<vmem>>, vector<512x256xbf16>
    %cst_24 = arith.constant dense<0.000000e+00> : vector<2x256xf32>
    %31 = tpu.matmul %29, %30, %cst_24 {dimension_numbers = #tpu.dot_dimension_numbers<[1], [0], [0], [1], [0, 0, 1, 1], [], []>} : vector<2x512xbf16>, vector<512x256xbf16>, vector<2x256xf32> -> vector<2x256xf32>
    %c0_25 = arith.constant 0 : index
    %c0_26 = arith.constant 0 : index
    %32 = vector.load %arg7[%c0_25, %c0_26] : memref<1x256xf32, #tpu.memory_space<vmem>>, vector<1x256xf32>
    %33 = vector.broadcast %32 : vector<1x256xf32> to vector<2x256xf32>
    %34 = arith.addf %31, %33 : vector<2x256xf32>
    %cst_27 = arith.constant 0.000000e+00 : f32
    %35 = vector.broadcast %cst_27 : f32 to vector<2x256xf32>
    %36 = arith.maximumf %34, %35 : vector<2x256xf32>
    %37 = arith.truncf %36 : vector<2x256xf32> to vector<2x256xbf16>
    %c0_28 = arith.constant 0 : index
    %c0_29 = arith.constant 0 : index
    %38 = vector.load %arg8[%c0_28, %c0_29] : memref<256x128xbf16, #tpu.memory_space<vmem>>, vector<256x128xbf16>
    %cst_30 = arith.constant dense<0.000000e+00> : vector<2x128xf32>
    %39 = tpu.matmul %37, %38, %cst_30 {dimension_numbers = #tpu.dot_dimension_numbers<[1], [0], [0], [1], [0, 0, 1, 1], [], []>} : vector<2x256xbf16>, vector<256x128xbf16>, vector<2x128xf32> -> vector<2x128xf32>
    %c0_31 = arith.constant 0 : index
    %c0_32 = arith.constant 0 : index
    %40 = vector.load %arg9[%c0_31, %c0_32] : memref<1x128xf32, #tpu.memory_space<vmem>>, vector<1x128xf32>
    %41 = vector.broadcast %40 : vector<1x128xf32> to vector<2x128xf32>
    %42 = arith.addf %39, %41 : vector<2x128xf32>
    %c0_33 = arith.constant 0 : index
    %c0_34 = arith.constant 0 : index
    %43 = vector.load %arg10[%c0_33, %c0_34] : memref<2x128xf32, #tpu.memory_space<vmem>>, vector<2x128xf32>
    tpu.vector_store %arg10[%c0_33, %c0_34], %42 {strides = array<i32>} : memref<2x128xf32, #tpu.memory_space<vmem>>, vector<2x128xf32>,
    return
  }
}

</mosaic_0001>

<bundles_post_ra>
// kernel: chess_classifier_forward.3
= control target key start
LH: loop header
LB: loop body
LE: loop exit
PB: predicated region body
PF: predicated region fallthrough
CT: control target
= control target key end

     0   :  { %s9446_s15 = smov 0   ;;  %s9448_s16 = smov 0   ;;  %s11314_s0 = inlined_call_operand.vmem [shape: bf16[4,4,1568,48], index: 0, kind: input, shape index: {}]   ;;  %s11315_s1 = inlined_call_operand.vmem [shape: bf16[48,64], index: 1, kind: input, shape index: {}]   ;;  %s11316_s2 = inlined_call_operand.vmem [shape: f32[1,64], index: 2, kind: input, shape index: {}]   ;;  %s11317_s3 = inlined_call_operand.vmem [shape: f32[1,64], index: 3, kind: input, shape index: {}]   ;;  %s11318_s4 = inlined_call_operand.vmem [shape: bf16[1568,64], index: 4, kind: output, shape index: {}]  }
   0x1   :  { %s9450_s17 = smov 0   ;;  %s9452_s18 = smov 0  }
   0x2   :  { %s9454_s19 = smov 0   ;;  %s9456_s20 = smov 0  }
   0x3   :  { %s9458_s21 = smov 0  }
   0x4 LB: > { %s23_s22 = sadd.s32 1, %s9411_s19  ;;  %s26_s23 = sadd.s32 1, %s9415_s20  ;;  %s9419_s21 = sphi %s9458_s21, %s14_s21   ;;  %s9415_s20 = sphi %s9456_s20, %s11477_s20   ;;  %s9411_s19 = sphi %s9454_s19, %s11476_s19   ;;  %s9407_s18 = sphi %s9452_s18, %s11475_s18   ;;  %s9403_s17 = sphi %s9450_s17, %s11474_s17   ;;  %s9399_s16 = sphi %s9448_s16, %s11473_s16   ;;  %s9395_s15 = sphi %s9446_s15, %s11472_s15  }
   0x5   : > { %p24_p0 = scmp.ge.s32.totalorder %s23_s22, 4  ;;  %p42_p1 = scmp.ne.s32.totalorder %s9399_s16, %s9395_s15 }
   0x6   : > { %p43_p2 = scmp.eq.s32.totalorder %s9419_s21, 0  ;;  %s35_s27 = sadd.s32 1, %s9399_s16 }
   0x7   : > { %s11479_s22 = smov (%p24_p0, %s23_s22), 0  ;;  %s11481_s23 = smov (!%p24_p0, %s26_s23), %s9415_s20 }
   0x8   : > { %p44_p3 = por %p43_p2, %p42_p1  ;;  %p28_p4 = scmp.ge.s32.totalorder %s11481_s23, 2 }
   0x9   : > { %s30_s24 = ssub.s32 %s9411_s19, %s11479_s22  ;;  %p7808_p6 = scmp.ge.s32.totalorder %s9419_s21, 8 }
   0xa   : > { %s11483_s23 = smov (%p28_p4, %s11481_s23), 0 }
   0xb   : > { %s31_s25 = ssub.s32 %s9415_s20, %s11483_s23  ;;  %166 = sbr.rel (%p7808_p6) target bundleno = 221 (0xdd), region = 28 }
   0xc   : > { %s32_s26 = sor.u32 %s31_s25, %s30_s24 }
   0xd   : > { %p33_p5 = scmp.eq.s32.totalorder %s32_s26, 0 }
   0xf   : > { %s9497_s28 = scalar_select %p33_p5, %s9399_s16, %s35_s27  }
  0x10   : > { %169 = sbr.rel (!%p44_p3) target bundleno = 221 (0xdd), region = 32  ;;  %s171_s29 = sand.u32 (%p44_p3), 1, %s9399_s16  }
  0x11   : > { %s174_s30 = smul.u32 (%p44_p3), 98, %s9415_s20 }
  0x12   : > { %s9302_s5 = smul.u32 (%p44_p3), 1568, %s171_s29 }
  0x13   : > { %s9303_s6 = smul.u32 (%p44_p3), 784, %s9411_s19 }
  0x14   : > { %s9511_s12 = scalar_lea.vmem (%p44_p3), [#allocation3], %s9302_s5 }
  0x15   : > { %s176_s7 = sadd.s32 %s9303_s6, %s174_s30 }
  0x16   : > { %s7809_s8 = sshll.u32 %s176_s7, 2 }
  0x17   : > { %s9506_s11 = scalar_lea.vmem %s11314_s0, %s7809_s8 }
  0x18   : > { %v195_v0 = vld [vmem:[%s9506_s11] sm:$0xff]   ;;  %v199_v1 = vld [vmem:[%s9506_s11 + $0x8] sm:$0xff]   ;;  %v203_v2 = vld [vmem:[%s9506_s11 + $0x10] sm:$0xff]  }
  0x19   : > { %196 = vst [vmem:[%s9511_s12] sm:$0xff] %v195_v0   ;;  %v207_v3 = vld [vmem:[%s9506_s11 + $0x18] sm:$0xff]   ;;  %v211_v4 = vld [vmem:[%s9506_s11 + $0x20] sm:$0xff]   ;;  %v215_v5 = vld [vmem:[%s9506_s11 + $0x28] sm:$0xff]  }
  0x1a   : > { %200 = vst [vmem:[%s9511_s12 + $0x8] sm:$0xff] %v199_v1   ;;  %v219_v6 = vld [vmem:[%s9506_s11 + $0x30] sm:$0xff]   ;;  %v223_v7 = vld [vmem:[%s9506_s11 + $0x38] sm:$0xff]   ;;  %v227_v8 = vld [vmem:[%s9506_s11 + $0x40] sm:$0xff]  }
  0x1b   : > { %204 = vst [vmem:[%s9511_s12 + $0x10] sm:$0xff] %v203_v2   ;;  %v231_v9 = vld [vmem:[%s9506_s11 + $0x48] sm:$0xff]   ;;  %v235_v10 = vld [vmem:[%s9506_s11 + $0x50] sm:$0xff]   ;;  %v239_v11 = vld [vmem:[%s9506_s11 + $0x58] sm:$0xff]  }
  0x1c   : > { %208 = vst [vmem:[%s9511_s12 + $0x18] sm:$0xff] %v207_v3   ;;  %v243_v12 = vld [vmem:[%s9506_s11 + $0x60] sm:$0xff]   ;;  %v247_v13 = vld [vmem:[%s9506_s11 + $0x68] sm:$0xff]   ;;  %v251_v14 = vld [vmem:[%s9506_s11 + $0x70] sm:$0xff]  }
  0x1d   : > { %212 = vst [vmem:[%s9511_s12 + $0x20] sm:$0xff] %v211_v4   ;;  %v255_v15 = vld [vmem:[%s9506_s11 + $0x78] sm:$0xff]   ;;  %v259_v16 = vld [vmem:[%s9506_s11 + $0x80] sm:$0xff]   ;;  %v263_v17 = vld [vmem:[%s9506_s11 + $0x88] sm:$0xff]  }
  0x1e   : > { %216 = vst [vmem:[%s9511_s12 + $0x28] sm:$0xff] %v215_v5   ;;  %v267_v18 = vld [vmem:[%s9506_s11 + $0x90] sm:$0xff]   ;;  %v271_v19 = vld [vmem:[%s9506_s11 + $0x98] sm:$0xff]   ;;  %v275_v20 = vld [vmem:[%s9506_s11 + $0xa0] sm:$0xff]  }
  0x1f   : > { %220 = vst [vmem:[%s9511_s12 + $0x30] sm:$0xff] %v219_v6   ;;  %v279_v21 = vld [vmem:[%s9506_s11 + $0xa8] sm:$0xff]   ;;  %v283_v22 = vld [vmem:[%s9506_s11 + $0xb0] sm:$0xff]   ;;  %v287_v23 = vld [vmem:[%s9506_s11 + $0xb8] sm:$0xff]  }
  0x20   : > { %224 = vst [vmem:[%s9511_s12 + $0x38] sm:$0xff] %v223_v7   ;;  %v291_v24 = vld [vmem:[%s9506_s11 + $0xc0] sm:$0xff]   ;;  %v295_v25 = vld [vmem:[%s9506_s11 + $0xc8] sm:$0xff]   ;;  %v299_v26 = vld [vmem:[%s9506_s11 + $0xd0] sm:$0xff]  }
  0x21   : > { %228 = vst [vmem:[%s9511_s12 + $0x40] sm:$0xff] %v227_v8   ;;  %v303_v27 = vld [vmem:[%s9506_s11 + $0xd8] sm:$0xff]   ;;  %v307_v28 = vld [vmem:[%s9506_s11 + $0xe0] sm:$0xff]   ;;  %v311_v29 = vld [vmem:[%s9506_s11 + $0xe8] sm:$0xff]  }
  0x22   : > { %232 = vst [vmem:[%s9511_s12 + $0x48] sm:$0xff] %v231_v9   ;;  %v315_v30 = vld [vmem:[%s9506_s11 + $0xf0] sm:$0xff]   ;;  %v319_v31 = vld [vmem:[%s9506_s11 + $0xf8] sm:$0xff]   ;;  %v323_v32 = vld [vmem:[%s9506_s11 + $0x100] sm:$0xff]  }
  0x23   : > { %236 = vst [vmem:[%s9511_s12 + $0x50] sm:$0xff] %v235_v10   ;;  %v327_v33 = vld [vmem:[%s9506_s11 + $0x108] sm:$0xff]   ;;  %v331_v34 = vld [vmem:[%s9506_s11 + $0x110] sm:$0xff]   ;;  %v335_v35 = vld [vmem:[%s9506_s11 + $0x118] sm:$0xff]  }
  0x24   : > { %240 = vst [vmem:[%s9511_s12 + $0x58] sm:$0xff] %v239_v11   ;;  %v339_v36 = vld [vmem:[%s9506_s11 + $0x120] sm:$0xff]   ;;  %v343_v37 = vld [vmem:[%s9506_s11 + $0x128] sm:$0xff]   ;;  %v347_v38 = vld [vmem:[%s9506_s11 + $0x130] sm:$0xff]  }
  0x25   : > { %244 = vst [vmem:[%s9511_s12 + $0x60] sm:$0xff] %v243_v12   ;;  %v351_v39 = vld [vmem:[%s9506_s11 + $0x138] sm:$0xff]   ;;  %v355_v40 = vld [vmem:[%s9506_s11 + $0x140] sm:$0xff]   ;;  %v359_v41 = vld [vmem:[%s9506_s11 + $0x148] sm:$0xff]  }
  0x26   : > { %248 = vst [vmem:[%s9511_s12 + $0x68] sm:$0xff] %v247_v13   ;;  %v363_v42 = vld [vmem:[%s9506_s11 + $0x150] sm:$0xff]   ;;  %v367_v43 = vld [vmem:[%s9506_s11 + $0x158] sm:$0xff]   ;;  %v371_v44 = vld [vmem:[%s9506_s11 + $0x160] sm:$0xff]  }
  0x27   : > { %252 = vst [vmem:[%s9511_s12 + $0x70] sm:$0xff] %v251_v14   ;;  %v375_v45 = vld [vmem:[%s9506_s11 + $0x168] sm:$0xff]   ;;  %v379_v46 = vld [vmem:[%s9506_s11 + $0x170] sm:$0xff]   ;;  %v383_v47 = vld [vmem:[%s9506_s11 + $0x178] sm:$0xff]  }
  0x28   : > { %256 = vst [vmem:[%s9511_s12 + $0x78] sm:$0xff] %v255_v15   ;;  %v387_v48 = vld [vmem:[%s9506_s11 + $0x180] sm:$0xff]   ;;  %v391_v49 = vld [vmem:[%s9506_s11 + $0x310] sm:$0xff]   ;;  %v395_v50 = vld [vmem:[%s9506_s11 + $0x318] sm:$0xff]  }
  0x29   : > { %260 = vst [vmem:[%s9511_s12 + $0x80] sm:$0xff] %v259_v16   ;;  %v399_v51 = vld [vmem:[%s9506_s11 + $0x320] sm:$0xff]   ;;  %v403_v52 = vld [vmem:[%s9506_s11 + $0x328] sm:$0xff]   ;;  %v407_v53 = vld [vmem:[%s9506_s11 + $0x330] sm:$0xff]  }
  0x2a   : > { %264 = vst [vmem:[%s9511_s12 + $0x88] sm:$0xff] %v263_v17   ;;  %v411_v54 = vld [vmem:[%s9506_s11 + $0x338] sm:$0xff]   ;;  %v415_v55 = vld [vmem:[%s9506_s11 + $0x340] sm:$0xff]   ;;  %v419_v56 = vld [vmem:[%s9506_s11 + $0x348] sm:$0xff]  }
  0x2b   : > { %268 = vst [vmem:[%s9511_s12 + $0x90] sm:$0xff] %v267_v18   ;;  %v423_v57 = vld [vmem:[%s9506_s11 + $0x350] sm:$0xff]   ;;  %v427_v58 = vld [vmem:[%s9506_s11 + $0x358] sm:$0xff]   ;;  %v431_v59 = vld [vmem:[%s9506_s11 + $0x360] sm:$0xff]  }
  0x2c   : > { %272 = vst [vmem:[%s9511_s12 + $0x98] sm:$0xff] %v271_v19   ;;  %v435_v60 = vld [vmem:[%s9506_s11 + $0x368] sm:$0xff]   ;;  %v439_v61 = vld [vmem:[%s9506_s11 + $0x370] sm:$0xff]   ;;  %v443_v62 = vld [vmem:[%s9506_s11 + $0x378] sm:$0xff]  }
  0x2d   : > { %276 = vst [vmem:[%s9511_s12 + $0xa0] sm:$0xff] %v275_v20   ;;  %v447_v63 = vld [vmem:[%s9506_s11 + $0x380] sm:$0xff]   ;;  %v451_v0 = vld [vmem:[%s9506_s11 + $0x388] sm:$0xff]   ;;  %v455_v1 = vld [vmem:[%s9506_s11 + $0x390] sm:$0xff]  }
  0x2e   : > { %280 = vst [vmem:[%s9511_s12 + $0xa8] sm:$0xff] %v279_v21   ;;  %v459_v2 = vld [vmem:[%s9506_s11 + $0x398] sm:$0xff]   ;;  %v463_v3 = vld [vmem:[%s9506_s11 + $0x3a0] sm:$0xff]   ;;  %v467_v4 = vld [vmem:[%s9506_s11 + $0x3a8] sm:$0xff]  }
  0x2f   : > { %284 = vst [vmem:[%s9511_s12 + $0xb0] sm:$0xff] %v283_v22   ;;  %v471_v5 = vld [vmem:[%s9506_s11 + $0x3b0] sm:$0xff]   ;;  %v475_v6 = vld [vmem:[%s9506_s11 + $0x3b8] sm:$0xff]   ;;  %v479_v7 = vld [vmem:[%s9506_s11 + $0x3c0] sm:$0xff]  }
  0x30   : > { %288 = vst [vmem:[%s9511_s12 + $0xb8] sm:$0xff] %v287_v23   ;;  %v483_v8 = vld [vmem:[%s9506_s11 + $0x3c8] sm:$0xff]   ;;  %v487_v9 = vld [vmem:[%s9506_s11 + $0x3d0] sm:$0xff]   ;;  %v491_v10 = vld [vmem:[%s9506_s11 + $0x3d8] sm:$0xff]  }
  0x31   : > { %292 = vst [vmem:[%s9511_s12 + $0xc0] sm:$0xff] %v291_v24   ;;  %v495_v11 = vld [vmem:[%s9506_s11 + $0x3e0] sm:$0xff]   ;;  %v499_v12 = vld [vmem:[%s9506_s11 + $0x3e8] sm:$0xff]   ;;  %v503_v13 = vld [vmem:[%s9506_s11 + $0x3f0] sm:$0xff]  }
  0x32   : > { %296 = vst [vmem:[%s9511_s12 + $0xc8] sm:$0xff] %v295_v25   ;;  %v507_v14 = vld [vmem:[%s9506_s11 + $0x3f8] sm:$0xff]   ;;  %v511_v15 = vld [vmem:[%s9506_s11 + $0x400] sm:$0xff]   ;;  %v515_v16 = vld [vmem:[%s9506_s11 + $0x408] sm:$0xff]  }
  0x33   : > { %300 = vst [vmem:[%s9511_s12 + $0xd0] sm:$0xff] %v299_v26   ;;  %v519_v17 = vld [vmem:[%s9506_s11 + $0x410] sm:$0xff]   ;;  %v523_v18 = vld [vmem:[%s9506_s11 + $0x418] sm:$0xff]   ;;  %v527_v19 = vld [vmem:[%s9506_s11 + $0x420] sm:$0xff]  }
  0x34   : > { %304 = vst [vmem:[%s9511_s12 + $0xd8] sm:$0xff] %v303_v27   ;;  %v531_v20 = vld [vmem:[%s9506_s11 + $0x428] sm:$0xff]   ;;  %v535_v21 = vld [vmem:[%s9506_s11 + $0x430] sm:$0xff]   ;;  %v539_v22 = vld [vmem:[%s9506_s11 + $0x438] sm:$0xff]  }
  0x35   : > { %308 = vst [vmem:[%s9511_s12 + $0xe0] sm:$0xff] %v307_v28   ;;  %v543_v23 = vld [vmem:[%s9506_s11 + $0x440] sm:$0xff]   ;;  %v547_v24 = vld [vmem:[%s9506_s11 + $0x448] sm:$0xff]   ;;  %v551_v25 = vld [vmem:[%s9506_s11 + $0x450] sm:$0xff]  }
  0x36   : > { %312 = vst [vmem:[%s9511_s12 + $0xe8] sm:$0xff] %v311_v29   ;;  %v555_v26 = vld [vmem:[%s9506_s11 + $0x458] sm:$0xff]   ;;  %v559_v27 = vld [vmem:[%s9506_s11 + $0x460] sm:$0xff]   ;;  %v563_v28 = vld [vmem:[%s9506_s11 + $0x468] sm:$0xff]  }
  0x37   : > { %316 = vst [vmem:[%s9511_s12 + $0xf0] sm:$0xff] %v315_v30   ;;  %v567_v29 = vld [vmem:[%s9506_s11 + $0x470] sm:$0xff]   ;;  %v571_v30 = vld [vmem:[%s9506_s11 + $0x478] sm:$0xff]  }
  0x38   : > { %320 = vst [vmem:[%s9511_s12 + $0xf8] sm:$0xff] %v319_v31   ;;  %v575_v31 = vld [vmem:[%s9506_s11 + $0x480] sm:$0xff]  }
  0x39   : > { %324 = vst [vmem:[%s9511_s12 + $0x100] sm:$0xff] %v323_v32   ;;  %v579_v32 = vld [vmem:[%s9506_s11 + $0x488] sm:$0xff]  }
  0x3a   : > { %328 = vst [vmem:[%s9511_s12 + $0x108] sm:$0xff] %v327_v33   ;;  %v583_v33 = vld [vmem:[%s9506_s11 + $0x490] sm:$0xff]  }
  0x3b   : > { %332 = vst [vmem:[%s9511_s12 + $0x110] sm:$0xff] %v331_v34   ;;  %v587_v34 = vld [vmem:[%s9506_s11 + $0x620] sm:$0xff]  }
  0x3c   : > { %336 = vst [vmem:[%s9511_s12 + $0x118] sm:$0xff] %v335_v35   ;;  %v591_v35 = vld [vmem:[%s9506_s11 + $0x628] sm:$0xff]  }
  0x3d   : > { %340 = vst [vmem:[%s9511_s12 + $0x120] sm:$0xff] %v339_v36   ;;  %v595_v36 = vld [vmem:[%s9506_s11 + $0x630] sm:$0xff]  }
  0x3e   : > { %344 = vst [vmem:[%s9511_s12 + $0x128] sm:$0xff] %v343_v37   ;;  %v599_v37 = vld [vmem:[%s9506_s11 + $0x638] sm:$0xff]  }
  0x3f   : > { %348 = vst [vmem:[%s9511_s12 + $0x130] sm:$0xff] %v347_v38   ;;  %v603_v38 = vld [vmem:[%s9506_s11 + $0x640] sm:$0xff]  }
  0x40   : > { %352 = vst [vmem:[%s9511_s12 + $0x138] sm:$0xff] %v351_v39   ;;  %v607_v39 = vld [vmem:[%s9506_s11 + $0x648] sm:$0xff]  }
  0x41   : > { %356 = vst [vmem:[%s9511_s12 + $0x140] sm:$0xff] %v355_v40   ;;  %v611_v40 = vld [vmem:[%s9506_s11 + $0x650] sm:$0xff]  }
  0x42   : > { %360 = vst [vmem:[%s9511_s12 + $0x148] sm:$0xff] %v359_v41   ;;  %v615_v41 = vld [vmem:[%s9506_s11 + $0x658] sm:$0xff]  }
  0x43   : > { %364 = vst [vmem:[%s9511_s12 + $0x150] sm:$0xff] %v363_v42   ;;  %v619_v42 = vld [vmem:[%s9506_s11 + $0x660] sm:$0xff]  }
  0x44   : > { %368 = vst [vmem:[%s9511_s12 + $0x158] sm:$0xff] %v367_v43   ;;  %v623_v43 = vld [vmem:[%s9506_s11 + $0x668] sm:$0xff]  }
  0x45   : > { %372 = vst [vmem:[%s9511_s12 + $0x160] sm:$0xff] %v371_v44   ;;  %v627_v44 = vld [vmem:[%s9506_s11 + $0x670] sm:$0xff]  }
  0x46   : > { %376 = vst [vmem:[%s9511_s12 + $0x168] sm:$0xff] %v375_v45   ;;  %v631_v45 = vld [vmem:[%s9506_s11 + $0x678] sm:$0xff]  }
  0x47   : > { %380 = vst [vmem:[%s9511_s12 + $0x170] sm:$0xff] %v379_v46   ;;  %v635_v46 = vld [vmem:[%s9506_s11 + $0x680] sm:$0xff]  }
  0x48   : > { %384 = vst [vmem:[%s9511_s12 + $0x178] sm:$0xff] %v383_v47   ;;  %v639_v47 = vld [vmem:[%s9506_s11 + $0x688] sm:$0xff]  }
  0x49   : > { %388 = vst [vmem:[%s9511_s12 + $0x180] sm:$0xff] %v387_v48   ;;  %v643_v48 = vld [vmem:[%s9506_s11 + $0x690] sm:$0xff]  }
  0x4a   : > { %392 = vst [vmem:[%s9511_s12 + $0x188] sm:$0xff] %v391_v49   ;;  %v647_v49 = vld [vmem:[%s9506_s11 + $0x698] sm:$0xff]  }
  0x4b   : > { %396 = vst [vmem:[%s9511_s12 + $0x190] sm:$0xff] %v395_v50   ;;  %v651_v50 = vld [vmem:[%s9506_s11 + $0x6a0] sm:$0xff]  }
  0x4c   : > { %400 = vst [vmem:[%s9511_s12 + $0x198] sm:$0xff] %v399_v51   ;;  %v655_v51 = vld [vmem:[%s9506_s11 + $0x6a8] sm:$0xff]  }
  0x4d   : > { %404 = vst [vmem:[%s9511_s12 + $0x1a0] sm:$0xff] %v403_v52   ;;  %v659_v52 = vld [vmem:[%s9506_s11 + $0x6b0] sm:$0xff]  }
  0x4e   : > { %408 = vst [vmem:[%s9511_s12 + $0x1a8] sm:$0xff] %v407_v53   ;;  %v663_v53 = vld [vmem:[%s9506_s11 + $0x6b8] sm:$0xff]  }
  0x4f   : > { %412 = vst [vmem:[%s9511_s12 + $0x1b0] sm:$0xff] %v411_v54   ;;  %v667_v54 = vld [vmem:[%s9506_s11 + $0x6c0] sm:$0xff]  }
  0x50   : > { %416 = vst [vmem:[%s9511_s12 + $0x1b8] sm:$0xff] %v415_v55   ;;  %v671_v55 = vld [vmem:[%s9506_s11 + $0x6c8] sm:$0xff]  }
  0x51   : > { %420 = vst [vmem:[%s9511_s12 + $0x1c0] sm:$0xff] %v419_v56   ;;  %v675_v56 = vld [vmem:[%s9506_s11 + $0x6d0] sm:$0xff]  }
  0x52   : > { %424 = vst [vmem:[%s9511_s12 + $0x1c8] sm:$0xff] %v423_v57   ;;  %v679_v57 = vld [vmem:[%s9506_s11 + $0x6d8] sm:$0xff]  }
  0x53   : > { %428 = vst [vmem:[%s9511_s12 + $0x1d0] sm:$0xff] %v427_v58   ;;  %v683_v58 = vld [vmem:[%s9506_s11 + $0x6e0] sm:$0xff]  }
  0x54   : > { %432 = vst [vmem:[%s9511_s12 + $0x1d8] sm:$0xff] %v431_v59   ;;  %v687_v59 = vld [vmem:[%s9506_s11 + $0x6e8] sm:$0xff]  }
  0x55   : > { %436 = vst [vmem:[%s9511_s12 + $0x1e0] sm:$0xff] %v435_v60   ;;  %v691_v60 = vld [vmem:[%s9506_s11 + $0x6f0] sm:$0xff]  }
  0x56   : > { %440 = vst [vmem:[%s9511_s12 + $0x1e8] sm:$0xff] %v439_v61   ;;  %v695_v61 = vld [vmem:[%s9506_s11 + $0x6f8] sm:$0xff]  }
  0x57   : > { %444 = vst [vmem:[%s9511_s12 + $0x1f0] sm:$0xff] %v443_v62   ;;  %v699_v62 = vld [vmem:[%s9506_s11 + $0x700] sm:$0xff]  }
  0x58   : > { %448 = vst [vmem:[%s9511_s12 + $0x1f8] sm:$0xff] %v447_v63   ;;  %v703_v63 = vld [vmem:[%s9506_s11 + $0x708] sm:$0xff]  }
  0x59   : > { %452 = vst [vmem:[%s9511_s12 + $0x200] sm:$0xff] %v451_v0   ;;  %v707_v0 = vld [vmem:[%s9506_s11 + $0x710] sm:$0xff]  }
  0x5a   : > { %456 = vst [vmem:[%s9511_s12 + $0x208] sm:$0xff] %v455_v1   ;;  %v711_v1 = vld [vmem:[%s9506_s11 + $0x718] sm:$0xff]  }
  0x5b   : > { %460 = vst [vmem:[%s9511_s12 + $0x210] sm:$0xff] %v459_v2   ;;  %v715_v2 = vld [vmem:[%s9506_s11 + $0x720] sm:$0xff]  }
  0x5c   : > { %464 = vst [vmem:[%s9511_s12 + $0x218] sm:$0xff] %v463_v3   ;;  %v719_v3 = vld [vmem:[%s9506_s11 + $0x728] sm:$0xff]  }
  0x5d   : > { %468 = vst [vmem:[%s9511_s12 + $0x220] sm:$0xff] %v467_v4   ;;  %v723_v4 = vld [vmem:[%s9506_s11 + $0x730] sm:$0xff]  }
  0x5e   : > { %472 = vst [vmem:[%s9511_s12 + $0x228] sm:$0xff] %v471_v5   ;;  %v727_v5 = vld [vmem:[%s9506_s11 + $0x738] sm:$0xff]  }
  0x5f   : > { %476 = vst [vmem:[%s9511_s12 + $0x230] sm:$0xff] %v475_v6   ;;  %v731_v6 = vld [vmem:[%s9506_s11 + $0x740] sm:$0xff]  }
  0x60   : > { %480 = vst [vmem:[%s9511_s12 + $0x238] sm:$0xff] %v479_v7   ;;  %v735_v7 = vld [vmem:[%s9506_s11 + $0x748] sm:$0xff]  }
  0x61   : > { %484 = vst [vmem:[%s9511_s12 + $0x240] sm:$0xff] %v483_v8   ;;  %v739_v8 = vld [vmem:[%s9506_s11 + $0x750] sm:$0xff]  }
  0x62   : > { %488 = vst [vmem:[%s9511_s12 + $0x248] sm:$0xff] %v487_v9   ;;  %v743_v9 = vld [vmem:[%s9506_s11 + $0x758] sm:$0xff]  }
  0x63   : > { %492 = vst [vmem:[%s9511_s12 + $0x250] sm:$0xff] %v491_v10   ;;  %v747_v10 = vld [vmem:[%s9506_s11 + $0x760] sm:$0xff]  }
  0x64   : > { %496 = vst [vmem:[%s9511_s12 + $0x258] sm:$0xff] %v495_v11   ;;  %v751_v11 = vld [vmem:[%s9506_s11 + $0x768] sm:$0xff]  }
  0x65   : > { %500 = vst [vmem:[%s9511_s12 + $0x260] sm:$0xff] %v499_v12   ;;  %v755_v12 = vld [vmem:[%s9506_s11 + $0x770] sm:$0xff]  }
  0x66   : > { %504 = vst [vmem:[%s9511_s12 + $0x268] sm:$0xff] %v503_v13   ;;  %v759_v13 = vld [vmem:[%s9506_s11 + $0x778] sm:$0xff]  }
  0x67   : > { %508 = vst [vmem:[%s9511_s12 + $0x270] sm:$0xff] %v507_v14   ;;  %v763_v14 = vld [vmem:[%s9506_s11 + $0x780] sm:$0xff]  }
  0x68   : > { %512 = vst [vmem:[%s9511_s12 + $0x278] sm:$0xff] %v511_v15   ;;  %v767_v15 = vld [vmem:[%s9506_s11 + $0x788] sm:$0xff]  }
  0x69   : > { %516 = vst [vmem:[%s9511_s12 + $0x280] sm:$0xff] %v515_v16   ;;  %v771_v16 = vld [vmem:[%s9506_s11 + $0x790] sm:$0xff]  }
  0x6a   : > { %520 = vst [vmem:[%s9511_s12 + $0x288] sm:$0xff] %v519_v17   ;;  %v775_v17 = vld [vmem:[%s9506_s11 + $0x798] sm:$0xff]  }
  0x6b   : > { %524 = vst [vmem:[%s9511_s12 + $0x290] sm:$0xff] %v523_v18   ;;  %v779_v18 = vld [vmem:[%s9506_s11 + $0x7a0] sm:$0xff]  }
  0x6c   : > { %528 = vst [vmem:[%s9511_s12 + $0x298] sm:$0xff] %v527_v19   ;;  %v783_v19 = vld [vmem:[%s9506_s11 + $0x930] sm:$0xff]  }
  0x6d   : > { %532 = vst [vmem:[%s9511_s12 + $0x2a0] sm:$0xff] %v531_v20   ;;  %v787_v20 = vld [vmem:[%s9506_s11 + $0x938] sm:$0xff]  }
  0x6e   : > { %536 = vst [vmem:[%s9511_s12 + $0x2a8] sm:$0xff] %v535_v21   ;;  %v791_v21 = vld [vmem:[%s9506_s11 + $0x940] sm:$0xff]  }
  0x6f   : > { %540 = vst [vmem:[%s9511_s12 + $0x2b0] sm:$0xff] %v539_v22   ;;  %v795_v22 = vld [vmem:[%s9506_s11 + $0x948] sm:$0xff]  }
  0x70   : > { %544 = vst [vmem:[%s9511_s12 + $0x2b8] sm:$0xff] %v543_v23   ;;  %v799_v23 = vld [vmem:[%s9506_s11 + $0x950] sm:$0xff]  }
  0x71   : > { %548 = vst [vmem:[%s9511_s12 + $0x2c0] sm:$0xff] %v547_v24   ;;  %v803_v24 = vld [vmem:[%s9506_s11 + $0x958] sm:$0xff]  }
  0x72   : > { %552 = vst [vmem:[%s9511_s12 + $0x2c8] sm:$0xff] %v551_v25   ;;  %v807_v25 = vld [vmem:[%s9506_s11 + $0x960] sm:$0xff]  }
  0x73   : > { %556 = vst [vmem:[%s9511_s12 + $0x2d0] sm:$0xff] %v555_v26   ;;  %v811_v26 = vld [vmem:[%s9506_s11 + $0x968] sm:$0xff]  }
  0x74   : > { %560 = vst [vmem:[%s9511_s12 + $0x2d8] sm:$0xff] %v559_v27   ;;  %v815_v27 = vld [vmem:[%s9506_s11 + $0x970] sm:$0xff]  }
  0x75   : > { %564 = vst [vmem:[%s9511_s12 + $0x2e0] sm:$0xff] %v563_v28   ;;  %v819_v28 = vld [vmem:[%s9506_s11 + $0x978] sm:$0xff]  }
  0x76   : > { %568 = vst [vmem:[%s9511_s12 + $0x2e8] sm:$0xff] %v567_v29   ;;  %v823_v29 = vld [vmem:[%s9506_s11 + $0x980] sm:$0xff]  }
  0x77   : > { %572 = vst [vmem:[%s9511_s12 + $0x2f0] sm:$0xff] %v571_v30   ;;  %v827_v30 = vld [vmem:[%s9506_s11 + $0x988] sm:$0xff]  }
  0x78   : > { %576 = vst [vmem:[%s9511_s12 + $0x2f8] sm:$0xff] %v575_v31   ;;  %v831_v31 = vld [vmem:[%s9506_s11 + $0x990] sm:$0xff]  }
  0x79   : > { %580 = vst [vmem:[%s9511_s12 + $0x300] sm:$0xff] %v579_v32   ;;  %v835_v32 = vld [vmem:[%s9506_s11 + $0x998] sm:$0xff]  }
  0x7a   : > { %584 = vst [vmem:[%s9511_s12 + $0x308] sm:$0xff] %v583_v33   ;;  %v839_v33 = vld [vmem:[%s9506_s11 + $0x9a0] sm:$0xff]  }
  0x7b   : > { %588 = vst [vmem:[%s9511_s12 + $0x310] sm:$0xff] %v587_v34   ;;  %v843_v34 = vld [vmem:[%s9506_s11 + $0x9a8] sm:$0xff]  }
  0x7c   : > { %592 = vst [vmem:[%s9511_s12 + $0x318] sm:$0xff] %v591_v35   ;;  %v847_v35 = vld [vmem:[%s9506_s11 + $0x9b0] sm:$0xff]  }
  0x7d   : > { %596 = vst [vmem:[%s9511_s12 + $0x320] sm:$0xff] %v595_v36   ;;  %v851_v36 = vld [vmem:[%s9506_s11 + $0x9b8] sm:$0xff]  }
  0x7e   : > { %600 = vst [vmem:[%s9511_s12 + $0x328] sm:$0xff] %v599_v37   ;;  %v855_v37 = vld [vmem:[%s9506_s11 + $0x9c0] sm:$0xff]  }
  0x7f   : > { %604 = vst [vmem:[%s9511_s12 + $0x330] sm:$0xff] %v603_v38   ;;  %v859_v38 = vld [vmem:[%s9506_s11 + $0x9c8] sm:$0xff]  }
  0x80   : > { %608 = vst [vmem:[%s9511_s12 + $0x338] sm:$0xff] %v607_v39   ;;  %v863_v39 = vld [vmem:[%s9506_s11 + $0x9d0] sm:$0xff]  }
  0x81   : > { %612 = vst [vmem:[%s9511_s12 + $0x340] sm:$0xff] %v611_v40   ;;  %v867_v40 = vld [vmem:[%s9506_s11 + $0x9d8] sm:$0xff]  }
  0x82   : > { %616 = vst [vmem:[%s9511_s12 + $0x348] sm:$0xff] %v615_v41   ;;  %v871_v41 = vld [vmem:[%s9506_s11 + $0x9e0] sm:$0xff]  }
  0x83   : > { %620 = vst [vmem:[%s9511_s12 + $0x350] sm:$0xff] %v619_v42   ;;  %v875_v42 = vld [vmem:[%s9506_s11 + $0x9e8] sm:$0xff]  }
  0x84   : > { %624 = vst [vmem:[%s9511_s12 + $0x358] sm:$0xff] %v623_v43   ;;  %v879_v43 = vld [vmem:[%s9506_s11 + $0x9f0] sm:$0xff]  }
  0x85   : > { %628 = vst [vmem:[%s9511_s12 + $0x360] sm:$0xff] %v627_v44   ;;  %v883_v44 = vld [vmem:[%s9506_s11 + $0x9f8] sm:$0xff]  }
  0x86   : > { %632 = vst [vmem:[%s9511_s12 + $0x368] sm:$0xff] %v631_v45   ;;  %v887_v45 = vld [vmem:[%s9506_s11 + $0xa00] sm:$0xff]  }
  0x87   : > { %636 = vst [vmem:[%s9511_s12 + $0x370] sm:$0xff] %v635_v46   ;;  %v891_v46 = vld [vmem:[%s9506_s11 + $0xa08] sm:$0xff]  }
  0x88   : > { %640 = vst [vmem:[%s9511_s12 + $0x378] sm:$0xff] %v639_v47   ;;  %v895_v47 = vld [vmem:[%s9506_s11 + $0xa10] sm:$0xff]  }
  0x89   : > { %644 = vst [vmem:[%s9511_s12 + $0x380] sm:$0xff] %v643_v48   ;;  %v899_v48 = vld [vmem:[%s9506_s11 + $0xa18] sm:$0xff]  }
  0x8a   : > { %648 = vst [vmem:[%s9511_s12 + $0x388] sm:$0xff] %v647_v49   ;;  %v903_v49 = vld [vmem:[%s9506_s11 + $0xa20] sm:$0xff]  }
  0x8b   : > { %652 = vst [vmem:[%s9511_s12 + $0x390] sm:$0xff] %v651_v50   ;;  %v907_v50 = vld [vmem:[%s9506_s11 + $0xa28] sm:$0xff]  }
  0x8c   : > { %656 = vst [vmem:[%s9511_s12 + $0x398] sm:$0xff] %v655_v51   ;;  %v911_v51 = vld [vmem:[%s9506_s11 + $0xa30] sm:$0xff]  }
  0x8d   : > { %660 = vst [vmem:[%s9511_s12 + $0x3a0] sm:$0xff] %v659_v52   ;;  %v915_v52 = vld [vmem:[%s9506_s11 + $0xa38] sm:$0xff]  }
  0x8e   : > { %664 = vst [vmem:[%s9511_s12 + $0x3a8] sm:$0xff] %v663_v53   ;;  %v919_v53 = vld [vmem:[%s9506_s11 + $0xa40] sm:$0xff]  }
  0x8f   : > { %668 = vst [vmem:[%s9511_s12 + $0x3b0] sm:$0xff] %v667_v54   ;;  %v923_v54 = vld [vmem:[%s9506_s11 + $0xa48] sm:$0xff]  }
  0x90   : > { %672 = vst [vmem:[%s9511_s12 + $0x3b8] sm:$0xff] %v671_v55   ;;  %v927_v55 = vld [vmem:[%s9506_s11 + $0xa50] sm:$0xff]  }
  0x91   : > { %676 = vst [vmem:[%s9511_s12 + $0x3c0] sm:$0xff] %v675_v56   ;;  %v931_v56 = vld [vmem:[%s9506_s11 + $0xa58] sm:$0xff]  }
  0x92   : > { %680 = vst [vmem:[%s9511_s12 + $0x3c8] sm:$0xff] %v679_v57   ;;  %v935_v57 = vld [vmem:[%s9506_s11 + $0xa60] sm:$0xff]  }
  0x93   : > { %684 = vst [vmem:[%s9511_s12 + $0x3d0] sm:$0xff] %v683_v58   ;;  %v939_v58 = vld [vmem:[%s9506_s11 + $0xa68] sm:$0xff]  }
  0x94   : > { %688 = vst [vmem:[%s9511_s12 + $0x3d8] sm:$0xff] %v687_v59   ;;  %v943_v59 = vld [vmem:[%s9506_s11 + $0xa70] sm:$0xff]  }
  0x95   : > { %692 = vst [vmem:[%s9511_s12 + $0x3e0] sm:$0xff] %v691_v60   ;;  %v947_v60 = vld [vmem:[%s9506_s11 + $0xa78] sm:$0xff]  }
  0x96   : > { %696 = vst [vmem:[%s9511_s12 + $0x3e8] sm:$0xff] %v695_v61   ;;  %v951_v61 = vld [vmem:[%s9506_s11 + $0xa80] sm:$0xff]  }
  0x97   : > { %700 = vst [vmem:[%s9511_s12 + $0x3f0] sm:$0xff] %v699_v62   ;;  %v955_v62 = vld [vmem:[%s9506_s11 + $0xa88] sm:$0xff]  }
  0x98   : > { %704 = vst [vmem:[%s9511_s12 + $0x3f8] sm:$0xff] %v703_v63   ;;  %v959_v63 = vld [vmem:[%s9506_s11 + $0xa90] sm:$0xff]  }
  0x99   : > { %708 = vst [vmem:[%s9511_s12 + $0x400] sm:$0xff] %v707_v0   ;;  %v963_v0 = vld [vmem:[%s9506_s11 + $0xa98] sm:$0xff]  }
  0x9a   : > { %712 = vst [vmem:[%s9511_s12 + $0x408] sm:$0xff] %v711_v1   ;;  %v967_v1 = vld [vmem:[%s9506_s11 + $0xaa0] sm:$0xff]  }
  0x9b   : > { %716 = vst [vmem:[%s9511_s12 + $0x410] sm:$0xff] %v715_v2   ;;  %v971_v2 = vld [vmem:[%s9506_s11 + $0xaa8] sm:$0xff]  }
  0x9c   : > { %720 = vst [vmem:[%s9511_s12 + $0x418] sm:$0xff] %v719_v3   ;;  %v975_v3 = vld [vmem:[%s9506_s11 + $0xab0] sm:$0xff]  }
  0x9d   : > { %724 = vst [vmem:[%s9511_s12 + $0x420] sm:$0xff] %v723_v4  }
  0x9e   : > { %728 = vst [vmem:[%s9511_s12 + $0x428] sm:$0xff] %v727_v5  }
  0x9f   : > { %732 = vst [vmem:[%s9511_s12 + $0x430] sm:$0xff] %v731_v6  }
  0xa0   : > { %736 = vst [vmem:[%s9511_s12 + $0x438] sm:$0xff] %v735_v7  }
  0xa1   : > { %740 = vst [vmem:[%s9511_s12 + $0x440] sm:$0xff] %v739_v8  }
  0xa2   : > { %744 = vst [vmem:[%s9511_s12 + $0x448] sm:$0xff] %v743_v9  }
  0xa3   : > { %748 = vst [vmem:[%s9511_s12 + $0x450] sm:$0xff] %v747_v10  }
  0xa4   : > { %752 = vst [vmem:[%s9511_s12 + $0x458] sm:$0xff] %v751_v11  }
  0xa5   : > { %756 = vst [vmem:[%s9511_s12 + $0x460] sm:$0xff] %v755_v12  }
  0xa6   : > { %760 = vst [vmem:[%s9511_s12 + $0x468] sm:$0xff] %v759_v13  }
  0xa7   : > { %764 = vst [vmem:[%s9511_s12 + $0x470] sm:$0xff] %v763_v14  }
  0xa8   : > { %768 = vst [vmem:[%s9511_s12 + $0x478] sm:$0xff] %v767_v15  }
  0xa9   : > { %772 = vst [vmem:[%s9511_s12 + $0x480] sm:$0xff] %v771_v16  }
  0xaa   : > { %776 = vst [vmem:[%s9511_s12 + $0x488] sm:$0xff] %v775_v17  }
  0xab   : > { %780 = vst [vmem:[%s9511_s12 + $0x490] sm:$0xff] %v779_v18  }
  0xac   : > { %784 = vst [vmem:[%s9511_s12 + $0x498] sm:$0xff] %v783_v19  }
  0xad   : > { %788 = vst [vmem:[%s9511_s12 + $0x4a0] sm:$0xff] %v787_v20  }
  0xae   : > { %792 = vst [vmem:[%s9511_s12 + $0x4a8] sm:$0xff] %v791_v21  }
  0xaf   : > { %796 = vst [vmem:[%s9511_s12 + $0x4b0] sm:$0xff] %v795_v22  }
  0xb0   : > { %800 = vst [vmem:[%s9511_s12 + $0x4b8] sm:$0xff] %v799_v23  }
  0xb1   : > { %804 = vst [vmem:[%s9511_s12 + $0x4c0] sm:$0xff] %v803_v24  }
  0xb2   : > { %808 = vst [vmem:[%s9511_s12 + $0x4c8] sm:$0xff] %v807_v25  }
  0xb3   : > { %812 = vst [vmem:[%s9511_s12 + $0x4d0] sm:$0xff] %v811_v26  }
  0xb4   : > { %816 = vst [vmem:[%s9511_s12 + $0x4d8] sm:$0xff] %v815_v27  }
  0xb5   : > { %820 = vst [vmem:[%s9511_s12 + $0x4e0] sm:$0xff] %v819_v28  }
  0xb6   : > { %824 = vst [vmem:[%s9511_s12 + $0x4e8] sm:$0xff] %v823_v29  }
  0xb7   : > { %828 = vst [vmem:[%s9511_s12 + $0x4f0] sm:$0xff] %v827_v30  }
  0xb8   : > { %832 = vst [vmem:[%s9511_s12 + $0x4f8] sm:$0xff] %v831_v31  }
  0xb9   : > { %836 = vst [vmem:[%s9511_s12 + $0x500] sm:$0xff] %v835_v32  }
  0xba   : > { %840 = vst [vmem:[%s9511_s12 + $0x508] sm:$0xff] %v839_v33  }
  0xbb   : > { %844 = vst [vmem:[%s9511_s12 + $0x510] sm:$0xff] %v843_v34  }
  0xbc   : > { %848 = vst [vmem:[%s9511_s12 + $0x518] sm:$0xff] %v847_v35  }
  0xbd   : > { %852 = vst [vmem:[%s9511_s12 + $0x520] sm:$0xff] %v851_v36  }
  0xbe   : > { %856 = vst [vmem:[%s9511_s12 + $0x528] sm:$0xff] %v855_v37  }
  0xbf   : > { %860 = vst [vmem:[%s9511_s12 + $0x530] sm:$0xff] %v859_v38  }
  0xc0   : > { %864 = vst [vmem:[%s9511_s12 + $0x538] sm:$0xff] %v863_v39  }
  0xc1   : > { %868 = vst [vmem:[%s9511_s12 + $0x540] sm:$0xff] %v867_v40  }
  0xc2   : > { %872 = vst [vmem:[%s9511_s12 + $0x548] sm:$0xff] %v871_v41  }
  0xc3   : > { %876 = vst [vmem:[%s9511_s12 + $0x550] sm:$0xff] %v875_v42  }
  0xc4   : > { %880 = vst [vmem:[%s9511_s12 + $0x558] sm:$0xff] %v879_v43  }
  0xc5   : > { %884 = vst [vmem:[%s9511_s12 + $0x560] sm:$0xff] %v883_v44  }
  0xc6   : > { %888 = vst [vmem:[%s9511_s12 + $0x568] sm:$0xff] %v887_v45  }
  0xc7   : > { %892 = vst [vmem:[%s9511_s12 + $0x570] sm:$0xff] %v891_v46  }
  0xc8   : > { %896 = vst [vmem:[%s9511_s12 + $0x578] sm:$0xff] %v895_v47  }
  0xc9   : > { %900 = vst [vmem:[%s9511_s12 + $0x580] sm:$0xff] %v899_v48  }
  0xca   : > { %904 = vst [vmem:[%s9511_s12 + $0x588] sm:$0xff] %v903_v49  }
  0xcb   : > { %908 = vst [vmem:[%s9511_s12 + $0x590] sm:$0xff] %v907_v50  }
  0xcc   : > { %912 = vst [vmem:[%s9511_s12 + $0x598] sm:$0xff] %v911_v51  }
  0xcd   : > { %916 = vst [vmem:[%s9511_s12 + $0x5a0] sm:$0xff] %v915_v52  }
  0xce   : > { %920 = vst [vmem:[%s9511_s12 + $0x5a8] sm:$0xff] %v919_v53  }
  0xcf   : > { %924 = vst [vmem:[%s9511_s12 + $0x5b0] sm:$0xff] %v923_v54  }
  0xd0   : > { %928 = vst [vmem:[%s9511_s12 + $0x5b8] sm:$0xff] %v927_v55  }
  0xd1   : > { %932 = vst [vmem:[%s9511_s12 + $0x5c0] sm:$0xff] %v931_v56  }
  0xd2   : > { %936 = vst [vmem:[%s9511_s12 + $0x5c8] sm:$0xff] %v935_v57  }
  0xd3   : > { %940 = vst [vmem:[%s9511_s12 + $0x5d0] sm:$0xff] %v939_v58  }
  0xd4   : > { %944 = vst [vmem:[%s9511_s12 + $0x5d8] sm:$0xff] %v943_v59  }
  0xd5   : > { %948 = vst [vmem:[%s9511_s12 + $0x5e0] sm:$0xff] %v947_v60  }
  0xd6   : > { %952 = vst [vmem:[%s9511_s12 + $0x5e8] sm:$0xff] %v951_v61  }
  0xd7   : > { %956 = vst [vmem:[%s9511_s12 + $0x5f0] sm:$0xff] %v955_v62  }
  0xd8   : > { %960 = vst [vmem:[%s9511_s12 + $0x5f8] sm:$0xff] %v959_v63  }
  0xd9   : > { %964 = vst [vmem:[%s9511_s12 + $0x600] sm:$0xff] %v963_v0  }
  0xda   : > { %968 = vst [vmem:[%s9511_s12 + $0x608] sm:$0xff] %v967_v1  }
  0xdb   : > { %972 = vst [vmem:[%s9511_s12 + $0x610] sm:$0xff] %v971_v2  }
  0xdc   : > { %976 = vst [vmem:[%s9511_s12 + $0x618] sm:$0xff] %v975_v3  }
  0xdd PF: > { %p7810_p7 = scmp.ge.s32.totalorder %s9419_s21, 1  ;;  %p3379_p8 = scmp.lt.s32.totalorder %s9419_s21, 9 }
  0xdf   : > { %p3380_p9 = pnand %p7810_p7, %p3379_p8 }
  0xe1   : > { %3383 = sbr.rel (%p3380_p9) target bundleno = 1476 (0x5c4), region = 84 }
  0xe6   : > { %s3412_s13 = smul.u32 98, %s9407_s18  ;;  %v9154_v4 = vld [vmem:[%s11315_s1 + $0x10] sm:$0xff]  ;;  %s3386_s25 = sand.u32 1, %s9395_s15   ;;  %v9153_v5 = vld [vmem:[%s11315_s1 + $0x8] sm:$0xff]  ;;  %v9152_v6 = vld [vmem:[%s11315_s1] sm:$0xff]  ;;  %vm3786_vm0 = vcmask 392192  }
  0xe7   : > { %3939 = vmatpush.bf16.msra.mxu0 %v9154_v4  ;;  %4684 = vmatpush.bf16.msra.mxu1 %v9154_v4  ;;  %s9304_s29 = smul.u32 1568, %s3386_s25  ;;  %p9098_p11 = scmp.ne.s32.totalorder %s9403_s17, 0 }
  0xe8   : > { %p3413_p10 = scmp.lt.s32.totalorder %s3412_s13, 195  ;;  %5527 = vmatpush.bf16.msra.mxu2 %v9154_v4  ;;  %6370 = vmatpush.bf16.msra.mxu3 %v9154_v4 }
  0xe9   : > { %s9920_s8 = scalar_lea.vmem [#allocation3], %s9304_s29 }
  0xea   : > { %s11485_s13 = smov (!%p3413_p10, %s3412_s13), 195  ;;  %v9103_v7 = vld [vmem:[%s9920_s8] sm:$0xff]  ;;  %v9155_v8 = vld [vmem:[%s9920_s8 + $0x188] sm:$0xff]  ;;  %v9204_v9 = vld [vmem:[%s9920_s8 + $0x310] sm:$0xff] }
  0xeb   : > { %s7811_s30 = sshll.u32 %s11485_s13, 2  ;;  %3940 = vmatpush.bf16.msra.mxu0 %v9153_v5  ;;  %4685 = vmatpush.bf16.msra.mxu1 %v9153_v5  ;;  %v9253_v10 = vld [vmem:[%s9920_s8 + $0x498] sm:$0xff]  ;;  %v9104_v11 = vld [vmem:[%s9920_s8 + $0x8] sm:$0xff]  ;;  %v9156_v12 = vld [vmem:[%s9920_s8 + $0x190] sm:$0xff] }
  0xec   : > { %s9918_s7 = scalar_lea.vmem %s11318_s4, %s7811_s30  ;;  %5528 = vmatpush.bf16.msra.mxu2 %v9153_v5  ;;  %6371 = vmatpush.bf16.msra.mxu3 %v9153_v5  ;;  %v9205_v13 = vld [vmem:[%s9920_s8 + $0x318] sm:$0xff]  ;;  %v9254_v14 = vld [vmem:[%s9920_s8 + $0x4a0] sm:$0xff]  ;;  %v9105_v15 = vld [vmem:[%s9920_s8 + $0x10] sm:$0xff] }
  0xed   : > { %v9157_v16 = vld [vmem:[%s9920_s8 + $0x198] sm:$0xff]  ;;  %v9206_v17 = vld [vmem:[%s9920_s8 + $0x320] sm:$0xff]  ;;  %v9255_v18 = vld [vmem:[%s9920_s8 + $0x4a8] sm:$0xff] }
  0xee   : > { %v9106_v19 = vld [vmem:[%s9920_s8 + $0x18] sm:$0xff]  ;;  %v9158_v20 = vld [vmem:[%s9920_s8 + $0x1a0] sm:$0xff]  ;;  %v9207_v21 = vld [vmem:[%s9920_s8 + $0x328] sm:$0xff] }
  0xef   : > { %3941 = vmatpush.bf16.msra.mxu0 %v9152_v6  ;;  %4686 = vmatpush.bf16.msra.mxu1 %v9152_v6  ;;  %v9256_v22 = vld [vmem:[%s9920_s8 + $0x4b0] sm:$0xff]  ;;  %v9107_v23 = vld [vmem:[%s9920_s8 + $0x20] sm:$0xff]  ;;  %v9159_v24 = vld [vmem:[%s9920_s8 + $0x1a8] sm:$0xff] }
  0xf0   : > { %5529 = vmatpush.bf16.msra.mxu2 %v9152_v6  ;;  %6372 = vmatpush.bf16.msra.mxu3 %v9152_v6  ;;  %v9208_v25 = vld [vmem:[%s9920_s8 + $0x330] sm:$0xff]  ;;  %v9257_v26 = vld [vmem:[%s9920_s8 + $0x4b8] sm:$0xff]  ;;  %v9108_v27 = vld [vmem:[%s9920_s8 + $0x28] sm:$0xff] }
  0xf1   : > { %v9160_v28 = vld [vmem:[%s9920_s8 + $0x1b0] sm:$0xff]  ;;  %v9209_v29 = vld [vmem:[%s9920_s8 + $0x338] sm:$0xff]  ;;  %v9258_v30 = vld [vmem:[%s9920_s8 + $0x4c0] sm:$0xff] }
  0xf2   : > { %8020 = vmatmul.msk.bf16.vlgmr.msra.gmra.mxu0 %vm3786_vm0, %v9103_v7  ;;  %8363 = vmatmul.msk.bf16.vlgmr.msra.gmra.mxu1 %vm3786_vm0, %v9155_v8  ;;  %v9109_v31 = vld [vmem:[%s9920_s8 + $0x30] sm:$0xff]  ;;  %v9161_v32 = vld [vmem:[%s9920_s8 + $0x1b8] sm:$0xff]  ;;  %v9210_v33 = vld [vmem:[%s9920_s8 + $0x340] sm:$0xff] }
  0xf3   : > { %8706 = vmatmul.msk.bf16.vlgmr.msra.gmra.mxu2 %vm3786_vm0, %v9204_v9  ;;  %9049 = vmatmul.msk.bf16.vlgmr.msra.gmra.mxu3 %vm3786_vm0, %v9253_v10  ;;  %v9259_v34 = vld [vmem:[%s9920_s8 + $0x4c8] sm:$0xff]  ;;  %v9110_v35 = vld [vmem:[%s9920_s8 + $0x38] sm:$0xff]  ;;  %v9162_v36 = vld [vmem:[%s9920_s8 + $0x1c0] sm:$0xff] }
  0xf4   : > { %v9211_v37 = vld [vmem:[%s9920_s8 + $0x348] sm:$0xff]  ;;  %v9260_v38 = vld [vmem:[%s9920_s8 + $0x4d0] sm:$0xff]  ;;  %v9111_v39 = vld [vmem:[%s9920_s8 + $0x40] sm:$0xff] }
  0xf5   : > { %v9163_v40 = vld [vmem:[%s9920_s8 + $0x1c8] sm:$0xff]  ;;  %v9212_v43 = vld [vmem:[%s9920_s8 + $0x350] sm:$0xff]  ;;  %v9261_v44 = vld [vmem:[%s9920_s8 + $0x4d8] sm:$0xff] }
  0xf6   : > { %v9112_v55 = vld [vmem:[%s9920_s8 + $0x48] sm:$0xff]  ;;  %v9164_v56 = vld [vmem:[%s9920_s8 + $0x1d0] sm:$0xff]  ;;  %v9213_v60 = vld [vmem:[%s9920_s8 + $0x358] sm:$0xff] }
  0xf7   : > { %v9262_v61 = vld [vmem:[%s9920_s8 + $0x4e0] sm:$0xff]  ;;  %v9113_v9 = vld [vmem:[%s9920_s8 + $0x50] sm:$0xff]  ;;  %v9165_v10 = vld [vmem:[%s9920_s8 + $0x1d8] sm:$0xff] }
 0x102   : > { %8021 = vmatmul.msk.bf16.gmra.mxu0 %vm3786_vm0, %v9104_v11  ;;  %8364 = vmatmul.msk.bf16.gmra.mxu1 %vm3786_vm0, %v9156_v12 }
 0x103   : > { %8707 = vmatmul.msk.bf16.gmra.mxu2 %vm3786_vm0, %v9205_v13  ;;  %9050 = vmatmul.msk.bf16.gmra.mxu3 %vm3786_vm0, %v9254_v14  ;;  %v9214_v14 = vld [vmem:[%s9920_s8 + $0x360] sm:$0xff] }
 0x112   : > { %8022 = vmatmul.msk.bf16.gmra.mxu0 %vm3786_vm0, %v9105_v15  ;;  %8365 = vmatmul.msk.bf16.gmra.mxu1 %vm3786_vm0, %v9157_v16  ;;  %v9263_v15 = vld [vmem:[%s9920_s8 + $0x4e8] sm:$0xff] }
 0x113   : > { %8708 = vmatmul.msk.bf16.gmra.mxu2 %vm3786_vm0, %v9206_v17  ;;  %9051 = vmatmul.msk.bf16.gmra.mxu3 %vm3786_vm0, %v9255_v18 }
 0x122   : > { %8023 = vmatmul.msk.bf16.gmra.mxu0 %vm3786_vm0, %v9106_v19  ;;  %8366 = vmatmul.msk.bf16.gmra.mxu1 %vm3786_vm0, %v9158_v20 }
 0x123   : > { %8709 = vmatmul.msk.bf16.gmra.mxu2 %vm3786_vm0, %v9207_v21  ;;  %9052 = vmatmul.msk.bf16.gmra.mxu3 %vm3786_vm0, %v9256_v22 }
 0x132   : > { %8024 = vmatmul.msk.bf16.gmra.mxu0 %vm3786_vm0, %v9107_v23  ;;  %8367 = vmatmul.msk.bf16.gmra.mxu1 %vm3786_vm0, %v9159_v24 }
 0x133   : > { %8710 = vmatmul.msk.bf16.gmra.mxu2 %vm3786_vm0, %v9208_v25  ;;  %9053 = vmatmul.msk.bf16.gmra.mxu3 %vm3786_vm0, %v9257_v26 }
 0x142   : > { %8025 = vmatmul.msk.bf16.gmra.mxu0 %vm3786_vm0, %v9108_v27  ;;  %8368 = vmatmul.msk.bf16.gmra.mxu1 %vm3786_vm0, %v9160_v28  ;;  %v9114_v27 = vld [vmem:[%s9920_s8 + $0x58] sm:$0xff]  ;;  %v9166_v28 = vld [vmem:[%s9920_s8 + $0x1e0] sm:$0xff] }
 0x143   : > { %8711 = vmatmul.msk.bf16.gmra.mxu2 %vm3786_vm0, %v9209_v29  ;;  %9054 = vmatmul.msk.bf16.gmra.mxu3 %vm3786_vm0, %v9258_v30 }
 0x152   : > { %8026 = vmatmul.msk.bf16.gmra.mxu0 %vm3786_vm0, %v9109_v31  ;;  %8369 = vmatmul.msk.bf16.gmra.mxu1 %vm3786_vm0, %v9161_v32  ;;  %v9215_v32 = vld [vmem:[%s9920_s8 + $0x368] sm:$0xff] }
 0x153   : > { %8712 = vmatmul.msk.bf16.gmra.mxu2 %vm3786_vm0, %v9210_v33  ;;  %9055 = vmatmul.msk.bf16.gmra.mxu3 %vm3786_vm0, %v9259_v34  ;;  %v9264_v33 = vld [vmem:[%s9920_s8 + $0x4f0] sm:$0xff] }
 0x162   : > { %8027 = vmatmul.msk.bf16.gmra.mxu0 %vm3786_vm0, %v9110_v35  ;;  %8370 = vmatmul.msk.bf16.gmra.mxu1 %vm3786_vm0, %v9162_v36 }
 0x163   : > { %8713 = vmatmul.msk.bf16.gmra.mxu2 %vm3786_vm0, %v9211_v37  ;;  %9056 = vmatmul.msk.bf16.gmra.mxu3 %vm3786_vm0, %v9260_v38 }
 0x16f   : > { %v3943_v41 = vpop.f32.mrf.mxu0  ;;  %v4688_v42 = vpop.f32.mrf.mxu1 }
 0x170   : > { %v4933_v45 = vmax.f32 %v3943_v41, %v4688_v42 }
 0x172   : > { %8028 = vmatmul.msk.bf16.gmra.mxu0 %vm3786_vm0, %v9111_v39  ;;  %8371 = vmatmul.msk.bf16.gmra.mxu1 %vm3786_vm0, %v9163_v40 }
 0x173   : > { %8714 = vmatmul.msk.bf16.gmra.mxu2 %vm3786_vm0, %v9212_v43  ;;  %9057 = vmatmul.msk.bf16.gmra.mxu3 %vm3786_vm0, %v9261_v44 }
 0x176   : > { %v5531_v46 = vpop.f32.mrf.mxu2  ;;  %v6374_v47 = vpop.f32.mrf.mxu3 }
 0x177   : > { %v5776_v48 = vmax.f32 %v4933_v45, %v5531_v46  ;;  %v3945_v49 = vpop.f32.mrf.mxu0  ;;  %v4690_v50 = vpop.f32.mrf.mxu1  ;;  %v9115_v45 = vld [vmem:[%s9920_s8 + $0x60] sm:$0xff]  ;;  %v9167_v46 = vld [vmem:[%s9920_s8 + $0x1e8] sm:$0xff] }
 0x178   : > { %v4934_v51 = vmax.f32 %v3945_v49, %v4690_v50  ;;  %v9216_v50 = vld [vmem:[%s9920_s8 + $0x370] sm:$0xff] }
 0x179   : > { %v9994_v52 = vmax.f32 %v5776_v48, %v6374_v47 }
 0x17e   : > { %v5533_v53 = vpop.f32.mrf.mxu2  ;;  %v6376_v54 = vpop.f32.mrf.mxu3 }
 0x17f   : > { %v5777_v57 = vmax.f32 %v4934_v51, %v5533_v53  ;;  %v3948_v58 = vpop.f32.mrf.mxu0  ;;  %v4693_v59 = vpop.f32.mrf.mxu1  ;;  %v9265_v51 = vld [vmem:[%s9920_s8 + $0x4f8] sm:$0xff] }
 0x180   : > { %v4935_v62 = vmax.f32 %v3948_v58, %v4693_v59 }
 0x181   : > { %v10000_v63 = vmax.f32 %v5777_v57, %v6376_v54 }
 0x182   : > { %8029 = vmatmul.msk.bf16.gmra.mxu0 %vm3786_vm0, %v9112_v55  ;;  %8372 = vmatmul.msk.bf16.gmra.mxu1 %vm3786_vm0, %v9164_v56 }
 0x183   : > { %8715 = vmatmul.msk.bf16.gmra.mxu2 %vm3786_vm0, %v9213_v60  ;;  %9058 = vmatmul.msk.bf16.gmra.mxu3 %vm3786_vm0, %v9262_v61 }
 0x186   : > { %v5536_v0 = vpop.f32.mrf.mxu2  ;;  %v6379_v1 = vpop.f32.mrf.mxu3 }
 0x187   : > { %v5778_v2 = vmax.f32 %v4935_v62, %v5536_v0  ;;  %v3950_v3 = vpop.f32.mrf.mxu0  ;;  %v4695_v4 = vpop.f32.mrf.mxu1 }
 0x188   : > { %v4936_v5 = vmax.f32 %v3950_v3, %v4695_v4 }
 0x189   : > { %v10006_v6 = vmax.f32 %v5778_v2, %v6379_v1  ;;  %v9116_v1 = vld [vmem:[%s9920_s8 + $0x68] sm:$0xff]  ;;  %v9168_v2 = vld [vmem:[%s9920_s8 + $0x1f0] sm:$0xff] }
 0x18e   : > { %v5538_v7 = vpop.f32.mrf.mxu2  ;;  %v6381_v8 = vpop.f32.mrf.mxu3 }
 0x18f   : > { %v5779_v11 = vmax.f32 %v4936_v5, %v5538_v7  ;;  %v3953_v12 = vpop.f32.mrf.mxu0  ;;  %v4698_v13 = vpop.f32.mrf.mxu1  ;;  %v9217_v7 = vld [vmem:[%s9920_s8 + $0x378] sm:$0xff] }
 0x190   : > { %v4937_v16 = vmax.f32 %v3953_v12, %v4698_v13 }
 0x191   : > { %v10012_v17 = vmax.f32 %v5779_v11, %v6381_v8  ;;  %v9266_v8 = vld [vmem:[%s9920_s8 + $0x500] sm:$0xff] }
 0x192   : > { %8030 = vmatmul.msk.bf16.gmra.mxu0 %vm3786_vm0, %v9113_v9  ;;  %8373 = vmatmul.msk.bf16.gmra.mxu1 %vm3786_vm0, %v9165_v10 }
 0x193   : > { %8716 = vmatmul.msk.bf16.gmra.mxu2 %vm3786_vm0, %v9214_v14  ;;  %9059 = vmatmul.msk.bf16.gmra.mxu3 %vm3786_vm0, %v9263_v15 }
 0x196   : > { %v5541_v18 = vpop.f32.mrf.mxu2  ;;  %v6384_v19 = vpop.f32.mrf.mxu3 }
 0x197   : > { %v5780_v20 = vmax.f32 %v4937_v16, %v5541_v18  ;;  %v3955_v21 = vpop.f32.mrf.mxu0  ;;  %v4700_v22 = vpop.f32.mrf.mxu1 }
 0x198   : > { %v4938_v23 = vmax.f32 %v3955_v21, %v4700_v22  ;;  %v9117_v21 = vld [vmem:[%s9920_s8 + $0x70] sm:$0xff]  ;;  %v9169_v22 = vld [vmem:[%s9920_s8 + $0x1f8] sm:$0xff] }
 0x199   : > { %v10018_v24 = vmax.f32 %v5780_v20, %v6384_v19 }
 0x19e   : > { %v5543_v25 = vpop.f32.mrf.mxu2  ;;  %v6386_v26 = vpop.f32.mrf.mxu3 }
 0x19f   : > { %v5781_v29 = vmax.f32 %v4938_v23, %v5543_v25  ;;  %v3958_v30 = vpop.f32.mrf.mxu0  ;;  %v4703_v31 = vpop.f32.mrf.mxu1 }
 0x1a0   : > { %v4939_v34 = vmax.f32 %v3958_v30, %v4703_v31 }
 0x1a1   : > { %v10024_v35 = vmax.f32 %v5781_v29, %v6386_v26 }
 0x1a2   : > { %8031 = vmatmul.msk.bf16.gmra.mxu0 %vm3786_vm0, %v9114_v27  ;;  %8374 = vmatmul.msk.bf16.gmra.mxu1 %vm3786_vm0, %v9166_v28  ;;  %v9218_v27 = vld [vmem:[%s9920_s8 + $0x380] sm:$0xff]  ;;  %v9267_v28 = vld [vmem:[%s9920_s8 + $0x508] sm:$0xff] }
 0x1a3   : > { %8717 = vmatmul.msk.bf16.gmra.mxu2 %vm3786_vm0, %v9215_v32  ;;  %9060 = vmatmul.msk.bf16.gmra.mxu3 %vm3786_vm0, %v9264_v33 }
 0x1a6   : > { %v5546_v36 = vpop.f32.mrf.mxu2  ;;  %v6389_v37 = vpop.f32.mrf.mxu3 }
 0x1a7   : > { %v5782_v38 = vmax.f32 %v4939_v34, %v5546_v36  ;;  %v3960_v39 = vpop.f32.mrf.mxu0  ;;  %v4705_v40 = vpop.f32.mrf.mxu1 }
 0x1a8   : > { %v4940_v41 = vmax.f32 %v3960_v39, %v4705_v40 }
 0x1a9   : > { %v10030_v42 = vmax.f32 %v5782_v38, %v6389_v37 }
 0x1ae   : > { %v5548_v43 = vpop.f32.mrf.mxu2  ;;  %v6391_v44 = vpop.f32.mrf.mxu3 }
 0x1af   : > { %v5783_v47 = vmax.f32 %v4940_v41, %v5548_v43  ;;  %v3963_v48 = vpop.f32.mrf.mxu0  ;;  %v4708_v49 = vpop.f32.mrf.mxu1  ;;  %v9118_v41 = vld [vmem:[%s9920_s8 + $0x78] sm:$0xff]  ;;  %v9170_v43 = vld [vmem:[%s9920_s8 + $0x200] sm:$0xff] }
 0x1b0   : > { %v4941_v53 = vmax.f32 %v3963_v48, %v4708_v49  ;;  %v9268_v48 = vld [vmem:[%s9920_s8 + $0x510] sm:$0xff] }
 0x1b1   : > { %v10036_v54 = vmax.f32 %v5783_v47, %v6391_v44  ;;  %v9219_v47 = vld [vmem:[%s9920_s8 + $0x388] sm:$0xff] }
 0x1b2   : > { %8032 = vmatmul.msk.bf16.gmra.mxu0 %vm3786_vm0, %v9115_v45  ;;  %8375 = vmatmul.msk.bf16.gmra.mxu1 %vm3786_vm0, %v9167_v46 }
 0x1b3   : > { %8718 = vmatmul.msk.bf16.gmra.mxu2 %vm3786_vm0, %v9216_v50  ;;  %9061 = vmatmul.msk.bf16.gmra.mxu3 %vm3786_vm0, %v9265_v51 }
 0x1b6   : > { %v5551_v55 = vpop.f32.mrf.mxu2  ;;  %v6394_v56 = vpop.f32.mrf.mxu3 }
 0x1b7   : > { %v5784_v57 = vmax.f32 %v4941_v53, %v5551_v55  ;;  %v3965_v58 = vpop.f32.mrf.mxu0  ;;  %v4710_v59 = vpop.f32.mrf.mxu1 }
 0x1b8   : > { %v4942_v60 = vmax.f32 %v3965_v58, %v4710_v59 }
 0x1b9   : > { %v10042_v61 = vmax.f32 %v5784_v57, %v6394_v56 }
 0x1be   : > { %v5553_v62 = vpop.f32.mrf.mxu2  ;;  %v6396_v0 = vpop.f32.mrf.mxu3 }
 0x1bf   : > { %v5785_v3 = vmax.f32 %v4942_v60, %v5553_v62  ;;  %v3968_v4 = vpop.f32.mrf.mxu0  ;;  %v4713_v5 = vpop.f32.mrf.mxu1 }
 0x1c0   : > { %v4943_v9 = vmax.f32 %v3968_v4, %v4713_v5  ;;  %v9220_v5 = vld [vmem:[%s9920_s8 + $0x390] sm:$0xff] }
 0x1c1   : > { %v10048_v10 = vmax.f32 %v5785_v3, %v6396_v0  ;;  %v9119_v0 = vld [vmem:[%s9920_s8 + $0x80] sm:$0xff] }
 0x1c2   : > { %8033 = vmatmul.msk.bf16.gmra.mxu0 %vm3786_vm0, %v9116_v1  ;;  %8376 = vmatmul.msk.bf16.gmra.mxu1 %vm3786_vm0, %v9168_v2  ;;  %v9171_v1 = vld [vmem:[%s9920_s8 + $0x208] sm:$0xff] }
 0x1c3   : > { %8719 = vmatmul.msk.bf16.gmra.mxu2 %vm3786_vm0, %v9217_v7  ;;  %9062 = vmatmul.msk.bf16.gmra.mxu3 %vm3786_vm0, %v9266_v8  ;;  %v9269_v7 = vld [vmem:[%s9920_s8 + $0x518] sm:$0xff] }
 0x1c6   : > { %v5556_v11 = vpop.f32.mrf.mxu2  ;;  %v6399_v12 = vpop.f32.mrf.mxu3 }
 0x1c7   : > { %v5786_v13 = vmax.f32 %v4943_v9, %v5556_v11  ;;  %v3970_v14 = vpop.f32.mrf.mxu0  ;;  %v4715_v15 = vpop.f32.mrf.mxu1 }
 0x1c8   : > { %v4944_v16 = vmax.f32 %v3970_v14, %v4715_v15 }
 0x1c9   : > { %v10054_v18 = vmax.f32 %v5786_v13, %v6399_v12 }
 0x1ce   : > { %v5558_v19 = vpop.f32.mrf.mxu2  ;;  %v6401_v20 = vpop.f32.mrf.mxu3 }
 0x1cf   : > { %v5787_v23 = vmax.f32 %v4944_v16, %v5558_v19  ;;  %v3973_v25 = vpop.f32.mrf.mxu0  ;;  %v4718_v26 = vpop.f32.mrf.mxu1 }
 0x1d0   : > { %v4945_v29 = vmax.f32 %v3973_v25, %v4718_v26 }
 0x1d1   : > { %v10060_v30 = vmax.f32 %v5787_v23, %v6401_v20  ;;  %v9172_v23 = vld [vmem:[%s9920_s8 + $0x210] sm:$0xff] }
 0x1d2   : > { %8034 = vmatmul.msk.bf16.gmra.mxu0 %vm3786_vm0, %v9117_v21  ;;  %8377 = vmatmul.msk.bf16.gmra.mxu1 %vm3786_vm0, %v9169_v22  ;;  %v9120_v22 = vld [vmem:[%s9920_s8 + $0x88] sm:$0xff] }
 0x1d3   : > { %8720 = vmatmul.msk.bf16.gmra.mxu2 %vm3786_vm0, %v9218_v27  ;;  %9063 = vmatmul.msk.bf16.gmra.mxu3 %vm3786_vm0, %v9267_v28  ;;  %v9221_v28 = vld [vmem:[%s9920_s8 + $0x398] sm:$0xff] }
 0x1d6   : > { %v5561_v31 = vpop.f32.mrf.mxu2  ;;  %v6404_v32 = vpop.f32.mrf.mxu3 }
 0x1d7   : > { %v5788_v33 = vmax.f32 %v4945_v29, %v5561_v31  ;;  %v3975_v34 = vpop.f32.mrf.mxu0  ;;  %v4720_v36 = vpop.f32.mrf.mxu1  ;;  %v9270_v29 = vld [vmem:[%s9920_s8 + $0x520] sm:$0xff] }
 0x1d8   : > { %v4946_v37 = vmax.f32 %v3975_v34, %v4720_v36 }
 0x1d9   : > { %v10066_v38 = vmax.f32 %v5788_v33, %v6404_v32 }
 0x1de   : > { %v5563_v39 = vpop.f32.mrf.mxu2  ;;  %v6406_v40 = vpop.f32.mrf.mxu3 }
 0x1df   : > { %v5789_v44 = vmax.f32 %v4946_v37, %v5563_v39  ;;  %v3978_v45 = vpop.f32.mrf.mxu0  ;;  %v4723_v46 = vpop.f32.mrf.mxu1 }
 0x1e0   : > { %v4947_v49 = vmax.f32 %v3978_v45, %v4723_v46  ;;  %v9121_v45 = vld [vmem:[%s9920_s8 + $0x90] sm:$0xff]  ;;  %v9173_v46 = vld [vmem:[%s9920_s8 + $0x218] sm:$0xff] }
 0x1e1   : > { %v10072_v50 = vmax.f32 %v5789_v44, %v6406_v40 }
 0x1e2   : > { %8035 = vmatmul.msk.bf16.gmra.mxu0 %vm3786_vm0, %v9118_v41  ;;  %8378 = vmatmul.msk.bf16.gmra.mxu1 %vm3786_vm0, %v9170_v43 }
 0x1e3   : > { %8721 = vmatmul.msk.bf16.gmra.mxu2 %vm3786_vm0, %v9219_v47  ;;  %9064 = vmatmul.msk.bf16.gmra.mxu3 %vm3786_vm0, %v9268_v48 }
 0x1e6   : > { %v5566_v51 = vpop.f32.mrf.mxu2  ;;  %v6409_v53 = vpop.f32.mrf.mxu3 }
 0x1e7   : > { %v5790_v55 = vmax.f32 %v4947_v49, %v5566_v51  ;;  %v3980_v56 = vpop.f32.mrf.mxu0  ;;  %v4725_v57 = vpop.f32.mrf.mxu1  ;;  %v9222_v51 = vld [vmem:[%s9920_s8 + $0x3a0] sm:$0xff] }
 0x1e8   : > { %v4948_v58 = vmax.f32 %v3980_v56, %v4725_v57 }
 0x1e9   : > { %v10078_v59 = vmax.f32 %v5790_v55, %v6409_v53  ;;  %v9271_v53 = vld [vmem:[%s9920_s8 + $0x528] sm:$0xff] }
 0x1ee   : > { %v5568_v60 = vpop.f32.mrf.mxu2  ;;  %v6411_v62 = vpop.f32.mrf.mxu3 }
 0x1ef   : > { %v5791_v2 = vmax.f32 %v4948_v58, %v5568_v60  ;;  %v3983_v3 = vpop.f32.mrf.mxu0  ;;  %v4728_v4 = vpop.f32.mrf.mxu1 }
 0x1f0   : > { %v4949_v8 = vmax.f32 %v3983_v3, %v4728_v4 }
 0x1f1   : > { %v10084_v9 = vmax.f32 %v5791_v2, %v6411_v62 }
 0x1f2   : > { %8036 = vmatmul.msk.bf16.gmra.mxu0 %vm3786_vm0, %v9119_v0  ;;  %8379 = vmatmul.msk.bf16.gmra.mxu1 %vm3786_vm0, %v9171_v1 }
 0x1f3   : > { %8722 = vmatmul.msk.bf16.gmra.mxu2 %vm3786_vm0, %v9220_v5  ;;  %9065 = vmatmul.msk.bf16.gmra.mxu3 %vm3786_vm0, %v9269_v7  ;;  %v9122_v5 = vld [vmem:[%s9920_s8 + $0x98] sm:$0xff]  ;;  %v9174_v7 = vld [vmem:[%s9920_s8 + $0x220] sm:$0xff] }
 0x1f6   : > { %v5571_v11 = vpop.f32.mrf.mxu2  ;;  %v6414_v12 = vpop.f32.mrf.mxu3 }
 0x1f7   : > { %v5792_v13 = vmax.f32 %v4949_v8, %v5571_v11  ;;  %v3985_v14 = vpop.f32.mrf.mxu0  ;;  %v4730_v15 = vpop.f32.mrf.mxu1 }
 0x1f8   : > { %v4950_v16 = vmax.f32 %v3985_v14, %v4730_v15  ;;  %v9272_v14 = vld [vmem:[%s9920_s8 + $0x530] sm:$0xff] }
 0x1f9   : > { %v10090_v19 = vmax.f32 %v5792_v13, %v6414_v12  ;;  %v9223_v13 = vld [vmem:[%s9920_s8 + $0x3a8] sm:$0xff] }
 0x1fe   : > { %v5573_v20 = vpop.f32.mrf.mxu2  ;;  %v6416_v21 = vpop.f32.mrf.mxu3 }
 0x1ff   : > { %v5793_v25 = vmax.f32 %v4950_v16, %v5573_v20  ;;  %v3988_v26 = vpop.f32.mrf.mxu0  ;;  %v4733_v27 = vpop.f32.mrf.mxu1 }
 0x200   : > { %v4951_v31 = vmax.f32 %v3988_v26, %v4733_v27 }
 0x201   : > { %v10096_v32 = vmax.f32 %v5793_v25, %v6416_v21 }
 0x202   : > { %8037 = vmatmul.msk.bf16.gmra.mxu0 %vm3786_vm0, %v9120_v22  ;;  %8380 = vmatmul.msk.bf16.gmra.mxu1 %vm3786_vm0, %v9172_v23 }
 0x203   : > { %8723 = vmatmul.msk.bf16.gmra.mxu2 %vm3786_vm0, %v9221_v28  ;;  %9066 = vmatmul.msk.bf16.gmra.mxu3 %vm3786_vm0, %v9270_v29 }
 0x206   : > { %v5576_v33 = vpop.f32.mrf.mxu2  ;;  %v6419_v34 = vpop.f32.mrf.mxu3 }
 0x207   : > { %v5794_v36 = vmax.f32 %v4951_v31, %v5576_v33  ;;  %v3990_v37 = vpop.f32.mrf.mxu0  ;;  %v4735_v39 = vpop.f32.mrf.mxu1  ;;  %v9123_v31 = vld [vmem:[%s9920_s8 + $0xa0] sm:$0xff]  ;;  %v9175_v33 = vld [vmem:[%s9920_s8 + $0x228] sm:$0xff] }
 0x208   : > { %v4952_v40 = vmax.f32 %v3990_v37, %v4735_v39  ;;  %v9224_v39 = vld [vmem:[%s9920_s8 + $0x3b0] sm:$0xff] }
 0x209   : > { %v10102_v41 = vmax.f32 %v5794_v36, %v6419_v34 }
 0x20e   : > { %v5578_v43 = vpop.f32.mrf.mxu2  ;;  %v6421_v44 = vpop.f32.mrf.mxu3 }
 0x20f   : > { %v5795_v47 = vmax.f32 %v4952_v40, %v5578_v43  ;;  %v3993_v48 = vpop.f32.mrf.mxu0  ;;  %v4738_v49 = vpop.f32.mrf.mxu1  ;;  %v9273_v40 = vld [vmem:[%s9920_s8 + $0x538] sm:$0xff] }
 0x210   : > { %v4953_v55 = vmax.f32 %v3993_v48, %v4738_v49 }
 0x211   : > { %v10108_v56 = vmax.f32 %v5795_v47, %v6421_v44 }
 0x212   : > { %8038 = vmatmul.msk.bf16.gmra.mxu0 %vm3786_vm0, %v9121_v45  ;;  %8381 = vmatmul.msk.bf16.gmra.mxu1 %vm3786_vm0, %v9173_v46 }
 0x213   : > { %8724 = vmatmul.msk.bf16.gmra.mxu2 %vm3786_vm0, %v9222_v51  ;;  %9067 = vmatmul.msk.bf16.gmra.mxu3 %vm3786_vm0, %v9271_v53 }
 0x216   : > { %v5581_v57 = vpop.f32.mrf.mxu2  ;;  %v6424_v58 = vpop.f32.mrf.mxu3 }
 0x217   : > { %v5796_v60 = vmax.f32 %v4953_v55, %v5581_v57  ;;  %v3995_v62 = vpop.f32.mrf.mxu0  ;;  %v4740_v0 = vpop.f32.mrf.mxu1 }
 0x218   : > { %v4954_v1 = vmax.f32 %v3995_v62, %v4740_v0 }
 0x219   : > { %v10114_v2 = vmax.f32 %v5796_v60, %v6424_v58  ;;  %v9124_v58 = vld [vmem:[%s9920_s8 + $0xa8] sm:$0xff]  ;;  %v9176_v60 = vld [vmem:[%s9920_s8 + $0x230] sm:$0xff] }
 0x21e   : > { %v5583_v3 = vpop.f32.mrf.mxu2  ;;  %v6426_v4 = vpop.f32.mrf.mxu3 }
 0x21f   : > { %v5797_v8 = vmax.f32 %v4954_v1, %v5583_v3  ;;  %v3998_v11 = vpop.f32.mrf.mxu0  ;;  %v4743_v12 = vpop.f32.mrf.mxu1  ;;  %v9225_v3 = vld [vmem:[%s9920_s8 + $0x3b8] sm:$0xff] }
 0x220   : > { %v4955_v15 = vmax.f32 %v3998_v11, %v4743_v12 }
 0x221   : > { %v10120_v16 = vmax.f32 %v5797_v8, %v6426_v4  ;;  %v9274_v4 = vld [vmem:[%s9920_s8 + $0x540] sm:$0xff] }
 0x222   : > { %8039 = vmatmul.msk.bf16.gmra.mxu0 %vm3786_vm0, %v9122_v5  ;;  %8382 = vmatmul.msk.bf16.gmra.mxu1 %vm3786_vm0, %v9174_v7 }
 0x223   : > { %8725 = vmatmul.msk.bf16.gmra.mxu2 %vm3786_vm0, %v9223_v13  ;;  %9068 = vmatmul.msk.bf16.gmra.mxu3 %vm3786_vm0, %v9272_v14 }
 0x226   : > { %v5586_v20 = vpop.f32.mrf.mxu2  ;;  %v6429_v21 = vpop.f32.mrf.mxu3 }
 0x227   : > { %v5798_v22 = vmax.f32 %v4955_v15, %v5586_v20  ;;  %v4000_v23 = vpop.f32.mrf.mxu0  ;;  %v4745_v25 = vpop.f32.mrf.mxu1 }
 0x228   : > { %v4956_v26 = vmax.f32 %v4000_v23, %v4745_v25  ;;  %v9125_v23 = vld [vmem:[%s9920_s8 + $0xb0] sm:$0xff]  ;;  %v9177_v25 = vld [vmem:[%s9920_s8 + $0x238] sm:$0xff] }
 0x229   : > { %v10126_v27 = vmax.f32 %v5798_v22, %v6429_v21 }
 0x22e   : > { %v5588_v28 = vpop.f32.mrf.mxu2  ;;  %v6431_v29 = vpop.f32.mrf.mxu3 }
 0x22f   : > { %v5799_v34 = vmax.f32 %v4956_v26, %v5588_v28  ;;  %v4003_v36 = vpop.f32.mrf.mxu0  ;;  %v4748_v37 = vpop.f32.mrf.mxu1 }
 0x230   : > { %v4957_v43 = vmax.f32 %v4003_v36, %v4748_v37 }
 0x231   : > { %v10132_v44 = vmax.f32 %v5799_v34, %v6431_v29 }
 0x232   : > { %8040 = vmatmul.msk.bf16.gmra.mxu0 %vm3786_vm0, %v9123_v31  ;;  %8383 = vmatmul.msk.bf16.gmra.mxu1 %vm3786_vm0, %v9175_v33  ;;  %v9226_v31 = vld [vmem:[%s9920_s8 + $0x3c0] sm:$0xff]  ;;  %v9275_v33 = vld [vmem:[%s9920_s8 + $0x548] sm:$0xff] }
 0x233   : > { %8726 = vmatmul.msk.bf16.gmra.mxu2 %vm3786_vm0, %v9224_v39  ;;  %9069 = vmatmul.msk.bf16.gmra.mxu3 %vm3786_vm0, %v9273_v40 }
 0x236   : > { %v5591_v45 = vpop.f32.mrf.mxu2  ;;  %v6434_v46 = vpop.f32.mrf.mxu3 }
 0x237   : > { %v5800_v47 = vmax.f32 %v4957_v43, %v5591_v45  ;;  %v4005_v48 = vpop.f32.mrf.mxu0  ;;  %v4750_v49 = vpop.f32.mrf.mxu1 }
 0x238   : > { %v4958_v51 = vmax.f32 %v4005_v48, %v4750_v49 }
 0x239   : > { %v10138_v53 = vmax.f32 %v5800_v47, %v6434_v46 }
 0x23e   : > { %v5593_v55 = vpop.f32.mrf.mxu2  ;;  %v6436_v57 = vpop.f32.mrf.mxu3 }
 0x23f   : > { %v5801_v62 = vmax.f32 %v4958_v51, %v5593_v55  ;;  %v4008_v0 = vpop.f32.mrf.mxu0  ;;  %v4753_v1 = vpop.f32.mrf.mxu1  ;;  %v9126_v51 = vld [vmem:[%s9920_s8 + $0xb8] sm:$0xff]  ;;  %v9178_v55 = vld [vmem:[%s9920_s8 + $0x240] sm:$0xff] }
 0x240   : > { %v4959_v5 = vmax.f32 %v4008_v0, %v4753_v1  ;;  %v9276_v0 = vld [vmem:[%s9920_s8 + $0x550] sm:$0xff] }
 0x241   : > { %v10144_v7 = vmax.f32 %v5801_v62, %v6436_v57  ;;  %v9227_v62 = vld [vmem:[%s9920_s8 + $0x3c8] sm:$0xff] }
 0x242   : > { %8041 = vmatmul.msk.bf16.gmra.mxu0 %vm3786_vm0, %v9124_v58  ;;  %8384 = vmatmul.msk.bf16.gmra.mxu1 %vm3786_vm0, %v9176_v60 }
 0x243   : > { %8727 = vmatmul.msk.bf16.gmra.mxu2 %vm3786_vm0, %v9225_v3  ;;  %9070 = vmatmul.msk.bf16.gmra.mxu3 %vm3786_vm0, %v9274_v4 }
 0x246   : > { %v5596_v8 = vpop.f32.mrf.mxu2  ;;  %v6439_v11 = vpop.f32.mrf.mxu3 }
 0x247   : > { %v5802_v12 = vmax.f32 %v4959_v5, %v5596_v8  ;;  %v4010_v13 = vpop.f32.mrf.mxu0  ;;  %v4755_v14 = vpop.f32.mrf.mxu1 }
 0x248   : > { %v4960_v15 = vmax.f32 %v4010_v13, %v4755_v14 }
 0x249   : > { %v10150_v20 = vmax.f32 %v5802_v12, %v6439_v11 }
 0x24e   : > { %v5598_v21 = vpop.f32.mrf.mxu2  ;;  %v6441_v22 = vpop.f32.mrf.mxu3 }
 0x24f   : > { %v5803_v26 = vmax.f32 %v4960_v15, %v5598_v21  ;;  %v4013_v28 = vpop.f32.mrf.mxu0  ;;  %v4758_v29 = vpop.f32.mrf.mxu1 }
 0x250   : > { %v4961_v34 = vmax.f32 %v4013_v28, %v4758_v29  ;;  %v9228_v29 = vld [vmem:[%s9920_s8 + $0x3d0] sm:$0xff] }
 0x251   : > { %v10156_v36 = vmax.f32 %v5803_v26, %v6441_v22  ;;  %v9127_v22 = vld [vmem:[%s9920_s8 + $0xc0] sm:$0xff] }
 0x252   : > { %8042 = vmatmul.msk.bf16.gmra.mxu0 %vm3786_vm0, %v9125_v23  ;;  %8385 = vmatmul.msk.bf16.gmra.mxu1 %vm3786_vm0, %v9177_v25  ;;  %v9179_v23 = vld [vmem:[%s9920_s8 + $0x248] sm:$0xff] }
 0x253   : > { %8728 = vmatmul.msk.bf16.gmra.mxu2 %vm3786_vm0, %v9226_v31  ;;  %9071 = vmatmul.msk.bf16.gmra.mxu3 %vm3786_vm0, %v9275_v33  ;;  %v9277_v31 = vld [vmem:[%s9920_s8 + $0x558] sm:$0xff] }
 0x256   : > { %v5601_v37 = vpop.f32.mrf.mxu2  ;;  %v6444_v39 = vpop.f32.mrf.mxu3 }
 0x257   : > { %v5804_v40 = vmax.f32 %v4961_v34, %v5601_v37  ;;  %v4015_v43 = vpop.f32.mrf.mxu0  ;;  %v4760_v45 = vpop.f32.mrf.mxu1 }
 0x258   : > { %v4962_v46 = vmax.f32 %v4015_v43, %v4760_v45 }
 0x259   : > { %v10162_v47 = vmax.f32 %v5804_v40, %v6444_v39 }
 0x25e   : > { %v5603_v48 = vpop.f32.mrf.mxu2  ;;  %v6446_v49 = vpop.f32.mrf.mxu3 }
 0x25f   : > { %v5805_v57 = vmax.f32 %v4962_v46, %v5603_v48  ;;  %v4018_v58 = vpop.f32.mrf.mxu0  ;;  %v4763_v60 = vpop.f32.mrf.mxu1 }
 0x260   : > { %v4963_v1 = vmax.f32 %v4018_v58, %v4763_v60 }
 0x261   : > { %v10168_v3 = vmax.f32 %v5805_v57, %v6446_v49  ;;  %v9180_v57 = vld [vmem:[%s9920_s8 + $0x250] sm:$0xff] }
 0x262   : > { %8043 = vmatmul.msk.bf16.gmra.mxu0 %vm3786_vm0, %v9126_v51  ;;  %8386 = vmatmul.msk.bf16.gmra.mxu1 %vm3786_vm0, %v9178_v55  ;;  %v9128_v55 = vld [vmem:[%s9920_s8 + $0xc8] sm:$0xff] }
 0x263   : > { %8729 = vmatmul.msk.bf16.gmra.mxu2 %vm3786_vm0, %v9227_v62  ;;  %9072 = vmatmul.msk.bf16.gmra.mxu3 %vm3786_vm0, %v9276_v0  ;;  %v9229_v0 = vld [vmem:[%s9920_s8 + $0x3d8] sm:$0xff] }
 0x266   : > { %v5606_v4 = vpop.f32.mrf.mxu2  ;;  %v6449_v5 = vpop.f32.mrf.mxu3 }
 0x267   : > { %v5806_v8 = vmax.f32 %v4963_v1, %v5606_v4  ;;  %v4020_v11 = vpop.f32.mrf.mxu0  ;;  %v4765_v12 = vpop.f32.mrf.mxu1  ;;  %v9278_v1 = vld [vmem:[%s9920_s8 + $0x560] sm:$0xff] }
 0x268   : > { %v4964_v13 = vmax.f32 %v4020_v11, %v4765_v12 }
 0x269   : > { %v10174_v14 = vmax.f32 %v5806_v8, %v6449_v5 }
 0x26e   : > { %v5608_v15 = vpop.f32.mrf.mxu2  ;;  %v6451_v21 = vpop.f32.mrf.mxu3 }
 0x26f   : > { %v5807_v25 = vmax.f32 %v4964_v13, %v5608_v15  ;;  %v4023_v26 = vpop.f32.mrf.mxu0  ;;  %v4768_v28 = vpop.f32.mrf.mxu1 }
 0x270   : > { %v4965_v33 = vmax.f32 %v4023_v26, %v4768_v28  ;;  %v9129_v26 = vld [vmem:[%s9920_s8 + $0xd0] sm:$0xff]  ;;  %v9181_v28 = vld [vmem:[%s9920_s8 + $0x258] sm:$0xff] }
 0x271   : > { %v10180_v34 = vmax.f32 %v5807_v25, %v6451_v21 }
 0x272   : > { %8044 = vmatmul.msk.bf16.gmra.mxu0 %vm3786_vm0, %v9127_v22  ;;  %8387 = vmatmul.msk.bf16.gmra.mxu1 %vm3786_vm0, %v9179_v23 }
 0x273   : > { %8730 = vmatmul.msk.bf16.gmra.mxu2 %vm3786_vm0, %v9228_v29  ;;  %9073 = vmatmul.msk.bf16.gmra.mxu3 %vm3786_vm0, %v9277_v31 }
 0x276   : > { %v5611_v37 = vpop.f32.mrf.mxu2  ;;  %v6454_v39 = vpop.f32.mrf.mxu3 }
 0x277   : > { %v5808_v40 = vmax.f32 %v4965_v33, %v5611_v37  ;;  %v4025_v43 = vpop.f32.mrf.mxu0  ;;  %v4770_v45 = vpop.f32.mrf.mxu1  ;;  %v9230_v37 = vld [vmem:[%s9920_s8 + $0x3e0] sm:$0xff] }
 0x278   : > { %v4966_v46 = vmax.f32 %v4025_v43, %v4770_v45 }
 0x279   : > { %v10186_v48 = vmax.f32 %v5808_v40, %v6454_v39  ;;  %v9279_v39 = vld [vmem:[%s9920_s8 + $0x568] sm:$0xff] }
 0x27e   : > { %v5613_v49 = vpop.f32.mrf.mxu2  ;;  %v6456_v51 = vpop.f32.mrf.mxu3 }
 0x27f   : > { %v5809_v58 = vmax.f32 %v4966_v46, %v5613_v49  ;;  %v4028_v60 = vpop.f32.mrf.mxu0  ;;  %v4773_v62 = vpop.f32.mrf.mxu1 }
 0x280   : > { %v4967_v4 = vmax.f32 %v4028_v60, %v4773_v62 }
 0x281   : > { %v10192_v5 = vmax.f32 %v5809_v58, %v6456_v51 }
 0x282   : > { %8045 = vmatmul.msk.bf16.gmra.mxu0 %vm3786_vm0, %v9128_v55  ;;  %8388 = vmatmul.msk.bf16.gmra.mxu1 %vm3786_vm0, %v9180_v57 }
 0x283   : > { %8731 = vmatmul.msk.bf16.gmra.mxu2 %vm3786_vm0, %v9229_v0  ;;  %9074 = vmatmul.msk.bf16.gmra.mxu3 %vm3786_vm0, %v9278_v1  ;;  %v9130_v0 = vld [vmem:[%s9920_s8 + $0xd8] sm:$0xff]  ;;  %v9182_v1 = vld [vmem:[%s9920_s8 + $0x260] sm:$0xff] }
 0x286   : > { %v5616_v8 = vpop.f32.mrf.mxu2  ;;  %v6459_v11 = vpop.f32.mrf.mxu3 }
 0x287   : > { %v5810_v12 = vmax.f32 %v4967_v4, %v5616_v8  ;;  %v4030_v13 = vpop.f32.mrf.mxu0  ;;  %v4775_v15 = vpop.f32.mrf.mxu1 }
 0x288   : > { %v4968_v21 = vmax.f32 %v4030_v13, %v4775_v15  ;;  %v9280_v13 = vld [vmem:[%s9920_s8 + $0x570] sm:$0xff] }
 0x289   : > { %v10198_v22 = vmax.f32 %v5810_v12, %v6459_v11  ;;  %v9231_v12 = vld [vmem:[%s9920_s8 + $0x3e8] sm:$0xff] }
 0x28e   : > { %v5618_v23 = vpop.f32.mrf.mxu2  ;;  %v6461_v25 = vpop.f32.mrf.mxu3 }
 0x28f   : > { %v5811_v29 = vmax.f32 %v4968_v21, %v5618_v23  ;;  %v4033_v31 = vpop.f32.mrf.mxu0  ;;  %v4778_v33 = vpop.f32.mrf.mxu1 }
 0x290   : > { %v4969_v40 = vmax.f32 %v4033_v31, %v4778_v33 }
 0x291   : > { %v10204_v43 = vmax.f32 %v5811_v29, %v6461_v25 }
 0x292   : > { %8046 = vmatmul.msk.bf16.gmra.mxu0 %vm3786_vm0, %v9129_v26  ;;  %8389 = vmatmul.msk.bf16.gmra.mxu1 %vm3786_vm0, %v9181_v28 }
 0x293   : > { %8732 = vmatmul.msk.bf16.gmra.mxu2 %vm3786_vm0, %v9230_v37  ;;  %9075 = vmatmul.msk.bf16.gmra.mxu3 %vm3786_vm0, %v9279_v39 }
 0x296   : > { %v5621_v45 = vpop.f32.mrf.mxu2  ;;  %v6464_v46 = vpop.f32.mrf.mxu3 }
 0x297   : > { %v5812_v49 = vmax.f32 %v4969_v40, %v5621_v45  ;;  %v4035_v51 = vpop.f32.mrf.mxu0  ;;  %v4780_v55 = vpop.f32.mrf.mxu1  ;;  %v9131_v40 = vld [vmem:[%s9920_s8 + $0xe0] sm:$0xff]  ;;  %v9183_v45 = vld [vmem:[%s9920_s8 + $0x268] sm:$0xff] }
 0x298   : > { %v4970_v57 = vmax.f32 %v4035_v51, %v4780_v55  ;;  %v9232_v55 = vld [vmem:[%s9920_s8 + $0x3f0] sm:$0xff] }
 0x299   : > { %v10210_v58 = vmax.f32 %v5812_v49, %v6464_v46 }
 0x29e   : > { %v5623_v60 = vpop.f32.mrf.mxu2  ;;  %v6466_v62 = vpop.f32.mrf.mxu3 }
 0x29f   : > { %v5813_v4 = vmax.f32 %v4970_v57, %v5623_v60  ;;  %v4038_v8 = vpop.f32.mrf.mxu0  ;;  %v4783_v11 = vpop.f32.mrf.mxu1  ;;  %v9281_v57 = vld [vmem:[%s9920_s8 + $0x578] sm:$0xff] }
 0x2a0   : > { %v4971_v15 = vmax.f32 %v4038_v8, %v4783_v11 }
 0x2a1   : > { %v10216_v21 = vmax.f32 %v5813_v4, %v6466_v62 }
 0x2a2   : > { %8047 = vmatmul.msk.bf16.gmra.mxu0 %vm3786_vm0, %v9130_v0  ;;  %8390 = vmatmul.msk.bf16.gmra.mxu1 %vm3786_vm0, %v9182_v1 }
 0x2a3   : > { %8733 = vmatmul.msk.bf16.gmra.mxu2 %vm3786_vm0, %v9231_v12  ;;  %9076 = vmatmul.msk.bf16.gmra.mxu3 %vm3786_vm0, %v9280_v13 }
 0x2a6   : > { %v5626_v23 = vpop.f32.mrf.mxu2  ;;  %v6469_v25 = vpop.f32.mrf.mxu3 }
 0x2a7   : > { %v5814_v26 = vmax.f32 %v4971_v15, %v5626_v23  ;;  %v4040_v28 = vpop.f32.mrf.mxu0  ;;  %v4785_v29 = vpop.f32.mrf.mxu1 }
 0x2a8   : > { %v4972_v31 = vmax.f32 %v4040_v28, %v4785_v29 }
 0x2a9   : > { %v10222_v33 = vmax.f32 %v5814_v26, %v6469_v25  ;;  %v9132_v25 = vld [vmem:[%s9920_s8 + $0xe8] sm:$0xff]  ;;  %v9184_v26 = vld [vmem:[%s9920_s8 + $0x270] sm:$0xff] }
 0x2ae   : > { %v5628_v37 = vpop.f32.mrf.mxu2  ;;  %v6471_v39 = vpop.f32.mrf.mxu3 }
 0x2af   : > { %v5815_v46 = vmax.f32 %v4972_v31, %v5628_v37  ;;  %v4043_v49 = vpop.f32.mrf.mxu0  ;;  %v4788_v51 = vpop.f32.mrf.mxu1  ;;  %v9233_v37 = vld [vmem:[%s9920_s8 + $0x3f8] sm:$0xff] }
 0x2b0   : > { %v4973_v60 = vmax.f32 %v4043_v49, %v4788_v51 }
 0x2b1   : > { %v10228_v62 = vmax.f32 %v5815_v46, %v6471_v39  ;;  %v9282_v39 = vld [vmem:[%s9920_s8 + $0x580] sm:$0xff] }
 0x2b2   : > { %8048 = vmatmul.msk.bf16.gmra.mxu0 %vm3786_vm0, %v9131_v40  ;;  %8391 = vmatmul.msk.bf16.gmra.mxu1 %vm3786_vm0, %v9183_v45 }
 0x2b3   : > { %8734 = vmatmul.msk.bf16.gmra.mxu2 %vm3786_vm0, %v9232_v55  ;;  %9077 = vmatmul.msk.bf16.gmra.mxu3 %vm3786_vm0, %v9281_v57 }
 0x2b6   : > { %v5631_v0 = vpop.f32.mrf.mxu2  ;;  %v6474_v1 = vpop.f32.mrf.mxu3 }
 0x2b7   : > { %v5816_v4 = vmax.f32 %v4973_v60, %v5631_v0  ;;  %v4045_v8 = vpop.f32.mrf.mxu0  ;;  %v4790_v11 = vpop.f32.mrf.mxu1 }
 0x2b8   : > { %v4974_v12 = vmax.f32 %v4045_v8, %v4790_v11  ;;  %v9133_v8 = vld [vmem:[%s9920_s8 + $0xf0] sm:$0xff]  ;;  %v9185_v11 = vld [vmem:[%s9920_s8 + $0x278] sm:$0xff] }
 0x2b9   : > { %v10234_v13 = vmax.f32 %v5816_v4, %v6474_v1 }
 0x2be   : > { %v5633_v15 = vpop.f32.mrf.mxu2  ;;  %v6476_v23 = vpop.f32.mrf.mxu3 }
 0x2bf   : > { %v5817_v28 = vmax.f32 %v4974_v12, %v5633_v15  ;;  %v4048_v29 = vpop.f32.mrf.mxu0  ;;  %v4793_v31 = vpop.f32.mrf.mxu1 }
 0x2c0   : > { %v4975_v40 = vmax.f32 %v4048_v29, %v4793_v31 }
 0x2c1   : > { %v10240_v45 = vmax.f32 %v5817_v28, %v6476_v23 }
 0x2c2   : > { %8049 = vmatmul.msk.bf16.gmra.mxu0 %vm3786_vm0, %v9132_v25  ;;  %8392 = vmatmul.msk.bf16.gmra.mxu1 %vm3786_vm0, %v9184_v26  ;;  %v9234_v25 = vld [vmem:[%s9920_s8 + $0x400] sm:$0xff]  ;;  %v9283_v26 = vld [vmem:[%s9920_s8 + $0x588] sm:$0xff] }
 0x2c3   : > { %8735 = vmatmul.msk.bf16.gmra.mxu2 %vm3786_vm0, %v9233_v37  ;;  %9078 = vmatmul.msk.bf16.gmra.mxu3 %vm3786_vm0, %v9282_v39 }
 0x2c6   : > { %v5636_v46 = vpop.f32.mrf.mxu2  ;;  %v6479_v49 = vpop.f32.mrf.mxu3 }
 0x2c7   : > { %v5818_v51 = vmax.f32 %v4975_v40, %v5636_v46  ;;  %v4050_v55 = vpop.f32.mrf.mxu0  ;;  %v4795_v57 = vpop.f32.mrf.mxu1 }
 0x2c8   : > { %v4976_v60 = vmax.f32 %v4050_v55, %v4795_v57 }
 0x2c9   : > { %v10246_v0 = vmax.f32 %v5818_v51, %v6479_v49 }
 0x2ce   : > { %v5638_v1 = vpop.f32.mrf.mxu2  ;;  %v6481_v4 = vpop.f32.mrf.mxu3 }
 0x2cf   : > { %v5819_v12 = vmax.f32 %v4976_v60, %v5638_v1  ;;  %v4053_v15 = vpop.f32.mrf.mxu0  ;;  %v4798_v23 = vpop.f32.mrf.mxu1  ;;  %v9134_v60 = vld [vmem:[%s9920_s8 + $0xf8] sm:$0xff]  ;;  %v9186_v1 = vld [vmem:[%s9920_s8 + $0x280] sm:$0xff] }
 0x2d0   : > { %v4977_v28 = vmax.f32 %v4053_v15, %v4798_v23  ;;  %v9284_v15 = vld [vmem:[%s9920_s8 + $0x590] sm:$0xff] }
 0x2d1   : > { %v10252_v29 = vmax.f32 %v5819_v12, %v6481_v4  ;;  %v9235_v12 = vld [vmem:[%s9920_s8 + $0x408] sm:$0xff] }
 0x2d2   : > { %8050 = vmatmul.msk.bf16.gmra.mxu0 %vm3786_vm0, %v9133_v8  ;;  %8393 = vmatmul.msk.bf16.gmra.mxu1 %vm3786_vm0, %v9185_v11 }
 0x2d3   : > { %11319 = vst [vmem:[#allocation4_spill] sm:$0xff] %v10252_v29  ;;  %8736 = vmatmul.msk.bf16.gmra.mxu2 %vm3786_vm0, %v9234_v25  ;;  %9079 = vmatmul.msk.bf16.gmra.mxu3 %vm3786_vm0, %v9283_v26 }
 0x2d6   : > { %v5641_v31 = vpop.f32.mrf.mxu2  ;;  %v6484_v37 = vpop.f32.mrf.mxu3 }
 0x2d7   : > { %v5820_v39 = vmax.f32 %v4977_v28, %v5641_v31  ;;  %v4055_v40 = vpop.f32.mrf.mxu0  ;;  %v4800_v46 = vpop.f32.mrf.mxu1 }
 0x2d8   : > { %v4978_v49 = vmax.f32 %v4055_v40, %v4800_v46 }
 0x2d9   : > { %v10258_v51 = vmax.f32 %v5820_v39, %v6484_v37 }
 0x2db   : > { %11320 = vst [vmem:[#allocation5_spill] sm:$0xff] %v10258_v51 }
 0x2de   : > { %v5643_v55 = vpop.f32.mrf.mxu2  ;;  %v6486_v57 = vpop.f32.mrf.mxu3 }
 0x2df   : > { %v5821_v4 = vmax.f32 %v4978_v49, %v5643_v55  ;;  %v4058_v8 = vpop.f32.mrf.mxu0  ;;  %v4803_v11 = vpop.f32.mrf.mxu1 }
 0x2e0   : > { %v4979_v23 = vmax.f32 %v4058_v8, %v4803_v11  ;;  %v9236_v11 = vld [vmem:[%s9920_s8 + $0x410] sm:$0xff] }
 0x2e1   : > { %v10264_v25 = vmax.f32 %v5821_v4, %v6486_v57  ;;  %v9135_v57 = vld [vmem:[%s9920_s8 + $0x100] sm:$0xff] }
 0x2e2   : > { %8051 = vmatmul.msk.bf16.gmra.mxu0 %vm3786_vm0, %v9134_v60  ;;  %8394 = vmatmul.msk.bf16.gmra.mxu1 %vm3786_vm0, %v9186_v1  ;;  %v9187_v60 = vld [vmem:[%s9920_s8 + $0x288] sm:$0xff] }
 0x2e3   : > { %11321 = vst [vmem:[#allocation6_spill] sm:$0xff] %v10264_v25  ;;  %8737 = vmatmul.msk.bf16.gmra.mxu2 %vm3786_vm0, %v9235_v12  ;;  %9080 = vmatmul.msk.bf16.gmra.mxu3 %vm3786_vm0, %v9284_v15  ;;  %v9285_v12 = vld [vmem:[%s9920_s8 + $0x598] sm:$0xff] }
 0x2e6   : > { %v5646_v26 = vpop.f32.mrf.mxu2  ;;  %v6489_v28 = vpop.f32.mrf.mxu3 }
 0x2e7   : > { %v5822_v31 = vmax.f32 %v4979_v23, %v5646_v26  ;;  %v4060_v37 = vpop.f32.mrf.mxu0  ;;  %v4805_v39 = vpop.f32.mrf.mxu1 }
 0x2e8   : > { %v4980_v40 = vmax.f32 %v4060_v37, %v4805_v39 }
 0x2e9   : > { %v10270_v46 = vmax.f32 %v5822_v31, %v6489_v28 }
 0x2eb   : > { %11322 = vst [vmem:[#allocation7_spill] sm:$0xff] %v10270_v46 }
 0x2ee   : > { %v5648_v49 = vpop.f32.mrf.mxu2  ;;  %v6491_v55 = vpop.f32.mrf.mxu3 }
 0x2ef   : > { %v5823_v4 = vmax.f32 %v4980_v40, %v5648_v49  ;;  %v4063_v1 = vpop.f32.mrf.mxu0  ;;  %v4808_v8 = vpop.f32.mrf.mxu1 }
 0x2f0   : > { %v4981_v15 = vmax.f32 %v4063_v1, %v4808_v8 }
 0x2f1   : > { %v10276_v25 = vmax.f32 %v5823_v4, %v6491_v55  ;;  %v9136_v4 = vld [vmem:[%s9920_s8 + $0x108] sm:$0xff] }
 0x2f2   : > { %8052 = vmatmul.msk.bf16.gmra.mxu0 %vm3786_vm0, %v9135_v57  ;;  %8395 = vmatmul.msk.bf16.gmra.mxu1 %vm3786_vm0, %v9187_v60  ;;  %v9188_v57 = vld [vmem:[%s9920_s8 + $0x290] sm:$0xff] }
 0x2f3   : > { %11323 = vst [vmem:[#allocation8_spill] sm:$0xff] %v10276_v25  ;;  %8738 = vmatmul.msk.bf16.gmra.mxu2 %vm3786_vm0, %v9236_v11  ;;  %9081 = vmatmul.msk.bf16.gmra.mxu3 %vm3786_vm0, %v9285_v12  ;;  %v9237_v11 = vld [vmem:[%s9920_s8 + $0x418] sm:$0xff]  ;;  %v9286_v25 = vld [vmem:[%s9920_s8 + $0x5a0] sm:$0xff] }
 0x2f6   : > { %v5651_v23 = vpop.f32.mrf.mxu2  ;;  %v6494_v26 = vpop.f32.mrf.mxu3 }
 0x2f7   : > { %v5824_v28 = vmax.f32 %v4981_v15, %v5651_v23  ;;  %v4065_v31 = vpop.f32.mrf.mxu0  ;;  %v4810_v37 = vpop.f32.mrf.mxu1 }
 0x2f8   : > { %v4982_v39 = vmax.f32 %v4065_v31, %v4810_v37 }
 0x2f9   : > { %v10282_v40 = vmax.f32 %v5824_v28, %v6494_v26 }
 0x2fb   : > { %11324 = vst [vmem:[#allocation9_spill] sm:$0xff] %v10282_v40 }
 0x2fe   : > { %v5653_v49 = vpop.f32.mrf.mxu2  ;;  %v6496_v55 = vpop.f32.mrf.mxu3 }
 0x2ff   : > { %v5825_v1 = vmax.f32 %v4982_v39, %v5653_v49  ;;  %v4068_v60 = vpop.f32.mrf.mxu0  ;;  %v4813_v8 = vpop.f32.mrf.mxu1 }
 0x300   : > { %v4983_v12 = vmax.f32 %v4068_v60, %v4813_v8 }
 0x301   : > { %v10288_v46 = vmax.f32 %v5825_v1, %v6496_v55  ;;  %v9137_v1 = vld [vmem:[%s9920_s8 + $0x110] sm:$0xff] }
 0x302   : > { %8053 = vmatmul.msk.bf16.gmra.mxu0 %vm3786_vm0, %v9136_v4  ;;  %8396 = vmatmul.msk.bf16.gmra.mxu1 %vm3786_vm0, %v9188_v57  ;;  %v9189_v4 = vld [vmem:[%s9920_s8 + $0x298] sm:$0xff] }
 0x303   : > { %11325 = vst [vmem:[#allocation10_spill] sm:$0xff] %v10288_v46  ;;  %8739 = vmatmul.msk.bf16.gmra.mxu2 %vm3786_vm0, %v9237_v11  ;;  %9082 = vmatmul.msk.bf16.gmra.mxu3 %vm3786_vm0, %v9286_v25  ;;  %v9238_v11 = vld [vmem:[%s9920_s8 + $0x420] sm:$0xff]  ;;  %v9287_v46 = vld [vmem:[%s9920_s8 + $0x5a8] sm:$0xff] }
 0x306   : > { %v5656_v15 = vpop.f32.mrf.mxu2  ;;  %v6499_v23 = vpop.f32.mrf.mxu3 }
 0x307   : > { %v5826_v26 = vmax.f32 %v4983_v12, %v5656_v15  ;;  %v4070_v28 = vpop.f32.mrf.mxu0  ;;  %v4815_v31 = vpop.f32.mrf.mxu1 }
 0x308   : > { %v4984_v37 = vmax.f32 %v4070_v28, %v4815_v31 }
 0x309   : > { %v10294_v39 = vmax.f32 %v5826_v26, %v6499_v23 }
 0x30b   : > { %11326 = vst [vmem:[#allocation11_spill] sm:$0xff] %v10294_v39 }
 0x30e   : > { %v5658_v49 = vpop.f32.mrf.mxu2  ;;  %v6501_v55 = vpop.f32.mrf.mxu3 }
 0x30f   : > { %v5827_v60 = vmax.f32 %v4984_v37, %v5658_v49  ;;  %v4073_v57 = vpop.f32.mrf.mxu0  ;;  %v4818_v8 = vpop.f32.mrf.mxu1 }
 0x310   : > { %v4985_v25 = vmax.f32 %v4073_v57, %v4818_v8 }
 0x311   : > { %v10300_v40 = vmax.f32 %v5827_v60, %v6501_v55  ;;  %v9138_v60 = vld [vmem:[%s9920_s8 + $0x118] sm:$0xff] }
 0x312   : > { %8054 = vmatmul.msk.bf16.gmra.mxu0 %vm3786_vm0, %v9137_v1  ;;  %8397 = vmatmul.msk.bf16.gmra.mxu1 %vm3786_vm0, %v9189_v4  ;;  %v9190_v1 = vld [vmem:[%s9920_s8 + $0x2a0] sm:$0xff] }
 0x313   : > { %11327 = vst [vmem:[#allocation12_spill] sm:$0xff] %v10300_v40  ;;  %8740 = vmatmul.msk.bf16.gmra.mxu2 %vm3786_vm0, %v9238_v11  ;;  %9083 = vmatmul.msk.bf16.gmra.mxu3 %vm3786_vm0, %v9287_v46  ;;  %v9239_v11 = vld [vmem:[%s9920_s8 + $0x428] sm:$0xff]  ;;  %v9288_v40 = vld [vmem:[%s9920_s8 + $0x5b0] sm:$0xff] }
 0x316   : > { %v5661_v12 = vpop.f32.mrf.mxu2  ;;  %v6504_v15 = vpop.f32.mrf.mxu3 }
 0x317   : > { %v5828_v23 = vmax.f32 %v4985_v25, %v5661_v12  ;;  %v4075_v26 = vpop.f32.mrf.mxu0  ;;  %v4820_v28 = vpop.f32.mrf.mxu1 }
 0x318   : > { %v4986_v31 = vmax.f32 %v4075_v26, %v4820_v28 }
 0x319   : > { %v10306_v37 = vmax.f32 %v5828_v23, %v6504_v15 }
 0x31b   : > { %11328 = vst [vmem:[#allocation13_spill] sm:$0xff] %v10306_v37 }
 0x31e   : > { %v5663_v49 = vpop.f32.mrf.mxu2  ;;  %v6506_v55 = vpop.f32.mrf.mxu3 }
 0x31f   : > { %v5829_v57 = vmax.f32 %v4986_v31, %v5663_v49  ;;  %v4078_v4 = vpop.f32.mrf.mxu0  ;;  %v4823_v8 = vpop.f32.mrf.mxu1 }
 0x320   : > { %v4987_v46 = vmax.f32 %v4078_v4, %v4823_v8 }
 0x321   : > { %v10312_v39 = vmax.f32 %v5829_v57, %v6506_v55  ;;  %v9139_v57 = vld [vmem:[%s9920_s8 + $0x120] sm:$0xff] }
 0x322   : > { %8055 = vmatmul.msk.bf16.gmra.mxu0 %vm3786_vm0, %v9138_v60  ;;  %8398 = vmatmul.msk.bf16.gmra.mxu1 %vm3786_vm0, %v9190_v1  ;;  %v9191_v60 = vld [vmem:[%s9920_s8 + $0x2a8] sm:$0xff] }
 0x323   : > { %11329 = vst [vmem:[#allocation14_spill] sm:$0xff] %v10312_v39  ;;  %8741 = vmatmul.msk.bf16.gmra.mxu2 %vm3786_vm0, %v9239_v11  ;;  %9084 = vmatmul.msk.bf16.gmra.mxu3 %vm3786_vm0, %v9288_v40  ;;  %v9240_v11 = vld [vmem:[%s9920_s8 + $0x430] sm:$0xff]  ;;  %v9289_v39 = vld [vmem:[%s9920_s8 + $0x5b8] sm:$0xff] }
 0x326   : > { %v5666_v25 = vpop.f32.mrf.mxu2  ;;  %v6509_v12 = vpop.f32.mrf.mxu3 }
 0x327   : > { %v5830_v15 = vmax.f32 %v4987_v46, %v5666_v25  ;;  %v4080_v23 = vpop.f32.mrf.mxu0  ;;  %v4825_v26 = vpop.f32.mrf.mxu1 }
 0x328   : > { %v4988_v28 = vmax.f32 %v4080_v23, %v4825_v26 }
 0x329   : > { %v10318_v31 = vmax.f32 %v5830_v15, %v6509_v12 }
 0x32b   : > { %11330 = vst [vmem:[#allocation15_spill] sm:$0xff] %v10318_v31 }
 0x32e   : > { %v5668_v49 = vpop.f32.mrf.mxu2  ;;  %v6511_v55 = vpop.f32.mrf.mxu3 }
 0x32f   : > { %v5831_v4 = vmax.f32 %v4988_v28, %v5668_v49  ;;  %v4083_v1 = vpop.f32.mrf.mxu0  ;;  %v4828_v8 = vpop.f32.mrf.mxu1 }
 0x330   : > { %v4989_v40 = vmax.f32 %v4083_v1, %v4828_v8 }
 0x331   : > { %v10324_v37 = vmax.f32 %v5831_v4, %v6511_v55  ;;  %v9140_v4 = vld [vmem:[%s9920_s8 + $0x128] sm:$0xff] }
 0x332   : > { %8056 = vmatmul.msk.bf16.gmra.mxu0 %vm3786_vm0, %v9139_v57  ;;  %8399 = vmatmul.msk.bf16.gmra.mxu1 %vm3786_vm0, %v9191_v60  ;;  %v9192_v57 = vld [vmem:[%s9920_s8 + $0x2b0] sm:$0xff] }
 0x333   : > { %11331 = vst [vmem:[#allocation16_spill] sm:$0xff] %v10324_v37  ;;  %8742 = vmatmul.msk.bf16.gmra.mxu2 %vm3786_vm0, %v9240_v11  ;;  %9085 = vmatmul.msk.bf16.gmra.mxu3 %vm3786_vm0, %v9289_v39  ;;  %v9241_v11 = vld [vmem:[%s9920_s8 + $0x438] sm:$0xff]  ;;  %v9290_v37 = vld [vmem:[%s9920_s8 + $0x5c0] sm:$0xff] }
 0x336   : > { %v5671_v46 = vpop.f32.mrf.mxu2  ;;  %v6514_v25 = vpop.f32.mrf.mxu3 }
 0x337   : > { %v5832_v12 = vmax.f32 %v4989_v40, %v5671_v46  ;;  %v4085_v15 = vpop.f32.mrf.mxu0  ;;  %v4830_v23 = vpop.f32.mrf.mxu1 }
 0x338   : > { %v4990_v26 = vmax.f32 %v4085_v15, %v4830_v23 }
 0x339   : > { %v10330_v28 = vmax.f32 %v5832_v12, %v6514_v25 }
 0x33b   : > { %11332 = vst [vmem:[#allocation17_spill] sm:$0xff] %v10330_v28 }
 0x33e   : > { %v5673_v49 = vpop.f32.mrf.mxu2  ;;  %v6516_v55 = vpop.f32.mrf.mxu3 }
 0x33f   : > { %v5833_v1 = vmax.f32 %v4990_v26, %v5673_v49  ;;  %v4088_v60 = vpop.f32.mrf.mxu0  ;;  %v4833_v8 = vpop.f32.mrf.mxu1 }
 0x340   : > { %v4991_v39 = vmax.f32 %v4088_v60, %v4833_v8 }
 0x341   : > { %v10336_v31 = vmax.f32 %v5833_v1, %v6516_v55  ;;  %v9141_v1 = vld [vmem:[%s9920_s8 + $0x130] sm:$0xff] }
 0x342   : > { %8057 = vmatmul.msk.bf16.gmra.mxu0 %vm3786_vm0, %v9140_v4  ;;  %8400 = vmatmul.msk.bf16.gmra.mxu1 %vm3786_vm0, %v9192_v57  ;;  %v9193_v4 = vld [vmem:[%s9920_s8 + $0x2b8] sm:$0xff] }
 0x343   : > { %11333 = vst [vmem:[#allocation18_spill] sm:$0xff] %v10336_v31  ;;  %8743 = vmatmul.msk.bf16.gmra.mxu2 %vm3786_vm0, %v9241_v11  ;;  %9086 = vmatmul.msk.bf16.gmra.mxu3 %vm3786_vm0, %v9290_v37  ;;  %v9242_v11 = vld [vmem:[%s9920_s8 + $0x440] sm:$0xff]  ;;  %v9291_v31 = vld [vmem:[%s9920_s8 + $0x5c8] sm:$0xff] }
 0x346   : > { %v5676_v40 = vpop.f32.mrf.mxu2  ;;  %v6519_v46 = vpop.f32.mrf.mxu3 }
 0x347   : > { %v5834_v25 = vmax.f32 %v4991_v39, %v5676_v40  ;;  %v4090_v12 = vpop.f32.mrf.mxu0  ;;  %v4835_v15 = vpop.f32.mrf.mxu1 }
 0x348   : > { %v4992_v23 = vmax.f32 %v4090_v12, %v4835_v15 }
 0x349   : > { %v10342_v26 = vmax.f32 %v5834_v25, %v6519_v46 }
 0x34b   : > { %11334 = vst [vmem:[#allocation19_spill] sm:$0xff] %v10342_v26 }
 0x34e   : > { %v5678_v49 = vpop.f32.mrf.mxu2  ;;  %v6521_v55 = vpop.f32.mrf.mxu3 }
 0x34f   : > { %v5835_v60 = vmax.f32 %v4992_v23, %v5678_v49  ;;  %v4093_v57 = vpop.f32.mrf.mxu0  ;;  %v4838_v8 = vpop.f32.mrf.mxu1 }
 0x350   : > { %v4993_v37 = vmax.f32 %v4093_v57, %v4838_v8 }
 0x351   : > { %v10348_v28 = vmax.f32 %v5835_v60, %v6521_v55  ;;  %v9142_v60 = vld [vmem:[%s9920_s8 + $0x138] sm:$0xff] }
 0x352   : > { %8058 = vmatmul.msk.bf16.gmra.mxu0 %vm3786_vm0, %v9141_v1  ;;  %8401 = vmatmul.msk.bf16.gmra.mxu1 %vm3786_vm0, %v9193_v4  ;;  %v9194_v1 = vld [vmem:[%s9920_s8 + $0x2c0] sm:$0xff] }
 0x353   : > { %11335 = vst [vmem:[#allocation20_spill] sm:$0xff] %v10348_v28  ;;  %8744 = vmatmul.msk.bf16.gmra.mxu2 %vm3786_vm0, %v9242_v11  ;;  %9087 = vmatmul.msk.bf16.gmra.mxu3 %vm3786_vm0, %v9291_v31  ;;  %v9243_v11 = vld [vmem:[%s9920_s8 + $0x448] sm:$0xff]  ;;  %v9292_v28 = vld [vmem:[%s9920_s8 + $0x5d0] sm:$0xff] }
 0x356   : > { %v5681_v39 = vpop.f32.mrf.mxu2  ;;  %v6524_v40 = vpop.f32.mrf.mxu3 }
 0x357   : > { %v5836_v46 = vmax.f32 %v4993_v37, %v5681_v39  ;;  %v4095_v25 = vpop.f32.mrf.mxu0  ;;  %v4840_v12 = vpop.f32.mrf.mxu1 }
 0x358   : > { %v4994_v15 = vmax.f32 %v4095_v25, %v4840_v12 }
 0x359   : > { %v10354_v23 = vmax.f32 %v5836_v46, %v6524_v40 }
 0x35b   : > { %11336 = vst [vmem:[#allocation21_spill] sm:$0xff] %v10354_v23 }
 0x35e   : > { %v5683_v49 = vpop.f32.mrf.mxu2  ;;  %v6526_v55 = vpop.f32.mrf.mxu3 }
 0x35f   : > { %v5837_v57 = vmax.f32 %v4994_v15, %v5683_v49  ;;  %v4098_v4 = vpop.f32.mrf.mxu0  ;;  %v4843_v8 = vpop.f32.mrf.mxu1 }
 0x360   : > { %v4995_v31 = vmax.f32 %v4098_v4, %v4843_v8 }
 0x361   : > { %v10360_v26 = vmax.f32 %v5837_v57, %v6526_v55  ;;  %v9143_v57 = vld [vmem:[%s9920_s8 + $0x140] sm:$0xff] }
 0x362   : > { %8059 = vmatmul.msk.bf16.gmra.mxu0 %vm3786_vm0, %v9142_v60  ;;  %8402 = vmatmul.msk.bf16.gmra.mxu1 %vm3786_vm0, %v9194_v1  ;;  %v9195_v60 = vld [vmem:[%s9920_s8 + $0x2c8] sm:$0xff] }
 0x363   : > { %11337 = vst [vmem:[#allocation22_spill] sm:$0xff] %v10360_v26  ;;  %8745 = vmatmul.msk.bf16.gmra.mxu2 %vm3786_vm0, %v9243_v11  ;;  %9088 = vmatmul.msk.bf16.gmra.mxu3 %vm3786_vm0, %v9292_v28  ;;  %v9244_v11 = vld [vmem:[%s9920_s8 + $0x450] sm:$0xff]  ;;  %v9293_v26 = vld [vmem:[%s9920_s8 + $0x5d8] sm:$0xff] }
 0x366   : > { %v5686_v37 = vpop.f32.mrf.mxu2  ;;  %v6529_v39 = vpop.f32.mrf.mxu3 }
 0x367   : > { %v5838_v40 = vmax.f32 %v4995_v31, %v5686_v37  ;;  %v4100_v46 = vpop.f32.mrf.mxu0  ;;  %v4845_v25 = vpop.f32.mrf.mxu1 }
 0x368   : > { %v4996_v12 = vmax.f32 %v4100_v46, %v4845_v25 }
 0x369   : > { %v10366_v15 = vmax.f32 %v5838_v40, %v6529_v39 }
 0x36b   : > { %11338 = vst [vmem:[#allocation23_spill] sm:$0xff] %v10366_v15 }
 0x36e   : > { %v5688_v49 = vpop.f32.mrf.mxu2  ;;  %v6531_v55 = vpop.f32.mrf.mxu3 }
 0x36f   : > { %v5839_v4 = vmax.f32 %v4996_v12, %v5688_v49  ;;  %v4103_v1 = vpop.f32.mrf.mxu0  ;;  %v4848_v8 = vpop.f32.mrf.mxu1 }
 0x370   : > { %v4997_v28 = vmax.f32 %v4103_v1, %v4848_v8 }
 0x371   : > { %v10372_v23 = vmax.f32 %v5839_v4, %v6531_v55  ;;  %v9144_v4 = vld [vmem:[%s9920_s8 + $0x148] sm:$0xff] }
 0x372   : > { %8060 = vmatmul.msk.bf16.gmra.mxu0 %vm3786_vm0, %v9143_v57  ;;  %8403 = vmatmul.msk.bf16.gmra.mxu1 %vm3786_vm0, %v9195_v60  ;;  %v9196_v57 = vld [vmem:[%s9920_s8 + $0x2d0] sm:$0xff] }
 0x373   : > { %11339 = vst [vmem:[#allocation24_spill] sm:$0xff] %v10372_v23  ;;  %8746 = vmatmul.msk.bf16.gmra.mxu2 %vm3786_vm0, %v9244_v11  ;;  %9089 = vmatmul.msk.bf16.gmra.mxu3 %vm3786_vm0, %v9293_v26  ;;  %v9245_v11 = vld [vmem:[%s9920_s8 + $0x458] sm:$0xff]  ;;  %v9294_v23 = vld [vmem:[%s9920_s8 + $0x5e0] sm:$0xff] }
 0x376   : > { %v5691_v31 = vpop.f32.mrf.mxu2  ;;  %v6534_v37 = vpop.f32.mrf.mxu3 }
 0x377   : > { %v5840_v39 = vmax.f32 %v4997_v28, %v5691_v31  ;;  %v4105_v40 = vpop.f32.mrf.mxu0  ;;  %v4850_v46 = vpop.f32.mrf.mxu1 }
 0x378   : > { %v4998_v25 = vmax.f32 %v4105_v40, %v4850_v46 }
 0x379   : > { %v10378_v12 = vmax.f32 %v5840_v39, %v6534_v37 }
 0x37b   : > { %11340 = vst [vmem:[#allocation25_spill] sm:$0xff] %v10378_v12 }
 0x37e   : > { %v5693_v49 = vpop.f32.mrf.mxu2  ;;  %v6536_v55 = vpop.f32.mrf.mxu3 }
 0x37f   : > { %v5841_v1 = vmax.f32 %v4998_v25, %v5693_v49  ;;  %v4108_v60 = vpop.f32.mrf.mxu0  ;;  %v4853_v8 = vpop.f32.mrf.mxu1 }
 0x380   : > { %v4999_v26 = vmax.f32 %v4108_v60, %v4853_v8 }
 0x381   : > { %v10384_v15 = vmax.f32 %v5841_v1, %v6536_v55  ;;  %v9145_v1 = vld [vmem:[%s9920_s8 + $0x150] sm:$0xff] }
 0x382   : > { %8061 = vmatmul.msk.bf16.gmra.mxu0 %vm3786_vm0, %v9144_v4  ;;  %8404 = vmatmul.msk.bf16.gmra.mxu1 %vm3786_vm0, %v9196_v57  ;;  %v9197_v4 = vld [vmem:[%s9920_s8 + $0x2d8] sm:$0xff] }
 0x383   : > { %11341 = vst [vmem:[#allocation26_spill] sm:$0xff] %v10384_v15  ;;  %8747 = vmatmul.msk.bf16.gmra.mxu2 %vm3786_vm0, %v9245_v11  ;;  %9090 = vmatmul.msk.bf16.gmra.mxu3 %vm3786_vm0, %v9294_v23  ;;  %v9246_v11 = vld [vmem:[%s9920_s8 + $0x460] sm:$0xff]  ;;  %v9295_v15 = vld [vmem:[%s9920_s8 + $0x5e8] sm:$0xff] }
 0x386   : > { %v5696_v28 = vpop.f32.mrf.mxu2  ;;  %v6539_v31 = vpop.f32.mrf.mxu3 }
 0x387   : > { %v5842_v37 = vmax.f32 %v4999_v26, %v5696_v28  ;;  %v4110_v39 = vpop.f32.mrf.mxu0  ;;  %v4855_v40 = vpop.f32.mrf.mxu1 }
 0x388   : > { %v5000_v46 = vmax.f32 %v4110_v39, %v4855_v40 }
 0x389   : > { %v10390_v25 = vmax.f32 %v5842_v37, %v6539_v31 }
 0x38b   : > { %11342 = vst [vmem:[#allocation27_spill] sm:$0xff] %v10390_v25 }
 0x38e   : > { %v5698_v49 = vpop.f32.mrf.mxu2  ;;  %v6541_v55 = vpop.f32.mrf.mxu3 }
 0x38f   : > { %v5843_v60 = vmax.f32 %v5000_v46, %v5698_v49  ;;  %v4113_v57 = vpop.f32.mrf.mxu0  ;;  %v4858_v8 = vpop.f32.mrf.mxu1 }
 0x390   : > { %v5001_v23 = vmax.f32 %v4113_v57, %v4858_v8 }
 0x391   : > { %v10396_v12 = vmax.f32 %v5843_v60, %v6541_v55  ;;  %v9146_v60 = vld [vmem:[%s9920_s8 + $0x158] sm:$0xff] }
 0x392   : > { %8062 = vmatmul.msk.bf16.gmra.mxu0 %vm3786_vm0, %v9145_v1  ;;  %8405 = vmatmul.msk.bf16.gmra.mxu1 %vm3786_vm0, %v9197_v4  ;;  %v9198_v1 = vld [vmem:[%s9920_s8 + $0x2e0] sm:$0xff] }
 0x393   : > { %11343 = vst [vmem:[#allocation28_spill] sm:$0xff] %v10396_v12  ;;  %8748 = vmatmul.msk.bf16.gmra.mxu2 %vm3786_vm0, %v9246_v11  ;;  %9091 = vmatmul.msk.bf16.gmra.mxu3 %vm3786_vm0, %v9295_v15  ;;  %v9247_v11 = vld [vmem:[%s9920_s8 + $0x468] sm:$0xff]  ;;  %v9296_v12 = vld [vmem:[%s9920_s8 + $0x5f0] sm:$0xff] }
 0x396   : > { %v5701_v26 = vpop.f32.mrf.mxu2  ;;  %v6544_v28 = vpop.f32.mrf.mxu3 }
 0x397   : > { %v5844_v31 = vmax.f32 %v5001_v23, %v5701_v26  ;;  %v4115_v37 = vpop.f32.mrf.mxu0  ;;  %v4860_v39 = vpop.f32.mrf.mxu1 }
 0x398   : > { %v5002_v40 = vmax.f32 %v4115_v37, %v4860_v39 }
 0x399   : > { %v10402_v46 = vmax.f32 %v5844_v31, %v6544_v28 }
 0x39b   : > { %11344 = vst [vmem:[#allocation29_spill] sm:$0xff] %v10402_v46 }
 0x39e   : > { %v5703_v49 = vpop.f32.mrf.mxu2  ;;  %v6546_v55 = vpop.f32.mrf.mxu3 }
 0x39f   : > { %v5845_v57 = vmax.f32 %v5002_v40, %v5703_v49  ;;  %v4118_v4 = vpop.f32.mrf.mxu0  ;;  %v4863_v8 = vpop.f32.mrf.mxu1 }
 0x3a0   : > { %v5003_v15 = vmax.f32 %v4118_v4, %v4863_v8 }
 0x3a1   : > { %v10408_v25 = vmax.f32 %v5845_v57, %v6546_v55  ;;  %v9147_v57 = vld [vmem:[%s9920_s8 + $0x160] sm:$0xff] }
 0x3a2   : > { %8063 = vmatmul.msk.bf16.gmra.mxu0 %vm3786_vm0, %v9146_v60  ;;  %8406 = vmatmul.msk.bf16.gmra.mxu1 %vm3786_vm0, %v9198_v1  ;;  %v9199_v60 = vld [vmem:[%s9920_s8 + $0x2e8] sm:$0xff] }
 0x3a3   : > { %11345 = vst [vmem:[#allocation30_spill] sm:$0xff] %v10408_v25  ;;  %8749 = vmatmul.msk.bf16.gmra.mxu2 %vm3786_vm0, %v9247_v11  ;;  %9092 = vmatmul.msk.bf16.gmra.mxu3 %vm3786_vm0, %v9296_v12  ;;  %v9248_v11 = vld [vmem:[%s9920_s8 + $0x470] sm:$0xff]  ;;  %v9297_v25 = vld [vmem:[%s9920_s8 + $0x5f8] sm:$0xff] }
 0x3a6   : > { %v5706_v23 = vpop.f32.mrf.mxu2  ;;  %v6549_v26 = vpop.f32.mrf.mxu3 }
 0x3a7   : > { %v5846_v28 = vmax.f32 %v5003_v15, %v5706_v23  ;;  %v4120_v31 = vpop.f32.mrf.mxu0  ;;  %v4865_v37 = vpop.f32.mrf.mxu1 }
 0x3a8   : > { %v5004_v39 = vmax.f32 %v4120_v31, %v4865_v37 }
 0x3a9   : > { %v10414_v40 = vmax.f32 %v5846_v28, %v6549_v26 }
 0x3ab   : > { %11346 = vst [vmem:[#allocation31_spill] sm:$0xff] %v10414_v40 }
 0x3ae   : > { %v5708_v49 = vpop.f32.mrf.mxu2  ;;  %v6551_v55 = vpop.f32.mrf.mxu3 }
 0x3af   : > { %v5847_v4 = vmax.f32 %v5004_v39, %v5708_v49  ;;  %v4123_v1 = vpop.f32.mrf.mxu0  ;;  %v4868_v8 = vpop.f32.mrf.mxu1 }
 0x3b0   : > { %v5005_v12 = vmax.f32 %v4123_v1, %v4868_v8 }
 0x3b1   : > { %v10420_v46 = vmax.f32 %v5847_v4, %v6551_v55  ;;  %v9148_v4 = vld [vmem:[%s9920_s8 + $0x168] sm:$0xff] }
 0x3b2   : > { %8064 = vmatmul.msk.bf16.gmra.mxu0 %vm3786_vm0, %v9147_v57  ;;  %8407 = vmatmul.msk.bf16.gmra.mxu1 %vm3786_vm0, %v9199_v60  ;;  %v9200_v57 = vld [vmem:[%s9920_s8 + $0x2f0] sm:$0xff] }
 0x3b3   : > { %11347 = vst [vmem:[#allocation32_spill] sm:$0xff] %v10420_v46  ;;  %8750 = vmatmul.msk.bf16.gmra.mxu2 %vm3786_vm0, %v9248_v11  ;;  %9093 = vmatmul.msk.bf16.gmra.mxu3 %vm3786_vm0, %v9297_v25  ;;  %v9249_v11 = vld [vmem:[%s9920_s8 + $0x478] sm:$0xff]  ;;  %v9298_v46 = vld [vmem:[%s9920_s8 + $0x600] sm:$0xff] }
 0x3b6   : > { %v5711_v15 = vpop.f32.mrf.mxu2  ;;  %v6554_v23 = vpop.f32.mrf.mxu3 }
 0x3b7   : > { %v5848_v26 = vmax.f32 %v5005_v12, %v5711_v15  ;;  %v4125_v28 = vpop.f32.mrf.mxu0  ;;  %v4870_v31 = vpop.f32.mrf.mxu1 }
 0x3b8   : > { %v5006_v37 = vmax.f32 %v4125_v28, %v4870_v31 }
 0x3b9   : > { %v10426_v39 = vmax.f32 %v5848_v26, %v6554_v23 }
 0x3bb   : > { %11348 = vst [vmem:[#allocation33_spill] sm:$0xff] %v10426_v39 }
 0x3be   : > { %v5713_v49 = vpop.f32.mrf.mxu2  ;;  %v6556_v55 = vpop.f32.mrf.mxu3 }
 0x3bf   : > { %v5849_v1 = vmax.f32 %v5006_v37, %v5713_v49  ;;  %v4128_v60 = vpop.f32.mrf.mxu0  ;;  %v4873_v8 = vpop.f32.mrf.mxu1 }
 0x3c0   : > { %v5007_v25 = vmax.f32 %v4128_v60, %v4873_v8 }
 0x3c1   : > { %v10432_v40 = vmax.f32 %v5849_v1, %v6556_v55  ;;  %v9149_v1 = vld [vmem:[%s9920_s8 + $0x170] sm:$0xff] }
 0x3c2   : > { %8065 = vmatmul.msk.bf16.gmra.mxu0 %vm3786_vm0, %v9148_v4  ;;  %8408 = vmatmul.msk.bf16.gmra.mxu1 %vm3786_vm0, %v9200_v57  ;;  %v9201_v4 = vld [vmem:[%s9920_s8 + $0x2f8] sm:$0xff] }
 0x3c3   : > { %11349 = vst [vmem:[#allocation34_spill] sm:$0xff] %v10432_v40  ;;  %8751 = vmatmul.msk.bf16.gmra.mxu2 %vm3786_vm0, %v9249_v11  ;;  %9094 = vmatmul.msk.bf16.gmra.mxu3 %vm3786_vm0, %v9298_v46  ;;  %v9250_v11 = vld [vmem:[%s9920_s8 + $0x480] sm:$0xff]  ;;  %v9299_v40 = vld [vmem:[%s9920_s8 + $0x608] sm:$0xff] }
 0x3c6   : > { %v5716_v12 = vpop.f32.mrf.mxu2  ;;  %v6559_v15 = vpop.f32.mrf.mxu3 }
 0x3c7   : > { %v5850_v23 = vmax.f32 %v5007_v25, %v5716_v12  ;;  %v4130_v26 = vpop.f32.mrf.mxu0  ;;  %v4875_v28 = vpop.f32.mrf.mxu1 }
 0x3c8   : > { %v5008_v31 = vmax.f32 %v4130_v26, %v4875_v28 }
 0x3c9   : > { %v10438_v37 = vmax.f32 %v5850_v23, %v6559_v15 }
 0x3cb   : > { %11350 = vst [vmem:[#allocation35_spill] sm:$0xff] %v10438_v37 }
 0x3ce   : > { %v5718_v49 = vpop.f32.mrf.mxu2  ;;  %v6561_v55 = vpop.f32.mrf.mxu3 }
 0x3cf   : > { %v5851_v60 = vmax.f32 %v5008_v31, %v5718_v49  ;;  %v4133_v57 = vpop.f32.mrf.mxu0  ;;  %v4878_v8 = vpop.f32.mrf.mxu1 }
 0x3d0   : > { %v5009_v46 = vmax.f32 %v4133_v57, %v4878_v8 }
 0x3d1   : > { %v10444_v39 = vmax.f32 %v5851_v60, %v6561_v55  ;;  %v9150_v60 = vld [vmem:[%s9920_s8 + $0x178] sm:$0xff] }
 0x3d2   : > { %8066 = vmatmul.msk.bf16.gmra.mxu0 %vm3786_vm0, %v9149_v1  ;;  %8409 = vmatmul.msk.bf16.gmra.mxu1 %vm3786_vm0, %v9201_v4  ;;  %v9202_v1 = vld [vmem:[%s9920_s8 + $0x300] sm:$0xff] }
 0x3d3   : > { %11351 = vst [vmem:[#allocation36_spill] sm:$0xff] %v10444_v39  ;;  %8752 = vmatmul.msk.bf16.gmra.mxu2 %vm3786_vm0, %v9250_v11  ;;  %9095 = vmatmul.msk.bf16.gmra.mxu3 %vm3786_vm0, %v9299_v40  ;;  %v9251_v11 = vld [vmem:[%s9920_s8 + $0x488] sm:$0xff]  ;;  %v9300_v39 = vld [vmem:[%s9920_s8 + $0x610] sm:$0xff] }
 0x3d6   : > { %v5721_v25 = vpop.f32.mrf.mxu2  ;;  %v6564_v12 = vpop.f32.mrf.mxu3 }
 0x3d7   : > { %v5852_v15 = vmax.f32 %v5009_v46, %v5721_v25  ;;  %v4135_v23 = vpop.f32.mrf.mxu0  ;;  %v4880_v26 = vpop.f32.mrf.mxu1 }
 0x3d8   : > { %v5010_v28 = vmax.f32 %v4135_v23, %v4880_v26 }
 0x3d9   : > { %v10450_v31 = vmax.f32 %v5852_v15, %v6564_v12 }
 0x3db   : > { %11352 = vst [vmem:[#allocation37_spill] sm:$0xff] %v10450_v31 }
 0x3de   : > { %v5723_v49 = vpop.f32.mrf.mxu2  ;;  %v6566_v55 = vpop.f32.mrf.mxu3 }
 0x3df   : > { %v5853_v57 = vmax.f32 %v5010_v28, %v5723_v49  ;;  %v4138_v4 = vpop.f32.mrf.mxu0  ;;  %v4883_v8 = vpop.f32.mrf.mxu1 }
 0x3e0   : > { %v5011_v40 = vmax.f32 %v4138_v4, %v4883_v8 }
 0x3e1   : > { %v10456_v37 = vmax.f32 %v5853_v57, %v6566_v55  ;;  %v9151_v57 = vld [vmem:[%s9920_s8 + $0x180] sm:$0xff] }
 0x3e2   : > { %8067 = vmatmul.msk.bf16.gmra.mxu0 %vm3786_vm0, %v9150_v60  ;;  %8410 = vmatmul.msk.bf16.gmra.mxu1 %vm3786_vm0, %v9202_v1  ;;  %v9203_v60 = vld [vmem:[%s9920_s8 + $0x308] sm:$0xff] }
 0x3e3   : > { %11353 = vst [vmem:[#allocation38_spill] sm:$0xff] %v10456_v37  ;;  %8753 = vmatmul.msk.bf16.gmra.mxu2 %vm3786_vm0, %v9251_v11  ;;  %9096 = vmatmul.msk.bf16.gmra.mxu3 %vm3786_vm0, %v9300_v39  ;;  %v9252_v11 = vld [vmem:[%s9920_s8 + $0x490] sm:$0xff]  ;;  %v9301_v37 = vld [vmem:[%s9920_s8 + $0x618] sm:$0xff] }
 0x3e6   : > { %v5726_v46 = vpop.f32.mrf.mxu2  ;;  %v6569_v25 = vpop.f32.mrf.mxu3 }
 0x3e7   : > { %v5854_v12 = vmax.f32 %v5011_v40, %v5726_v46  ;;  %v4140_v15 = vpop.f32.mrf.mxu0  ;;  %v4885_v23 = vpop.f32.mrf.mxu1 }
 0x3e8   : > { %v5012_v26 = vmax.f32 %v4140_v15, %v4885_v23 }
 0x3e9   : > { %v10462_v28 = vmax.f32 %v5854_v12, %v6569_v25 }
 0x3eb   : > { %11354 = vst [vmem:[#allocation39_spill] sm:$0xff] %v10462_v28 }
 0x3ee   : > { %v5728_v49 = vpop.f32.mrf.mxu2  ;;  %v6571_v55 = vpop.f32.mrf.mxu3 }
 0x3ef   : > { %v5855_v4 = vmax.f32 %v5012_v26, %v5728_v49  ;;  %v4143_v1 = vpop.f32.mrf.mxu0  ;;  %v4888_v8 = vpop.f32.mrf.mxu1 }
 0x3f0   : > { %v5013_v31 = vmax.f32 %v4143_v1, %v4888_v8 }
 0x3f1   : > { %v10468_v39 = vmax.f32 %v5855_v4, %v6571_v55 }
 0x3f2   : > { %8068 = vmatmul.msk.bf16.gmra.mxu0 %vm3786_vm0, %v9151_v57  ;;  %8411 = vmatmul.msk.bf16.gmra.mxu1 %vm3786_vm0, %v9203_v60 }
 0x3f3   : > { %11355 = vst [vmem:[#allocation40_spill] sm:$0xff] %v10468_v39  ;;  %8754 = vmatmul.msk.bf16.gmra.mxu2 %vm3786_vm0, %v9252_v11  ;;  %9097 = vmatmul.msk.bf16.gmra.mxu3 %vm3786_vm0, %v9301_v37 }
 0x3f6   : > { %v5731_v40 = vpop.f32.mrf.mxu2  ;;  %v6574_v46 = vpop.f32.mrf.mxu3 }
 0x3f7   : > { %v5856_v25 = vmax.f32 %v5013_v31, %v5731_v40  ;;  %v4145_v12 = vpop.f32.mrf.mxu0  ;;  %v4890_v15 = vpop.f32.mrf.mxu1 }
 0x3f8   : > { %v5014_v23 = vmax.f32 %v4145_v12, %v4890_v15 }
 0x3f9   : > { %v10474_v26 = vmax.f32 %v5856_v25, %v6574_v46 }
 0x3fb   : > { %11356 = vst [vmem:[#allocation41_spill] sm:$0xff] %v10474_v26 }
 0x3fe   : > { %v5733_v49 = vpop.f32.mrf.mxu2  ;;  %v6576_v1 = vpop.f32.mrf.mxu3 }
 0x3ff   : > { %v5857_v55 = vmax.f32 %v5014_v23, %v5733_v49  ;;  %v4148_v4 = vpop.f32.mrf.mxu0  ;;  %v4893_v8 = vpop.f32.mrf.mxu1 }
 0x400   : > { %v5015_v57 = vmax.f32 %v4148_v4, %v4893_v8 }
 0x401   : > { %v10476_v39 = vmax.f32 %v5857_v55, %v6576_v1 }
 0x403   : > { %11357 = vst [vmem:[#allocation42_spill] sm:$0xff] %v10476_v39 }
 0x406   : > { %v5736_v60 = vpop.f32.mrf.mxu2  ;;  %v6579_v11 = vpop.f32.mrf.mxu3 }
 0x407   : > { %v5858_v28 = vmax.f32 %v5015_v57, %v5736_v60  ;;  %v4150_v37 = vpop.f32.mrf.mxu0  ;;  %v4895_v51 = vpop.f32.mrf.mxu1 }
 0x408   : > { %v5016_v29 = vmax.f32 %v4150_v37, %v4895_v51 }
 0x409   : > { %v10478_v31 = vmax.f32 %v5858_v28, %v6579_v11 }
 0x40b   : > { %11358 = vst [vmem:[#allocation43_spill] sm:$0xff] %v10478_v31 }
 0x40e   : > { %v5738_v40 = vpop.f32.mrf.mxu2  ;;  %v6581_v12 = vpop.f32.mrf.mxu3 }
 0x40f   : > { %v5859_v46 = vmax.f32 %v5016_v29, %v5738_v40  ;;  %v4153_v25 = vpop.f32.mrf.mxu0  ;;  %v4898_v15 = vpop.f32.mrf.mxu1 }
 0x410   : > { %v5017_v26 = vmax.f32 %v4153_v25, %v4898_v15 }
 0x411   : > { %v10480_v23 = vmax.f32 %v5859_v46, %v6581_v12 }
 0x413   : > { %11359 = vst [vmem:[#allocation44_spill] sm:$0xff] %v10480_v23 }
 0x416   : > { %v5741_v49 = vpop.f32.mrf.mxu2  ;;  %v6584_v4 = vpop.f32.mrf.mxu3 }
 0x417   : > { %v5860_v1 = vmax.f32 %v5017_v26, %v5741_v49  ;;  %v4155_v55 = vpop.f32.mrf.mxu0  ;;  %v4900_v8 = vpop.f32.mrf.mxu1 }
 0x418   : > { %v5018_v39 = vmax.f32 %v4155_v55, %v4900_v8 }
 0x419   : > { %v10482_v57 = vmax.f32 %v5860_v1, %v6584_v4 }
 0x41b   : > { %11360 = vst [vmem:[#allocation45_spill] sm:$0xff] %v10482_v57 }
 0x41e   : > { %v5743_v60 = vpop.f32.mrf.mxu2  ;;  %v6586_v51 = vpop.f32.mrf.mxu3 }
 0x41f   : > { %v5861_v28 = vmax.f32 %v5018_v39, %v5743_v60  ;;  %v4158_v11 = vpop.f32.mrf.mxu0  ;;  %v4903_v37 = vpop.f32.mrf.mxu1 }
 0x420   : > { %v5019_v31 = vmax.f32 %v4158_v11, %v4903_v37 }
 0x421   : > { %v10484_v29 = vmax.f32 %v5861_v28, %v6586_v51 }
 0x423   : > { %11361 = vst [vmem:[#allocation46_spill] sm:$0xff] %v10484_v29 }
 0x426   : > { %v5746_v40 = vpop.f32.mrf.mxu2  ;;  %v6589_v25 = vpop.f32.mrf.mxu3 }
 0x427   : > { %v5862_v12 = vmax.f32 %v5019_v31, %v5746_v40  ;;  %v4160_v46 = vpop.f32.mrf.mxu0  ;;  %v4905_v15 = vpop.f32.mrf.mxu1 }
 0x428   : > { %v5020_v23 = vmax.f32 %v4160_v46, %v4905_v15 }
 0x429   : > { %v10486_v26 = vmax.f32 %v5862_v12, %v6589_v25 }
 0x42b   : > { %11362 = vst [vmem:[#allocation47_spill] sm:$0xff] %v10486_v26 }
 0x42e   : > { %v5748_v49 = vpop.f32.mrf.mxu2  ;;  %v6591_v55 = vpop.f32.mrf.mxu3 }
 0x42f   : > { %v5863_v4 = vmax.f32 %v5020_v23, %v5748_v49  ;;  %v4163_v1 = vpop.f32.mrf.mxu0  ;;  %v4908_v8 = vpop.f32.mrf.mxu1 }
 0x430   : > { %v5021_v57 = vmax.f32 %v4163_v1, %v4908_v8 }
 0x431   : > { %v10488_v39 = vmax.f32 %v5863_v4, %v6591_v55 }
 0x433   : > { %11363 = vst [vmem:[#allocation48_spill] sm:$0xff] %v10488_v39 }
 0x436   : > { %v5751_v60 = vpop.f32.mrf.mxu2  ;;  %v6594_v11 = vpop.f32.mrf.mxu3 }
 0x437   : > { %v5864_v51 = vmax.f32 %v5021_v57, %v5751_v60  ;;  %v4165_v28 = vpop.f32.mrf.mxu0  ;;  %v4910_v37 = vpop.f32.mrf.mxu1 }
 0x438   : > { %v5022_v29 = vmax.f32 %v4165_v28, %v4910_v37 }
 0x439   : > { %v10490_v31 = vmax.f32 %v5864_v51, %v6594_v11 }
 0x43b   : > { %11364 = vst [vmem:[#allocation49_spill] sm:$0xff] %v10490_v31 }
 0x43e   : > { %v5753_v40 = vpop.f32.mrf.mxu2  ;;  %v6596_v46 = vpop.f32.mrf.mxu3 }
 0x43f   : > { %v5865_v25 = vmax.f32 %v5022_v29, %v5753_v40  ;;  %v4168_v12 = vpop.f32.mrf.mxu0  ;;  %v4913_v15 = vpop.f32.mrf.mxu1 }
 0x440   : > { %v5023_v23 = vmax.f32 %v4168_v12, %v4913_v15 }
 0x441   : > { %v10492_v26 = vmax.f32 %v5865_v25, %v6596_v46 }
 0x443   : > { %11365 = vst [vmem:[#allocation50_spill] sm:$0xff] %v10492_v26 }
 0x446   : > { %v5756_v49 = vpop.f32.mrf.mxu2  ;;  %v6599_v1 = vpop.f32.mrf.mxu3 }
 0x447   : > { %v5866_v55 = vmax.f32 %v5023_v23, %v5756_v49  ;;  %v4170_v4 = vpop.f32.mrf.mxu0  ;;  %v4915_v8 = vpop.f32.mrf.mxu1 }
 0x448   : > { %v5024_v57 = vmax.f32 %v4170_v4, %v4915_v8 }
 0x449   : > { %v10494_v39 = vmax.f32 %v5866_v55, %v6599_v1 }
 0x44b   : > { %11366 = vst [vmem:[#allocation51_spill] sm:$0xff] %v10494_v39 }
 0x44e   : > { %v5758_v60 = vpop.f32.mrf.mxu2  ;;  %v6601_v28 = vpop.f32.mrf.mxu3 }
 0x44f   : > { %v5867_v11 = vmax.f32 %v5024_v57, %v5758_v60  ;;  %v4173_v51 = vpop.f32.mrf.mxu0  ;;  %v4918_v37 = vpop.f32.mrf.mxu1 }
 0x450   : > { %v5025_v29 = vmax.f32 %v4173_v51, %v4918_v37 }
 0x451   : > { %v10496_v31 = vmax.f32 %v5867_v11, %v6601_v28 }
 0x453   : > { %11367 = vst [vmem:[#allocation52_spill] sm:$0xff] %v10496_v31 }
 0x456   : > { %v5761_v40 = vpop.f32.mrf.mxu2  ;;  %v6604_v46 = vpop.f32.mrf.mxu3 }
 0x457   : > { %v5868_v25 = vmax.f32 %v5025_v29, %v5761_v40  ;;  %v4175_v12 = vpop.f32.mrf.mxu0  ;;  %v4920_v15 = vpop.f32.mrf.mxu1 }
 0x458   : > { %v5026_v23 = vmax.f32 %v4175_v12, %v4920_v15 }
 0x459   : > { %v10498_v26 = vmax.f32 %v5868_v25, %v6604_v46 }
 0x45b   : > { %11368 = vst [vmem:[#allocation53_spill] sm:$0xff] %v10498_v26 }
 0x45e   : > { %v5763_v49 = vpop.f32.mrf.mxu2  ;;  %v6606_v1 = vpop.f32.mrf.mxu3 }
 0x45f   : > { %v5869_v55 = vmax.f32 %v5026_v23, %v5763_v49  ;;  %v4178_v4 = vpop.f32.mrf.mxu0  ;;  %v4923_v8 = vpop.f32.mrf.mxu1 }
 0x460   : > { %v5027_v57 = vmax.f32 %v4178_v4, %v4923_v8 }
 0x461   : > { %v10500_v39 = vmax.f32 %v5869_v55, %v6606_v1 }
 0x463   : > { %11369 = vst [vmem:[#allocation54_spill] sm:$0xff] %v10500_v39 }
 0x466   : > { %v5766_v60 = vpop.f32.mrf.mxu2  ;;  %v6609_v28 = vpop.f32.mrf.mxu3 }
 0x467   : > { %v5870_v11 = vmax.f32 %v5027_v57, %v5766_v60  ;;  %v4180_v51 = vpop.f32.mrf.mxu0  ;;  %v4925_v37 = vpop.f32.mrf.mxu1 }
 0x468   : > { %v5028_v29 = vmax.f32 %v4180_v51, %v4925_v37 }
 0x469   : > { %v10502_v31 = vmax.f32 %v5870_v11, %v6609_v28 }
 0x46e   : > { %v5768_v40 = vpop.f32.mrf.mxu2  ;;  %v6611_v46 = vpop.f32.mrf.mxu3 }
 0x46f   : > { %v5871_v25 = vmax.f32 %v5028_v29, %v5768_v40  ;;  %v4183_v12 = vpop.f32.mrf.mxu0  ;;  %v4928_v15 = vpop.f32.mrf.mxu1 }
 0x470   : > { %v5029_v23 = vmax.f32 %v4183_v12, %v4928_v15 }
 0x471   : > { %v10504_v26 = vmax.f32 %v5871_v25, %v6611_v46 }
 0x476   : > { %v5771_v49 = vpop.f32.mrf.mxu2  ;;  %v6614_v1 = vpop.f32.mrf.mxu3 }
 0x477   : > { %v5872_v55 = vmax.f32 %v5029_v23, %v5771_v49  ;;  %v4185_v8 = vpop.f32.mrf.mxu0  ;;  %v4930_v57 = vpop.f32.mrf.mxu1 }
 0x478   : > { %v5030_v60 = vmax.f32 %v4185_v8, %v4930_v57 }
 0x479   : > { %v10506_v4 = vmax.f32 %v5872_v55, %v6614_v1 }
 0x47d   : > { %6720 = sbr.rel (%p9098_p11) target bundleno = 1253 (0x4e5), region = 92 }
 0x47e   : > { %v5773_v39 = vpop.f32.mrf.mxu2  ;;  %v6616_v11 = vpop.f32.mrf.mxu3 }
 0x47f   : > { %v5873_v28 = vmax.f32 %v5030_v60, %v5773_v39 }
 0x481   : > { %v10508_v51 = vmax.f32 %v5873_v28, %v6616_v11 }
 0x482   : > { %vm6721_vm1 = vcmask 523264   ;;  %v11370_v39 = vld [vmem:[#allocation4_spill] sm:$0xff]  ;;  %v11371_v37 = vld [vmem:[#allocation5_spill] sm:$0xff]  ;;  %v11372_v29 = vld [vmem:[#allocation6_spill] sm:$0xff] }
 0x483   : > { %6722 = vst.msk [vmem:[#allocation2] sm:$0xff] %vm6721_vm1, %v9994_v52  ;;  %v11373_v40 = vld [vmem:[#allocation7_spill] sm:$0xff]  ;;  %v11374_v46 = vld [vmem:[#allocation8_spill] sm:$0xff]  ;;  %v11375_v25 = vld [vmem:[#allocation9_spill] sm:$0xff] }
 0x484   : > { %6723 = vst.msk [vmem:[#allocation2 + $0x8] sm:$0xff] %vm6721_vm1, %v10000_v63  ;;  %v11376_v12 = vld [vmem:[#allocation10_spill] sm:$0xff]  ;;  %v11377_v15 = vld [vmem:[#allocation11_spill] sm:$0xff]  ;;  %v11378_v23 = vld [vmem:[#allocation12_spill] sm:$0xff] }
 0x485   : > { %6724 = vst.msk [vmem:[#allocation2 + $0x10] sm:$0xff] %vm6721_vm1, %v10006_v6  ;;  %v11379_v49 = vld [vmem:[#allocation13_spill] sm:$0xff]  ;;  %v11380_v1 = vld [vmem:[#allocation14_spill] sm:$0xff]  ;;  %v11381_v55 = vld [vmem:[#allocation15_spill] sm:$0xff] }
 0x486   : > { %6725 = vst.msk [vmem:[#allocation2 + $0x18] sm:$0xff] %vm6721_vm1, %v10012_v17  ;;  %v11382_v8 = vld [vmem:[#allocation16_spill] sm:$0xff]  ;;  %v11383_v57 = vld [vmem:[#allocation17_spill] sm:$0xff]  ;;  %v11384_v60 = vld [vmem:[#allocation18_spill] sm:$0xff] }
 0x487   : > { %6726 = vst.msk [vmem:[#allocation2 + $0x20] sm:$0xff] %vm6721_vm1, %v10018_v24  ;;  %v11385_v28 = vld [vmem:[#allocation19_spill] sm:$0xff]  ;;  %v11386_v11 = vld [vmem:[#allocation20_spill] sm:$0xff] }
 0x488   : > { %6727 = vst.msk [vmem:[#allocation2 + $0x28] sm:$0xff] %vm6721_vm1, %v10024_v35 }
 0x489   : > { %6728 = vst.msk [vmem:[#allocation2 + $0x30] sm:$0xff] %vm6721_vm1, %v10030_v42 }
 0x48a   : > { %6729 = vst.msk [vmem:[#allocation2 + $0x38] sm:$0xff] %vm6721_vm1, %v10036_v54 }
 0x48b   : > { %6730 = vst.msk [vmem:[#allocation2 + $0x40] sm:$0xff] %vm6721_vm1, %v10042_v61 }
 0x48c   : > { %6731 = vst.msk [vmem:[#allocation2 + $0x48] sm:$0xff] %vm6721_vm1, %v10048_v10 }
 0x48d   : > { %6732 = vst.msk [vmem:[#allocation2 + $0x50] sm:$0xff] %vm6721_vm1, %v10054_v18 }
 0x48e   : > { %6733 = vst.msk [vmem:[#allocation2 + $0x58] sm:$0xff] %vm6721_vm1, %v10060_v30 }
 0x48f   : > { %6734 = vst.msk [vmem:[#allocation2 + $0x60] sm:$0xff] %vm6721_vm1, %v10066_v38 }
 0x490   : > { %6735 = vst.msk [vmem:[#allocation2 + $0x68] sm:$0xff] %vm6721_vm1, %v10072_v50 }
 0x491   : > { %6736 = vst.msk [vmem:[#allocation2 + $0x70] sm:$0xff] %vm6721_vm1, %v10078_v59 }
 0x492   : > { %6737 = vst.msk [vmem:[#allocation2 + $0x78] sm:$0xff] %vm6721_vm1, %v10084_v9 }
 0x493   : > { %6738 = vst.msk [vmem:[#allocation2 + $0x80] sm:$0xff] %vm6721_vm1, %v10090_v19 }
 0x494   : > { %6739 = vst.msk [vmem:[#allocation2 + $0x88] sm:$0xff] %vm6721_vm1, %v10096_v32 }
 0x495   : > { %6740 = vst.msk [vmem:[#allocation2 + $0x90] sm:$0xff] %vm6721_vm1, %v10102_v41 }
 0x496   : > { %6741 = vst.msk [vmem:[#allocation2 + $0x98] sm:$0xff] %vm6721_vm1, %v10108_v56 }
 0x497   : > { %6742 = vst.msk [vmem:[#allocation2 + $0xa0] sm:$0xff] %vm6721_vm1, %v10114_v2 }
 0x498   : > { %6743 = vst.msk [vmem:[#allocation2 + $0xa8] sm:$0xff] %vm6721_vm1, %v10120_v16 }
 0x499   : > { %6744 = vst.msk [vmem:[#allocation2 + $0xb0] sm:$0xff] %vm6721_vm1, %v10126_v27 }
 0x49a   : > { %6745 = vst.msk [vmem:[#allocation2 + $0xb8] sm:$0xff] %vm6721_vm1, %v10132_v44 }
 0x49b   : > { %6746 = vst.msk [vmem:[#allocation2 + $0xc0] sm:$0xff] %vm6721_vm1, %v10138_v53 }
 0x49c   : > { %6747 = vst.msk [vmem:[#allocation2 + $0xc8] sm:$0xff] %vm6721_vm1, %v10144_v7 }
 0x49d   : > { %6748 = vst.msk [vmem:[#allocation2 + $0xd0] sm:$0xff] %vm6721_vm1, %v10150_v20 }
 0x49e   : > { %6749 = vst.msk [vmem:[#allocation2 + $0xd8] sm:$0xff] %vm6721_vm1, %v10156_v36 }
 0x49f   : > { %6750 = vst.msk [vmem:[#allocation2 + $0xe0] sm:$0xff] %vm6721_vm1, %v10162_v47 }
 0x4a0   : > { %6751 = vst.msk [vmem:[#allocation2 + $0xe8] sm:$0xff] %vm6721_vm1, %v10168_v3 }
 0x4a1   : > { %6752 = vst.msk [vmem:[#allocation2 + $0xf0] sm:$0xff] %vm6721_vm1, %v10174_v14 }
 0x4a2   : > { %6753 = vst.msk [vmem:[#allocation2 + $0xf8] sm:$0xff] %vm6721_vm1, %v10180_v34 }
 0x4a3   : > { %6754 = vst.msk [vmem:[#allocation2 + $0x100] sm:$0xff] %vm6721_vm1, %v10186_v48 }
 0x4a4   : > { %6755 = vst.msk [vmem:[#allocation2 + $0x108] sm:$0xff] %vm6721_vm1, %v10192_v5 }
 0x4a5   : > { %6756 = vst.msk [vmem:[#allocation2 + $0x110] sm:$0xff] %vm6721_vm1, %v10198_v22 }
 0x4a6   : > { %6757 = vst.msk [vmem:[#allocation2 + $0x118] sm:$0xff] %vm6721_vm1, %v10204_v43 }
 0x4a7   : > { %6758 = vst.msk [vmem:[#allocation2 + $0x120] sm:$0xff] %vm6721_vm1, %v10210_v58 }
 0x4a8   : > { %6759 = vst.msk [vmem:[#allocation2 + $0x128] sm:$0xff] %vm6721_vm1, %v10216_v21 }
 0x4a9   : > { %6760 = vst.msk [vmem:[#allocation2 + $0x130] sm:$0xff] %vm6721_vm1, %v10222_v33 }
 0x4aa   : > { %6761 = vst.msk [vmem:[#allocation2 + $0x138] sm:$0xff] %vm6721_vm1, %v10228_v62 }
 0x4ab   : > { %6762 = vst.msk [vmem:[#allocation2 + $0x140] sm:$0xff] %vm6721_vm1, %v10234_v13 }
 0x4ac   : > { %6763 = vst.msk [vmem:[#allocation2 + $0x148] sm:$0xff] %vm6721_vm1, %v10240_v45 }
 0x4ad   : > { %6764 = vst.msk [vmem:[#allocation2 + $0x150] sm:$0xff] %vm6721_vm1, %v10246_v0 }
 0x4ae   : > { %6765 = vst.msk [vmem:[#allocation2 + $0x158] sm:$0xff] %vm6721_vm1, %v11370_v39  ;;  %v11387_v39 = vld [vmem:[#allocation21_spill] sm:$0xff] }
 0x4af   : > { %6766 = vst.msk [vmem:[#allocation2 + $0x160] sm:$0xff] %vm6721_vm1, %v11371_v37  ;;  %v11388_v37 = vld [vmem:[#allocation22_spill] sm:$0xff] }
 0x4b0   : > { %6767 = vst.msk [vmem:[#allocation2 + $0x168] sm:$0xff] %vm6721_vm1, %v11372_v29  ;;  %v11389_v29 = vld [vmem:[#allocation23_spill] sm:$0xff] }
 0x4b1   : > { %6768 = vst.msk [vmem:[#allocation2 + $0x170] sm:$0xff] %vm6721_vm1, %v11373_v40  ;;  %v11390_v40 = vld [vmem:[#allocation24_spill] sm:$0xff] }
 0x4b2   : > { %6769 = vst.msk [vmem:[#allocation2 + $0x178] sm:$0xff] %vm6721_vm1, %v11374_v46  ;;  %v11391_v46 = vld [vmem:[#allocation25_spill] sm:$0xff] }
 0x4b3   : > { %6770 = vst.msk [vmem:[#allocation2 + $0x180] sm:$0xff] %vm6721_vm1, %v11375_v25  ;;  %v11392_v25 = vld [vmem:[#allocation26_spill] sm:$0xff] }
 0x4b4   : > { %6771 = vst.msk [vmem:[#allocation2 + $0x188] sm:$0xff] %vm6721_vm1, %v11376_v12  ;;  %v11393_v12 = vld [vmem:[#allocation27_spill] sm:$0xff] }
 0x4b5   : > { %6772 = vst.msk [vmem:[#allocation2 + $0x190] sm:$0xff] %vm6721_vm1, %v11377_v15  ;;  %v11394_v15 = vld [vmem:[#allocation28_spill] sm:$0xff] }
 0x4b6   : > { %6773 = vst.msk [vmem:[#allocation2 + $0x198] sm:$0xff] %vm6721_vm1, %v11378_v23  ;;  %v11395_v23 = vld [vmem:[#allocation29_spill] sm:$0xff] }
 0x4b7   : > { %6774 = vst.msk [vmem:[#allocation2 + $0x1a0] sm:$0xff] %vm6721_vm1, %v11379_v49  ;;  %v11396_v49 = vld [vmem:[#allocation30_spill] sm:$0xff] }
 0x4b8   : > { %6775 = vst.msk [vmem:[#allocation2 + $0x1a8] sm:$0xff] %vm6721_vm1, %v11380_v1  ;;  %v11397_v1 = vld [vmem:[#allocation31_spill] sm:$0xff] }
 0x4b9   : > { %6776 = vst.msk [vmem:[#allocation2 + $0x1b0] sm:$0xff] %vm6721_vm1, %v11381_v55  ;;  %v11398_v55 = vld [vmem:[#allocation32_spill] sm:$0xff] }
 0x4ba   : > { %6777 = vst.msk [vmem:[#allocation2 + $0x1b8] sm:$0xff] %vm6721_vm1, %v11382_v8  ;;  %v11399_v8 = vld [vmem:[#allocation33_spill] sm:$0xff] }
 0x4bb   : > { %6778 = vst.msk [vmem:[#allocation2 + $0x1c0] sm:$0xff] %vm6721_vm1, %v11383_v57  ;;  %v11400_v57 = vld [vmem:[#allocation34_spill] sm:$0xff] }
 0x4bc   : > { %6779 = vst.msk [vmem:[#allocation2 + $0x1c8] sm:$0xff] %vm6721_vm1, %v11384_v60  ;;  %v11401_v60 = vld [vmem:[#allocation35_spill] sm:$0xff] }
 0x4bd   : > { %6780 = vst.msk [vmem:[#allocation2 + $0x1d0] sm:$0xff] %vm6721_vm1, %v11385_v28  ;;  %v11402_v28 = vld [vmem:[#allocation36_spill] sm:$0xff] }
 0x4be   : > { %6781 = vst.msk [vmem:[#allocation2 + $0x1d8] sm:$0xff] %vm6721_vm1, %v11386_v11  ;;  %v11403_v11 = vld [vmem:[#allocation37_spill] sm:$0xff] }
 0x4bf   : > { %6782 = vst.msk [vmem:[#allocation2 + $0x1e0] sm:$0xff] %vm6721_vm1, %v11387_v39  ;;  %v11404_v39 = vld [vmem:[#allocation38_spill] sm:$0xff] }
 0x4c0   : > { %6783 = vst.msk [vmem:[#allocation2 + $0x1e8] sm:$0xff] %vm6721_vm1, %v11388_v37  ;;  %v11405_v37 = vld [vmem:[#allocation39_spill] sm:$0xff] }
 0x4c1   : > { %6784 = vst.msk [vmem:[#allocation2 + $0x1f0] sm:$0xff] %vm6721_vm1, %v11389_v29  ;;  %v11406_v29 = vld [vmem:[#allocation40_spill] sm:$0xff] }
 0x4c2   : > { %6785 = vst.msk [vmem:[#allocation2 + $0x1f8] sm:$0xff] %vm6721_vm1, %v11390_v40  ;;  %v11407_v40 = vld [vmem:[#allocation41_spill] sm:$0xff] }
 0x4c3   : > { %6786 = vst.msk [vmem:[#allocation2 + $0x200] sm:$0xff] %vm6721_vm1, %v11391_v46  ;;  %v11408_v46 = vld [vmem:[#allocation42_spill] sm:$0xff] }
 0x4c4   : > { %6787 = vst.msk [vmem:[#allocation2 + $0x208] sm:$0xff] %vm6721_vm1, %v11392_v25  ;;  %v11409_v25 = vld [vmem:[#allocation43_spill] sm:$0xff] }
 0x4c5   : > { %6788 = vst.msk [vmem:[#allocation2 + $0x210] sm:$0xff] %vm6721_vm1, %v11393_v12  ;;  %v11410_v12 = vld [vmem:[#allocation44_spill] sm:$0xff] }
 0x4c6   : > { %6789 = vst.msk [vmem:[#allocation2 + $0x218] sm:$0xff] %vm6721_vm1, %v11394_v15  ;;  %v11411_v15 = vld [vmem:[#allocation45_spill] sm:$0xff] }
 0x4c7   : > { %6790 = vst.msk [vmem:[#allocation2 + $0x220] sm:$0xff] %vm6721_vm1, %v11395_v23  ;;  %v11412_v23 = vld [vmem:[#allocation46_spill] sm:$0xff] }
 0x4c8   : > { %6791 = vst.msk [vmem:[#allocation2 + $0x228] sm:$0xff] %vm6721_vm1, %v11396_v49  ;;  %v11413_v49 = vld [vmem:[#allocation47_spill] sm:$0xff] }
 0x4c9   : > { %6792 = vst.msk [vmem:[#allocation2 + $0x230] sm:$0xff] %vm6721_vm1, %v11397_v1  ;;  %v11414_v1 = vld [vmem:[#allocation48_spill] sm:$0xff] }
 0x4ca   : > { %6793 = vst.msk [vmem:[#allocation2 + $0x238] sm:$0xff] %vm6721_vm1, %v11398_v55  ;;  %v11415_v55 = vld [vmem:[#allocation49_spill] sm:$0xff] }
 0x4cb   : > { %6794 = vst.msk [vmem:[#allocation2 + $0x240] sm:$0xff] %vm6721_vm1, %v11399_v8  ;;  %v11416_v8 = vld [vmem:[#allocation50_spill] sm:$0xff] }
 0x4cc   : > { %6795 = vst.msk [vmem:[#allocation2 + $0x248] sm:$0xff] %vm6721_vm1, %v11400_v57  ;;  %v11417_v57 = vld [vmem:[#allocation51_spill] sm:$0xff] }
 0x4cd   : > { %6796 = vst.msk [vmem:[#allocation2 + $0x250] sm:$0xff] %vm6721_vm1, %v11401_v60  ;;  %v11418_v60 = vld [vmem:[#allocation52_spill] sm:$0xff] }
 0x4ce   : > { %6797 = vst.msk [vmem:[#allocation2 + $0x258] sm:$0xff] %vm6721_vm1, %v11402_v28  ;;  %v11419_v28 = vld [vmem:[#allocation53_spill] sm:$0xff] }
 0x4cf   : > { %6798 = vst.msk [vmem:[#allocation2 + $0x260] sm:$0xff] %vm6721_vm1, %v11403_v11  ;;  %v11420_v11 = vld [vmem:[#allocation54_spill] sm:$0xff] }
 0x4d0   : > { %6799 = vst.msk [vmem:[#allocation2 + $0x268] sm:$0xff] %vm6721_vm1, %v11404_v39 }
 0x4d1   : > { %6800 = vst.msk [vmem:[#allocation2 + $0x270] sm:$0xff] %vm6721_vm1, %v11405_v37 }
 0x4d2   : > { %6801 = vst.msk [vmem:[#allocation2 + $0x278] sm:$0xff] %vm6721_vm1, %v11406_v29 }
 0x4d3   : > { %6802 = vst.msk [vmem:[#allocation2 + $0x280] sm:$0xff] %vm6721_vm1, %v11407_v40 }
 0x4d4   : > { %6803 = vst.msk [vmem:[#allocation2 + $0x288] sm:$0xff] %vm6721_vm1, %v11408_v46 }
 0x4d5   : > { %6804 = vst.msk [vmem:[#allocation2 + $0x290] sm:$0xff] %vm6721_vm1, %v11409_v25 }
 0x4d6   : > { %6805 = vst.msk [vmem:[#allocation2 + $0x298] sm:$0xff] %vm6721_vm1, %v11410_v12 }
 0x4d7   : > { %6806 = vst.msk [vmem:[#allocation2 + $0x2a0] sm:$0xff] %vm6721_vm1, %v11411_v15 }
 0x4d8   : > { %6807 = vst.msk [vmem:[#allocation2 + $0x2a8] sm:$0xff] %vm6721_vm1, %v11412_v23 }
 0x4d9   : > { %6808 = vst.msk [vmem:[#allocation2 + $0x2b0] sm:$0xff] %vm6721_vm1, %v11413_v49 }
 0x4da   : > { %6809 = vst.msk [vmem:[#allocation2 + $0x2b8] sm:$0xff] %vm6721_vm1, %v11414_v1 }
 0x4db   : > { %6810 = vst.msk [vmem:[#allocation2 + $0x2c0] sm:$0xff] %vm6721_vm1, %v11415_v55 }
 0x4dc   : > { %6811 = vst.msk [vmem:[#allocation2 + $0x2c8] sm:$0xff] %vm6721_vm1, %v11416_v8 }
 0x4dd   : > { %6812 = vst.msk [vmem:[#allocation2 + $0x2d0] sm:$0xff] %vm6721_vm1, %v11417_v57 }
 0x4de   : > { %6813 = vst.msk [vmem:[#allocation2 + $0x2d8] sm:$0xff] %vm6721_vm1, %v11418_v60 }
 0x4df   : > { %6814 = vst.msk [vmem:[#allocation2 + $0x2e0] sm:$0xff] %vm6721_vm1, %v11419_v28 }
 0x4e0   : > { %6815 = vst.msk [vmem:[#allocation2 + $0x2e8] sm:$0xff] %vm6721_vm1, %v11420_v11 }
 0x4e1   : > { %6816 = vst.msk [vmem:[#allocation2 + $0x2f0] sm:$0xff] %vm6721_vm1, %v10502_v31 }
 0x4e2   : > { %6817 = vst.msk [vmem:[#allocation2 + $0x2f8] sm:$0xff] %vm6721_vm1, %v10504_v26 }
 0x4e3   : > { %6818 = vst.msk [vmem:[#allocation2 + $0x300] sm:$0xff] %vm6721_vm1, %v10506_v4 }
 0x4e4   : > { %6819 = vst.msk [vmem:[#allocation2 + $0x308] sm:$0xff] %vm6721_vm1, %v10508_v51 }
 0x4e5 PF: > { %p9099_p12 = scmp.le.s32.totalorder %s9403_s17, 0 }
 0x4e7   : > { %6823 = sbr.rel (%p9099_p12) target bundleno = 1361 (0x551), region = 96 }
 0x4ec   : > { %v6824_v39 = vld [vmem:[#allocation2] sm:$0xff]  ;;  %vm7020_vm2 = vcmask 523264   ;;  %v6825_v37 = vld [vmem:[#allocation2 + $0x8] sm:$0xff]  ;;  %v6826_v29 = vld [vmem:[#allocation2 + $0x10] sm:$0xff] }
 0x4ed   : > { %v6922_v40 = vmax.f32 %v6824_v39, %v9994_v52  ;;  %v6923_v46 = vmax.f32 %v6825_v37, %v10000_v63  ;;  %v6924_v25 = vmax.f32 %v6826_v29, %v10006_v6  ;;  %v6827_v12 = vld [vmem:[#allocation2 + $0x18] sm:$0xff]  ;;  %v6828_v15 = vld [vmem:[#allocation2 + $0x20] sm:$0xff]  ;;  %v6829_v23 = vld [vmem:[#allocation2 + $0x28] sm:$0xff] }
 0x4ee   : > { %v6925_v49 = vmax.f32 %v6827_v12, %v10012_v17  ;;  %v6830_v1 = vld [vmem:[#allocation2 + $0x30] sm:$0xff]  ;;  %v6926_v55 = vmax.f32 %v6828_v15, %v10018_v24  ;;  %v6831_v8 = vld [vmem:[#allocation2 + $0x38] sm:$0xff]  ;;  %v6927_v57 = vmax.f32 %v6829_v23, %v10024_v35  ;;  %v6832_v52 = vld [vmem:[#allocation2 + $0x40] sm:$0xff] }
 0x4ef   : > { %7021 = vst.msk [vmem:[#allocation2] sm:$0xff] %vm7020_vm2, %v6922_v40  ;;  %v6928_v63 = vmax.f32 %v6830_v1, %v10030_v42  ;;  %v6833_v6 = vld [vmem:[#allocation2 + $0x48] sm:$0xff]  ;;  %v6929_v17 = vmax.f32 %v6831_v8, %v10036_v54  ;;  %v6834_v60 = vld [vmem:[#allocation2 + $0x50] sm:$0xff]  ;;  %v6930_v24 = vmax.f32 %v6832_v52, %v10042_v61  ;;  %v6835_v28 = vld [vmem:[#allocation2 + $0x58] sm:$0xff] }
 0x4f0   : > { %7022 = vst.msk [vmem:[#allocation2 + $0x8] sm:$0xff] %vm7020_vm2, %v6923_v46  ;;  %v6931_v35 = vmax.f32 %v6833_v6, %v10048_v10  ;;  %v6836_v11 = vld [vmem:[#allocation2 + $0x60] sm:$0xff]  ;;  %v6932_v42 = vmax.f32 %v6834_v60, %v10054_v18  ;;  %v6837_v39 = vld [vmem:[#allocation2 + $0x68] sm:$0xff]  ;;  %v6933_v54 = vmax.f32 %v6835_v28, %v10060_v30  ;;  %v6838_v37 = vld [vmem:[#allocation2 + $0x70] sm:$0xff] }
 0x4f1   : > { %7023 = vst.msk [vmem:[#allocation2 + $0x10] sm:$0xff] %vm7020_vm2, %v6924_v25  ;;  %v6934_v61 = vmax.f32 %v6836_v11, %v10066_v38  ;;  %v6839_v29 = vld [vmem:[#allocation2 + $0x78] sm:$0xff]  ;;  %v6935_v10 = vmax.f32 %v6837_v39, %v10072_v50  ;;  %v6840_v40 = vld [vmem:[#allocation2 + $0x80] sm:$0xff]  ;;  %v6936_v18 = vmax.f32 %v6838_v37, %v10078_v59  ;;  %v6841_v46 = vld [vmem:[#allocation2 + $0x88] sm:$0xff] }
 0x4f2   : > { %7024 = vst.msk [vmem:[#allocation2 + $0x18] sm:$0xff] %vm7020_vm2, %v6925_v49  ;;  %v6937_v30 = vmax.f32 %v6839_v29, %v10084_v9  ;;  %v6842_v25 = vld [vmem:[#allocation2 + $0x90] sm:$0xff]  ;;  %v6938_v38 = vmax.f32 %v6840_v40, %v10090_v19  ;;  %v6843_v12 = vld [vmem:[#allocation2 + $0x98] sm:$0xff]  ;;  %v6939_v50 = vmax.f32 %v6841_v46, %v10096_v32  ;;  %v6844_v15 = vld [vmem:[#allocation2 + $0xa0] sm:$0xff] }
 0x4f3   : > { %7025 = vst.msk [vmem:[#allocation2 + $0x20] sm:$0xff] %vm7020_vm2, %v6926_v55  ;;  %v6940_v59 = vmax.f32 %v6842_v25, %v10102_v41  ;;  %v6845_v23 = vld [vmem:[#allocation2 + $0xa8] sm:$0xff]  ;;  %v6941_v9 = vmax.f32 %v6843_v12, %v10108_v56  ;;  %v6846_v49 = vld [vmem:[#allocation2 + $0xb0] sm:$0xff]  ;;  %v6942_v19 = vmax.f32 %v6844_v15, %v10114_v2  ;;  %v6847_v1 = vld [vmem:[#allocation2 + $0xb8] sm:$0xff] }
 0x4f4   : > { %7026 = vst.msk [vmem:[#allocation2 + $0x28] sm:$0xff] %vm7020_vm2, %v6927_v57  ;;  %v6943_v32 = vmax.f32 %v6845_v23, %v10120_v16  ;;  %v6848_v55 = vld [vmem:[#allocation2 + $0xc0] sm:$0xff]  ;;  %v6944_v41 = vmax.f32 %v6846_v49, %v10126_v27  ;;  %v6849_v8 = vld [vmem:[#allocation2 + $0xc8] sm:$0xff]  ;;  %v6945_v56 = vmax.f32 %v6847_v1, %v10132_v44  ;;  %v6850_v57 = vld [vmem:[#allocation2 + $0xd0] sm:$0xff] }
 0x4f5   : > { %7027 = vst.msk [vmem:[#allocation2 + $0x30] sm:$0xff] %vm7020_vm2, %v6928_v63  ;;  %v6946_v2 = vmax.f32 %v6848_v55, %v10138_v53  ;;  %v6851_v52 = vld [vmem:[#allocation2 + $0xd8] sm:$0xff]  ;;  %v6947_v16 = vmax.f32 %v6849_v8, %v10144_v7  ;;  %v6852_v63 = vld [vmem:[#allocation2 + $0xe0] sm:$0xff]  ;;  %v6948_v27 = vmax.f32 %v6850_v57, %v10150_v20  ;;  %v6853_v6 = vld [vmem:[#allocation2 + $0xe8] sm:$0xff] }
 0x4f6   : > { %7028 = vst.msk [vmem:[#allocation2 + $0x38] sm:$0xff] %vm7020_vm2, %v6929_v17  ;;  %v6949_v44 = vmax.f32 %v6851_v52, %v10156_v36  ;;  %v6854_v17 = vld [vmem:[#allocation2 + $0xf0] sm:$0xff]  ;;  %v6950_v53 = vmax.f32 %v6852_v63, %v10162_v47  ;;  %v6855_v60 = vld [vmem:[#allocation2 + $0xf8] sm:$0xff]  ;;  %v6951_v7 = vmax.f32 %v6853_v6, %v10168_v3  ;;  %v6857_v28 = vld [vmem:[#allocation2 + $0x108] sm:$0xff] }
 0x4f7   : > { %7029 = vst.msk [vmem:[#allocation2 + $0x40] sm:$0xff] %vm7020_vm2, %v6930_v24  ;;  %v6856_v24 = vld [vmem:[#allocation2 + $0x100] sm:$0xff]  ;;  %v6952_v20 = vmax.f32 %v6854_v17, %v10174_v14  ;;  %v6953_v36 = vmax.f32 %v6855_v60, %v10180_v34  ;;  %v6859_v11 = vld [vmem:[#allocation2 + $0x118] sm:$0xff]  ;;  %v6955_v3 = vmax.f32 %v6857_v28, %v10192_v5  ;;  %v6861_v39 = vld [vmem:[#allocation2 + $0x128] sm:$0xff] }
 0x4f8   : > { %7030 = vst.msk [vmem:[#allocation2 + $0x48] sm:$0xff] %vm7020_vm2, %v6931_v35  ;;  %v6858_v35 = vld [vmem:[#allocation2 + $0x110] sm:$0xff]  ;;  %v6954_v47 = vmax.f32 %v6856_v24, %v10186_v48  ;;  %v6957_v34 = vmax.f32 %v6859_v11, %v10204_v43  ;;  %v6863_v37 = vld [vmem:[#allocation2 + $0x138] sm:$0xff]  ;;  %v6959_v5 = vmax.f32 %v6861_v39, %v10216_v21  ;;  %v6865_v29 = vld [vmem:[#allocation2 + $0x148] sm:$0xff] }
 0x4f9   : > { %7031 = vst.msk [vmem:[#allocation2 + $0x50] sm:$0xff] %vm7020_vm2, %v6932_v42  ;;  %v6860_v42 = vld [vmem:[#allocation2 + $0x120] sm:$0xff]  ;;  %v6956_v14 = vmax.f32 %v6858_v35, %v10198_v22  ;;  %v6961_v43 = vmax.f32 %v6863_v37, %v10228_v62  ;;  %v6867_v40 = vld [vmem:[#allocation2 + $0x158] sm:$0xff]  ;;  %v6963_v21 = vmax.f32 %v6865_v29, %v10240_v45  ;;  %v6869_v46 = vld [vmem:[#allocation2 + $0x168] sm:$0xff] }
 0x4fa   : > { %7032 = vst.msk [vmem:[#allocation2 + $0x58] sm:$0xff] %vm7020_vm2, %v6933_v54  ;;  %v6862_v54 = vld [vmem:[#allocation2 + $0x130] sm:$0xff]  ;;  %v6958_v48 = vmax.f32 %v6860_v42, %v10210_v58  ;;  %v6871_v12 = vld [vmem:[#allocation2 + $0x178] sm:$0xff]  ;;  %v6872_v15 = vld [vmem:[#allocation2 + $0x180] sm:$0xff] }
 0x4fb   : > { %7033 = vst.msk [vmem:[#allocation2 + $0x60] sm:$0xff] %vm7020_vm2, %v6934_v61  ;;  %v6864_v61 = vld [vmem:[#allocation2 + $0x140] sm:$0xff]  ;;  %v6960_v22 = vmax.f32 %v6862_v54, %v10222_v33  ;;  %v6870_v25 = vld [vmem:[#allocation2 + $0x170] sm:$0xff]  ;;  %v6873_v23 = vld [vmem:[#allocation2 + $0x188] sm:$0xff] }
 0x4fc   : > { %7034 = vst.msk [vmem:[#allocation2 + $0x68] sm:$0xff] %vm7020_vm2, %v6935_v10  ;;  %v6866_v10 = vld [vmem:[#allocation2 + $0x150] sm:$0xff]  ;;  %v6962_v58 = vmax.f32 %v6864_v61, %v10234_v13  ;;  %v11426_v1 = vld [vmem:[#allocation9_spill] sm:$0xff]  ;;  %v11428_v57 = vld [vmem:[#allocation11_spill] sm:$0xff] }
 0x4fd   : > { %7035 = vst.msk [vmem:[#allocation2 + $0x70] sm:$0xff] %vm7020_vm2, %v6936_v18  ;;  %v6868_v18 = vld [vmem:[#allocation2 + $0x160] sm:$0xff]  ;;  %v6964_v33 = vmax.f32 %v6866_v10, %v10246_v0  ;;  %v6875_v55 = vld [vmem:[#allocation2 + $0x198] sm:$0xff]  ;;  %v6877_v52 = vld [vmem:[#allocation2 + $0x1a8] sm:$0xff] }
 0x4fe   : > { %7036 = vst.msk [vmem:[#allocation2 + $0x78] sm:$0xff] %vm7020_vm2, %v6937_v30  ;;  %v11421_v30 = vld [vmem:[#allocation4_spill] sm:$0xff]  ;;  %v11430_v6 = vld [vmem:[#allocation13_spill] sm:$0xff]  ;;  %v11432_v24 = vld [vmem:[#allocation15_spill] sm:$0xff] }
 0x4ff   : > { %7037 = vst.msk [vmem:[#allocation2 + $0x80] sm:$0xff] %vm7020_vm2, %v6938_v38  ;;  %v6965_v62 = vmax.f32 %v6867_v40, %v11421_v30  ;;  %v11422_v38 = vld [vmem:[#allocation5_spill] sm:$0xff]  ;;  %v6881_v28 = vld [vmem:[#allocation2 + $0x1c8] sm:$0xff]  ;;  %v11441_v30 = vld [vmem:[#allocation24_spill] sm:$0xff] }
 0x500   : > { %7038 = vst.msk [vmem:[#allocation2 + $0x88] sm:$0xff] %vm7020_vm2, %v6939_v50  ;;  %v6966_v13 = vmax.f32 %v6868_v18, %v11422_v38  ;;  %v11423_v50 = vld [vmem:[#allocation6_spill] sm:$0xff]  ;;  %v6879_v17 = vld [vmem:[#allocation2 + $0x1b8] sm:$0xff]  ;;  %v11436_v54 = vld [vmem:[#allocation19_spill] sm:$0xff] }
 0x501   : > { %7039 = vst.msk [vmem:[#allocation2 + $0x90] sm:$0xff] %vm7020_vm2, %v6940_v59  ;;  %v6967_v45 = vmax.f32 %v6869_v46, %v11423_v50  ;;  %v11424_v59 = vld [vmem:[#allocation7_spill] sm:$0xff]  ;;  %v11434_v11 = vld [vmem:[#allocation17_spill] sm:$0xff]  ;;  %v11443_v50 = vld [vmem:[#allocation26_spill] sm:$0xff] }
 0x502   : > { %7040 = vst.msk [vmem:[#allocation2 + $0x98] sm:$0xff] %vm7020_vm2, %v6941_v9  ;;  %v6968_v0 = vmax.f32 %v6870_v25, %v11424_v59  ;;  %v11425_v9 = vld [vmem:[#allocation8_spill] sm:$0xff]  ;;  %v6883_v42 = vld [vmem:[#allocation2 + $0x1d8] sm:$0xff]  ;;  %v6885_v37 = vld [vmem:[#allocation2 + $0x1e8] sm:$0xff] }
 0x503   : > { %7041 = vst.msk [vmem:[#allocation2 + $0xa0] sm:$0xff] %vm7020_vm2, %v6942_v19  ;;  %v6969_v49 = vmax.f32 %v6871_v12, %v11425_v9  ;;  %v6874_v19 = vld [vmem:[#allocation2 + $0x190] sm:$0xff]  ;;  %v11438_v29 = vld [vmem:[#allocation21_spill] sm:$0xff]  ;;  %v11440_v18 = vld [vmem:[#allocation23_spill] sm:$0xff] }
 0x504   : > { %7042 = vst.msk [vmem:[#allocation2 + $0xa8] sm:$0xff] %vm7020_vm2, %v6943_v32  ;;  %v6970_v32 = vmax.f32 %v6872_v15, %v11426_v1  ;;  %v6887_v10 = vld [vmem:[#allocation2 + $0x1f8] sm:$0xff]  ;;  %v6889_v46 = vld [vmem:[#allocation2 + $0x208] sm:$0xff]  ;;  %v6890_v25 = vld [vmem:[#allocation2 + $0x210] sm:$0xff] }
 0x505   : > { %7043 = vst.msk [vmem:[#allocation2 + $0xb0] sm:$0xff] %vm7020_vm2, %v6944_v41  ;;  %v11427_v41 = vld [vmem:[#allocation10_spill] sm:$0xff]  ;;  %v11442_v38 = vld [vmem:[#allocation25_spill] sm:$0xff]  ;;  %v11444_v59 = vld [vmem:[#allocation27_spill] sm:$0xff] }
 0x506   : > { %7044 = vst.msk [vmem:[#allocation2 + $0xb8] sm:$0xff] %vm7020_vm2, %v6945_v56  ;;  %v6971_v8 = vmax.f32 %v6873_v23, %v11427_v41  ;;  %v6876_v56 = vld [vmem:[#allocation2 + $0x1a0] sm:$0xff]  ;;  %v6891_v12 = vld [vmem:[#allocation2 + $0x218] sm:$0xff]  ;;  %v6893_v23 = vld [vmem:[#allocation2 + $0x228] sm:$0xff] }
 0x507   : > { %7045 = vst.msk [vmem:[#allocation2 + $0xc0] sm:$0xff] %vm7020_vm2, %v6946_v2  ;;  %v6972_v2 = vmax.f32 %v6874_v19, %v11428_v57  ;;  %v6892_v15 = vld [vmem:[#allocation2 + $0x220] sm:$0xff]  ;;  %v11445_v9 = vld [vmem:[#allocation28_spill] sm:$0xff]  ;;  %v11446_v1 = vld [vmem:[#allocation29_spill] sm:$0xff] }
 0x508   : > { %7046 = vst.msk [vmem:[#allocation2 + $0xc8] sm:$0xff] %vm7020_vm2, %v6947_v16  ;;  %v11429_v16 = vld [vmem:[#allocation12_spill] sm:$0xff]  ;;  %v11447_v41 = vld [vmem:[#allocation30_spill] sm:$0xff]  ;;  %v11448_v57 = vld [vmem:[#allocation31_spill] sm:$0xff] }
 0x509   : > { %7047 = vst.msk [vmem:[#allocation2 + $0xd0] sm:$0xff] %vm7020_vm2, %v6948_v27  ;;  %v6973_v63 = vmax.f32 %v6875_v55, %v11429_v16  ;;  %v6878_v27 = vld [vmem:[#allocation2 + $0x1b0] sm:$0xff]  ;;  %v6895_v55 = vld [vmem:[#allocation2 + $0x238] sm:$0xff] }
 0x50a   : > { %7048 = vst.msk [vmem:[#allocation2 + $0xd8] sm:$0xff] %vm7020_vm2, %v6949_v44  ;;  %v6974_v44 = vmax.f32 %v6876_v56, %v11430_v6  ;;  %v6894_v19 = vld [vmem:[#allocation2 + $0x230] sm:$0xff]  ;;  %v6896_v56 = vld [vmem:[#allocation2 + $0x240] sm:$0xff]  ;;  %v11450_v6 = vld [vmem:[#allocation33_spill] sm:$0xff] }
 0x50b   : > { %7049 = vst.msk [vmem:[#allocation2 + $0xe0] sm:$0xff] %vm7020_vm2, %v6950_v53  ;;  %v11431_v53 = vld [vmem:[#allocation14_spill] sm:$0xff]  ;;  %v11449_v16 = vld [vmem:[#allocation32_spill] sm:$0xff] }
 0x50c   : > { %7050 = vst.msk [vmem:[#allocation2 + $0xe8] sm:$0xff] %vm7020_vm2, %v6951_v7  ;;  %v6975_v60 = vmax.f32 %v6877_v52, %v11431_v53  ;;  %v6880_v7 = vld [vmem:[#allocation2 + $0x1c0] sm:$0xff]  ;;  %v6897_v52 = vld [vmem:[#allocation2 + $0x248] sm:$0xff] }
 0x50d   : > { %7051 = vst.msk [vmem:[#allocation2 + $0xf0] sm:$0xff] %vm7020_vm2, %v6952_v20  ;;  %v6976_v20 = vmax.f32 %v6878_v27, %v11432_v24  ;;  %v6898_v27 = vld [vmem:[#allocation2 + $0x250] sm:$0xff]  ;;  %v11451_v53 = vld [vmem:[#allocation34_spill] sm:$0xff]  ;;  %v11452_v24 = vld [vmem:[#allocation35_spill] sm:$0xff] }
 0x50e   : > { %7052 = vst.msk [vmem:[#allocation2 + $0xf8] sm:$0xff] %vm7020_vm2, %v6953_v36  ;;  %v11433_v36 = vld [vmem:[#allocation16_spill] sm:$0xff] }
 0x50f   : > { %7053 = vst.msk [vmem:[#allocation2 + $0x100] sm:$0xff] %vm7020_vm2, %v6954_v47  ;;  %v6977_v35 = vmax.f32 %v6879_v17, %v11433_v36  ;;  %v6882_v47 = vld [vmem:[#allocation2 + $0x1d0] sm:$0xff]  ;;  %v6899_v17 = vld [vmem:[#allocation2 + $0x258] sm:$0xff] }
 0x510   : > { %7054 = vst.msk [vmem:[#allocation2 + $0x108] sm:$0xff] %vm7020_vm2, %v6955_v3  ;;  %v6978_v3 = vmax.f32 %v6880_v7, %v11434_v11  ;;  %v6900_v7 = vld [vmem:[#allocation2 + $0x260] sm:$0xff]  ;;  %v11453_v36 = vld [vmem:[#allocation36_spill] sm:$0xff]  ;;  %v11454_v11 = vld [vmem:[#allocation37_spill] sm:$0xff] }
 0x511   : > { %7055 = vst.msk [vmem:[#allocation2 + $0x110] sm:$0xff] %vm7020_vm2, %v6956_v14  ;;  %v11435_v14 = vld [vmem:[#allocation18_spill] sm:$0xff] }
 0x512   : > { %7056 = vst.msk [vmem:[#allocation2 + $0x118] sm:$0xff] %vm7020_vm2, %v6957_v34  ;;  %v6979_v39 = vmax.f32 %v6881_v28, %v11435_v14  ;;  %v6884_v34 = vld [vmem:[#allocation2 + $0x1e0] sm:$0xff]  ;;  %v6901_v28 = vld [vmem:[#allocation2 + $0x268] sm:$0xff] }
 0x513   : > { %7057 = vst.msk [vmem:[#allocation2 + $0x120] sm:$0xff] %vm7020_vm2, %v6958_v48  ;;  %v6980_v48 = vmax.f32 %v6882_v47, %v11436_v54  ;;  %v6902_v47 = vld [vmem:[#allocation2 + $0x270] sm:$0xff]  ;;  %v11455_v14 = vld [vmem:[#allocation38_spill] sm:$0xff]  ;;  %v11456_v54 = vld [vmem:[#allocation39_spill] sm:$0xff] }
 0x514   : > { %7058 = vst.msk [vmem:[#allocation2 + $0x128] sm:$0xff] %vm7020_vm2, %v6959_v5  ;;  %v11437_v5 = vld [vmem:[#allocation20_spill] sm:$0xff] }
 0x515   : > { %7059 = vst.msk [vmem:[#allocation2 + $0x130] sm:$0xff] %vm7020_vm2, %v6960_v22  ;;  %v6981_v61 = vmax.f32 %v6883_v42, %v11437_v5  ;;  %v6886_v22 = vld [vmem:[#allocation2 + $0x1f0] sm:$0xff]  ;;  %v6903_v42 = vld [vmem:[#allocation2 + $0x278] sm:$0xff] }
 0x516   : > { %7060 = vst.msk [vmem:[#allocation2 + $0x138] sm:$0xff] %vm7020_vm2, %v6961_v43  ;;  %v6982_v43 = vmax.f32 %v6884_v34, %v11438_v29  ;;  %v6904_v34 = vld [vmem:[#allocation2 + $0x280] sm:$0xff]  ;;  %v11457_v5 = vld [vmem:[#allocation40_spill] sm:$0xff]  ;;  %v11458_v29 = vld [vmem:[#allocation41_spill] sm:$0xff] }
 0x517   : > { %7061 = vst.msk [vmem:[#allocation2 + $0x140] sm:$0xff] %vm7020_vm2, %v6962_v58  ;;  %v11439_v58 = vld [vmem:[#allocation22_spill] sm:$0xff] }
 0x518   : > { %7062 = vst.msk [vmem:[#allocation2 + $0x148] sm:$0xff] %vm7020_vm2, %v6963_v21  ;;  %v6983_v40 = vmax.f32 %v6885_v37, %v11439_v58  ;;  %v6888_v21 = vld [vmem:[#allocation2 + $0x200] sm:$0xff]  ;;  %v6905_v37 = vld [vmem:[#allocation2 + $0x288] sm:$0xff] }
 0x519   : > { %7063 = vst.msk [vmem:[#allocation2 + $0x150] sm:$0xff] %vm7020_vm2, %v6964_v33  ;;  %v6984_v33 = vmax.f32 %v6886_v22, %v11440_v18  ;;  %v6906_v22 = vld [vmem:[#allocation2 + $0x290] sm:$0xff]  ;;  %v11459_v58 = vld [vmem:[#allocation42_spill] sm:$0xff]  ;;  %v11460_v18 = vld [vmem:[#allocation43_spill] sm:$0xff] }
 0x51a   : > { %7064 = vst.msk [vmem:[#allocation2 + $0x158] sm:$0xff] %vm7020_vm2, %v6965_v62  ;;  %v6985_v62 = vmax.f32 %v6887_v10, %v11441_v30  ;;  %v6907_v10 = vld [vmem:[#allocation2 + $0x298] sm:$0xff]  ;;  %v11461_v30 = vld [vmem:[#allocation44_spill] sm:$0xff] }
 0x51b   : > { %7065 = vst.msk [vmem:[#allocation2 + $0x160] sm:$0xff] %vm7020_vm2, %v6966_v13  ;;  %v6986_v13 = vmax.f32 %v6888_v21, %v11442_v38  ;;  %v6908_v21 = vld [vmem:[#allocation2 + $0x2a0] sm:$0xff]  ;;  %v11462_v38 = vld [vmem:[#allocation45_spill] sm:$0xff] }
 0x51c   : > { %7066 = vst.msk [vmem:[#allocation2 + $0x168] sm:$0xff] %vm7020_vm2, %v6967_v45  ;;  %v6987_v45 = vmax.f32 %v6889_v46, %v11443_v50  ;;  %v6909_v46 = vld [vmem:[#allocation2 + $0x2a8] sm:$0xff]  ;;  %v11463_v50 = vld [vmem:[#allocation46_spill] sm:$0xff] }
 0x51d   : > { %7067 = vst.msk [vmem:[#allocation2 + $0x170] sm:$0xff] %vm7020_vm2, %v6968_v0  ;;  %v6988_v0 = vmax.f32 %v6890_v25, %v11444_v59  ;;  %v6910_v25 = vld [vmem:[#allocation2 + $0x2b0] sm:$0xff]  ;;  %v11464_v59 = vld [vmem:[#allocation47_spill] sm:$0xff] }
 0x51e   : > { %7068 = vst.msk [vmem:[#allocation2 + $0x178] sm:$0xff] %vm7020_vm2, %v6969_v49  ;;  %v6989_v49 = vmax.f32 %v6891_v12, %v11445_v9  ;;  %v6911_v12 = vld [vmem:[#allocation2 + $0x2b8] sm:$0xff]  ;;  %v11465_v9 = vld [vmem:[#allocation48_spill] sm:$0xff] }
 0x51f   : > { %7069 = vst.msk [vmem:[#allocation2 + $0x180] sm:$0xff] %vm7020_vm2, %v6970_v32  ;;  %v6990_v32 = vmax.f32 %v6892_v15, %v11446_v1  ;;  %v6912_v15 = vld [vmem:[#allocation2 + $0x2c0] sm:$0xff]  ;;  %v11466_v1 = vld [vmem:[#allocation49_spill] sm:$0xff] }
 0x520   : > { %7070 = vst.msk [vmem:[#allocation2 + $0x188] sm:$0xff] %vm7020_vm2, %v6971_v8  ;;  %v6991_v8 = vmax.f32 %v6893_v23, %v11447_v41  ;;  %v6913_v23 = vld [vmem:[#allocation2 + $0x2c8] sm:$0xff]  ;;  %v11467_v41 = vld [vmem:[#allocation50_spill] sm:$0xff] }
 0x521   : > { %7071 = vst.msk [vmem:[#allocation2 + $0x190] sm:$0xff] %vm7020_vm2, %v6972_v2  ;;  %v6992_v2 = vmax.f32 %v6894_v19, %v11448_v57  ;;  %v6914_v19 = vld [vmem:[#allocation2 + $0x2d0] sm:$0xff]  ;;  %v11468_v57 = vld [vmem:[#allocation51_spill] sm:$0xff] }
 0x522   : > { %7072 = vst.msk [vmem:[#allocation2 + $0x198] sm:$0xff] %vm7020_vm2, %v6973_v63  ;;  %v6993_v63 = vmax.f32 %v6895_v55, %v11449_v16  ;;  %v6915_v55 = vld [vmem:[#allocation2 + $0x2d8] sm:$0xff]  ;;  %v11469_v16 = vld [vmem:[#allocation52_spill] sm:$0xff] }
 0x523   : > { %7073 = vst.msk [vmem:[#allocation2 + $0x1a0] sm:$0xff] %vm7020_vm2, %v6974_v44  ;;  %v6994_v44 = vmax.f32 %v6896_v56, %v11450_v6  ;;  %v6916_v56 = vld [vmem:[#allocation2 + $0x2e0] sm:$0xff]  ;;  %v11470_v6 = vld [vmem:[#allocation53_spill] sm:$0xff] }
 0x524   : > { %7074 = vst.msk [vmem:[#allocation2 + $0x1a8] sm:$0xff] %vm7020_vm2, %v6975_v60  ;;  %v6995_v60 = vmax.f32 %v6897_v52, %v11451_v53  ;;  %v6917_v52 = vld [vmem:[#allocation2 + $0x2e8] sm:$0xff]  ;;  %v11471_v53 = vld [vmem:[#allocation54_spill] sm:$0xff] }
 0x525   : > { %7075 = vst.msk [vmem:[#allocation2 + $0x1b0] sm:$0xff] %vm7020_vm2, %v6976_v20  ;;  %v6996_v20 = vmax.f32 %v6898_v27, %v11452_v24  ;;  %v6918_v27 = vld [vmem:[#allocation2 + $0x2f0] sm:$0xff] }
 0x526   : > { %7076 = vst.msk [vmem:[#allocation2 + $0x1b8] sm:$0xff] %vm7020_vm2, %v6977_v35  ;;  %v6997_v35 = vmax.f32 %v6899_v17, %v11453_v36  ;;  %v6919_v17 = vld [vmem:[#allocation2 + $0x2f8] sm:$0xff]  ;;  %v7016_v24 = vmax.f32 %v6918_v27, %v10502_v31 }
 0x527   : > { %7077 = vst.msk [vmem:[#allocation2 + $0x1c0] sm:$0xff] %vm7020_vm2, %v6978_v3  ;;  %v6998_v3 = vmax.f32 %v6900_v7, %v11454_v11  ;;  %v6920_v7 = vld [vmem:[#allocation2 + $0x300] sm:$0xff] }
 0x528   : > { %7078 = vst.msk [vmem:[#allocation2 + $0x1c8] sm:$0xff] %vm7020_vm2, %v6979_v39  ;;  %v6999_v39 = vmax.f32 %v6901_v28, %v11455_v14  ;;  %v7017_v28 = vmax.f32 %v6919_v17, %v10504_v26  ;;  %v7018_v36 = vmax.f32 %v6920_v7, %v10506_v4 }
 0x529   : > { %7079 = vst.msk [vmem:[#allocation2 + $0x1d0] sm:$0xff] %vm7020_vm2, %v6980_v48  ;;  %v7000_v48 = vmax.f32 %v6902_v47, %v11456_v54 }
 0x52a   : > { %7080 = vst.msk [vmem:[#allocation2 + $0x1d8] sm:$0xff] %vm7020_vm2, %v6981_v61  ;;  %v7001_v61 = vmax.f32 %v6903_v42, %v11457_v5 }
 0x52b   : > { %7081 = vst.msk [vmem:[#allocation2 + $0x1e0] sm:$0xff] %vm7020_vm2, %v6982_v43  ;;  %v7002_v43 = vmax.f32 %v6904_v34, %v11458_v29 }
 0x52c   : > { %7082 = vst.msk [vmem:[#allocation2 + $0x1e8] sm:$0xff] %vm7020_vm2, %v6983_v40  ;;  %v7003_v40 = vmax.f32 %v6905_v37, %v11459_v58 }
 0x52d   : > { %7083 = vst.msk [vmem:[#allocation2 + $0x1f0] sm:$0xff] %vm7020_vm2, %v6984_v33  ;;  %v7004_v33 = vmax.f32 %v6906_v22, %v11460_v18 }
 0x52e   : > { %7084 = vst.msk [vmem:[#allocation2 + $0x1f8] sm:$0xff] %vm7020_vm2, %v6985_v62  ;;  %v7005_v62 = vmax.f32 %v6907_v10, %v11461_v30 }
 0x52f   : > { %7085 = vst.msk [vmem:[#allocation2 + $0x200] sm:$0xff] %vm7020_vm2, %v6986_v13  ;;  %v7006_v13 = vmax.f32 %v6908_v21, %v11462_v38 }
 0x530   : > { %7086 = vst.msk [vmem:[#allocation2 + $0x208] sm:$0xff] %vm7020_vm2, %v6987_v45  ;;  %v7007_v45 = vmax.f32 %v6909_v46, %v11463_v50 }
 0x531   : > { %7087 = vst.msk [vmem:[#allocation2 + $0x210] sm:$0xff] %vm7020_vm2, %v6988_v0  ;;  %v7008_v0 = vmax.f32 %v6910_v25, %v11464_v59 }
 0x532   : > { %7088 = vst.msk [vmem:[#allocation2 + $0x218] sm:$0xff] %vm7020_vm2, %v6989_v49  ;;  %v7009_v49 = vmax.f32 %v6911_v12, %v11465_v9 }
 0x533   : > { %7089 = vst.msk [vmem:[#allocation2 + $0x220] sm:$0xff] %vm7020_vm2, %v6990_v32  ;;  %v7010_v32 = vmax.f32 %v6912_v15, %v11466_v1 }
 0x534   : > { %7090 = vst.msk [vmem:[#allocation2 + $0x228] sm:$0xff] %vm7020_vm2, %v6991_v8  ;;  %v7011_v8 = vmax.f32 %v6913_v23, %v11467_v41 }
 0x535   : > { %7091 = vst.msk [vmem:[#allocation2 + $0x230] sm:$0xff] %vm7020_vm2, %v6992_v2  ;;  %v7012_v2 = vmax.f32 %v6914_v19, %v11468_v57 }
 0x536   : > { %7092 = vst.msk [vmem:[#allocation2 + $0x238] sm:$0xff] %vm7020_vm2, %v6993_v63  ;;  %v7013_v63 = vmax.f32 %v6915_v55, %v11469_v16 }
 0x537   : > { %7093 = vst.msk [vmem:[#allocation2 + $0x240] sm:$0xff] %vm7020_vm2, %v6994_v44  ;;  %v7014_v44 = vmax.f32 %v6916_v56, %v11470_v6 }
 0x538   : > { %7094 = vst.msk [vmem:[#allocation2 + $0x248] sm:$0xff] %vm7020_vm2, %v6995_v60  ;;  %v7015_v60 = vmax.f32 %v6917_v52, %v11471_v53 }
 0x539   : > { %7095 = vst.msk [vmem:[#allocation2 + $0x250] sm:$0xff] %vm7020_vm2, %v6996_v20  ;;  %v6921_v20 = vld [vmem:[#allocation2 + $0x308] sm:$0xff] }
 0x53a   : > { %7096 = vst.msk [vmem:[#allocation2 + $0x258] sm:$0xff] %vm7020_vm2, %v6997_v35  ;;  %v7019_v35 = vmax.f32 %v6921_v20, %v10508_v51 }
 0x53b   : > { %7097 = vst.msk [vmem:[#allocation2 + $0x260] sm:$0xff] %vm7020_vm2, %v6998_v3 }
 0x53c   : > { %7098 = vst.msk [vmem:[#allocation2 + $0x268] sm:$0xff] %vm7020_vm2, %v6999_v39 }
 0x53d   : > { %7099 = vst.msk [vmem:[#allocation2 + $0x270] sm:$0xff] %vm7020_vm2, %v7000_v48 }
 0x53e   : > { %7100 = vst.msk [vmem:[#allocation2 + $0x278] sm:$0xff] %vm7020_vm2, %v7001_v61 }
 0x53f   : > { %7101 = vst.msk [vmem:[#allocation2 + $0x280] sm:$0xff] %vm7020_vm2, %v7002_v43 }
 0x540   : > { %7102 = vst.msk [vmem:[#allocation2 + $0x288] sm:$0xff] %vm7020_vm2, %v7003_v40 }
 0x541   : > { %7103 = vst.msk [vmem:[#allocation2 + $0x290] sm:$0xff] %vm7020_vm2, %v7004_v33 }
 0x542   : > { %7104 = vst.msk [vmem:[#allocation2 + $0x298] sm:$0xff] %vm7020_vm2, %v7005_v62 }
 0x543   : > { %7105 = vst.msk [vmem:[#allocation2 + $0x2a0] sm:$0xff] %vm7020_vm2, %v7006_v13 }
 0x544   : > { %7106 = vst.msk [vmem:[#allocation2 + $0x2a8] sm:$0xff] %vm7020_vm2, %v7007_v45 }
 0x545   : > { %7107 = vst.msk [vmem:[#allocation2 + $0x2b0] sm:$0xff] %vm7020_vm2, %v7008_v0 }
 0x546   : > { %7108 = vst.msk [vmem:[#allocation2 + $0x2b8] sm:$0xff] %vm7020_vm2, %v7009_v49 }
 0x547   : > { %7109 = vst.msk [vmem:[#allocation2 + $0x2c0] sm:$0xff] %vm7020_vm2, %v7010_v32 }
 0x548   : > { %7110 = vst.msk [vmem:[#allocation2 + $0x2c8] sm:$0xff] %vm7020_vm2, %v7011_v8 }
 0x549   : > { %7111 = vst.msk [vmem:[#allocation2 + $0x2d0] sm:$0xff] %vm7020_vm2, %v7012_v2 }
 0x54a   : > { %7112 = vst.msk [vmem:[#allocation2 + $0x2d8] sm:$0xff] %vm7020_vm2, %v7013_v63 }
 0x54b   : > { %7113 = vst.msk [vmem:[#allocation2 + $0x2e0] sm:$0xff] %vm7020_vm2, %v7014_v44 }
 0x54c   : > { %7114 = vst.msk [vmem:[#allocation2 + $0x2e8] sm:$0xff] %vm7020_vm2, %v7015_v60 }
 0x54d   : > { %7115 = vst.msk [vmem:[#allocation2 + $0x2f0] sm:$0xff] %vm7020_vm2, %v7016_v24 }
 0x54e   : > { %7116 = vst.msk [vmem:[#allocation2 + $0x2f8] sm:$0xff] %vm7020_vm2, %v7017_v28 }
 0x54f   : > { %7117 = vst.msk [vmem:[#allocation2 + $0x300] sm:$0xff] %vm7020_vm2, %v7018_v36 }
 0x550   : > { %7118 = vst.msk [vmem:[#allocation2 + $0x308] sm:$0xff] %vm7020_vm2, %v7019_v35 }
 0x551 PF: > { %p9100_p13 = scmp.ne.s32.totalorder %s9403_s17, 3 }
 0x553   : > { %7122 = sbr.rel (%p9100_p13) target bundleno = 1476 (0x5c4), region = 100 }
 0x558   : > { %v7123_v26 = vld [vmem:[#allocation2] sm:$0xff]  ;;  %v7124_v51 = vld [vmem:[#allocation2 + $0x8] sm:$0xff]  ;;  %v7125_v3 = vld [vmem:[#allocation2 + $0x10] sm:$0xff]  ;;  %vm7621_vm3 = vcmask 519168  }
 0x559   : > { %v10908_v31 = vld [vmem:[%s11316_s2] ss:$0 sm:$0xff]  ;;  %v7126_v42 = vld [vmem:[#allocation2 + $0x18] sm:$0xff]  ;;  %v7128_v48 = vld [vmem:[#allocation2 + $0x28] sm:$0xff] }
 0x55a   : > { %v10913_v4 = vld [vmem:[%s11317_s3] ss:$0 sm:$0xff]  ;;  %v7225_v47 = vmul.f32 %v10908_v31, %v7123_v26  ;;  %v7226_v11 = vmul.f32 %v10908_v31, %v7124_v51  ;;  %v7227_v39 = vmul.f32 %v10908_v31, %v7125_v3  ;;  %v7228_v34 = vmul.f32 %v10908_v31, %v7126_v42  ;;  %v7129_v37 = vld [vmem:[#allocation2 + $0x30] sm:$0xff]  ;;  %v7130_v5 = vld [vmem:[#allocation2 + $0x38] sm:$0xff] }
 0x55b   : > { %v7127_v14 = vld [vmem:[#allocation2 + $0x20] sm:$0xff]  ;;  %v7230_v29 = vmul.f32 %v10908_v31, %v7128_v48  ;;  %v7231_v43 = vmul.f32 %v10908_v31, %v7129_v37  ;;  %v7232_v21 = vmul.f32 %v10908_v31, %v7130_v5  ;;  %v7132_v50 = vld [vmem:[#allocation2 + $0x48] sm:$0xff]  ;;  %v7133_v23 = vld [vmem:[#allocation2 + $0x50] sm:$0xff] }
 0x55c   : > { %v7229_v54 = vmul.f32 %v10908_v31, %v7127_v14  ;;  %v7327_v61 = vadd.f32 %v10913_v4, %v7225_v47  ;;  %v7328_v22 = vadd.f32 %v10913_v4, %v7226_v11  ;;  %v7329_v10 = vadd.f32 %v10913_v4, %v7227_v39  ;;  %v7131_v12 = vld [vmem:[#allocation2 + $0x40] sm:$0xff]  ;;  %v7134_v9 = vld [vmem:[#allocation2 + $0x58] sm:$0xff]  ;;  %v7136_v41 = vld [vmem:[#allocation2 + $0x68] sm:$0xff] }
 0x55d   : > { %v7330_v58 = vadd.f32 %v10913_v4, %v7228_v34  ;;  %v7332_v46 = vadd.f32 %v10913_v4, %v7230_v29  ;;  %v7333_v30 = vadd.f32 %v10913_v4, %v7231_v43  ;;  %v7334_v13 = vadd.f32 %v10913_v4, %v7232_v21  ;;  %v7135_v49 = vld [vmem:[#allocation2 + $0x60] sm:$0xff]  ;;  %v7137_v8 = vld [vmem:[#allocation2 + $0x70] sm:$0xff]  ;;  %v7138_v16 = vld [vmem:[#allocation2 + $0x78] sm:$0xff] }
 0x55e   : > { %v7331_v40 = vadd.f32 %v10913_v4, %v7229_v54  ;;  %v7425_v18 = vmax.f32 %v7327_v61, 0.0  ;;  %v7426_v33 = vmax.f32 %v7328_v22, 0.0  ;;  %v7427_v62 = vmax.f32 %v7329_v10, 0.0  ;;  %v7139_v11 = vld [vmem:[#allocation2 + $0x80] sm:$0xff]  ;;  %v7140_v3 = vld [vmem:[#allocation2 + $0x88] sm:$0xff]  ;;  %v7141_v54 = vld [vmem:[#allocation2 + $0x90] sm:$0xff] }
 0x55f   : > { %v7428_v25 = vmax.f32 %v7330_v58, 0.0  ;;  %v7430_v59 = vmax.f32 %v7332_v46, 0.0  ;;  %v7431_v0 = vmax.f32 %v7333_v30, 0.0  ;;  %v7432_v55 = vmax.f32 %v7334_v13, 0.0  ;;  %v7142_v22 = vld [vmem:[#allocation2 + $0x98] sm:$0xff]  ;;  %v7143_v29 = vld [vmem:[#allocation2 + $0xa0] sm:$0xff] }
 0x560   : > { %v7429_v38 = vmax.f32 %v7331_v40, 0.0  ;;  %v7523_v45 = vpack.c.bf16 %v7425_v18, %v7425_v18  ;;  %v7524_v15 = vpack.c.bf16 %v7426_v33, %v7426_v33  ;;  %v7525_v19 = vpack.c.bf16 %v7427_v62, %v7427_v62  ;;  %v7144_v21 = vld [vmem:[#allocation2 + $0xa8] sm:$0xff]  ;;  %v7145_v18 = vld [vmem:[#allocation2 + $0xb0] sm:$0xff] }
 0x561   : > { %v7526_v1 = vpack.c.bf16 %v7428_v25, %v7428_v25  ;;  %v7528_v56 = vpack.c.bf16 %v7430_v59, %v7430_v59  ;;  %v7529_v57 = vpack.c.bf16 %v7431_v0, %v7431_v0  ;;  %v7233_v2 = vmul.f32 %v10908_v31, %v7131_v12  ;;  %v7146_v25 = vld [vmem:[#allocation2 + $0xb8] sm:$0xff] }
 0x562   : > { %v7527_v32 = vpack.c.bf16 %v7429_v38, %v7429_v38  ;;  %7622 = vst.msk [vmem:[%s9918_s7] sm:$0xf] %vm7621_vm3, %v7523_v45  ;;  %v7234_v52 = vmul.f32 %v10908_v31, %v7132_v50  ;;  %v7530_v63 = vpack.c.bf16 %v7432_v55, %v7432_v55  ;;  %v7235_v27 = vmul.f32 %v10908_v31, %v7133_v23 }
 0x563   : > { %7623 = vst.msk [vmem:[%s9918_s7 + $0x4] sm:$0xf] %vm7621_vm3, %v7524_v15  ;;  %v7236_v6 = vmul.f32 %v10908_v31, %v7134_v9  ;;  %v7237_v44 = vmul.f32 %v10908_v31, %v7135_v49  ;;  %v7335_v17 = vadd.f32 %v10913_v4, %v7233_v2  ;;  %v7238_v60 = vmul.f32 %v10908_v31, %v7136_v41 }
 0x564   : > { %7624 = vst.msk [vmem:[%s9918_s7 + $0x8] sm:$0xf] %vm7621_vm3, %v7525_v19  ;;  %v7336_v53 = vadd.f32 %v10913_v4, %v7234_v52  ;;  %v7239_v7 = vmul.f32 %v10908_v31, %v7137_v8  ;;  %v7337_v24 = vadd.f32 %v10913_v4, %v7235_v27  ;;  %v7240_v36 = vmul.f32 %v10908_v31, %v7138_v16  ;;  %v7147_v8 = vld [vmem:[#allocation2 + $0xc0] sm:$0xff] }
 0x565   : > { %7625 = vst.msk [vmem:[%s9918_s7 + $0xc] sm:$0xf] %vm7621_vm3, %v7526_v1  ;;  %v7338_v20 = vadd.f32 %v10913_v4, %v7236_v6  ;;  %v7339_v28 = vadd.f32 %v10913_v4, %v7237_v44  ;;  %v7433_v35 = vmax.f32 %v7335_v17, 0.0  ;;  %v7340_v51 = vadd.f32 %v10913_v4, %v7238_v60  ;;  %v7151_v60 = vld [vmem:[#allocation2 + $0xe0] sm:$0xff] }
 0x566   : > { %7626 = vst.msk [vmem:[%s9918_s7 + $0x10] sm:$0xf] %vm7621_vm3, %v7527_v32  ;;  %v7434_v26 = vmax.f32 %v7336_v53, 0.0  ;;  %v7341_v47 = vadd.f32 %v10913_v4, %v7239_v7  ;;  %v7435_v42 = vmax.f32 %v7337_v24, 0.0  ;;  %v7342_v34 = vadd.f32 %v10913_v4, %v7240_v36  ;;  %v7150_v53 = vld [vmem:[#allocation2 + $0xd8] sm:$0xff]  ;;  %v7152_v36 = vld [vmem:[#allocation2 + $0xe8] sm:$0xff] }
 0x567   : > { %7627 = vst.msk [vmem:[%s9918_s7 + $0x14] sm:$0xf] %vm7621_vm3, %v7528_v56  ;;  %v7436_v14 = vmax.f32 %v7338_v20, 0.0  ;;  %v7437_v39 = vmax.f32 %v7339_v28, 0.0  ;;  %v7531_v48 = vpack.c.bf16 %v7433_v35, %v7433_v35  ;;  %v7438_v5 = vmax.f32 %v7340_v51, 0.0  ;;  %v7148_v56 = vld [vmem:[#allocation2 + $0xc8] sm:$0xff] }
 0x568   : > { %7628 = vst.msk [vmem:[%s9918_s7 + $0x18] sm:$0xf] %vm7621_vm3, %v7529_v57  ;;  %v7532_v37 = vpack.c.bf16 %v7434_v26, %v7434_v26  ;;  %v7439_v61 = vmax.f32 %v7341_v47, 0.0  ;;  %v7533_v43 = vpack.c.bf16 %v7435_v42, %v7435_v42  ;;  %v7440_v40 = vmax.f32 %v7342_v34, 0.0  ;;  %v7153_v35 = vld [vmem:[#allocation2 + $0xf0] sm:$0xff] }
 0x569   : > { %7629 = vst.msk [vmem:[%s9918_s7 + $0x1c] sm:$0xf] %vm7621_vm3, %v7530_v63  ;;  %v7534_v10 = vpack.c.bf16 %v7436_v14, %v7436_v14  ;;  %v7535_v58 = vpack.c.bf16 %v7437_v39, %v7437_v39  ;;  %v7536_v33 = vpack.c.bf16 %v7438_v5, %v7438_v5  ;;  %v7241_v30 = vmul.f32 %v10908_v31, %v7139_v11  ;;  %v7149_v63 = vld [vmem:[#allocation2 + $0xd0] sm:$0xff] }
 0x56a   : > { %7630 = vst.msk [vmem:[%s9918_s7 + $0x20] sm:$0xf] %vm7621_vm3, %v7531_v48  ;;  %v7537_v46 = vpack.c.bf16 %v7439_v61, %v7439_v61  ;;  %v7242_v62 = vmul.f32 %v10908_v31, %v7140_v3  ;;  %v7538_v38 = vpack.c.bf16 %v7440_v40, %v7440_v40  ;;  %v7243_v13 = vmul.f32 %v10908_v31, %v7141_v54  ;;  %v7154_v3 = vld [vmem:[#allocation2 + $0xf8] sm:$0xff] }
 0x56b   : > { %7631 = vst.msk [vmem:[%s9918_s7 + $0x24] sm:$0xf] %vm7621_vm3, %v7532_v37  ;;  %v7244_v12 = vmul.f32 %v10908_v31, %v7142_v22  ;;  %v7245_v50 = vmul.f32 %v10908_v31, %v7143_v29  ;;  %v7343_v45 = vadd.f32 %v10913_v4, %v7241_v30  ;;  %v7246_v59 = vmul.f32 %v10908_v31, %v7144_v21 }
 0x56c   : > { %7632 = vst.msk [vmem:[%s9918_s7 + $0x28] sm:$0xf] %vm7621_vm3, %v7533_v43  ;;  %v7344_v15 = vadd.f32 %v10913_v4, %v7242_v62  ;;  %v7247_v0 = vmul.f32 %v10908_v31, %v7145_v18  ;;  %v7345_v23 = vadd.f32 %v10913_v4, %v7243_v13  ;;  %v7248_v19 = vmul.f32 %v10908_v31, %v7146_v25  ;;  %v7155_v18 = vld [vmem:[#allocation2 + $0x100] sm:$0xff] }
 0x56d   : > { %7633 = vst.msk [vmem:[%s9918_s7 + $0x2c] sm:$0xf] %vm7621_vm3, %v7534_v10  ;;  %v7346_v9 = vadd.f32 %v10913_v4, %v7244_v12  ;;  %v7347_v49 = vadd.f32 %v10913_v4, %v7245_v50  ;;  %v7441_v1 = vmax.f32 %v7343_v45, 0.0  ;;  %v7348_v55 = vadd.f32 %v10913_v4, %v7246_v59  ;;  %v7159_v59 = vld [vmem:[#allocation2 + $0x120] sm:$0xff] }
 0x56e   : > { %7634 = vst.msk [vmem:[%s9918_s7 + $0x30] sm:$0xf] %vm7621_vm3, %v7535_v58  ;;  %v7442_v32 = vmax.f32 %v7344_v15, 0.0  ;;  %v7349_v41 = vadd.f32 %v10913_v4, %v7247_v0  ;;  %v7443_v57 = vmax.f32 %v7345_v23, 0.0  ;;  %v7350_v16 = vadd.f32 %v10913_v4, %v7248_v19  ;;  %v7158_v15 = vld [vmem:[#allocation2 + $0x118] sm:$0xff]  ;;  %v7160_v19 = vld [vmem:[#allocation2 + $0x128] sm:$0xff] }
 0x56f   : > { %7635 = vst.msk [vmem:[%s9918_s7 + $0x34] sm:$0xf] %vm7621_vm3, %v7536_v33  ;;  %v7444_v2 = vmax.f32 %v7346_v9, 0.0  ;;  %v7445_v52 = vmax.f32 %v7347_v49, 0.0  ;;  %v7539_v27 = vpack.c.bf16 %v7441_v1, %v7441_v1  ;;  %v7446_v44 = vmax.f32 %v7348_v55, 0.0  ;;  %v7156_v33 = vld [vmem:[#allocation2 + $0x108] sm:$0xff] }
 0x570   : > { %7636 = vst.msk [vmem:[%s9918_s7 + $0x38] sm:$0xf] %vm7621_vm3, %v7537_v46  ;;  %v7540_v6 = vpack.c.bf16 %v7442_v32, %v7442_v32  ;;  %v7447_v17 = vmax.f32 %v7349_v41, 0.0  ;;  %v7541_v7 = vpack.c.bf16 %v7443_v57, %v7443_v57  ;;  %v7448_v28 = vmax.f32 %v7350_v16, 0.0  ;;  %v7161_v1 = vld [vmem:[#allocation2 + $0x130] sm:$0xff] }
 0x571   : > { %7637 = vst.msk [vmem:[%s9918_s7 + $0x3c] sm:$0xf] %vm7621_vm3, %v7538_v38  ;;  %v7542_v24 = vpack.c.bf16 %v7444_v2, %v7444_v2  ;;  %v7543_v20 = vpack.c.bf16 %v7445_v52, %v7445_v52  ;;  %v7544_v26 = vpack.c.bf16 %v7446_v44, %v7446_v44  ;;  %v7249_v47 = vmul.f32 %v10908_v31, %v7147_v8  ;;  %v7157_v38 = vld [vmem:[#allocation2 + $0x110] sm:$0xff] }
 0x572   : > { %7638 = vst.msk [vmem:[%s9918_s7 + $0x40] sm:$0xf] %vm7621_vm3, %v7539_v27  ;;  %v7545_v51 = vpack.c.bf16 %v7447_v17, %v7447_v17  ;;  %v7250_v11 = vmul.f32 %v10908_v31, %v7148_v56  ;;  %v7546_v42 = vpack.c.bf16 %v7448_v28, %v7448_v28  ;;  %v7251_v14 = vmul.f32 %v10908_v31, %v7149_v63  ;;  %v7162_v56 = vld [vmem:[#allocation2 + $0x138] sm:$0xff] }
 0x573   : > { %7639 = vst.msk [vmem:[%s9918_s7 + $0x44] sm:$0xf] %vm7621_vm3, %v7540_v6  ;;  %v7252_v39 = vmul.f32 %v10908_v31, %v7150_v53  ;;  %v7253_v34 = vmul.f32 %v10908_v31, %v7151_v60  ;;  %v7351_v54 = vadd.f32 %v10913_v4, %v7249_v47  ;;  %v7254_v37 = vmul.f32 %v10908_v31, %v7152_v36 }
 0x574   : > { %7640 = vst.msk [vmem:[%s9918_s7 + $0x48] sm:$0xf] %vm7621_vm3, %v7541_v7  ;;  %v7352_v48 = vadd.f32 %v10913_v4, %v7250_v11  ;;  %v7255_v5 = vmul.f32 %v10908_v31, %v7153_v35  ;;  %v7353_v61 = vadd.f32 %v10913_v4, %v7251_v14  ;;  %v7256_v43 = vmul.f32 %v10908_v31, %v7154_v3  ;;  %v7163_v35 = vld [vmem:[#allocation2 + $0x140] sm:$0xff] }
 0x575   : > { %7641 = vst.msk [vmem:[%s9918_s7 + $0x4c] sm:$0xf] %vm7621_vm3, %v7542_v24  ;;  %v7354_v22 = vadd.f32 %v10913_v4, %v7252_v39  ;;  %v7355_v29 = vadd.f32 %v10913_v4, %v7253_v34  ;;  %v7449_v10 = vmax.f32 %v7351_v54, 0.0  ;;  %v7356_v40 = vadd.f32 %v10913_v4, %v7254_v37  ;;  %v7167_v37 = vld [vmem:[#allocation2 + $0x160] sm:$0xff] }
 0x576   : > { %7642 = vst.msk [vmem:[%s9918_s7 + $0x50] sm:$0xf] %vm7621_vm3, %v7543_v20  ;;  %v7450_v58 = vmax.f32 %v7352_v48, 0.0  ;;  %v7357_v21 = vadd.f32 %v10913_v4, %v7255_v5  ;;  %v7451_v46 = vmax.f32 %v7353_v61, 0.0  ;;  %v7358_v25 = vadd.f32 %v10913_v4, %v7256_v43  ;;  %v7166_v48 = vld [vmem:[#allocation2 + $0x158] sm:$0xff]  ;;  %v7168_v43 = vld [vmem:[#allocation2 + $0x168] sm:$0xff] }
 0x577   : > { %7643 = vst.msk [vmem:[%s9918_s7 + $0x54] sm:$0xf] %vm7621_vm3, %v7544_v26  ;;  %v7452_v30 = vmax.f32 %v7354_v22, 0.0  ;;  %v7453_v62 = vmax.f32 %v7355_v29, 0.0  ;;  %v7547_v13 = vpack.c.bf16 %v7449_v10, %v7449_v10  ;;  %v7454_v50 = vmax.f32 %v7356_v40, 0.0  ;;  %v7164_v26 = vld [vmem:[#allocation2 + $0x148] sm:$0xff] }
 0x578   : > { %7644 = vst.msk [vmem:[%s9918_s7 + $0x58] sm:$0xf] %vm7621_vm3, %v7545_v51  ;;  %v7548_v12 = vpack.c.bf16 %v7450_v58, %v7450_v58  ;;  %v7455_v45 = vmax.f32 %v7357_v21, 0.0  ;;  %v7549_v0 = vpack.c.bf16 %v7451_v46, %v7451_v46  ;;  %v7456_v49 = vmax.f32 %v7358_v25, 0.0  ;;  %v7169_v10 = vld [vmem:[#allocation2 + $0x170] sm:$0xff] }
 0x579   : > { %7645 = vst.msk [vmem:[%s9918_s7 + $0x5c] sm:$0xf] %vm7621_vm3, %v7546_v42  ;;  %v7550_v23 = vpack.c.bf16 %v7452_v30, %v7452_v30  ;;  %v7551_v9 = vpack.c.bf16 %v7453_v62, %v7453_v62  ;;  %v7552_v32 = vpack.c.bf16 %v7454_v50, %v7454_v50  ;;  %v7257_v41 = vmul.f32 %v10908_v31, %v7155_v18  ;;  %v7165_v42 = vld [vmem:[#allocation2 + $0x150] sm:$0xff] }
 0x57a   : > { %7646 = vst.msk [vmem:[%s9918_s7 + $0x60] sm:$0xf] %vm7621_vm3, %v7547_v13  ;;  %v7553_v55 = vpack.c.bf16 %v7455_v45, %v7455_v45  ;;  %v7258_v8 = vmul.f32 %v10908_v31, %v7156_v33  ;;  %v7554_v57 = vpack.c.bf16 %v7456_v49, %v7456_v49  ;;  %v7259_v2 = vmul.f32 %v10908_v31, %v7157_v38  ;;  %v7170_v33 = vld [vmem:[#allocation2 + $0x178] sm:$0xff] }
 0x57b   : > { %7647 = vst.msk [vmem:[%s9918_s7 + $0x64] sm:$0xf] %vm7621_vm3, %v7548_v12  ;;  %v7260_v52 = vmul.f32 %v10908_v31, %v7158_v15  ;;  %v7261_v16 = vmul.f32 %v10908_v31, %v7159_v59  ;;  %v7359_v63 = vadd.f32 %v10913_v4, %v7257_v41  ;;  %v7262_v6 = vmul.f32 %v10908_v31, %v7160_v19 }
 0x57c   : > { %7648 = vst.msk [vmem:[%s9918_s7 + $0x68] sm:$0xf] %vm7621_vm3, %v7549_v0  ;;  %v7360_v27 = vadd.f32 %v10913_v4, %v7258_v8  ;;  %v7263_v44 = vmul.f32 %v10908_v31, %v7161_v1  ;;  %v7361_v17 = vadd.f32 %v10913_v4, %v7259_v2  ;;  %v7264_v7 = vmul.f32 %v10908_v31, %v7162_v56  ;;  %v7171_v1 = vld [vmem:[#allocation2 + $0x180] sm:$0xff] }
 0x57d   : > { %7649 = vst.msk [vmem:[%s9918_s7 + $0x6c] sm:$0xf] %vm7621_vm3, %v7550_v23  ;;  %v7362_v53 = vadd.f32 %v10913_v4, %v7260_v52  ;;  %v7363_v60 = vadd.f32 %v10913_v4, %v7261_v16  ;;  %v7457_v24 = vmax.f32 %v7359_v63, 0.0  ;;  %v7364_v28 = vadd.f32 %v10913_v4, %v7262_v6  ;;  %v7175_v6 = vld [vmem:[#allocation2 + $0x1a0] sm:$0xff] }
 0x57e   : > { %7650 = vst.msk [vmem:[%s9918_s7 + $0x70] sm:$0xf] %vm7621_vm3, %v7551_v9  ;;  %v7458_v20 = vmax.f32 %v7360_v27, 0.0  ;;  %v7365_v36 = vadd.f32 %v10913_v4, %v7263_v44  ;;  %v7459_v51 = vmax.f32 %v7361_v17, 0.0  ;;  %v7366_v3 = vadd.f32 %v10913_v4, %v7264_v7  ;;  %v7174_v27 = vld [vmem:[#allocation2 + $0x198] sm:$0xff]  ;;  %v7176_v7 = vld [vmem:[#allocation2 + $0x1a8] sm:$0xff] }
 0x57f   : > { %7651 = vst.msk [vmem:[%s9918_s7 + $0x74] sm:$0xf] %vm7621_vm3, %v7552_v32  ;;  %v7460_v47 = vmax.f32 %v7362_v53, 0.0  ;;  %v7461_v11 = vmax.f32 %v7363_v60, 0.0  ;;  %v7555_v14 = vpack.c.bf16 %v7457_v24, %v7457_v24  ;;  %v7462_v34 = vmax.f32 %v7364_v28, 0.0  ;;  %v7172_v32 = vld [vmem:[#allocation2 + $0x188] sm:$0xff] }
 0x580   : > { %7652 = vst.msk [vmem:[%s9918_s7 + $0x78] sm:$0xf] %vm7621_vm3, %v7553_v55  ;;  %v7556_v39 = vpack.c.bf16 %v7458_v20, %v7458_v20  ;;  %v7463_v54 = vmax.f32 %v7365_v36, 0.0  ;;  %v7557_v5 = vpack.c.bf16 %v7459_v51, %v7459_v51  ;;  %v7464_v29 = vmax.f32 %v7366_v3, 0.0  ;;  %v7177_v24 = vld [vmem:[#allocation2 + $0x1b0] sm:$0xff] }
 0x581   : > { %7653 = vst.msk [vmem:[%s9918_s7 + $0x7c] sm:$0xf] %vm7621_vm3, %v7554_v57  ;;  %v7558_v61 = vpack.c.bf16 %v7460_v47, %v7460_v47  ;;  %v7559_v22 = vpack.c.bf16 %v7461_v11, %v7461_v11  ;;  %v7560_v58 = vpack.c.bf16 %v7462_v34, %v7462_v34  ;;  %v7265_v21 = vmul.f32 %v10908_v31, %v7163_v35  ;;  %v7173_v57 = vld [vmem:[#allocation2 + $0x190] sm:$0xff] }
 0x582   : > { %7654 = vst.msk [vmem:[%s9918_s7 + $0x80] sm:$0xf] %vm7621_vm3, %v7555_v14  ;;  %v7561_v40 = vpack.c.bf16 %v7463_v54, %v7463_v54  ;;  %v7266_v18 = vmul.f32 %v10908_v31, %v7164_v26  ;;  %v7562_v46 = vpack.c.bf16 %v7464_v29, %v7464_v29  ;;  %v7267_v30 = vmul.f32 %v10908_v31, %v7165_v42  ;;  %v7178_v26 = vld [vmem:[#allocation2 + $0x1b8] sm:$0xff] }
 0x583   : > { %7655 = vst.msk [vmem:[%s9918_s7 + $0x84] sm:$0xf] %vm7621_vm3, %v7556_v39  ;;  %v7268_v62 = vmul.f32 %v10908_v31, %v7166_v48  ;;  %v7269_v25 = vmul.f32 %v10908_v31, %v7167_v37  ;;  %v7367_v38 = vadd.f32 %v10913_v4, %v7265_v21  ;;  %v7270_v12 = vmul.f32 %v10908_v31, %v7168_v43 }
 0x584   : > { %7656 = vst.msk [vmem:[%s9918_s7 + $0x88] sm:$0xf] %vm7621_vm3, %v7557_v5  ;;  %v7368_v13 = vadd.f32 %v10913_v4, %v7266_v18  ;;  %v7271_v50 = vmul.f32 %v10908_v31, %v7169_v10  ;;  %v7369_v45 = vadd.f32 %v10913_v4, %v7267_v30  ;;  %v7272_v0 = vmul.f32 %v10908_v31, %v7170_v33  ;;  %v7179_v10 = vld [vmem:[#allocation2 + $0x1c0] sm:$0xff] }
 0x585   : > { %7657 = vst.msk [vmem:[%s9918_s7 + $0x8c] sm:$0xf] %vm7621_vm3, %v7558_v61  ;;  %v7370_v15 = vadd.f32 %v10913_v4, %v7268_v62  ;;  %v7371_v59 = vadd.f32 %v10913_v4, %v7269_v25  ;;  %v7465_v23 = vmax.f32 %v7367_v38, 0.0  ;;  %v7372_v49 = vadd.f32 %v10913_v4, %v7270_v12  ;;  %v7183_v12 = vld [vmem:[#allocation2 + $0x1e0] sm:$0xff] }
 0x586   : > { %7658 = vst.msk [vmem:[%s9918_s7 + $0x90] sm:$0xf] %vm7621_vm3, %v7559_v22  ;;  %v7466_v9 = vmax.f32 %v7368_v13, 0.0  ;;  %v7373_v19 = vadd.f32 %v10913_v4, %v7271_v50  ;;  %v7467_v55 = vmax.f32 %v7369_v45, 0.0  ;;  %v7374_v56 = vadd.f32 %v10913_v4, %v7272_v0  ;;  %v7182_v13 = vld [vmem:[#allocation2 + $0x1d8] sm:$0xff]  ;;  %v7184_v0 = vld [vmem:[#allocation2 + $0x1e8] sm:$0xff] }
 0x587   : > { %7659 = vst.msk [vmem:[%s9918_s7 + $0x94] sm:$0xf] %vm7621_vm3, %v7560_v58  ;;  %v7468_v41 = vmax.f32 %v7370_v15, 0.0  ;;  %v7469_v8 = vmax.f32 %v7371_v59, 0.0  ;;  %v7563_v2 = vpack.c.bf16 %v7465_v23, %v7465_v23  ;;  %v7470_v16 = vmax.f32 %v7372_v49, 0.0  ;;  %v7180_v58 = vld [vmem:[#allocation2 + $0x1c8] sm:$0xff] }
 0x588   : > { %7660 = vst.msk [vmem:[%s9918_s7 + $0x98] sm:$0xf] %vm7621_vm3, %v7561_v40  ;;  %v7564_v52 = vpack.c.bf16 %v7466_v9, %v7466_v9  ;;  %v7471_v63 = vmax.f32 %v7373_v19, 0.0  ;;  %v7565_v44 = vpack.c.bf16 %v7467_v55, %v7467_v55  ;;  %v7472_v60 = vmax.f32 %v7374_v56, 0.0  ;;  %v7185_v23 = vld [vmem:[#allocation2 + $0x1f0] sm:$0xff] }
 0x589   : > { %7661 = vst.msk [vmem:[%s9918_s7 + $0x9c] sm:$0xf] %vm7621_vm3, %v7562_v46  ;;  %v7566_v17 = vpack.c.bf16 %v7468_v41, %v7468_v41  ;;  %v7567_v53 = vpack.c.bf16 %v7469_v8, %v7469_v8  ;;  %v7568_v20 = vpack.c.bf16 %v7470_v16, %v7470_v16  ;;  %v7273_v36 = vmul.f32 %v10908_v31, %v7171_v1  ;;  %v7181_v46 = vld [vmem:[#allocation2 + $0x1d0] sm:$0xff] }
 0x58a   : > { %7662 = vst.msk [vmem:[%s9918_s7 + $0xa0] sm:$0xf] %vm7621_vm3, %v7563_v2  ;;  %v7569_v28 = vpack.c.bf16 %v7471_v63, %v7471_v63  ;;  %v7274_v35 = vmul.f32 %v10908_v31, %v7172_v32  ;;  %v7570_v51 = vpack.c.bf16 %v7472_v60, %v7472_v60  ;;  %v7275_v47 = vmul.f32 %v10908_v31, %v7173_v57  ;;  %v7186_v32 = vld [vmem:[#allocation2 + $0x1f8] sm:$0xff] }
 0x58b   : > { %7663 = vst.msk [vmem:[%s9918_s7 + $0xa4] sm:$0xf] %vm7621_vm3, %v7564_v52  ;;  %v7276_v11 = vmul.f32 %v10908_v31, %v7174_v27  ;;  %v7277_v3 = vmul.f32 %v10908_v31, %v7175_v6  ;;  %v7375_v42 = vadd.f32 %v10913_v4, %v7273_v36  ;;  %v7278_v39 = vmul.f32 %v10908_v31, %v7176_v7 }
 0x58c   : > { %7664 = vst.msk [vmem:[%s9918_s7 + $0xa8] sm:$0xf] %vm7621_vm3, %v7565_v44  ;;  %v7376_v14 = vadd.f32 %v10913_v4, %v7274_v35  ;;  %v7279_v34 = vmul.f32 %v10908_v31, %v7177_v24  ;;  %v7377_v54 = vadd.f32 %v10913_v4, %v7275_v47  ;;  %v7280_v5 = vmul.f32 %v10908_v31, %v7178_v26  ;;  %v7187_v24 = vld [vmem:[#allocation2 + $0x200] sm:$0xff] }
 0x58d   : > { %7665 = vst.msk [vmem:[%s9918_s7 + $0xac] sm:$0xf] %vm7621_vm3, %v7566_v17  ;;  %v7378_v48 = vadd.f32 %v10913_v4, %v7276_v11  ;;  %v7379_v37 = vadd.f32 %v10913_v4, %v7277_v3  ;;  %v7473_v61 = vmax.f32 %v7375_v42, 0.0  ;;  %v7380_v29 = vadd.f32 %v10913_v4, %v7278_v39  ;;  %v7191_v39 = vld [vmem:[#allocation2 + $0x220] sm:$0xff] }
 0x58e   : > { %7666 = vst.msk [vmem:[%s9918_s7 + $0xb0] sm:$0xf] %vm7621_vm3, %v7567_v53  ;;  %v7474_v22 = vmax.f32 %v7376_v14, 0.0  ;;  %v7381_v43 = vadd.f32 %v10913_v4, %v7279_v34  ;;  %v7475_v40 = vmax.f32 %v7377_v54, 0.0  ;;  %v7382_v33 = vadd.f32 %v10913_v4, %v7280_v5  ;;  %v7190_v14 = vld [vmem:[#allocation2 + $0x218] sm:$0xff]  ;;  %v7192_v5 = vld [vmem:[#allocation2 + $0x228] sm:$0xff] }
 0x58f   : > { %7667 = vst.msk [vmem:[%s9918_s7 + $0xb4] sm:$0xf] %vm7621_vm3, %v7568_v20  ;;  %v7476_v21 = vmax.f32 %v7378_v48, 0.0  ;;  %v7477_v18 = vmax.f32 %v7379_v37, 0.0  ;;  %v7571_v30 = vpack.c.bf16 %v7473_v61, %v7473_v61  ;;  %v7478_v25 = vmax.f32 %v7380_v29, 0.0  ;;  %v7188_v20 = vld [vmem:[#allocation2 + $0x208] sm:$0xff] }
 0x590   : > { %7668 = vst.msk [vmem:[%s9918_s7 + $0xb8] sm:$0xf] %vm7621_vm3, %v7569_v28  ;;  %v7572_v62 = vpack.c.bf16 %v7474_v22, %v7474_v22  ;;  %v7479_v38 = vmax.f32 %v7381_v43, 0.0  ;;  %v7573_v50 = vpack.c.bf16 %v7475_v40, %v7475_v40  ;;  %v7480_v59 = vmax.f32 %v7382_v33, 0.0  ;;  %v7193_v61 = vld [vmem:[#allocation2 + $0x230] sm:$0xff] }
 0x591   : > { %7669 = vst.msk [vmem:[%s9918_s7 + $0xbc] sm:$0xf] %vm7621_vm3, %v7570_v51  ;;  %v7574_v45 = vpack.c.bf16 %v7476_v21, %v7476_v21  ;;  %v7575_v15 = vpack.c.bf16 %v7477_v18, %v7477_v18  ;;  %v7576_v9 = vpack.c.bf16 %v7478_v25, %v7478_v25  ;;  %v7281_v19 = vmul.f32 %v10908_v31, %v7179_v10  ;;  %v7189_v51 = vld [vmem:[#allocation2 + $0x210] sm:$0xff] }
 0x592   : > { %7670 = vst.msk [vmem:[%s9918_s7 + $0xc0] sm:$0xf] %vm7621_vm3, %v7571_v30  ;;  %v7577_v49 = vpack.c.bf16 %v7479_v38, %v7479_v38  ;;  %v7282_v1 = vmul.f32 %v10908_v31, %v7180_v58  ;;  %v7578_v55 = vpack.c.bf16 %v7480_v59, %v7480_v59  ;;  %v7283_v41 = vmul.f32 %v10908_v31, %v7181_v46  ;;  %v7194_v58 = vld [vmem:[#allocation2 + $0x238] sm:$0xff] }
 0x593   : > { %7671 = vst.msk [vmem:[%s9918_s7 + $0xc4] sm:$0xf] %vm7621_vm3, %v7572_v62  ;;  %v7284_v8 = vmul.f32 %v10908_v31, %v7182_v13  ;;  %v7285_v56 = vmul.f32 %v10908_v31, %v7183_v12  ;;  %v7383_v57 = vadd.f32 %v10913_v4, %v7281_v19  ;;  %v7286_v52 = vmul.f32 %v10908_v31, %v7184_v0 }
 0x594   : > { %7672 = vst.msk [vmem:[%s9918_s7 + $0xc8] sm:$0xf] %vm7621_vm3, %v7573_v50  ;;  %v7384_v2 = vadd.f32 %v10913_v4, %v7282_v1  ;;  %v7287_v16 = vmul.f32 %v10908_v31, %v7185_v23  ;;  %v7385_v63 = vadd.f32 %v10913_v4, %v7283_v41  ;;  %v7288_v44 = vmul.f32 %v10908_v31, %v7186_v32  ;;  %v7195_v23 = vld [vmem:[#allocation2 + $0x240] sm:$0xff] }
 0x595   : > { %7673 = vst.msk [vmem:[%s9918_s7 + $0xcc] sm:$0xf] %vm7621_vm3, %v7574_v45  ;;  %v7386_v27 = vadd.f32 %v10913_v4, %v7284_v8  ;;  %v7387_v6 = vadd.f32 %v10913_v4, %v7285_v56  ;;  %v7481_v17 = vmax.f32 %v7383_v57, 0.0  ;;  %v7388_v60 = vadd.f32 %v10913_v4, %v7286_v52  ;;  %v7199_v52 = vld [vmem:[#allocation2 + $0x260] sm:$0xff] }
 0x596   : > { %7674 = vst.msk [vmem:[%s9918_s7 + $0xd0] sm:$0xf] %vm7621_vm3, %v7575_v15  ;;  %v7482_v53 = vmax.f32 %v7384_v2, 0.0  ;;  %v7389_v7 = vadd.f32 %v10913_v4, %v7287_v16  ;;  %v7483_v28 = vmax.f32 %v7385_v63, 0.0  ;;  %v7390_v26 = vadd.f32 %v10913_v4, %v7288_v44  ;;  %v7198_v2 = vld [vmem:[#allocation2 + $0x258] sm:$0xff]  ;;  %v7200_v44 = vld [vmem:[#allocation2 + $0x268] sm:$0xff] }
 0x597   : > { %7675 = vst.msk [vmem:[%s9918_s7 + $0xd4] sm:$0xf] %vm7621_vm3, %v7576_v9  ;;  %v7484_v36 = vmax.f32 %v7386_v27, 0.0  ;;  %v7485_v35 = vmax.f32 %v7387_v6, 0.0  ;;  %v7579_v47 = vpack.c.bf16 %v7481_v17, %v7481_v17  ;;  %v7486_v3 = vmax.f32 %v7388_v60, 0.0  ;;  %v7196_v9 = vld [vmem:[#allocation2 + $0x248] sm:$0xff] }
 0x598   : > { %7676 = vst.msk [vmem:[%s9918_s7 + $0xd8] sm:$0xf] %vm7621_vm3, %v7577_v49  ;;  %v7580_v11 = vpack.c.bf16 %v7482_v53, %v7482_v53  ;;  %v7487_v42 = vmax.f32 %v7389_v7, 0.0  ;;  %v7581_v34 = vpack.c.bf16 %v7483_v28, %v7483_v28  ;;  %v7488_v37 = vmax.f32 %v7390_v26, 0.0  ;;  %v7201_v17 = vld [vmem:[#allocation2 + $0x270] sm:$0xff] }
 0x599   : > { %7677 = vst.msk [vmem:[%s9918_s7 + $0xdc] sm:$0xf] %vm7621_vm3, %v7578_v55  ;;  %v7582_v54 = vpack.c.bf16 %v7484_v36, %v7484_v36  ;;  %v7583_v48 = vpack.c.bf16 %v7485_v35, %v7485_v35  ;;  %v7584_v22 = vpack.c.bf16 %v7486_v3, %v7486_v3  ;;  %v7289_v43 = vmul.f32 %v10908_v31, %v7187_v24  ;;  %v7197_v55 = vld [vmem:[#allocation2 + $0x250] sm:$0xff] }
 0x59a   : > { %7678 = vst.msk [vmem:[%s9918_s7 + $0xe0] sm:$0xf] %vm7621_vm3, %v7579_v47  ;;  %v7585_v29 = vpack.c.bf16 %v7487_v42, %v7487_v42  ;;  %v7290_v10 = vmul.f32 %v10908_v31, %v7188_v20  ;;  %v7586_v40 = vpack.c.bf16 %v7488_v37, %v7488_v37  ;;  %v7291_v21 = vmul.f32 %v10908_v31, %v7189_v51  ;;  %v7202_v20 = vld [vmem:[#allocation2 + $0x278] sm:$0xff] }
 0x59b   : > { %7679 = vst.msk [vmem:[%s9918_s7 + $0xe4] sm:$0xf] %vm7621_vm3, %v7580_v11  ;;  %v7292_v18 = vmul.f32 %v10908_v31, %v7190_v14  ;;  %v7293_v33 = vmul.f32 %v10908_v31, %v7191_v39  ;;  %v7391_v46 = vadd.f32 %v10913_v4, %v7289_v43  ;;  %v7294_v62 = vmul.f32 %v10908_v31, %v7192_v5 }
 0x59c   : > { %7680 = vst.msk [vmem:[%s9918_s7 + $0xe8] sm:$0xf] %vm7621_vm3, %v7581_v34  ;;  %v7392_v30 = vadd.f32 %v10913_v4, %v7290_v10  ;;  %v7295_v25 = vmul.f32 %v10908_v31, %v7193_v61  ;;  %v7393_v38 = vadd.f32 %v10913_v4, %v7291_v21  ;;  %v7296_v50 = vmul.f32 %v10908_v31, %v7194_v58  ;;  %v7203_v61 = vld [vmem:[#allocation2 + $0x280] sm:$0xff] }
 0x59d   : > { %7681 = vst.msk [vmem:[%s9918_s7 + $0xec] sm:$0xf] %vm7621_vm3, %v7582_v54  ;;  %v7394_v13 = vadd.f32 %v10913_v4, %v7292_v18  ;;  %v7395_v12 = vadd.f32 %v10913_v4, %v7293_v33  ;;  %v7489_v45 = vmax.f32 %v7391_v46, 0.0  ;;  %v7396_v59 = vadd.f32 %v10913_v4, %v7294_v62  ;;  %v7207_v62 = vld [vmem:[#allocation2 + $0x2a0] sm:$0xff] }
 0x59e   : > { %7682 = vst.msk [vmem:[%s9918_s7 + $0xf0] sm:$0xf] %vm7621_vm3, %v7583_v48  ;;  %v7490_v15 = vmax.f32 %v7392_v30, 0.0  ;;  %v7397_v0 = vadd.f32 %v10913_v4, %v7295_v25  ;;  %v7491_v49 = vmax.f32 %v7393_v38, 0.0  ;;  %v7398_v32 = vadd.f32 %v10913_v4, %v7296_v50  ;;  %v7206_v30 = vld [vmem:[#allocation2 + $0x298] sm:$0xff]  ;;  %v7208_v50 = vld [vmem:[#allocation2 + $0x2a8] sm:$0xff] }
 0x59f   : > { %7683 = vst.msk [vmem:[%s9918_s7 + $0xf4] sm:$0xf] %vm7621_vm3, %v7584_v22  ;;  %v7492_v19 = vmax.f32 %v7394_v13, 0.0  ;;  %v7493_v1 = vmax.f32 %v7395_v12, 0.0  ;;  %v7587_v41 = vpack.c.bf16 %v7489_v45, %v7489_v45  ;;  %v7494_v56 = vmax.f32 %v7396_v59, 0.0  ;;  %v7204_v22 = vld [vmem:[#allocation2 + $0x288] sm:$0xff] }
 0x5a0   : > { %7684 = vst.msk [vmem:[%s9918_s7 + $0xf8] sm:$0xf] %vm7621_vm3, %v7585_v29  ;;  %v7588_v8 = vpack.c.bf16 %v7490_v15, %v7490_v15  ;;  %v7495_v57 = vmax.f32 %v7397_v0, 0.0  ;;  %v7589_v16 = vpack.c.bf16 %v7491_v49, %v7491_v49  ;;  %v7496_v6 = vmax.f32 %v7398_v32, 0.0  ;;  %v7209_v45 = vld [vmem:[#allocation2 + $0x2b0] sm:$0xff] }
 0x5a1   : > { %7685 = vst.msk [vmem:[%s9918_s7 + $0xfc] sm:$0xf] %vm7621_vm3, %v7586_v40  ;;  %v7590_v63 = vpack.c.bf16 %v7492_v19, %v7492_v19  ;;  %v7591_v27 = vpack.c.bf16 %v7493_v1, %v7493_v1  ;;  %v7592_v53 = vpack.c.bf16 %v7494_v56, %v7494_v56  ;;  %v7297_v7 = vmul.f32 %v10908_v31, %v7195_v23  ;;  %v7205_v40 = vld [vmem:[#allocation2 + $0x290] sm:$0xff] }
 0x5a2   : > { %7686 = vst.msk [vmem:[%s9918_s7 + $0x100] sm:$0xf] %vm7621_vm3, %v7587_v41  ;;  %v7593_v60 = vpack.c.bf16 %v7495_v57, %v7495_v57  ;;  %v7298_v24 = vmul.f32 %v10908_v31, %v7196_v9  ;;  %v7594_v28 = vpack.c.bf16 %v7496_v6, %v7496_v6  ;;  %v7299_v36 = vmul.f32 %v10908_v31, %v7197_v55  ;;  %v7210_v9 = vld [vmem:[#allocation2 + $0x2b8] sm:$0xff] }
 0x5a3   : > { %7687 = vst.msk [vmem:[%s9918_s7 + $0x104] sm:$0xf] %vm7621_vm3, %v7588_v8  ;;  %v7300_v35 = vmul.f32 %v10908_v31, %v7198_v2  ;;  %v7301_v26 = vmul.f32 %v10908_v31, %v7199_v52  ;;  %v7399_v51 = vadd.f32 %v10913_v4, %v7297_v7  ;;  %v7302_v11 = vmul.f32 %v10908_v31, %v7200_v44 }
 0x5a4   : > { %7688 = vst.msk [vmem:[%s9918_s7 + $0x108] sm:$0xf] %vm7621_vm3, %v7589_v16  ;;  %v7400_v47 = vadd.f32 %v10913_v4, %v7298_v24  ;;  %v7303_v3 = vmul.f32 %v10908_v31, %v7201_v17  ;;  %v7401_v42 = vadd.f32 %v10913_v4, %v7299_v36  ;;  %v7304_v34 = vmul.f32 %v10908_v31, %v7202_v20  ;;  %v7211_v17 = vld [vmem:[#allocation2 + $0x2c0] sm:$0xff] }
 0x5a5   : > { %7689 = vst.msk [vmem:[%s9918_s7 + $0x10c] sm:$0xf] %vm7621_vm3, %v7590_v63  ;;  %v7402_v14 = vadd.f32 %v10913_v4, %v7300_v35  ;;  %v7403_v39 = vadd.f32 %v10913_v4, %v7301_v26  ;;  %v7497_v54 = vmax.f32 %v7399_v51, 0.0  ;;  %v7404_v37 = vadd.f32 %v10913_v4, %v7302_v11  ;;  %v7214_v51 = vld [vmem:[#allocation2 + $0x2d8] sm:$0xff] }
 0x5a6   : > { %7690 = vst.msk [vmem:[%s9918_s7 + $0x110] sm:$0xf] %vm7621_vm3, %v7591_v27  ;;  %v7498_v48 = vmax.f32 %v7400_v47, 0.0  ;;  %v7405_v5 = vadd.f32 %v10913_v4, %v7303_v3  ;;  %v7499_v29 = vmax.f32 %v7401_v42, 0.0  ;;  %v7406_v58 = vadd.f32 %v10913_v4, %v7304_v34  ;;  %v7215_v47 = vld [vmem:[#allocation2 + $0x2e0] sm:$0xff] }
 0x5a7   : > { %7691 = vst.msk [vmem:[%s9918_s7 + $0x114] sm:$0xf] %vm7621_vm3, %v7592_v53  ;;  %v7500_v43 = vmax.f32 %v7402_v14, 0.0  ;;  %v7501_v10 = vmax.f32 %v7403_v39, 0.0  ;;  %v7595_v21 = vpack.c.bf16 %v7497_v54, %v7497_v54  ;;  %v7502_v33 = vmax.f32 %v7404_v37, 0.0  ;;  %v7212_v53 = vld [vmem:[#allocation2 + $0x2c8] sm:$0xff] }
 0x5a8   : > { %7692 = vst.msk [vmem:[%s9918_s7 + $0x118] sm:$0xf] %vm7621_vm3, %v7593_v60  ;;  %v7596_v18 = vpack.c.bf16 %v7498_v48, %v7498_v48  ;;  %v7503_v46 = vmax.f32 %v7405_v5, 0.0  ;;  %v7597_v25 = vpack.c.bf16 %v7499_v29, %v7499_v29  ;;  %v7504_v12 = vmax.f32 %v7406_v58, 0.0  ;;  %v7216_v39 = vld [vmem:[#allocation2 + $0x2e8] sm:$0xff] }
 0x5a9   : > { %7693 = vst.msk [vmem:[%s9918_s7 + $0x11c] sm:$0xf] %vm7621_vm3, %v7594_v28  ;;  %v7598_v38 = vpack.c.bf16 %v7500_v43, %v7500_v43  ;;  %v7599_v13 = vpack.c.bf16 %v7501_v10, %v7501_v10  ;;  %v7600_v15 = vpack.c.bf16 %v7502_v33, %v7502_v33  ;;  %v7305_v0 = vmul.f32 %v10908_v31, %v7203_v61  ;;  %v9363_v48 = vld [vmem:[%s11316_s2] ss:$0 sm:$0xff]  ;;  %v7218_v61 = vld [vmem:[#allocation2 + $0x2f8] sm:$0xff] }
 0x5aa   : > { %7694 = vst.msk [vmem:[%s9918_s7 + $0x120] sm:$0xf] %vm7621_vm3, %v7595_v21  ;;  %v7601_v59 = vpack.c.bf16 %v7503_v46, %v7503_v46  ;;  %v7306_v23 = vmul.f32 %v10908_v31, %v7204_v22  ;;  %v7602_v49 = vpack.c.bf16 %v7504_v12, %v7504_v12  ;;  %v7307_v19 = vmul.f32 %v10908_v31, %v7205_v40  ;;  %v9364_v58 = vld [vmem:[%s11317_s3] ss:$0 sm:$0xff] }
 0x5ab   : > { %7695 = vst.msk [vmem:[%s9918_s7 + $0x124] sm:$0xf] %vm7621_vm3, %v7596_v18  ;;  %v7308_v1 = vmul.f32 %v10908_v31, %v7206_v30  ;;  %v7309_v32 = vmul.f32 %v10908_v31, %v7207_v62  ;;  %v7407_v55 = vadd.f32 %v10913_v4, %v7305_v0  ;;  %v7310_v8 = vmul.f32 %v10908_v31, %v7208_v50 }
 0x5ac   : > { %7696 = vst.msk [vmem:[%s9918_s7 + $0x128] sm:$0xf] %vm7621_vm3, %v7597_v25  ;;  %v7408_v41 = vadd.f32 %v10913_v4, %v7306_v23  ;;  %v7311_v56 = vmul.f32 %v10908_v31, %v7209_v45  ;;  %v7409_v57 = vadd.f32 %v10913_v4, %v7307_v19  ;;  %v7312_v16 = vmul.f32 %v10908_v31, %v7210_v9  ;;  %v7213_v31 = vld [vmem:[#allocation2 + $0x2d0] sm:$0xff]  ;;  %v7219_v45 = vld [vmem:[#allocation2 + $0x300] sm:$0xff]  ;;  %v7220_v9 = vld [vmem:[#allocation2 + $0x308] sm:$0xff] }
 0x5ad   : > { %7697 = vst.msk [vmem:[%s9918_s7 + $0x12c] sm:$0xf] %vm7621_vm3, %v7598_v38  ;;  %v7410_v2 = vadd.f32 %v10913_v4, %v7308_v1  ;;  %v7411_v52 = vadd.f32 %v10913_v4, %v7309_v32  ;;  %v7505_v63 = vmax.f32 %v7407_v55, 0.0  ;;  %v7412_v6 = vadd.f32 %v10913_v4, %v7310_v8 }
 0x5ae   : > { %7698 = vst.msk [vmem:[%s9918_s7 + $0x130] sm:$0xf] %vm7621_vm3, %v7599_v13  ;;  %v7506_v27 = vmax.f32 %v7408_v41, 0.0  ;;  %v7413_v44 = vadd.f32 %v10913_v4, %v7311_v56  ;;  %v7507_v60 = vmax.f32 %v7409_v57, 0.0  ;;  %v7414_v20 = vadd.f32 %v10913_v4, %v7312_v16  ;;  %v7217_v4 = vld [vmem:[#allocation2 + $0x2f0] sm:$0xff] }
 0x5af   : > { %7699 = vst.msk [vmem:[%s9918_s7 + $0x134] sm:$0xf] %vm7621_vm3, %v7600_v15  ;;  %v7508_v7 = vmax.f32 %v7410_v2, 0.0  ;;  %v7509_v24 = vmax.f32 %v7411_v52, 0.0  ;;  %v7603_v28 = vpack.c.bf16 %v7505_v63, %v7505_v63  ;;  %v7510_v35 = vmax.f32 %v7412_v6, 0.0 }
 0x5b0   : > { %7700 = vst.msk [vmem:[%s9918_s7 + $0x138] sm:$0xf] %vm7621_vm3, %v7601_v59  ;;  %v7604_v36 = vpack.c.bf16 %v7506_v27, %v7506_v27  ;;  %v7511_v26 = vmax.f32 %v7413_v44, 0.0  ;;  %v7605_v11 = vpack.c.bf16 %v7507_v60, %v7507_v60  ;;  %v7512_v14 = vmax.f32 %v7414_v20, 0.0 }
 0x5b1   : > { %7701 = vst.msk [vmem:[%s9918_s7 + $0x13c] sm:$0xf] %vm7621_vm3, %v7602_v49  ;;  %v7606_v3 = vpack.c.bf16 %v7508_v7, %v7508_v7  ;;  %v7607_v42 = vpack.c.bf16 %v7509_v24, %v7509_v24  ;;  %v7608_v34 = vpack.c.bf16 %v7510_v35, %v7510_v35  ;;  %v7313_v37 = vmul.f32 %v9363_v48, %v7211_v17 }
 0x5b2   : > { %7702 = vst.msk [vmem:[%s9918_s7 + $0x140] sm:$0xf] %vm7621_vm3, %v7603_v28  ;;  %v7609_v54 = vpack.c.bf16 %v7511_v26, %v7511_v26  ;;  %v7314_v5 = vmul.f32 %v9363_v48, %v7212_v53  ;;  %v7610_v22 = vpack.c.bf16 %v7512_v14, %v7512_v14  ;;  %v7315_v29 = vmul.f32 %v9363_v48, %v7213_v31 }
 0x5b3   : > { %7703 = vst.msk [vmem:[%s9918_s7 + $0x144] sm:$0xf] %vm7621_vm3, %v7604_v36  ;;  %v7316_v43 = vmul.f32 %v9363_v48, %v7214_v51  ;;  %v7317_v10 = vmul.f32 %v9363_v48, %v7215_v47  ;;  %v7415_v40 = vadd.f32 %v9364_v58, %v7313_v37  ;;  %v7318_v18 = vmul.f32 %v9363_v48, %v7216_v39 }
 0x5b4   : > { %7704 = vst.msk [vmem:[%s9918_s7 + $0x148] sm:$0xf] %vm7621_vm3, %v7605_v11  ;;  %v7416_v21 = vadd.f32 %v9364_v58, %v7314_v5  ;;  %v7319_v33 = vmul.f32 %v9363_v48, %v7217_v4  ;;  %v7417_v46 = vadd.f32 %v9364_v58, %v7315_v29  ;;  %v7320_v25 = vmul.f32 %v9363_v48, %v7218_v61 }
 0x5b5   : > { %7705 = vst.msk [vmem:[%s9918_s7 + $0x14c] sm:$0xf] %vm7621_vm3, %v7606_v3  ;;  %v7418_v30 = vadd.f32 %v9364_v58, %v7316_v43  ;;  %v7419_v62 = vadd.f32 %v9364_v58, %v7317_v10  ;;  %v7513_v38 = vmax.f32 %v7415_v40, 0.0  ;;  %v7420_v12 = vadd.f32 %v9364_v58, %v7318_v18 }
 0x5b6   : > { %7706 = vst.msk [vmem:[%s9918_s7 + $0x150] sm:$0xf] %vm7621_vm3, %v7607_v42  ;;  %v7514_v13 = vmax.f32 %v7416_v21, 0.0  ;;  %v7421_v50 = vadd.f32 %v9364_v58, %v7319_v33  ;;  %v7515_v15 = vmax.f32 %v7417_v46, 0.0  ;;  %v7422_v23 = vadd.f32 %v9364_v58, %v7320_v25 }
 0x5b7   : > { %7707 = vst.msk [vmem:[%s9918_s7 + $0x154] sm:$0xf] %vm7621_vm3, %v7608_v34  ;;  %v7516_v59 = vmax.f32 %v7418_v30, 0.0  ;;  %v7517_v0 = vmax.f32 %v7419_v62, 0.0  ;;  %v7611_v49 = vpack.c.bf16 %v7513_v38, %v7513_v38  ;;  %v7518_v1 = vmax.f32 %v7420_v12, 0.0 }
 0x5b8   : > { %7708 = vst.msk [vmem:[%s9918_s7 + $0x158] sm:$0xf] %vm7621_vm3, %v7609_v54  ;;  %v7612_v19 = vpack.c.bf16 %v7514_v13, %v7514_v13  ;;  %v7519_v32 = vmax.f32 %v7421_v50, 0.0  ;;  %v7613_v55 = vpack.c.bf16 %v7515_v15, %v7515_v15  ;;  %v7520_v8 = vmax.f32 %v7422_v23, 0.0 }
 0x5b9   : > { %7709 = vst.msk [vmem:[%s9918_s7 + $0x15c] sm:$0xf] %vm7621_vm3, %v7610_v22  ;;  %v7614_v41 = vpack.c.bf16 %v7516_v59, %v7516_v59  ;;  %v7615_v56 = vpack.c.bf16 %v7517_v0, %v7517_v0  ;;  %v7321_v57 = vmul.f32 %v9363_v48, %v7219_v45  ;;  %v7322_v2 = vmul.f32 %v9363_v48, %v7220_v9 }
 0x5ba   : > { %7710 = vst.msk [vmem:[%s9918_s7 + $0x160] sm:$0xf] %vm7621_vm3, %v7611_v49  ;;  %v7616_v52 = vpack.c.bf16 %v7518_v1, %v7518_v1  ;;  %v7617_v16 = vpack.c.bf16 %v7519_v32, %v7519_v32  ;;  %v7618_v6 = vpack.c.bf16 %v7520_v8, %v7520_v8 }
 0x5bb   : > { %7711 = vst.msk [vmem:[%s9918_s7 + $0x164] sm:$0xf] %vm7621_vm3, %v7612_v19  ;;  %v7423_v63 = vadd.f32 %v9364_v58, %v7321_v57  ;;  %v7424_v27 = vadd.f32 %v9364_v58, %v7322_v2 }
 0x5bc   : > { %7712 = vst.msk [vmem:[%s9918_s7 + $0x168] sm:$0xf] %vm7621_vm3, %v7613_v55 }
 0x5bd   : > { %7713 = vst.msk [vmem:[%s9918_s7 + $0x16c] sm:$0xf] %vm7621_vm3, %v7614_v41  ;;  %v7521_v44 = vmax.f32 %v7423_v63, 0.0  ;;  %v7522_v17 = vmax.f32 %v7424_v27, 0.0 }
 0x5be   : > { %7714 = vst.msk [vmem:[%s9918_s7 + $0x170] sm:$0xf] %vm7621_vm3, %v7615_v56 }
 0x5bf   : > { %7715 = vst.msk [vmem:[%s9918_s7 + $0x174] sm:$0xf] %vm7621_vm3, %v7616_v52  ;;  %v7619_v53 = vpack.c.bf16 %v7521_v44, %v7521_v44  ;;  %v7620_v60 = vpack.c.bf16 %v7522_v17, %v7522_v17 }
 0x5c0   : > { %7716 = vst.msk [vmem:[%s9918_s7 + $0x178] sm:$0xf] %vm7621_vm3, %v7617_v16 }
 0x5c1   : > { %7717 = vst.msk [vmem:[%s9918_s7 + $0x17c] sm:$0xf] %vm7621_vm3, %v7618_v6 }
 0x5c2   : > { %7718 = vst.msk [vmem:[%s9918_s7 + $0x180] sm:$0xf] %vm7621_vm3, %v7619_v53 }
 0x5c3   : > { %7719 = vst.msk [vmem:[%s9918_s7 + $0x184] sm:$0xf] %vm7621_vm3, %v7620_v60 }
 0x5c4 PF: > { %s14_s21 = sadd.s32 1, %s9419_s21   ;;  %s11472_s15 = smov %s9399_s16 }
 0x5c5   : > { %p11_p0 = scmp.ge.s32.totalorder %s14_s21, 10   ;;  %s11473_s16 = smov %s9497_s28 }
 0x5c6   : > { %s11474_s17 = smov %s9411_s19  ;;  %s11475_s18 = smov %s9415_s20 }
 0x5c7   : > { %s11476_s19 = smov %s11479_s22  ;;  %s11477_s20 = smov %s11483_s23 }
 0x5c8   :  { %13 = sbr.rel (!%p11_p0) target bundleno = 4 (0x4), region = 142 }

// kernel: chess_classifier_forward.4
= control target key start
LH: loop header
LB: loop body
LE: loop exit
PB: predicated region body
PF: predicated region fallthrough
CT: control target
= control target key end

     0   :  { %s2324_s1 = inlined_call_operand.vmem [shape: bf16[256,128], index: 1, kind: input, shape index: {}]   ;;  %s2325_s0 = inlined_call_operand.vmem [shape: bf16[9,50,256], index: 0, kind: input, shape index: {}]   ;;  %s2326_s2 = inlined_call_operand.vmem [shape: f32[1,128], index: 2, kind: input, shape index: {}]   ;;  %s2327_s3 = inlined_call_operand.vmem [shape: f32[1,128], index: 3, kind: input, shape index: {}]   ;;  %s2328_s4 = inlined_call_operand.vmem [shape: bf16[50,128], index: 4, kind: output, shape index: {}]  }
   0x1   :  { %v1625_v0 = vld [vmem:[%s2324_s1 + $0x38] sm:$0xff]  ;;  %v1637_v2 = vld [vmem:[%s2324_s1 + $0x30] sm:$0xff]  ;;  %v1651_v4 = vld [vmem:[%s2324_s1 + $0x28] sm:$0xff] }
   0x2   :  { %v1630_v1 = vld [vmem:[%s2324_s1 + $0x78] sm:$0xff]  ;;  %189 = vmatpush.bf16.msra.mxu0 %v1625_v0  ;;  %1579 = vmatpush.bf16.msra.mxu2 %v1625_v0  ;;  %v1644_v3 = vld [vmem:[%s2324_s1 + $0x70] sm:$0xff]  ;;  %v1658_v5 = vld [vmem:[%s2324_s1 + $0x68] sm:$0xff] }
   0x3   :  { %217 = vmatpush.bf16.msra.mxu1 %v1630_v1  ;;  %1587 = vmatpush.bf16.msra.mxu3 %v1630_v1  ;;  %v1665_v6 = vld [vmem:[%s2324_s1 + $0x20] sm:$0xff]  ;;  %v1679_v8 = vld [vmem:[%s2324_s1 + $0x18] sm:$0xff]  ;;  %v1693_v10 = vld [vmem:[%s2324_s1 + $0x10] sm:$0xff] }
   0x4   :  { %v1672_v7 = vld [vmem:[%s2324_s1 + $0x60] sm:$0xff]  ;;  %v1686_v9 = vld [vmem:[%s2324_s1 + $0x58] sm:$0xff]  ;;  %v1700_v11 = vld [vmem:[%s2324_s1 + $0x50] sm:$0xff] }
   0x5   :  { %v1707_v12 = vld [vmem:[%s2324_s1 + $0x8] sm:$0xff]  ;;  %v1719_v14 = vld [vmem:[%s2324_s1] sm:$0xff]  ;;  %v23_v28 = vld [vmem:[%s2325_s0 + $0x30] sm:$0x11] }
   0x6   :  { %190 = vmatpush.bf16.msra.mxu0 %v1637_v2  ;;  %1580 = vmatpush.bf16.msra.mxu2 %v1637_v2  ;;  %v1714_v13 = vld [vmem:[%s2324_s1 + $0x48] sm:$0xff]  ;;  %v1724_v15 = vld [vmem:[%s2324_s1 + $0x40] sm:$0xff]  ;;  %v75_v29 = vunpack.c.l.b16 %v23_v28  ;;  %v1166_v30 = vld [vmem:[%s2325_s0 + $0x10] sm:$0xf]  ;;  %v76_v32 = vunpack.c.h.b16 %v23_v28 }
   0x7   :  { %218 = vmatpush.bf16.msra.mxu1 %v1644_v3  ;;  %1588 = vmatpush.bf16.msra.mxu3 %v1644_v3  ;;  %v1158_v16 = vld [vmem:[%s2325_s0] sm:$0xf]  ;;  %v1493_v17 = vld [vmem:[%s2325_s0 + $0x4] sm:$0xf0]  ;;  %v1492_v20 = vld [vmem:[%s2325_s0 + $0x4] sm:$0xf] }
   0x8   :  { %v1174_v18 = vld [vmem:[%s2325_s0 + $0x20] sm:$0xf]  ;;  %v1497_v19 = vld [vmem:[%s2325_s0 + $0x24] sm:$0xf0]  ;;  %v1160_v21 = vld [vmem:[%s2325_s0 + $0x8] sm:$0xf0]  ;;  %v1159_v24 = vor.u32 %v1493_v17, %v1158_v16  ;;  %v83_v36 = vpack.c.b16 %v75_v29, %v75_v29  ;;  %v84_v38 = vpack.c.b16 %v76_v32, %v76_v32 }
   0x9   :  { %v1496_v22 = vld [vmem:[%s2325_s0 + $0x24] sm:$0xf]  ;;  %v1176_v23 = vld [vmem:[%s2325_s0 + $0x28] sm:$0xf0]  ;;  %v1175_v25 = vor.u32 %v1497_v19, %v1174_v18  ;;  %v1163_v26 = vor.u32 %v1492_v20, %v1160_v21  ;;  %v1495_v31 = vld [vmem:[%s2325_s0 + $0x14] sm:$0xf0] }
   0xa   :  { %191 = vmatpush.bf16.msra.mxu0 %v1651_v4  ;;  %1581 = vmatpush.bf16.msra.mxu2 %v1651_v4  ;;  %v1179_v27 = vor.u32 %v1496_v22, %v1176_v23  ;;  %v1494_v33 = vld [vmem:[%s2325_s0 + $0x14] sm:$0xf]  ;;  %v1168_v34 = vld [vmem:[%s2325_s0 + $0x18] sm:$0xf0]  ;;  %v1167_v35 = vor.u32 %v1495_v31, %v1166_v30  ;;  %v1253_v39 = vld [vmem:[%s2325_s0 + $0x38] sm:$0xf] }
   0xb   :  { %219 = vmatpush.bf16.msra.mxu1 %v1658_v5  ;;  %1589 = vmatpush.bf16.msra.mxu3 %v1658_v5  ;;  %v1171_v37 = vor.u32 %v1494_v33, %v1168_v34  ;;  %v1515_v40 = vld [vmem:[%s2325_s0 + $0x3c] sm:$0xf0]  ;;  %v1514_v41 = vld [vmem:[%s2325_s0 + $0x3c] sm:$0xf]  ;;  %v1255_v42 = vld [vmem:[%s2325_s0 + $0x40] sm:$0xf0] }
   0xc   :  { %v1284_v43 = vld [vmem:[%s2325_s0 + $0x70] sm:$0xf]  ;;  %v1521_v44 = vld [vmem:[%s2325_s0 + $0x74] sm:$0xf0]  ;;  %v1520_v45 = vld [vmem:[%s2325_s0 + $0x74] sm:$0xf]  ;;  %v1254_v47 = vor.u32 %v1515_v40, %v1253_v39  ;;  %v1258_v48 = vor.u32 %v1514_v41, %v1255_v42 }
   0xd   :  { %v1286_v46 = vld [vmem:[%s2325_s0 + $0x78] sm:$0xf0]  ;;  %v1285_v49 = vor.u32 %v1521_v44, %v1284_v43  ;;  %v1261_v51 = vld [vmem:[%s2325_s0 + $0x48] sm:$0xf]  ;;  %v1517_v52 = vld [vmem:[%s2325_s0 + $0x4c] sm:$0xf0] }
   0xe   :  { %192 = vmatpush.bf16.msra.mxu0 %v1665_v6  ;;  %1582 = vmatpush.bf16.msra.mxu2 %v1665_v6  ;;  %v1289_v50 = vor.u32 %v1520_v45, %v1286_v46  ;;  %v1516_v53 = vld [vmem:[%s2325_s0 + $0x4c] sm:$0xf]  ;;  %v1263_v54 = vld [vmem:[%s2325_s0 + $0x50] sm:$0xf0]  ;;  %v1292_v55 = vld [vmem:[%s2325_s0 + $0x80] sm:$0xf]  ;;  %v1262_v59 = vor.u32 %v1517_v52, %v1261_v51 }
   0xf   :  { %220 = vmatpush.bf16.msra.mxu1 %v1672_v7  ;;  %1590 = vmatpush.bf16.msra.mxu3 %v1672_v7  ;;  %v1523_v56 = vld [vmem:[%s2325_s0 + $0x84] sm:$0xf0]  ;;  %v1522_v57 = vld [vmem:[%s2325_s0 + $0x84] sm:$0xf]  ;;  %v1294_v58 = vld [vmem:[%s2325_s0 + $0x88] sm:$0xf0]  ;;  %v1266_v60 = vor.u32 %v1516_v53, %v1263_v54 }
  0x10   :  { %v1293_v61 = vor.u32 %v1523_v56, %v1292_v55  ;;  %v1297_v62 = vor.u32 %v1522_v57, %v1294_v58  ;;  %v1269_v63 = vld [vmem:[%s2325_s0 + $0x58] sm:$0xf]  ;;  %v1519_v16 = vld [vmem:[%s2325_s0 + $0x5c] sm:$0xf0]  ;;  %v1518_v17 = vld [vmem:[%s2325_s0 + $0x5c] sm:$0xf] }
  0x11   :  { %v1271_v18 = vld [vmem:[%s2325_s0 + $0x60] sm:$0xf0]  ;;  %v1300_v19 = vld [vmem:[%s2325_s0 + $0x90] sm:$0xf]  ;;  %v1525_v20 = vld [vmem:[%s2325_s0 + $0x94] sm:$0xf0]  ;;  %v1270_v23 = vor.u32 %v1519_v16, %v1269_v63 }
  0x12   :  { %193 = vmatpush.bf16.msra.mxu0 %v1679_v8  ;;  %1583 = vmatpush.bf16.msra.mxu2 %v1679_v8  ;;  %v1524_v21 = vld [vmem:[%s2325_s0 + $0x94] sm:$0xf]  ;;  %v1302_v22 = vld [vmem:[%s2325_s0 + $0x98] sm:$0xf0]  ;;  %v1281_v28 = vld [vmem:[%s2325_s0 + $0xa0] sm:$0x11] }
  0x13   :  { %221 = vmatpush.bf16.msra.mxu1 %v1686_v9  ;;  %1591 = vmatpush.bf16.msra.mxu3 %v1686_v9  ;;  %v380_v31 = vunpack.c.l.b16 %v1281_v28  ;;  %v381_v32 = vunpack.c.h.b16 %v1281_v28  ;;  %v1526_v39 = vld [vmem:[%s2325_s0 + $0xac] sm:$0xf]  ;;  %v1317_v40 = vld [vmem:[%s2325_s0 + $0xb0] sm:$0xf0]  ;;  %v1346_v41 = vld [vmem:[%s2325_s0 + $0xe0] sm:$0xf] }
  0x14   :  { %v1533_v42 = vld [vmem:[%s2325_s0 + $0xe4] sm:$0xf0]  ;;  %v1532_v43 = vld [vmem:[%s2325_s0 + $0xe4] sm:$0xf]  ;;  %v1348_v44 = vld [vmem:[%s2325_s0 + $0xe8] sm:$0xf0]  ;;  %v1320_v46 = vor.u32 %v1526_v39, %v1317_v40 }
  0x15   :  { %v1534_v51 = vld [vmem:[%s2325_s0 + $0xf4] sm:$0xf]  ;;  %v1356_v52 = vld [vmem:[%s2325_s0 + $0xf8] sm:$0xf0]  ;;  %v1364_v57 = vld [vmem:[%s2325_s0 + $0x108] sm:$0xf0] }
  0x16   :  { %194 = vmatpush.bf16.msra.mxu0 %v1693_v10  ;;  %1584 = vmatpush.bf16.msra.mxu2 %v1693_v10  ;;  %v1359_v56 = vor.u32 %v1534_v51, %v1356_v52  ;;  %v1377_v40 = vld [vmem:[%s2325_s0 + $0x118] sm:$0xf] }
  0x17   :  { %222 = vmatpush.bf16.msra.mxu1 %v1700_v11  ;;  %1592 = vmatpush.bf16.msra.mxu3 %v1700_v11 }
  0x1a   :  { %195 = vmatpush.bf16.msra.mxu0 %v1707_v12  ;;  %1585 = vmatpush.bf16.msra.mxu2 %v1707_v12 }
  0x1b   :  { %223 = vmatpush.bf16.msra.mxu1 %v1714_v13  ;;  %1593 = vmatpush.bf16.msra.mxu3 %v1714_v13 }
  0x1e   :  { %196 = vmatpush.bf16.msra.mxu0 %v1719_v14  ;;  %1586 = vmatpush.bf16.msra.mxu2 %v1719_v14 }
  0x1f   :  { %224 = vmatpush.bf16.msra.mxu1 %v1724_v15  ;;  %1594 = vmatpush.bf16.msra.mxu3 %v1724_v15 }
  0x21   :  { %197 = vmatmul.bf16.vlgmr.msra.gmra.mxu0 %v1159_v24  ;;  %207 = vmatmul.bf16.vlgmr.msra.gmra.mxu2 %v1175_v25  ;;  %v1274_v24 = vor.u32 %v1518_v17, %v1271_v18  ;;  %v1301_v25 = vor.u32 %v1525_v20, %v1300_v19  ;;  %v1312_v19 = vld [vmem:[%s2325_s0 + $0xd8] sm:$0x11] }
  0x22   :  { %290 = vmatpush.bf16.msrb.mxu2 %v1625_v0  ;;  %225 = vmatmul.bf16.vlgmr.msra.gmra.mxu1 %v1163_v26  ;;  %v1305_v26 = vor.u32 %v1524_v21, %v1302_v22  ;;  %v488_v21 = vunpack.c.l.b16 %v1312_v19  ;;  %v489_v22 = vunpack.c.h.b16 %v1312_v19 }
  0x23   :  { %318 = vmatpush.bf16.msrb.mxu3 %v1630_v1  ;;  %398 = vmatpush.bf16.msrb.mxu0 %v1625_v0 }
  0x24   :  { %235 = vmatmul.bf16.vlgmr.msra.gmra.mxu3 %v1179_v27  ;;  %426 = vmatpush.bf16.msrb.mxu1 %v1630_v1  ;;  %v1250_v27 = vld [vmem:[%s2325_s0 + $0x68] sm:$0x11] }
  0x25   :  { %v272_v29 = vunpack.c.l.b16 %v1250_v27  ;;  %v273_v30 = vunpack.c.h.b16 %v1250_v27 }
  0x26   :  { %291 = vmatpush.bf16.msrb.mxu2 %v1637_v2 }
  0x27   :  { %319 = vmatpush.bf16.msrb.mxu3 %v1644_v3  ;;  %399 = vmatpush.bf16.msrb.mxu0 %v1637_v2  ;;  %v280_v33 = vpack.c.b16 %v272_v29, %v272_v29  ;;  %v281_v34 = vpack.c.b16 %v273_v30, %v273_v30  ;;  %v497_v29 = vpack.c.b16 %v489_v22, %v489_v22 }
  0x28   :  { %427 = vmatpush.bf16.msrb.mxu1 %v1644_v3 }
  0x2a   :  { %292 = vmatpush.bf16.msrb.mxu2 %v1651_v4 }
  0x2b   :  { %320 = vmatpush.bf16.msrb.mxu3 %v1658_v5  ;;  %400 = vmatpush.bf16.msrb.mxu0 %v1651_v4 }
  0x2c   :  { %428 = vmatpush.bf16.msrb.mxu1 %v1658_v5 }
  0x2e   :  { %293 = vmatpush.bf16.msrb.mxu2 %v1665_v6 }
  0x2f   :  { %321 = vmatpush.bf16.msrb.mxu3 %v1672_v7  ;;  %401 = vmatpush.bf16.msrb.mxu0 %v1665_v6 }
  0x30   :  { %429 = vmatpush.bf16.msrb.mxu1 %v1672_v7 }
  0x31   :  { %202 = vmatmul.bf16.gmra.mxu0 %v1167_v35  ;;  %212 = vmatmul.bf16.gmra.mxu2 %v83_v36  ;;  %v388_v35 = vpack.c.b16 %v380_v31, %v380_v31  ;;  %v389_v36 = vpack.c.b16 %v381_v32, %v381_v32 }
  0x32   :  { %294 = vmatpush.bf16.msrb.mxu2 %v1679_v8  ;;  %230 = vmatmul.bf16.gmra.mxu1 %v1171_v37  ;;  %v1315_v37 = vld [vmem:[%s2325_s0 + $0xa8] sm:$0xf] }
  0x33   :  { %322 = vmatpush.bf16.msrb.mxu3 %v1686_v9  ;;  %402 = vmatpush.bf16.msrb.mxu0 %v1679_v8 }
  0x34   :  { %240 = vmatmul.bf16.gmra.mxu3 %v84_v38  ;;  %430 = vmatpush.bf16.msrb.mxu1 %v1686_v9  ;;  %v1527_v38 = vld [vmem:[%s2325_s0 + $0xac] sm:$0xf0] }
  0x35   :  { %v1316_v45 = vor.u32 %v1527_v38, %v1315_v37 }
  0x36   :  { %295 = vmatpush.bf16.msrb.mxu2 %v1693_v10 }
  0x37   :  { %323 = vmatpush.bf16.msrb.mxu3 %v1700_v11  ;;  %403 = vmatpush.bf16.msrb.mxu0 %v1693_v10 }
  0x38   :  { %431 = vmatpush.bf16.msrb.mxu1 %v1700_v11 }
  0x3a   :  { %296 = vmatpush.bf16.msrb.mxu2 %v1707_v12 }
  0x3b   :  { %324 = vmatpush.bf16.msrb.mxu3 %v1714_v13  ;;  %404 = vmatpush.bf16.msrb.mxu0 %v1707_v12 }
  0x3c   :  { %432 = vmatpush.bf16.msrb.mxu1 %v1714_v13 }
  0x3e   :  { %297 = vmatpush.bf16.msrb.mxu2 %v1719_v14 }
  0x3f   :  { %325 = vmatpush.bf16.msrb.mxu3 %v1724_v15  ;;  %405 = vmatpush.bf16.msrb.mxu0 %v1719_v14 }
  0x40   :  { %433 = vmatpush.bf16.msrb.mxu1 %v1724_v15 }
  0x41   :  { %298 = vmatmul.bf16.vlgmr.msrb.gmra.mxu2 %v1254_v47  ;;  %v1347_v47 = vor.u32 %v1533_v42, %v1346_v41  ;;  %v1539_v41 = vld [vmem:[%s2325_s0 + $0x11c] sm:$0xf0]  ;;  %v1538_v42 = vld [vmem:[%s2325_s0 + $0x11c] sm:$0xf] }
  0x42   :  { %506 = vmatpush.bf16.msra.mxu2 %v1625_v0  ;;  %406 = vmatmul.bf16.vlgmr.msrb.gmra.mxu0 %v1285_v49  ;;  %v1323_v49 = vld [vmem:[%s2325_s0 + $0xb8] sm:$0xf] }
  0x43   :  { %534 = vmatpush.bf16.msra.mxu3 %v1630_v1  ;;  %614 = vmatpush.bf16.msra.mxu0 %v1625_v0 }
  0x44   :  { %642 = vmatpush.bf16.msra.mxu1 %v1630_v1  ;;  %326 = vmatmul.bf16.vlgmr.msrb.gmra.mxu3 %v1258_v48  ;;  %v1351_v48 = vor.u32 %v1532_v43, %v1348_v44  ;;  %v1379_v43 = vld [vmem:[%s2325_s0 + $0x120] sm:$0xf0]  ;;  %v1408_v44 = vld [vmem:[%s2325_s0 + $0x150] sm:$0xf] }
  0x45   :  { %434 = vmatmul.bf16.vlgmr.msrb.gmra.mxu1 %v1289_v50  ;;  %v1529_v50 = vld [vmem:[%s2325_s0 + $0xbc] sm:$0xf0] }
  0x46   :  { %507 = vmatpush.bf16.msra.mxu2 %v1637_v2  ;;  %v1324_v53 = vor.u32 %v1529_v50, %v1323_v49  ;;  %v1378_v50 = vor.u32 %v1539_v41, %v1377_v40  ;;  %v1548_v40 = vld [vmem:[%s2325_s0 + $0x174] sm:$0xf]  ;;  %v1426_v41 = vld [vmem:[%s2325_s0 + $0x178] sm:$0xf0] }
  0x47   :  { %535 = vmatpush.bf16.msra.mxu3 %v1644_v3  ;;  %615 = vmatpush.bf16.msra.mxu0 %v1637_v2 }
  0x48   :  { %643 = vmatpush.bf16.msra.mxu1 %v1644_v3 }
  0x4a   :  { %508 = vmatpush.bf16.msra.mxu2 %v1651_v4 }
  0x4b   :  { %536 = vmatpush.bf16.msra.mxu3 %v1658_v5  ;;  %616 = vmatpush.bf16.msra.mxu0 %v1651_v4 }
  0x4c   :  { %644 = vmatpush.bf16.msra.mxu1 %v1658_v5 }
  0x4e   :  { %509 = vmatpush.bf16.msra.mxu2 %v1665_v6 }
  0x4f   :  { %537 = vmatpush.bf16.msra.mxu3 %v1672_v7  ;;  %617 = vmatpush.bf16.msra.mxu0 %v1665_v6 }
  0x50   :  { %645 = vmatpush.bf16.msra.mxu1 %v1672_v7 }
  0x51   :  { %303 = vmatmul.bf16.gmra.mxu2 %v1262_v59 }
  0x52   :  { %510 = vmatpush.bf16.msra.mxu2 %v1679_v8  ;;  %411 = vmatmul.bf16.gmra.mxu0 %v1293_v61 }
  0x53   :  { %538 = vmatpush.bf16.msra.mxu3 %v1686_v9  ;;  %618 = vmatpush.bf16.msra.mxu0 %v1679_v8 }
  0x54   :  { %646 = vmatpush.bf16.msra.mxu1 %v1686_v9  ;;  %331 = vmatmul.bf16.gmra.mxu3 %v1266_v60 }
  0x55   :  { %439 = vmatmul.bf16.gmra.mxu1 %v1297_v62 }
  0x56   :  { %511 = vmatpush.bf16.msra.mxu2 %v1693_v10 }
  0x57   :  { %539 = vmatpush.bf16.msra.mxu3 %v1700_v11  ;;  %619 = vmatpush.bf16.msra.mxu0 %v1693_v10 }
  0x58   :  { %647 = vmatpush.bf16.msra.mxu1 %v1700_v11 }
  0x5a   :  { %512 = vmatpush.bf16.msra.mxu2 %v1707_v12 }
  0x5b   :  { %540 = vmatpush.bf16.msra.mxu3 %v1714_v13  ;;  %620 = vmatpush.bf16.msra.mxu0 %v1707_v12 }
  0x5c   :  { %648 = vmatpush.bf16.msra.mxu1 %v1714_v13 }
  0x5e   :  { %513 = vmatpush.bf16.msra.mxu2 %v1719_v14 }
  0x5f   :  { %541 = vmatpush.bf16.msra.mxu3 %v1724_v15  ;;  %621 = vmatpush.bf16.msra.mxu0 %v1719_v14 }
  0x60   :  { %649 = vmatpush.bf16.msra.mxu1 %v1724_v15 }
  0x61   :  { %308 = vmatmul.bf16.gmra.mxu2 %v1270_v23 }
  0x62   :  { %722 = vmatpush.bf16.msrb.mxu2 %v1625_v0  ;;  %416 = vmatmul.bf16.gmra.mxu0 %v1301_v25 }
  0x63   :  { %750 = vmatpush.bf16.msrb.mxu3 %v1630_v1  ;;  %830 = vmatpush.bf16.msrb.mxu0 %v1625_v0 }
  0x64   :  { %858 = vmatpush.bf16.msrb.mxu1 %v1630_v1  ;;  %336 = vmatmul.bf16.gmra.mxu3 %v1274_v24 }
  0x65   :  { %444 = vmatmul.bf16.gmra.mxu1 %v1305_v26  ;;  %v496_v26 = vpack.c.b16 %v488_v21, %v488_v21 }
  0x66   :  { %723 = vmatpush.bf16.msrb.mxu2 %v1637_v2 }
  0x67   :  { %751 = vmatpush.bf16.msrb.mxu3 %v1644_v3  ;;  %831 = vmatpush.bf16.msrb.mxu0 %v1637_v2 }
  0x68   :  { %859 = vmatpush.bf16.msrb.mxu1 %v1644_v3 }
  0x6a   :  { %724 = vmatpush.bf16.msrb.mxu2 %v1651_v4 }
  0x6b   :  { %752 = vmatpush.bf16.msrb.mxu3 %v1658_v5  ;;  %832 = vmatpush.bf16.msrb.mxu0 %v1651_v4 }
  0x6c   :  { %860 = vmatpush.bf16.msrb.mxu1 %v1658_v5 }
  0x6e   :  { %725 = vmatpush.bf16.msrb.mxu2 %v1665_v6 }
  0x6f   :  { %753 = vmatpush.bf16.msrb.mxu3 %v1672_v7  ;;  %833 = vmatpush.bf16.msrb.mxu0 %v1665_v6 }
  0x70   :  { %861 = vmatpush.bf16.msrb.mxu1 %v1672_v7 }
  0x71   :  { %313 = vmatmul.bf16.gmra.mxu2 %v280_v33 }
  0x72   :  { %726 = vmatpush.bf16.msrb.mxu2 %v1679_v8  ;;  %421 = vmatmul.bf16.gmra.mxu0 %v388_v35 }
  0x73   :  { %754 = vmatpush.bf16.msrb.mxu3 %v1686_v9  ;;  %834 = vmatpush.bf16.msrb.mxu0 %v1679_v8 }
  0x74   :  { %862 = vmatpush.bf16.msrb.mxu1 %v1686_v9  ;;  %341 = vmatmul.bf16.gmra.mxu3 %v281_v34 }
  0x75   :  { %449 = vmatmul.bf16.gmra.mxu1 %v389_v36 }
  0x76   :  { %727 = vmatpush.bf16.msrb.mxu2 %v1693_v10 }
  0x77   :  { %755 = vmatpush.bf16.msrb.mxu3 %v1700_v11  ;;  %835 = vmatpush.bf16.msrb.mxu0 %v1693_v10 }
  0x78   :  { %863 = vmatpush.bf16.msrb.mxu1 %v1700_v11 }
  0x7a   :  { %728 = vmatpush.bf16.msrb.mxu2 %v1707_v12 }
  0x7b   :  { %756 = vmatpush.bf16.msrb.mxu3 %v1714_v13  ;;  %836 = vmatpush.bf16.msrb.mxu0 %v1707_v12 }
  0x7c   :  { %864 = vmatpush.bf16.msrb.mxu1 %v1714_v13 }
  0x7e   :  { %729 = vmatpush.bf16.msrb.mxu2 %v1719_v14 }
  0x7f   :  { %757 = vmatpush.bf16.msrb.mxu3 %v1724_v15  ;;  %837 = vmatpush.bf16.msrb.mxu0 %v1719_v14 }
  0x80   :  { %865 = vmatpush.bf16.msrb.mxu1 %v1724_v15 }
  0x81   :  { %514 = vmatmul.bf16.vlgmr.msra.gmra.mxu2 %v1316_v45  ;;  %v1545_v45 = vld [vmem:[%s2325_s0 + $0x154] sm:$0xf0] }
  0x82   :  { %622 = vmatmul.bf16.vlgmr.msra.gmra.mxu0 %v1347_v47  ;;  %938 = vmatpush.bf16.msra.mxu2 %v1625_v0  ;;  %v1544_v47 = vld [vmem:[%s2325_s0 + $0x154] sm:$0xf] }
  0x83   :  { %1046 = vmatpush.bf16.msra.mxu0 %v1625_v0  ;;  %v1528_v0 = vld [vmem:[%s2325_s0 + $0xbc] sm:$0xf] }
  0x84   :  { %542 = vmatmul.bf16.vlgmr.msra.gmra.mxu3 %v1320_v46 }
  0x85   :  { %650 = vmatmul.bf16.vlgmr.msra.gmra.mxu1 %v1351_v48  ;;  %966 = vmatpush.bf16.msra.mxu3 %v1630_v1  ;;  %v1410_v48 = vld [vmem:[%s2325_s0 + $0x158] sm:$0xf0] }
  0x86   :  { %1074 = vmatpush.bf16.msra.mxu1 %v1630_v1  ;;  %939 = vmatpush.bf16.msra.mxu2 %v1637_v2  ;;  %v1325_v1 = vld [vmem:[%s2325_s0 + $0xc0] sm:$0xf0] }
  0x87   :  { %1047 = vmatpush.bf16.msra.mxu0 %v1637_v2  ;;  %v1354_v2 = vld [vmem:[%s2325_s0 + $0xf0] sm:$0xf]  ;;  %v1328_v54 = vor.u32 %v1528_v0, %v1325_v1  ;;  %v1382_v0 = vor.u32 %v1538_v42, %v1379_v43  ;;  %v1409_v1 = vor.u32 %v1545_v45, %v1408_v44 }
  0x89   :  { %967 = vmatpush.bf16.msra.mxu3 %v1644_v3 }
  0x8a   :  { %1075 = vmatpush.bf16.msra.mxu1 %v1644_v3  ;;  %v1535_v3 = vld [vmem:[%s2325_s0 + $0xf4] sm:$0xf0]  ;;  %940 = vmatpush.bf16.msra.mxu2 %v1651_v4 }
  0x8b   :  { %1048 = vmatpush.bf16.msra.mxu0 %v1651_v4  ;;  %v1355_v55 = vor.u32 %v1535_v3, %v1354_v2  ;;  %v1331_v4 = vld [vmem:[%s2325_s0 + $0xc8] sm:$0xf]  ;;  %v1413_v3 = vor.u32 %v1544_v47, %v1410_v48  ;;  %v1429_v48 = vor.u32 %v1548_v40, %v1426_v41 }
  0x8d   :  { %968 = vmatpush.bf16.msra.mxu3 %v1658_v5 }
  0x8e   :  { %1076 = vmatpush.bf16.msra.mxu1 %v1658_v5  ;;  %941 = vmatpush.bf16.msra.mxu2 %v1665_v6  ;;  %v1531_v5 = vld [vmem:[%s2325_s0 + $0xcc] sm:$0xf0] }
  0x8f   :  { %1049 = vmatpush.bf16.msra.mxu0 %v1665_v6  ;;  %v1530_v6 = vld [vmem:[%s2325_s0 + $0xcc] sm:$0xf]  ;;  %v1332_v58 = vor.u32 %v1531_v5, %v1331_v4 }
  0x91   :  { %969 = vmatpush.bf16.msra.mxu3 %v1672_v7  ;;  %519 = vmatmul.bf16.gmra.mxu2 %v1324_v53 }
  0x92   :  { %627 = vmatmul.bf16.gmra.mxu0 %v1355_v55  ;;  %942 = vmatpush.bf16.msra.mxu2 %v1679_v8 }
  0x93   :  { %1077 = vmatpush.bf16.msra.mxu1 %v1672_v7  ;;  %1050 = vmatpush.bf16.msra.mxu0 %v1679_v8  ;;  %v1333_v7 = vld [vmem:[%s2325_s0 + $0xd0] sm:$0xf0]  ;;  %v1362_v8 = vld [vmem:[%s2325_s0 + $0x100] sm:$0xf] }
  0x94   :  { %547 = vmatmul.bf16.gmra.mxu3 %v1328_v54  ;;  %v1336_v60 = vor.u32 %v1530_v6, %v1333_v7  ;;  %v1385_v7 = vld [vmem:[%s2325_s0 + $0x128] sm:$0xf] }
  0x95   :  { %655 = vmatmul.bf16.gmra.mxu1 %v1359_v56  ;;  %970 = vmatpush.bf16.msra.mxu3 %v1686_v9 }
  0x96   :  { %943 = vmatpush.bf16.msra.mxu2 %v1693_v10 }
  0x97   :  { %1078 = vmatpush.bf16.msra.mxu1 %v1686_v9  ;;  %1051 = vmatpush.bf16.msra.mxu0 %v1693_v10  ;;  %v1537_v9 = vld [vmem:[%s2325_s0 + $0x104] sm:$0xf0]  ;;  %v1536_v10 = vld [vmem:[%s2325_s0 + $0x104] sm:$0xf] }
  0x98   :  { %v1363_v61 = vor.u32 %v1537_v9, %v1362_v8  ;;  %v1367_v63 = vor.u32 %v1536_v10, %v1364_v57  ;;  %v1541_v8 = vld [vmem:[%s2325_s0 + $0x12c] sm:$0xf0]  ;;  %v1540_v9 = vld [vmem:[%s2325_s0 + $0x12c] sm:$0xf]  ;;  %v1387_v57 = vld [vmem:[%s2325_s0 + $0x130] sm:$0xf0] }
  0x99   :  { %971 = vmatpush.bf16.msra.mxu3 %v1700_v11 }
  0x9a   :  { %944 = vmatpush.bf16.msra.mxu2 %v1707_v12 }
  0x9b   :  { %1079 = vmatpush.bf16.msra.mxu1 %v1700_v11  ;;  %1052 = vmatpush.bf16.msra.mxu0 %v1707_v12 }
  0x9d   :  { %972 = vmatpush.bf16.msra.mxu3 %v1714_v13 }
  0x9e   :  { %v198_v59 = vpop.f32.mrf.mxu0  ;;  %945 = vmatpush.bf16.msra.mxu2 %v1719_v14 }
  0x9f   :  { %v226_v62 = vpop.f32.mrf.mxu1  ;;  %1080 = vmatpush.bf16.msra.mxu1 %v1714_v13  ;;  %1053 = vmatpush.bf16.msra.mxu0 %v1719_v14  ;;  %v1343_v13 = vld [vmem:[%s2325_s0 + $0x110] sm:$0x11] }
  0xa0   :  { %v2047_v16 = vadd.f32 %v226_v62, %v198_v59  ;;  %v596_v23 = vunpack.c.l.b16 %v1343_v13  ;;  %v597_v24 = vunpack.c.h.b16 %v1343_v13  ;;  %v1547_v59 = vld [vmem:[%s2325_s0 + $0x164] sm:$0xf0]  ;;  %v1418_v62 = vld [vmem:[%s2325_s0 + $0x168] sm:$0xf0] }
  0xa1   :  { %973 = vmatpush.bf16.msra.mxu3 %v1724_v15  ;;  %524 = vmatmul.bf16.gmra.mxu2 %v1332_v58  ;;  %v1416_v58 = vld [vmem:[%s2325_s0 + $0x160] sm:$0xf] }
  0xa2   :  { %632 = vmatmul.bf16.gmra.mxu0 %v1363_v61  ;;  %v604_v30 = vpack.c.b16 %v596_v23, %v596_v23  ;;  %v605_v32 = vpack.c.b16 %v597_v24, %v597_v24  ;;  %v1546_v61 = vld [vmem:[%s2325_s0 + $0x164] sm:$0xf] }
  0xa3   :  { %1081 = vmatpush.bf16.msra.mxu1 %v1724_v15 }
  0xa4   :  { %552 = vmatmul.bf16.gmra.mxu3 %v1336_v60  ;;  %v208_v11 = vpop.f32.mrf.mxu2 }
  0xa5   :  { %660 = vmatmul.bf16.gmra.mxu1 %v1367_v63 }
  0xa6   :  { %v200_v18 = vpop.f32.mrf.mxu0 }
  0xa7   :  { %v236_v12 = vpop.f32.mrf.mxu3  ;;  %v228_v20 = vpop.f32.mrf.mxu1 }
  0xa8   :  { %v2053_v17 = vadd.f32 %v236_v12, %v208_v11  ;;  %v2061_v14 = vadd.f32 %v228_v20, %v200_v18  ;;  %v1390_v12 = vor.u32 %v1540_v9, %v1387_v57  ;;  %v1417_v18 = vor.u32 %v1547_v59, %v1416_v58 }
  0xa9   :  { %v1421_v20 = vor.u32 %v1546_v61, %v1418_v62 }
  0xac   :  { %v210_v15 = vpop.f32.mrf.mxu2 }
  0xae   :  { %v203_v28 = vpop.f32.mrf.mxu0 }
  0xaf   :  { %v238_v25 = vpop.f32.mrf.mxu3  ;;  %v231_v31 = vpop.f32.mrf.mxu1 }
  0xb0   :  { %v2063_v27 = vadd.f32 %v238_v25, %v210_v15  ;;  %v2065_v33 = vadd.f32 %v231_v31, %v203_v28  ;;  %v1543_v31 = vld [vmem:[%s2325_s0 + $0x13c] sm:$0xf0] }
  0xb1   :  { %529 = vmatmul.bf16.gmra.mxu2 %v496_v26 }
  0xb2   :  { %637 = vmatmul.bf16.gmra.mxu0 %v604_v30 }
  0xb4   :  { %557 = vmatmul.bf16.gmra.mxu3 %v497_v29  ;;  %v213_v34 = vpop.f32.mrf.mxu2 }
  0xb5   :  { %665 = vmatmul.bf16.gmra.mxu1 %v605_v32  ;;  %v1542_v32 = vld [vmem:[%s2325_s0 + $0x13c] sm:$0xf] }
  0xb6   :  { %v205_v37 = vpop.f32.mrf.mxu0 }
  0xb7   :  { %v241_v35 = vpop.f32.mrf.mxu3  ;;  %v233_v38 = vpop.f32.mrf.mxu1 }
  0xb8   :  { %v2067_v36 = vadd.f32 %v241_v35, %v213_v34  ;;  %v2069_v39 = vadd.f32 %v233_v38, %v205_v37  ;;  %v1424_v35 = vld [vmem:[%s2325_s0 + $0x170] sm:$0xf]  ;;  %v1549_v37 = vld [vmem:[%s2325_s0 + $0x174] sm:$0xf0] }
  0xbc   :  { %v215_v46 = vpop.f32.mrf.mxu2 }
  0xbd   :  { %v1425_v46 = vor.u32 %v1549_v37, %v1424_v35 }
  0xbf   :  { %v243_v49 = vpop.f32.mrf.mxu3  ;;  %v407_v2 = vpop.f32.mrf.mxu0 }
  0xc1   :  { %730 = vmatmul.bf16.vlgmr.msrb.gmra.mxu2 %v1378_v50 }
  0xc2   :  { %v435_v51 = vpop.f32.mrf.mxu1  ;;  %838 = vmatmul.bf16.vlgmr.msrb.gmra.mxu0 %v1409_v1 }
  0xc3   :  { %v436_v52 = vadd.f32 %v435_v51, %v407_v2 }
  0xc4   :  { %758 = vmatmul.bf16.vlgmr.msrb.gmra.mxu3 %v1382_v0  ;;  %v299_v53 = vpop.f32.mrf.mxu2 }
  0xc5   :  { %866 = vmatmul.bf16.vlgmr.msrb.gmra.mxu1 %v1413_v3 }
  0xc7   :  { %v327_v54 = vpop.f32.mrf.mxu3  ;;  %v409_v56 = vpop.f32.mrf.mxu0 }
  0xc8   :  { %v328_v55 = vadd.f32 %v327_v54, %v299_v53 }
  0xca   :  { %v346_v4 = vmax.f32 %v2047_v16, %v328_v55  ;;  %v437_v5 = vpop.f32.mrf.mxu1  ;;  %v1386_v16 = vor.u32 %v1541_v8, %v1385_v7 }
  0xcb   :  { %v438_v6 = vadd.f32 %v437_v5, %v409_v56 }
  0xcc   :  { %v2105_v10 = vmax.f32 %v346_v4, %v436_v52  ;;  %v301_v60 = vpop.f32.mrf.mxu2  ;;  %v1374_v52 = vld [vmem:[%s2325_s0 + $0x148] sm:$0x11] }
  0xcd   :  { %v704_v4 = vunpack.c.l.b16 %v1374_v52  ;;  %v705_v5 = vunpack.c.h.b16 %v1374_v52 }
  0xcf   :  { %v329_v63 = vpop.f32.mrf.mxu3  ;;  %v412_v19 = vpop.f32.mrf.mxu0  ;;  %v712_v58 = vpack.c.b16 %v704_v4, %v704_v4 }
  0xd0   :  { %v330_v11 = vadd.f32 %v329_v63, %v301_v60  ;;  %v713_v60 = vpack.c.b16 %v705_v5, %v705_v5 }
  0xd1   :  { %735 = vmatmul.bf16.gmra.mxu2 %v1386_v16 }
  0xd2   :  { %v347_v13 = vmax.f32 %v2061_v14, %v330_v11  ;;  %v440_v21 = vpop.f32.mrf.mxu1  ;;  %843 = vmatmul.bf16.gmra.mxu0 %v1417_v18  ;;  %v1393_v14 = vld [vmem:[%s2325_s0 + $0x138] sm:$0xf] }
  0xd3   :  { %v441_v22 = vadd.f32 %v440_v21, %v412_v19  ;;  %v1394_v43 = vor.u32 %v1543_v31, %v1393_v14  ;;  %v1472_v14 = vld [vmem:[%s2325_s0 + $0x1c8] sm:$0xf0] }
  0xd4   :  { %763 = vmatmul.bf16.gmra.mxu3 %v1390_v12  ;;  %v2123_v23 = vmax.f32 %v347_v13, %v438_v6  ;;  %v304_v24 = vpop.f32.mrf.mxu2 }
  0xd5   :  { %871 = vmatmul.bf16.gmra.mxu1 %v1421_v20 }
  0xd7   :  { %v332_v15 = vpop.f32.mrf.mxu3  ;;  %v414_v26 = vpop.f32.mrf.mxu0 }
  0xd8   :  { %v333_v25 = vadd.f32 %v332_v15, %v304_v24  ;;  %v1439_v24 = vld [vmem:[%s2325_s0 + $0x188] sm:$0xf]  ;;  %v1550_v15 = vld [vmem:[%s2325_s0 + $0x18c] sm:$0xf] }
  0xda   :  { %v348_v28 = vmax.f32 %v2065_v33, %v333_v25  ;;  %v442_v29 = vpop.f32.mrf.mxu1  ;;  %v1395_v33 = vld [vmem:[%s2325_s0 + $0x140] sm:$0xf0] }
  0xdb   :  { %v443_v30 = vadd.f32 %v442_v29, %v414_v26  ;;  %v1398_v45 = vor.u32 %v1542_v32, %v1395_v33  ;;  %v1441_v26 = vld [vmem:[%s2325_s0 + $0x190] sm:$0xf0] }
  0xdc   :  { %v2135_v34 = vmax.f32 %v348_v28, %v441_v22  ;;  %v306_v38 = vpop.f32.mrf.mxu2  ;;  %v1557_v28 = vld [vmem:[%s2325_s0 + $0x1c4] sm:$0xf0]  ;;  %v1444_v33 = vor.u32 %v1550_v15, %v1441_v26 }
  0xdf   :  { %v334_v42 = vpop.f32.mrf.mxu3  ;;  %v417_v47 = vpop.f32.mrf.mxu0 }
  0xe0   :  { %v335_v44 = vadd.f32 %v334_v42, %v306_v38 }
  0xe1   :  { %740 = vmatmul.bf16.gmra.mxu2 %v1394_v43 }
  0xe2   :  { %v349_v49 = vmax.f32 %v2069_v39, %v335_v44  ;;  %v445_v50 = vpop.f32.mrf.mxu1  ;;  %848 = vmatmul.bf16.gmra.mxu0 %v1425_v46  ;;  %v1405_v39 = vld [vmem:[%s2325_s0 + $0x180] sm:$0x11] }
  0xe3   :  { %v446_v0 = vadd.f32 %v445_v50, %v417_v47  ;;  %v812_v6 = vunpack.c.l.b16 %v1405_v39  ;;  %v813_v8 = vunpack.c.h.b16 %v1405_v39  ;;  %v1553_v50 = vld [vmem:[%s2325_s0 + $0x19c] sm:$0xf0]  ;;  %v1480_v39 = vld [vmem:[%s2325_s0 + $0x1d8] sm:$0xf0] }
  0xe4   :  { %768 = vmatmul.bf16.gmra.mxu3 %v1398_v45  ;;  %v2153_v1 = vmax.f32 %v349_v49, %v443_v30  ;;  %v309_v2 = vpop.f32.mrf.mxu2  ;;  %v1556_v30 = vld [vmem:[%s2325_s0 + $0x1c4] sm:$0xf]  ;;  %v1447_v49 = vld [vmem:[%s2325_s0 + $0x198] sm:$0xf] }
  0xe5   :  { %876 = vmatmul.bf16.gmra.mxu1 %v1429_v48  ;;  %v820_v61 = vpack.c.b16 %v812_v6, %v812_v6  ;;  %v821_v63 = vpack.c.b16 %v813_v8, %v813_v8  ;;  %v1475_v38 = vor.u32 %v1556_v30, %v1472_v14 }
  0xe7   :  { %v337_v3 = vpop.f32.mrf.mxu3  ;;  %v419_v53 = vpop.f32.mrf.mxu0 }
  0xe8   :  { %v338_v51 = vadd.f32 %v337_v3, %v309_v2  ;;  %v1478_v3 = vld [vmem:[%s2325_s0 + $0x1d0] sm:$0xf] }
  0xea   :  { %v350_v54 = vmax.f32 %v2053_v17, %v338_v51  ;;  %v447_v55 = vpop.f32.mrf.mxu1  ;;  %v1559_v51 = vld [vmem:[%s2325_s0 + $0x1d4] sm:$0xf0] }
  0xeb   :  { %v448_v56 = vadd.f32 %v447_v55, %v419_v53  ;;  %v1558_v53 = vld [vmem:[%s2325_s0 + $0x1d4] sm:$0xf]  ;;  %v1448_v55 = vor.u32 %v1553_v50, %v1447_v49  ;;  %v1479_v5 = vor.u32 %v1559_v51, %v1478_v3 }
  0xec   :  { %v2162_v7 = vmax.f32 %v350_v54, %v446_v0  ;;  %v311_v9 = vpop.f32.mrf.mxu2  ;;  %v1552_v0 = vld [vmem:[%s2325_s0 + $0x19c] sm:$0xf]  ;;  %v1483_v8 = vor.u32 %v1558_v53, %v1480_v39 }
  0xef   :  { %v339_v57 = vpop.f32.mrf.mxu3  ;;  %v422_v62 = vpop.f32.mrf.mxu0 }
  0xf0   :  { %v340_v59 = vadd.f32 %v339_v57, %v311_v9 }
  0xf1   :  { %745 = vmatmul.bf16.gmra.mxu2 %v712_v58 }
  0xf2   :  { %v351_v16 = vmax.f32 %v2063_v27, %v340_v59  ;;  %v450_v11 = vpop.f32.mrf.mxu1  ;;  %853 = vmatmul.bf16.gmra.mxu0 %v820_v61  ;;  %v1551_v27 = vld [vmem:[%s2325_s0 + $0x18c] sm:$0xf0] }
  0xf3   :  { %v451_v17 = vadd.f32 %v450_v11, %v422_v62  ;;  %v1440_v32 = vor.u32 %v1551_v27, %v1439_v24  ;;  %v1560_v24 = vld [vmem:[%s2325_s0 + $0x1e4] sm:$0xf]  ;;  %v1488_v27 = vld [vmem:[%s2325_s0 + $0x1e8] sm:$0xf0] }
  0xf4   :  { %773 = vmatmul.bf16.gmra.mxu3 %v713_v60  ;;  %v2165_v12 = vmax.f32 %v351_v16, %v448_v56  ;;  %v314_v18 = vpop.f32.mrf.mxu2  ;;  %v1491_v14 = vor.u32 %v1560_v24, %v1488_v27 }
  0xf5   :  { %881 = vmatmul.bf16.gmra.mxu1 %v821_v63 }
  0xf7   :  { %v342_v19 = vpop.f32.mrf.mxu3  ;;  %v424_v13 = vpop.f32.mrf.mxu0 }
  0xf8   :  { %v343_v20 = vadd.f32 %v342_v19, %v314_v18  ;;  %v1555_v18 = vld [vmem:[%s2325_s0 + $0x1ac] sm:$0xf0]  ;;  %v1554_v19 = vld [vmem:[%s2325_s0 + $0x1ac] sm:$0xf]  ;;  %v1486_v13 = vld [vmem:[%s2325_s0 + $0x1e0] sm:$0xf] }
  0xfa   :  { %v352_v21 = vmax.f32 %v2067_v36, %v343_v20  ;;  %v452_v22 = vpop.f32.mrf.mxu1  ;;  %v1470_v36 = vld [vmem:[%s2325_s0 + $0x1c0] sm:$0xf] }
  0xfb   :  { %v1471_v35 = vor.u32 %v1557_v28, %v1470_v36 }
  0xfc   :  { %v2177_v25 = vmax.f32 %v352_v21, %v451_v17  ;;  %v316_v29 = vpop.f32.mrf.mxu2  ;;  %v1561_v21 = vld [vmem:[%s2325_s0 + $0x1e4] sm:$0xf0] }
  0xfd   :  { %v1487_v29 = vor.u32 %v1561_v21, %v1486_v13 }
  0xff   :  { %v344_v31 = vpop.f32.mrf.mxu3  ;;  %v623_v37 = vpop.f32.mrf.mxu0 }
 0x101   :  { %946 = vmatmul.bf16.vlgmr.msra.gmra.mxu2 %v1440_v32 }
 0x102   :  { %v651_v40 = vpop.f32.mrf.mxu1  ;;  %1054 = vmatmul.bf16.vlgmr.msra.gmra.mxu0 %v1471_v35 }
 0x103   :  { %v652_v41 = vadd.f32 %v651_v40, %v623_v37 }
 0x104   :  { %974 = vmatmul.bf16.vlgmr.msra.gmra.mxu3 %v1444_v33  ;;  %v515_v42 = vpop.f32.mrf.mxu2 }
 0x105   :  { %1082 = vmatmul.bf16.vlgmr.msra.gmra.mxu1 %v1475_v38 }
 0x107   :  { %v543_v43 = vpop.f32.mrf.mxu3  ;;  %v625_v45 = vpop.f32.mrf.mxu0 }
 0x108   :  { %v544_v44 = vadd.f32 %v543_v43, %v515_v42 }
 0x10a   :  { %v562_v46 = vmax.f32 %v2105_v10, %v544_v44  ;;  %v653_v47 = vpop.f32.mrf.mxu1  ;;  %v1449_v10 = vld [vmem:[%s2325_s0 + $0x1a0] sm:$0xf0] }
 0x10b   :  { %v654_v48 = vadd.f32 %v653_v47, %v625_v45  ;;  %v1452_v4 = vor.u32 %v1552_v0, %v1449_v10 }
 0x10c   :  { %v2204_v2 = vmax.f32 %v562_v46, %v652_v41  ;;  %v517_v52 = vpop.f32.mrf.mxu2  ;;  %v1436_v41 = vld [vmem:[%s2325_s0 + $0x1b8] sm:$0x11] }
 0x10d   :  { %v920_v46 = vunpack.c.l.b16 %v1436_v41  ;;  %v921_v47 = vunpack.c.h.b16 %v1436_v41 }
 0x10f   :  { %v545_v54 = vpop.f32.mrf.mxu3  ;;  %v628_v6 = vpop.f32.mrf.mxu0  ;;  %v928_v3 = vpack.c.b16 %v920_v46, %v920_v46 }
 0x110   :  { %v546_v56 = vadd.f32 %v545_v54, %v517_v52  ;;  %v929_v52 = vpack.c.b16 %v921_v47, %v921_v47 }
 0x111   :  { %951 = vmatmul.bf16.gmra.mxu2 %v1448_v55 }
 0x112   :  { %v563_v9 = vmax.f32 %v2123_v23, %v546_v56  ;;  %v656_v57 = vpop.f32.mrf.mxu1  ;;  %1059 = vmatmul.bf16.gmra.mxu0 %v1479_v5  ;;  %v1455_v23 = vld [vmem:[%s2325_s0 + $0x1a8] sm:$0xf] }
 0x113   :  { %v657_v58 = vadd.f32 %v656_v57, %v628_v6  ;;  %v1456_v26 = vor.u32 %v1555_v18, %v1455_v23 }
 0x114   :  { %979 = vmatmul.bf16.gmra.mxu3 %v1452_v4  ;;  %v2222_v59 = vmax.f32 %v563_v9, %v654_v48  ;;  %v520_v60 = vpop.f32.mrf.mxu2 }
 0x115   :  { %1087 = vmatmul.bf16.gmra.mxu1 %v1483_v8 }
 0x117   :  { %v548_v61 = vpop.f32.mrf.mxu3  ;;  %v630_v63 = vpop.f32.mrf.mxu0 }
 0x118   :  { %v549_v62 = vadd.f32 %v548_v61, %v520_v60 }
 0x11a   :  { %v564_v16 = vmax.f32 %v2135_v34, %v549_v62  ;;  %v658_v11 = vpop.f32.mrf.mxu1  ;;  %v1457_v34 = vld [vmem:[%s2325_s0 + $0x1b0] sm:$0xf0] }
 0x11b   :  { %v659_v17 = vadd.f32 %v658_v11, %v630_v63  ;;  %v1460_v28 = vor.u32 %v1554_v19, %v1457_v34 }
 0x11c   :  { %v2234_v20 = vmax.f32 %v564_v16, %v657_v58  ;;  %v522_v22 = vpop.f32.mrf.mxu2 }
 0x11f   :  { %v550_v15 = vpop.f32.mrf.mxu3  ;;  %v633_v30 = vpop.f32.mrf.mxu0 }
 0x120   :  { %v551_v36 = vadd.f32 %v550_v15, %v522_v22 }
 0x121   :  { %956 = vmatmul.bf16.gmra.mxu2 %v1456_v26 }
 0x122   :  { %v565_v31 = vmax.f32 %v2153_v1, %v551_v36  ;;  %v661_v32 = vpop.f32.mrf.mxu1  ;;  %1064 = vmatmul.bf16.gmra.mxu0 %v1487_v29  ;;  %v1467_v1 = vld [vmem:[%s2325_s0 + $0x1f0] sm:$0x11] }
 0x123   :  { %v662_v33 = vadd.f32 %v661_v32, %v633_v30  ;;  %v1028_v48 = vunpack.c.l.b16 %v1467_v1  ;;  %v1029_v50 = vunpack.c.h.b16 %v1467_v1 }
 0x124   :  { %984 = vmatmul.bf16.gmra.mxu3 %v1460_v28  ;;  %v2252_v35 = vmax.f32 %v565_v31, %v659_v17  ;;  %v525_v37 = vpop.f32.mrf.mxu2 }
 0x125   :  { %1092 = vmatmul.bf16.gmra.mxu1 %v1491_v14  ;;  %v1036_v53 = vpack.c.b16 %v1028_v48, %v1028_v48  ;;  %v1037_v54 = vpack.c.b16 %v1029_v50, %v1029_v50 }
 0x127   :  { %v553_v38 = vpop.f32.mrf.mxu3  ;;  %v635_v42 = vpop.f32.mrf.mxu0 }
 0x128   :  { %v554_v40 = vadd.f32 %v553_v38, %v525_v37 }
 0x12a   :  { %v566_v43 = vmax.f32 %v2162_v7, %v554_v40  ;;  %v663_v44 = vpop.f32.mrf.mxu1 }
 0x12b   :  { %v664_v45 = vadd.f32 %v663_v44, %v635_v42 }
 0x12c   :  { %v2261_v49 = vmax.f32 %v566_v43, %v662_v33  ;;  %v527_v0 = vpop.f32.mrf.mxu2 }
 0x12f   :  { %v555_v10 = vpop.f32.mrf.mxu3  ;;  %v638_v39 = vpop.f32.mrf.mxu0 }
 0x130   :  { %v556_v51 = vadd.f32 %v555_v10, %v527_v0 }
 0x131   :  { %961 = vmatmul.bf16.gmra.mxu2 %v928_v3 }
 0x132   :  { %v567_v55 = vmax.f32 %v2165_v12, %v556_v51  ;;  %v666_v56 = vpop.f32.mrf.mxu1  ;;  %1069 = vmatmul.bf16.gmra.mxu0 %v1036_v53 }
 0x133   :  { %v667_v7 = vadd.f32 %v666_v56, %v638_v39 }
 0x134   :  { %989 = vmatmul.bf16.gmra.mxu3 %v929_v52  ;;  %v675_v4 = vmax.f32 %v567_v55, %v664_v45  ;;  %v530_v5 = vpop.f32.mrf.mxu2 }
 0x135   :  { %1097 = vmatmul.bf16.gmra.mxu1 %v1037_v54 }
 0x137   :  { %v558_v6 = vpop.f32.mrf.mxu3  ;;  %v640_v9 = vpop.f32.mrf.mxu0 }
 0x138   :  { %v559_v8 = vadd.f32 %v558_v6, %v530_v5 }
 0x13a   :  { %v568_v57 = vmax.f32 %v2177_v25, %v559_v8  ;;  %v668_v58 = vpop.f32.mrf.mxu1 }
 0x13c   :  { %v676_v60 = vmax.f32 %v568_v57, %v667_v7  ;;  %v532_v61 = vpop.f32.mrf.mxu2 }
 0x13f   :  { %v560_v62 = vpop.f32.mrf.mxu3  ;;  %v839_v63 = vpop.f32.mrf.mxu0 }
 0x142   :  { %v867_v16 = vpop.f32.mrf.mxu1 }
 0x143   :  { %v868_v12 = vadd.f32 %v867_v16, %v839_v63 }
 0x144   :  { %v731_v11 = vpop.f32.mrf.mxu2 }
 0x147   :  { %v759_v17 = vpop.f32.mrf.mxu3  ;;  %v841_v18 = vpop.f32.mrf.mxu0 }
 0x148   :  { %v760_v23 = vadd.f32 %v759_v17, %v731_v11 }
 0x14a   :  { %v778_v19 = vmax.f32 %v2204_v2, %v760_v23  ;;  %v869_v34 = vpop.f32.mrf.mxu1 }
 0x14b   :  { %v870_v13 = vadd.f32 %v869_v34, %v841_v18 }
 0x14c   :  { %v886_v21 = vmax.f32 %v778_v19, %v868_v12  ;;  %v733_v22 = vpop.f32.mrf.mxu2  ;;  %v2285_v19 = vld [vmem:[%s2326_s2] ss:$0 sm:$0xff] }
 0x14f   :  { %v761_v24 = vpop.f32.mrf.mxu3  ;;  %v844_v25 = vpop.f32.mrf.mxu0 }
 0x150   :  { %v762_v27 = vadd.f32 %v761_v24, %v733_v22 }
 0x152   :  { %v779_v15 = vmax.f32 %v2222_v59, %v762_v27  ;;  %v872_v26 = vpop.f32.mrf.mxu1  ;;  %v2291_v27 = vld [vmem:[%s2327_s3] ss:$0 sm:$0xff] }
 0x153   :  { %v873_v36 = vadd.f32 %v872_v26, %v844_v25 }
 0x154   :  { %v2267_v28 = vmax.f32 %v779_v15, %v870_v13  ;;  %v736_v29 = vpop.f32.mrf.mxu2 }
 0x157   :  { %v764_v30 = vpop.f32.mrf.mxu3  ;;  %v846_v31 = vpop.f32.mrf.mxu0 }
 0x158   :  { %v765_v14 = vadd.f32 %v764_v30, %v736_v29 }
 0x15a   :  { %v780_v32 = vmax.f32 %v2234_v20, %v765_v14  ;;  %v874_v2 = vpop.f32.mrf.mxu1 }
 0x15b   :  { %v875_v33 = vadd.f32 %v874_v2, %v846_v31 }
 0x15c   :  { %v2270_v37 = vmax.f32 %v780_v32, %v873_v36  ;;  %v738_v38 = vpop.f32.mrf.mxu2 }
 0x15f   :  { %v766_v40 = vpop.f32.mrf.mxu3  ;;  %v849_v42 = vpop.f32.mrf.mxu0 }
 0x160   :  { %v767_v41 = vadd.f32 %v766_v40, %v738_v38 }
 0x162   :  { %v781_v59 = vmax.f32 %v2252_v35, %v767_v41  ;;  %v877_v1 = vpop.f32.mrf.mxu1 }
 0x163   :  { %v878_v43 = vadd.f32 %v877_v1, %v849_v42 }
 0x164   :  { %v2273_v44 = vmax.f32 %v781_v59, %v875_v33  ;;  %v741_v45 = vpop.f32.mrf.mxu2 }
 0x167   :  { %v769_v46 = vpop.f32.mrf.mxu3  ;;  %v851_v48 = vpop.f32.mrf.mxu0 }
 0x168   :  { %v770_v47 = vadd.f32 %v769_v46, %v741_v45 }
 0x16a   :  { %v782_v20 = vmax.f32 %v2261_v49, %v770_v47  ;;  %v879_v50 = vpop.f32.mrf.mxu1 }
 0x16b   :  { %v880_v0 = vadd.f32 %v879_v50, %v851_v48 }
 0x16c   :  { %v2276_v10 = vmax.f32 %v782_v20, %v878_v43  ;;  %v743_v3 = vpop.f32.mrf.mxu2 }
 0x16f   :  { %v771_v51 = vpop.f32.mrf.mxu3  ;;  %v854_v53 = vpop.f32.mrf.mxu0 }
 0x170   :  { %v772_v52 = vadd.f32 %v771_v51, %v743_v3 }
 0x172   :  { %v783_v39 = vmax.f32 %v675_v4, %v772_v52  ;;  %v882_v35 = vpop.f32.mrf.mxu1 }
 0x173   :  { %v883_v54 = vadd.f32 %v882_v35, %v854_v53 }
 0x174   :  { %v2278_v55 = vmax.f32 %v783_v39, %v880_v0  ;;  %v746_v56 = vpop.f32.mrf.mxu2 }
 0x177   :  { %v774_v7 = vpop.f32.mrf.mxu3  ;;  %v856_v6 = vpop.f32.mrf.mxu0 }
 0x178   :  { %v775_v5 = vadd.f32 %v774_v7, %v746_v56 }
 0x17a   :  { %v784_v8 = vmax.f32 %v676_v60, %v775_v5  ;;  %v884_v9 = vpop.f32.mrf.mxu1 }
 0x17c   :  { %v2280_v49 = vmax.f32 %v784_v8, %v883_v54  ;;  %v748_v57 = vpop.f32.mrf.mxu2 }
 0x17f   :  { %v776_v58 = vpop.f32.mrf.mxu3  ;;  %v1055_v61 = vpop.f32.mrf.mxu0 }
 0x182   :  { %v1083_v62 = vpop.f32.mrf.mxu1 }
 0x183   :  { %v1084_v11 = vadd.f32 %v1083_v62, %v1055_v61 }
 0x184   :  { %v947_v63 = vpop.f32.mrf.mxu2 }
 0x187   :  { %v975_v16 = vpop.f32.mrf.mxu3  ;;  %v1057_v4 = vpop.f32.mrf.mxu0 }
 0x188   :  { %v976_v12 = vadd.f32 %v975_v16, %v947_v63 }
 0x18a   :  { %v994_v17 = vmax.f32 %v886_v21, %v976_v12  ;;  %v1085_v23 = vpop.f32.mrf.mxu1 }
 0x18b   :  { %v1086_v25 = vadd.f32 %v1085_v23, %v1057_v4 }
 0x18c   :  { %v1102_v18 = vmax.f32 %v994_v17, %v1084_v11  ;;  %v949_v60 = vpop.f32.mrf.mxu2 }
 0x18e   :  { %v1113_v24 = vmul.f32 %v2285_v19, %v1102_v18 }
 0x18f   :  { %v977_v34 = vpop.f32.mrf.mxu3  ;;  %v1060_v22 = vpop.f32.mrf.mxu0 }
 0x190   :  { %v978_v13 = vadd.f32 %v977_v34, %v949_v60  ;;  %v1124_v36 = vadd.f32 %v2291_v27, %v1113_v24 }
 0x192   :  { %v995_v21 = vmax.f32 %v2267_v28, %v978_v13  ;;  %v1088_v15 = vpop.f32.mrf.mxu1  ;;  %v1131_v33 = vmax.f32 %v1124_v36, 0.0 }
 0x193   :  { %v1089_v40 = vadd.f32 %v1088_v15, %v1060_v22 }
 0x194   :  { %v1103_v26 = vmax.f32 %v995_v21, %v1086_v25  ;;  %v952_v30 = vpop.f32.mrf.mxu2 }
 0x196   :  { %v1114_v29 = vmul.f32 %v2285_v19, %v1103_v26 }
 0x197   :  { %v980_v14 = vpop.f32.mrf.mxu3  ;;  %v1062_v2 = vpop.f32.mrf.mxu0 }
 0x198   :  { %v1125_v31 = vadd.f32 %v2291_v27, %v1114_v29  ;;  %v981_v32 = vadd.f32 %v980_v14, %v952_v30 }
 0x19a   :  { %v1132_v38 = vmax.f32 %v1125_v31, 0.0  ;;  %v996_v41 = vmax.f32 %v2270_v37, %v981_v32  ;;  %v1090_v42 = vpop.f32.mrf.mxu1 }
 0x19b   :  { %v1091_v48 = vadd.f32 %v1090_v42, %v1062_v2 }
 0x19c   :  { %v1565_v59 = vpack.c.bf16 %v1132_v38, %v1131_v33  ;;  %v1104_v28 = vmax.f32 %v996_v41, %v1089_v40  ;;  %v954_v1 = vpop.f32.mrf.mxu2 }
 0x19e   :  { %1566 = vst [vmem:[%s2328_s4] sm:$0xff] %v1565_v59   ;;  %v1115_v47 = vmul.f32 %v2285_v19, %v1104_v28 }
 0x19f   :  { %v982_v43 = vpop.f32.mrf.mxu3  ;;  %v1065_v46 = vpop.f32.mrf.mxu0 }
 0x1a0   :  { %v983_v45 = vadd.f32 %v982_v43, %v954_v1  ;;  %v1126_v37 = vadd.f32 %v2291_v27, %v1115_v47 }
 0x1a2   :  { %v997_v20 = vmax.f32 %v2273_v44, %v983_v45  ;;  %v1093_v50 = vpop.f32.mrf.mxu1  ;;  %v1133_v54 = vmax.f32 %v1126_v37, 0.0 }
 0x1a3   :  { %v1094_v7 = vadd.f32 %v1093_v50, %v1065_v46 }
 0x1a4   :  { %v1105_v0 = vmax.f32 %v997_v20, %v1091_v48  ;;  %v957_v51 = vpop.f32.mrf.mxu2 }
 0x1a6   :  { %v1116_v3 = vmul.f32 %v2285_v19, %v1105_v0 }
 0x1a7   :  { %v985_v52 = vpop.f32.mrf.mxu3  ;;  %v1067_v35 = vpop.f32.mrf.mxu0 }
 0x1a8   :  { %v1127_v53 = vadd.f32 %v2291_v27, %v1116_v3  ;;  %v986_v39 = vadd.f32 %v985_v52, %v957_v51 }
 0x1aa   :  { %v1134_v56 = vmax.f32 %v1127_v53, 0.0  ;;  %v998_v5 = vmax.f32 %v2276_v10, %v986_v39  ;;  %v1095_v6 = vpop.f32.mrf.mxu1 }
 0x1ab   :  { %v1096_v63 = vadd.f32 %v1095_v6, %v1067_v35 }
 0x1ac   :  { %v1570_v8 = vpack.c.bf16 %v1134_v56, %v1133_v54  ;;  %v1106_v44 = vmax.f32 %v998_v5, %v1094_v7  ;;  %v959_v9 = vpop.f32.mrf.mxu2 }
 0x1ae   :  { %1577 = vst [vmem:[%s2328_s4 + $0x8] sm:$0xff] %v1570_v8   ;;  %v1117_v62 = vmul.f32 %v2285_v19, %v1106_v44 }
 0x1af   :  { %v987_v57 = vpop.f32.mrf.mxu3  ;;  %v1070_v61 = vpop.f32.mrf.mxu0 }
 0x1b0   :  { %v988_v58 = vadd.f32 %v987_v57, %v959_v9  ;;  %v1128_v10 = vadd.f32 %v2291_v27, %v1117_v62 }
 0x1b2   :  { %v999_v16 = vmax.f32 %v2278_v55, %v988_v58  ;;  %v1098_v12 = vpop.f32.mrf.mxu1  ;;  %v1135_v22 = vmax.f32 %v1128_v10, 0.0 }
 0x1b3   :  { %v1099_v60 = vadd.f32 %v1098_v12, %v1070_v61 }
 0x1b4   :  { %v1107_v4 = vmax.f32 %v999_v16, %v1096_v63  ;;  %v962_v17 = vpop.f32.mrf.mxu2 }
 0x1b6   :  { %v1118_v11 = vmul.f32 %v2285_v19, %v1107_v4 }
 0x1b7   :  { %v990_v23 = vpop.f32.mrf.mxu3  ;;  %v1072_v13 = vpop.f32.mrf.mxu0 }
 0x1b8   :  { %v1129_v18 = vadd.f32 %v2291_v27, %v1118_v11  ;;  %v991_v34 = vadd.f32 %v990_v23, %v962_v17 }
 0x1ba   :  { %v1136_v24 = vmax.f32 %v1129_v18, 0.0  ;;  %v1000_v25 = vmax.f32 %v2280_v49, %v991_v34  ;;  %v1100_v21 = vpop.f32.mrf.mxu1 }
 0x1bc   :  { %v1575_v15 = vpack.c.bf16 %v1136_v24, %v1135_v22  ;;  %v1108_v55 = vmax.f32 %v1000_v25, %v1099_v60  ;;  %v964_v36 = vpop.f32.mrf.mxu2 }
 0x1be   :  { %1578 = vst [vmem:[%s2328_s4 + $0x10] sm:$0xff] %v1575_v15   ;;  %v1119_v26 = vmul.f32 %v2285_v19, %v1108_v55 }
 0x1bf   :  { %v992_v29 = vpop.f32.mrf.mxu3 }
 0x1c0   :  { %v1130_v30 = vadd.f32 %v2291_v27, %v1119_v26 }
 0x1c2   :  { %v1137_v14 = vmax.f32 %v1130_v30, 0.0 }
 0x1c4   :  { %v1144_v31 = vpack.c.bf16 %v1137_v14, %v1137_v14 }
 0x1c6   :  { %1151 = vst [vmem:[%s2328_s4 + $0x18] sm:$0x1] %v1144_v31 }

// kernel: chess_classifier_forward.5
= control target key start
LH: loop header
LB: loop body
LE: loop exit
PB: predicated region body
PF: predicated region fallthrough
CT: control target
= control target key end

     0   :  { %s5125_s0 = inlined_call_operand.vmem [shape: bf16[2,36,512], index: 0, kind: input, shape index: {}]   ;;  %s5126_s1 = inlined_call_operand.vmem [shape: bf16[512,256], index: 1, kind: input, shape index: {}]   ;;  %s5127_s2 = inlined_call_operand.vmem [shape: f32[1,256], index: 2, kind: input, shape index: {}]   ;;  %s5128_s3 = inlined_call_operand.vmem [shape: f32[1,256], index: 3, kind: input, shape index: {}]   ;;  %s5129_s4 = inlined_call_operand.vmem [shape: bf16[256,512], index: 4, kind: input, shape index: {}]   ;;  %s5130_s5 = inlined_call_operand.vmem [shape: f32[1,512], index: 5, kind: input, shape index: {}]   ;;  %s5131_s6 = inlined_call_operand.vmem [shape: bf16[512,256], index: 6, kind: input, shape index: {}]   ;;  %s5132_s7 = inlined_call_operand.vmem [shape: f32[1,256], index: 7, kind: input, shape index: {}]   ;;  %s5133_s8 = inlined_call_operand.vmem [shape: bf16[256,128], index: 8, kind: input, shape index: {}]   ;;  %s5134_s9 = inlined_call_operand.vmem [shape: f32[1,128], index: 9, kind: input, shape index: {}]   ;;  %s5135_s10 = inlined_call_operand.hbm [shape: f32[2,128], index: 10, kind: output, shape index: {}]  }
   0x1   :  { %v2254_v0 = vld [vmem:[%s5126_s1 + $0x70] sm:$0xf]  ;;  %v3093_v1 = vld [vmem:[%s5126_s1 + $0x74] sm:$0xf0]  ;;  %v2246_v11 = vld [vmem:[%s5126_s1 + $0x60] sm:$0xf] }
   0x2   :  { %v2318_v2 = vld [vmem:[%s5126_s1 + $0xf0] sm:$0xf]  ;;  %v3387_v3 = vor.u32 %v3093_v1, %v2254_v0  ;;  %v3109_v4 = vld [vmem:[%s5126_s1 + $0xf4] sm:$0xf0]  ;;  %v3091_v13 = vld [vmem:[%s5126_s1 + $0x64] sm:$0xf0] }
   0x3   :  { %v2382_v5 = vld [vmem:[%s5126_s1 + $0x170] sm:$0xf]  ;;  %v3125_v6 = vld [vmem:[%s5126_s1 + $0x174] sm:$0xf0]  ;;  %v3398_v7 = vor.u32 %v3109_v4, %v2318_v2  ;;  %v2310_v14 = vld [vmem:[%s5126_s1 + $0xe0] sm:$0xf]  ;;  %v3425_v16 = vor.u32 %v3091_v13, %v2246_v11 }
   0x4   :  { %v3400_v8 = vor.u32 %v3125_v6, %v2382_v5  ;;  %v2446_v9 = vld [vmem:[%s5126_s1 + $0x1f0] sm:$0xf]  ;;  %v3141_v10 = vld [vmem:[%s5126_s1 + $0x1f4] sm:$0xf0]  ;;  %484 = vmatpush.bf16.msra.mxu0 %v3387_v3  ;;  %v3107_v15 = vld [vmem:[%s5126_s1 + $0xe4] sm:$0xf0] }
   0x5   :  { %v3412_v12 = vor.u32 %v3141_v10, %v2446_v9  ;;  %507 = vmatpush.bf16.msra.mxu1 %v3398_v7  ;;  %v3427_v17 = vor.u32 %v3107_v15, %v2310_v14  ;;  %v2374_v18 = vld [vmem:[%s5126_s1 + $0x160] sm:$0xf]  ;;  %v3123_v19 = vld [vmem:[%s5126_s1 + $0x164] sm:$0xf0]  ;;  %v2238_v23 = vld [vmem:[%s5126_s1 + $0x50] sm:$0xf] }
   0x6   :  { %530 = vmatpush.bf16.msra.mxu2 %v3400_v8  ;;  %v2438_v20 = vld [vmem:[%s5126_s1 + $0x1e0] sm:$0xf]  ;;  %v3439_v21 = vor.u32 %v3123_v19, %v2374_v18  ;;  %v3139_v22 = vld [vmem:[%s5126_s1 + $0x1e4] sm:$0xf0]  ;;  %v3089_v24 = vld [vmem:[%s5126_s1 + $0x54] sm:$0xf0] }
   0x7   :  { %553 = vmatpush.bf16.msra.mxu3 %v3412_v12  ;;  %v3450_v25 = vor.u32 %v3139_v22, %v2438_v20  ;;  %v2302_v26 = vld [vmem:[%s5126_s1 + $0xd0] sm:$0xf]  ;;  %v3105_v27 = vld [vmem:[%s5126_s1 + $0xd4] sm:$0xf0]  ;;  %v3462_v29 = vor.u32 %v3089_v24, %v2238_v23  ;;  %v2230_v35 = vld [vmem:[%s5126_s1 + $0x40] sm:$0xf] }
   0x8   :  { %v2366_v28 = vld [vmem:[%s5126_s1 + $0x150] sm:$0xf]  ;;  %485 = vmatpush.bf16.msra.mxu0 %v3425_v16  ;;  %v3121_v30 = vld [vmem:[%s5126_s1 + $0x154] sm:$0xf0]  ;;  %v3475_v33 = vor.u32 %v3105_v27, %v2302_v26  ;;  %v3087_v36 = vld [vmem:[%s5126_s1 + $0x44] sm:$0xf0] }
   0x9   :  { %v2430_v31 = vld [vmem:[%s5126_s1 + $0x1d0] sm:$0xf]  ;;  %v3137_v32 = vld [vmem:[%s5126_s1 + $0x1d4] sm:$0xf0]  ;;  %508 = vmatpush.bf16.msra.mxu1 %v3427_v17  ;;  %v3477_v34 = vor.u32 %v3121_v30, %v2366_v28  ;;  %v2294_v37 = vld [vmem:[%s5126_s1 + $0xc0] sm:$0xf]  ;;  %v3507_v44 = vor.u32 %v3087_v36, %v2230_v35 }
   0xa   :  { %531 = vmatpush.bf16.msra.mxu2 %v3439_v21  ;;  %v3489_v38 = vor.u32 %v3137_v32, %v2430_v31  ;;  %v3103_v39 = vld [vmem:[%s5126_s1 + $0xc4] sm:$0xf0]  ;;  %v2358_v40 = vld [vmem:[%s5126_s1 + $0x140] sm:$0xf]  ;;  %v2222_v47 = vld [vmem:[%s5126_s1 + $0x30] sm:$0xf] }
   0xb   :  { %554 = vmatpush.bf16.msra.mxu3 %v3450_v25  ;;  %v3119_v41 = vld [vmem:[%s5126_s1 + $0x144] sm:$0xf0]  ;;  %v2422_v42 = vld [vmem:[%s5126_s1 + $0x1c0] sm:$0xf]  ;;  %v3511_v45 = vor.u32 %v3103_v39, %v2294_v37  ;;  %v3085_v48 = vld [vmem:[%s5126_s1 + $0x34] sm:$0xf0] }
   0xc   :  { %v3135_v43 = vld [vmem:[%s5126_s1 + $0x1c4] sm:$0xf0]  ;;  %486 = vmatpush.bf16.msra.mxu0 %v3462_v29  ;;  %v3513_v46 = vor.u32 %v3119_v41, %v2358_v40  ;;  %v2286_v49 = vld [vmem:[%s5126_s1 + $0xb0] sm:$0xf]  ;;  %v3101_v51 = vld [vmem:[%s5126_s1 + $0xb4] sm:$0xf0]  ;;  %v3543_v56 = vor.u32 %v3085_v48, %v2222_v47 }
   0xd   :  { %509 = vmatpush.bf16.msra.mxu1 %v3475_v33  ;;  %v3525_v50 = vor.u32 %v3135_v43, %v2422_v42  ;;  %v2350_v52 = vld [vmem:[%s5126_s1 + $0x130] sm:$0xf]  ;;  %v3117_v53 = vld [vmem:[%s5126_s1 + $0x134] sm:$0xf0]  ;;  %v3547_v57 = vor.u32 %v3101_v51, %v2286_v49  ;;  %v2214_v59 = vld [vmem:[%s5126_s1 + $0x20] sm:$0xf] }
   0xe   :  { %532 = vmatpush.bf16.msra.mxu2 %v3477_v34  ;;  %v2414_v54 = vld [vmem:[%s5126_s1 + $0x1b0] sm:$0xf]  ;;  %v3133_v55 = vld [vmem:[%s5126_s1 + $0x1b4] sm:$0xf0]  ;;  %v3549_v58 = vor.u32 %v3117_v53, %v2350_v52  ;;  %v3083_v60 = vld [vmem:[%s5126_s1 + $0x24] sm:$0xf0] }
   0xf   :  { %555 = vmatpush.bf16.msra.mxu3 %v3489_v38  ;;  %v2278_v61 = vld [vmem:[%s5126_s1 + $0xa0] sm:$0xf]  ;;  %v3561_v62 = vor.u32 %v3133_v55, %v2414_v54  ;;  %v3099_v63 = vld [vmem:[%s5126_s1 + $0xa4] sm:$0xf0]  ;;  %v3579_v5 = vor.u32 %v3083_v60, %v2214_v59  ;;  %v2206_v10 = vld [vmem:[%s5126_s1 + $0x10] sm:$0xf] }
  0x10   :  { %487 = vmatpush.bf16.msra.mxu0 %v3507_v44  ;;  %v2342_v0 = vld [vmem:[%s5126_s1 + $0x120] sm:$0xf]  ;;  %v3115_v1 = vld [vmem:[%s5126_s1 + $0x124] sm:$0xf0]  ;;  %v3583_v6 = vor.u32 %v3099_v63, %v2278_v61  ;;  %v3081_v11 = vld [vmem:[%s5126_s1 + $0x14] sm:$0xf0] }
  0x11   :  { %510 = vmatpush.bf16.msra.mxu1 %v3511_v45  ;;  %v2406_v2 = vld [vmem:[%s5126_s1 + $0x1a0] sm:$0xf]  ;;  %v3131_v4 = vld [vmem:[%s5126_s1 + $0x1a4] sm:$0xf0]  ;;  %v3585_v9 = vor.u32 %v3115_v1, %v2342_v0  ;;  %v2270_v13 = vld [vmem:[%s5126_s1 + $0x90] sm:$0xf]  ;;  %v3618_v24 = vor.u32 %v3081_v11, %v2206_v10 }
  0x12   :  { %533 = vmatpush.bf16.msra.mxu2 %v3513_v46  ;;  %v3597_v14 = vor.u32 %v3131_v4, %v2406_v2  ;;  %v3097_v15 = vld [vmem:[%s5126_s1 + $0x94] sm:$0xf0]  ;;  %v2334_v18 = vld [vmem:[%s5126_s1 + $0x110] sm:$0xf]  ;;  %v2198_v23 = vld [vmem:[%s5126_s1] sm:$0xf] }
  0x13   :  { %556 = vmatpush.bf16.msra.mxu3 %v3525_v50  ;;  %v3113_v19 = vld [vmem:[%s5126_s1 + $0x114] sm:$0xf0]  ;;  %v2398_v20 = vld [vmem:[%s5126_s1 + $0x190] sm:$0xf]  ;;  %v3079_v26 = vld [vmem:[%s5126_s1 + $0x4] sm:$0xf0]  ;;  %v3631_v30 = vor.u32 %v3097_v15, %v2270_v13 }
  0x14   :  { %488 = vmatpush.bf16.msra.mxu0 %v3543_v56  ;;  %v3129_v22 = vld [vmem:[%s5126_s1 + $0x194] sm:$0xf0]  ;;  %v2262_v27 = vld [vmem:[%s5126_s1 + $0x80] sm:$0xf]  ;;  %v3095_v28 = vld [vmem:[%s5126_s1 + $0x84] sm:$0xf0]  ;;  %v3633_v31 = vor.u32 %v3113_v19, %v2334_v18  ;;  %v3669_v49 = vor.u32 %v3079_v26, %v2198_v23 }
  0x15   :  { %511 = vmatpush.bf16.msra.mxu1 %v3547_v57  ;;  %v2326_v32 = vld [vmem:[%s5126_s1 + $0x100] sm:$0xf]  ;;  %v3111_v35 = vld [vmem:[%s5126_s1 + $0x104] sm:$0xf0]  ;;  %v3645_v37 = vor.u32 %v3129_v22, %v2398_v20  ;;  %v3072_v41 = vld [vmem:[%s5125_s0 + $0xc] sm:$0xf0]  ;;  %v3682_v54 = vor.u32 %v3095_v28, %v2262_v27 }
  0x16   :  { %534 = vmatpush.bf16.msra.mxu2 %v3549_v58  ;;  %v2390_v36 = vld [vmem:[%s5126_s1 + $0x180] sm:$0xf]  ;;  %v3127_v39 = vld [vmem:[%s5126_s1 + $0x184] sm:$0xf0]  ;;  %v3070_v42 = vld [vmem:[%s5125_s0 + $0x4] sm:$0xf]  ;;  %v3684_v55 = vor.u32 %v3111_v35, %v2326_v32 }
  0x17   :  { %557 = vmatpush.bf16.msra.mxu3 %v3561_v62  ;;  %v2166_v40 = vld [vmem:[%s5125_s0] sm:$0xf]  ;;  %v2168_v43 = vld [vmem:[%s5125_s0 + $0x10] sm:$0xf0]  ;;  %v2384_v48 = vld [vmem:[%s5126_s1 + $0x178] sm:$0xf0]  ;;  %v3696_v63 = vor.u32 %v3127_v39, %v2390_v36 }
  0x18   :  { %489 = vmatpush.bf16.msra.mxu0 %v3579_v5  ;;  %v3124_v47 = vld [vmem:[%s5126_s1 + $0x174] sm:$0xf]  ;;  %v2174_v51 = vld [vmem:[%s5125_s0 + $0x8] sm:$0xf]  ;;  %v2448_v53 = vld [vmem:[%s5126_s1 + $0x1f8] sm:$0xf0]  ;;  %v3709_v10 = vor.u32 %v3072_v41, %v2166_v40  ;;  %v3723_v19 = vor.u32 %v3070_v42, %v2168_v43 }
  0x19   :  { %512 = vmatpush.bf16.msra.mxu1 %v3583_v6  ;;  %v3140_v52 = vld [vmem:[%s5126_s1 + $0x1f4] sm:$0xf]  ;;  %v3073_v59 = vld [vmem:[%s5125_s0 + $0x14] sm:$0xf0]  ;;  %v3071_v60 = vld [vmem:[%s5125_s0 + $0xc] sm:$0xf]  ;;  %v3698_v0 = vor.u32 %v3124_v47, %v2384_v48 }
  0x1a   :  { %535 = vmatpush.bf16.msra.mxu2 %v3585_v9  ;;  %v2176_v61 = vld [vmem:[%s5125_s0 + $0x18] sm:$0xf0]  ;;  %v3092_v1 = vld [vmem:[%s5126_s1 + $0x74] sm:$0xf]  ;;  %v3711_v11 = vor.u32 %v3140_v52, %v2448_v53  ;;  %v3122_v15 = vld [vmem:[%s5126_s1 + $0x164] sm:$0xf]  ;;  %v3725_v20 = vor.u32 %v3073_v59, %v2174_v51 }
  0x1b   :  { %558 = vmatpush.bf16.msra.mxu3 %v3597_v14  ;;  %v2256_v2 = vld [vmem:[%s5126_s1 + $0x78] sm:$0xf0]  ;;  %v3108_v4 = vld [vmem:[%s5126_s1 + $0xf4] sm:$0xf]  ;;  %v2376_v18 = vld [vmem:[%s5126_s1 + $0x168] sm:$0xf0]  ;;  %v3735_v26 = vor.u32 %v3071_v60, %v2176_v61 }
  0x1c   :  { %490 = vmatpush.bf16.msra.mxu0 %v3618_v24  ;;  %v2320_v13 = vld [vmem:[%s5126_s1 + $0xf8] sm:$0xf0]  ;;  %v3138_v22 = vld [vmem:[%s5126_s1 + $0x1e4] sm:$0xf]  ;;  %v2440_v23 = vld [vmem:[%s5126_s1 + $0x1e8] sm:$0xf0]  ;;  %v3737_v27 = vor.u32 %v3092_v1, %v2256_v2  ;;  %v3743_v32 = vor.u32 %v3122_v15, %v2376_v18 }
  0x1d   :  { %513 = vmatpush.bf16.msra.mxu1 %v3631_v30  ;;  %v3741_v28 = vor.u32 %v3108_v4, %v2320_v13  ;;  %v3090_v35 = vld [vmem:[%s5126_s1 + $0x64] sm:$0xf]  ;;  %v2248_v36 = vld [vmem:[%s5126_s1 + $0x68] sm:$0xf0]  ;;  %v3756_v40 = vor.u32 %v3138_v22, %v2440_v23  ;;  %v3120_v42 = vld [vmem:[%s5126_s1 + $0x154] sm:$0xf] }
  0x1e   :  { %536 = vmatpush.bf16.msra.mxu2 %v3633_v31  ;;  %5157 = vst [vmem:[#allocation6_spill] sm:$0xff] %v3743_v32  ;;  %v3106_v39 = vld [vmem:[%s5126_s1 + $0xe4] sm:$0xf]  ;;  %v2312_v41 = vld [vmem:[%s5126_s1 + $0xe8] sm:$0xf0]  ;;  %v3777_v51 = vor.u32 %v3090_v35, %v2248_v36 }
  0x1f   :  { %559 = vmatpush.bf16.msra.mxu3 %v3645_v37  ;;  %5156 = vst [vmem:[#allocation5_spill] sm:$0xff] %v3741_v28  ;;  %v2368_v43 = vld [vmem:[%s5126_s1 + $0x158] sm:$0xf0]  ;;  %v3136_v47 = vld [vmem:[%s5126_s1 + $0x1d4] sm:$0xf]  ;;  %v3781_v52 = vor.u32 %v3106_v39, %v2312_v41 }
  0x20   :  { %491 = vmatpush.bf16.msra.mxu0 %v3669_v49  ;;  %5158 = vst [vmem:[#allocation7_spill] sm:$0xff] %v3756_v40  ;;  %v2432_v48 = vld [vmem:[%s5126_s1 + $0x1d8] sm:$0xf0]  ;;  %v3783_v53 = vor.u32 %v3120_v42, %v2368_v43  ;;  %v3088_v59 = vld [vmem:[%s5126_s1 + $0x54] sm:$0xf] }
  0x21   :  { %514 = vmatpush.bf16.msra.mxu1 %v3682_v54  ;;  %5159 = vst [vmem:[#allocation8_spill] sm:$0xff] %v3777_v51  ;;  %v2240_v60 = vld [vmem:[%s5126_s1 + $0x58] sm:$0xf0]  ;;  %v3104_v61 = vld [vmem:[%s5126_s1 + $0xd4] sm:$0xf]  ;;  %v3795_v1 = vor.u32 %v3136_v47, %v2432_v48 }
  0x22   :  { %537 = vmatpush.bf16.msra.mxu2 %v3684_v55  ;;  %5160 = vst [vmem:[#allocation9_spill] sm:$0xff] %v3781_v52  ;;  %v2304_v2 = vld [vmem:[%s5126_s1 + $0xd8] sm:$0xf0]  ;;  %v3118_v4 = vld [vmem:[%s5126_s1 + $0x144] sm:$0xf]  ;;  %v3813_v22 = vor.u32 %v3088_v59, %v2240_v60 }
  0x23   :  { %560 = vmatpush.bf16.msra.mxu3 %v3696_v63  ;;  %492 = vmatmul.bf16.vlgmr.msra.gmra.mxu0 %v3709_v10  ;;  %5161 = vst [vmem:[#allocation10_spill] sm:$0xff] %v3783_v53  ;;  %v2360_v13 = vld [vmem:[%s5126_s1 + $0x148] sm:$0xf0]  ;;  %v3134_v15 = vld [vmem:[%s5126_s1 + $0x1c4] sm:$0xf]  ;;  %v3823_v36 = vor.u32 %v3104_v61, %v2304_v2 }
  0x24   :  { %515 = vmatmul.bf16.vlgmr.msra.gmra.mxu1 %v3723_v19  ;;  %576 = vmatpush.bf16.msrb.mxu0 %v3737_v27  ;;  %5162 = vst [vmem:[#allocation11_spill] sm:$0xff] %v3795_v1  ;;  %v2424_v18 = vld [vmem:[%s5126_s1 + $0x1c8] sm:$0xf0]  ;;  %v2182_v23 = vld [vmem:[%s5125_s0 + $0x20] sm:$0xf]  ;;  %v3825_v39 = vor.u32 %v3118_v4, %v2360_v13 }
  0x25   :  { %538 = vmatmul.bf16.vlgmr.msra.gmra.mxu2 %v3725_v20  ;;  %599 = vmatpush.bf16.msrb.mxu1 %v3741_v28  ;;  %v3076_v35 = vld [vmem:[%s5125_s0 + $0x2c] sm:$0xf0]  ;;  %5163 = vst [vmem:[#allocation12_spill] sm:$0xff] %v3823_v36  ;;  %v3086_v41 = vld [vmem:[%s5126_s1 + $0x44] sm:$0xf]  ;;  %v3843_v59 = vor.u32 %v3134_v15, %v2424_v18 }
  0x26   :  { %622 = vmatpush.bf16.msrb.mxu2 %v3698_v0  ;;  %561 = vmatmul.bf16.vlgmr.msra.gmra.mxu3 %v3735_v26  ;;  %5164 = vst [vmem:[#allocation13_spill] sm:$0xff] %v3825_v39  ;;  %v2232_v42 = vld [vmem:[%s5126_s1 + $0x48] sm:$0xf0]  ;;  %v3102_v43 = vld [vmem:[%s5126_s1 + $0xc4] sm:$0xf] }
  0x27   :  { %645 = vmatpush.bf16.msrb.mxu3 %v3711_v11  ;;  %v3074_v47 = vld [vmem:[%s5125_s0 + $0x24] sm:$0xf]  ;;  %v2184_v48 = vld [vmem:[%s5125_s0 + $0x30] sm:$0xf0]  ;;  %5165 = vst [vmem:[#allocation14_spill] sm:$0xff] %v3843_v59 }
  0x28   :  { %577 = vmatpush.bf16.msrb.mxu0 %v3777_v51  ;;  %v2296_v60 = vld [vmem:[%s5126_s1 + $0xc8] sm:$0xf0]  ;;  %v3116_v61 = vld [vmem:[%s5126_s1 + $0x134] sm:$0xf]  ;;  %v2352_v2 = vld [vmem:[%s5126_s1 + $0x138] sm:$0xf0] }
  0x29   :  { %600 = vmatpush.bf16.msrb.mxu1 %v3781_v52  ;;  %v2190_v4 = vld [vmem:[%s5125_s0 + $0x28] sm:$0xf]  ;;  %v3132_v13 = vld [vmem:[%s5126_s1 + $0x1b4] sm:$0xf]  ;;  %v2416_v15 = vld [vmem:[%s5126_s1 + $0x1b8] sm:$0xf0]  ;;  %v3873_v52 = vor.u32 %v3086_v41, %v2232_v42  ;;  %v3879_v51 = vor.u32 %v3116_v61, %v2352_v2  ;;  %v3890_v42 = vor.u32 %v3076_v35, %v2182_v23 }
  0x2a   :  { %623 = vmatpush.bf16.msrb.mxu2 %v3743_v32  ;;  %v3077_v18 = vld [vmem:[%s5125_s0 + $0x34] sm:$0xf0]  ;;  %v3084_v32 = vld [vmem:[%s5126_s1 + $0x34] sm:$0xf]  ;;  %v2224_v28 = vld [vmem:[%s5126_s1 + $0x38] sm:$0xf0] }
  0x2b   :  { %646 = vmatpush.bf16.msrb.mxu3 %v3756_v40  ;;  %5166 = vst [vmem:[#allocation15_spill] sm:$0xff] %v3873_v52  ;;  %v3877_v40 = vor.u32 %v3102_v43, %v2296_v60  ;;  %v3100_v41 = vld [vmem:[%s5126_s1 + $0xb4] sm:$0xf]  ;;  %v3893_v43 = vor.u32 %v3132_v13, %v2416_v15  ;;  %v2288_v60 = vld [vmem:[%s5126_s1 + $0xb8] sm:$0xf0]  ;;  %v3906_v23 = vor.u32 %v3077_v18, %v2190_v4 }
  0x2c   :  { %578 = vmatpush.bf16.msrb.mxu0 %v3813_v22  ;;  %5168 = vst [vmem:[#allocation17_spill] sm:$0xff] %v3879_v51  ;;  %v3114_v61 = vld [vmem:[%s5126_s1 + $0x124] sm:$0xf]  ;;  %v2344_v2 = vld [vmem:[%s5126_s1 + $0x128] sm:$0xf0] }
  0x2d   :  { %601 = vmatpush.bf16.msrb.mxu1 %v3823_v36  ;;  %5167 = vst [vmem:[#allocation16_spill] sm:$0xff] %v3877_v40  ;;  %v3130_v35 = vld [vmem:[%s5126_s1 + $0x1a4] sm:$0xf]  ;;  %v2408_v13 = vld [vmem:[%s5126_s1 + $0x1a8] sm:$0xf0]  ;;  %v3926_v4 = vor.u32 %v3114_v61, %v2344_v2 }
  0x2e   :  { %624 = vmatpush.bf16.msrb.mxu2 %v3783_v53  ;;  %v2192_v53 = vld [vmem:[%s5125_s0 + $0x38] sm:$0xf0]  ;;  %5169 = vst [vmem:[#allocation18_spill] sm:$0xff] %v3893_v43 }
  0x2f   :  { %647 = vmatpush.bf16.msrb.mxu3 %v3795_v1  ;;  %v3075_v1 = vld [vmem:[%s5125_s0 + $0x2c] sm:$0xf]  ;;  %5172 = vst [vmem:[#allocation21_spill] sm:$0xff] %v3926_v4 }
  0x30   :  { %v3914_v15 = vor.u32 %v3075_v1, %v2192_v53  ;;  %579 = vmatpush.bf16.msrb.mxu0 %v3873_v52  ;;  %v2216_v53 = vld [vmem:[%s5126_s1 + $0x28] sm:$0xf0] }
  0x31   :  { %602 = vmatpush.bf16.msrb.mxu1 %v3877_v40 }
  0x32   :  { %625 = vmatpush.bf16.msrb.mxu2 %v3825_v39  ;;  %v3904_v39 = vor.u32 %v3074_v47, %v2184_v48  ;;  %v3082_v47 = vld [vmem:[%s5126_s1 + $0x24] sm:$0xf]  ;;  %v3924_v48 = vor.u32 %v3100_v41, %v2288_v60 }
  0x33   :  { %648 = vmatpush.bf16.msrb.mxu3 %v3843_v59  ;;  %v3917_v59 = vor.u32 %v3084_v32, %v2224_v28  ;;  %v3098_v28 = vld [vmem:[%s5126_s1 + $0xa4] sm:$0xf] }
  0x34   :  { %5171 = vst [vmem:[#allocation20_spill] sm:$0xff] %v3924_v48 }
  0x35   :  { %5170 = vst [vmem:[#allocation19_spill] sm:$0xff] %v3917_v59 }
  0x36   :  { %626 = vmatpush.bf16.msrb.mxu2 %v3879_v51 }
  0x37   :  { %15 = vsyncpa [#allocation3], 0  ;;  %497 = vmatmul.bf16.gmra.mxu0 %v3890_v42  ;;  %649 = vmatpush.bf16.msrb.mxu3 %v3893_v43  ;;  %v3936_v32 = vor.u32 %v3130_v35, %v2408_v13  ;;  %v2280_v1 = vld [vmem:[%s5126_s1 + $0xa8] sm:$0xf0]  ;;  %v3112_v18 = vld [vmem:[%s5126_s1 + $0x114] sm:$0xf]  ;;  %v3957_v2 = vor.u32 %v3082_v47, %v2216_v53 }
  0x38   :  { %v2336_v41 = vld [vmem:[%s5126_s1 + $0x118] sm:$0xf0]  ;;  %520 = vmatmul.bf16.gmra.mxu1 %v3904_v39  ;;  %543 = vmatmul.bf16.gmra.mxu2 %v3906_v23  ;;  %v3128_v60 = vld [vmem:[%s5126_s1 + $0x194] sm:$0xf]  ;;  %v3961_v35 = vor.u32 %v3098_v28, %v2280_v1  ;;  %v3110_v1 = vld [vmem:[%s5126_s1 + $0x104] sm:$0xf] }
  0x39   :  { %5173 = vst [vmem:[#allocation22_spill] sm:$0xff] %v3936_v32  ;;  %v2400_v61 = vld [vmem:[%s5126_s1 + $0x198] sm:$0xf0]  ;;  %566 = vmatmul.bf16.gmra.mxu3 %v3914_v15  ;;  %580 = vmatpush.bf16.msrb.mxu0 %v3917_v59  ;;  %v3963_v13 = vor.u32 %v3112_v18, %v2336_v41  ;;  %v3080_v43 = vld [vmem:[%s5126_s1 + $0x14] sm:$0xf]  ;;  %vm670_vm0 = vcmask 1043456  }
  0x3a   :  { %603 = vmatpush.bf16.msrb.mxu1 %v3924_v48  ;;  %627 = vmatpush.bf16.msrb.mxu2 %v3926_v4  ;;  %v2208_v51 = vld [vmem:[%s5126_s1 + $0x18] sm:$0xf0]  ;;  %v3096_v47 = vld [vmem:[%s5126_s1 + $0x94] sm:$0xf]  ;;  %v3975_v53 = vor.u32 %v3128_v60, %v2400_v61  ;;  %v2328_v18 = vld [vmem:[%s5126_s1 + $0x108] sm:$0xf0] }
  0x3b   :  { %5174 = vst [vmem:[#allocation23_spill] sm:$0xff] %v3963_v13  ;;  %650 = vmatpush.bf16.msrb.mxu3 %v3936_v32  ;;  %v2272_v28 = vld [vmem:[%s5126_s1 + $0x98] sm:$0xf0]  ;;  %v44_v41 = vld [vmem:[%s5125_s0 + $0x40] sm:$0x33]  ;;  %v3999_v4 = vor.u32 %v3080_v43, %v2208_v51  ;;  %v4005_v59 = vor.u32 %v3110_v1, %v2328_v18  ;;  %vm962_vm1 = vcmask 1040384  }
  0x3c   :  { %5175 = vst [vmem:[#allocation24_spill] sm:$0xff] %v3975_v53  ;;  %v3126_v60 = vld [vmem:[%s5126_s1 + $0x184] sm:$0xf]  ;;  %v2392_v61 = vld [vmem:[%s5126_s1 + $0x188] sm:$0xf0]  ;;  %v4003_v48 = vor.u32 %v3096_v47, %v2272_v28  ;;  %v136_v36 = vunpack.c.l.b16 %v44_v41  ;;  %v137_v28 = vunpack.c.h.b16 %v44_v41  ;;  %s3322_s16 = smov [#allocation2]  }
  0x3d   :  { %v45_v32 = vld [vmem:[%s5125_s0 + $0x48] sm:$0x33]  ;;  %581 = vmatpush.bf16.msrb.mxu0 %v3957_v2  ;;  %v3078_v40 = vld [vmem:[%s5126_s1 + $0x4] sm:$0xf]  ;;  %v4014_v51 = vor.u32 %v3126_v60, %v2392_v61  ;;  %s2153_s17 = sshll.u32 %s3322_s16, 4  ;;  %s2155_s19 = sshll.u32 %s5135_s10, 4  ;;  %s2154_s17 = int_to_ptr.vmem [resolvable:$true] %s2153_s17  ;;  %s2156_s19 = int_to_ptr.hbm [resolvable:$true] %s2155_s19 }
  0x3e   :  { %604 = vmatpush.bf16.msrb.mxu1 %v3961_v35  ;;  %628 = vmatpush.bf16.msrb.mxu2 %v3963_v13  ;;  %v2200_v52 = vld [vmem:[%s5126_s1 + $0x8] sm:$0xf0]  ;;  %v3094_v43 = vld [vmem:[%s5126_s1 + $0x84] sm:$0xf]  ;;  %v138_v1 = vunpack.c.l.b16 %v45_v32  ;;  %v139_v18 = vunpack.c.h.b16 %v45_v32  ;;  %v4029_v61 = vpack.c.b16 %v136_v36, %v136_v36 }
  0x3f   :  { %651 = vmatpush.bf16.msrb.mxu3 %v3975_v53  ;;  %v2264_v47 = vld [vmem:[%s5126_s1 + $0x88] sm:$0xf0]  ;;  %v4023_v13 = vor.u32 %v3078_v40, %v2200_v52  ;;  %v4033_v53 = vpack.c.b16 %v137_v28, %v137_v28 }
  0x40   :  { %v4027_v60 = vor.u32 %v3094_v43, %v2264_v47  ;;  %v4035_v41 = vpack.c.b16 %v138_v1, %v138_v1  ;;  %v4038_v40 = vpack.c.b16 %v139_v18, %v139_v18  ;;  %v2490_v52 = vld [vmem:[%s5125_s0 + $0x88] sm:$0xf0] }
  0x41   :  { %582 = vmatpush.bf16.msrb.mxu0 %v3999_v4 }
  0x42   :  { %605 = vmatpush.bf16.msrb.mxu1 %v4003_v48  ;;  %629 = vmatpush.bf16.msrb.mxu2 %v4005_v59 }
  0x43   :  { %652 = vmatpush.bf16.msrb.mxu3 %v4014_v51 }
  0x45   :  { %583 = vmatpush.bf16.msrb.mxu0 %v4023_v13 }
  0x46   :  { %802 = vmatpush.bf16.msra.mxu2 %v3400_v8  ;;  %606 = vmatpush.bf16.msrb.mxu1 %v4027_v60  ;;  %v5178_v8 = vld [vmem:[#allocation8_spill] sm:$0xff] }
  0x47   :  { %825 = vmatpush.bf16.msra.mxu3 %v3412_v12  ;;  %502 = vmatmul.bf16.gmra.mxu0 %v4029_v61  ;;  %v5179_v12 = vld [vmem:[#allocation7_spill] sm:$0xff] }
  0x48   :  { %525 = vmatmul.bf16.gmra.mxu1 %v4033_v53  ;;  %548 = vmatmul.bf16.gmra.mxu2 %v4035_v41 }
  0x49   :  { %756 = vmatpush.bf16.msra.mxu0 %v3387_v3  ;;  %571 = vmatmul.bf16.gmra.mxu3 %v4038_v40  ;;  %v5176_v3 = vld [vmem:[#allocation5_spill] sm:$0xff] }
  0x4a   :  { %779 = vmatpush.bf16.msra.mxu1 %v3398_v7  ;;  %803 = vmatpush.bf16.msra.mxu2 %v3439_v21  ;;  %v5177_v7 = vld [vmem:[#allocation6_spill] sm:$0xff]  ;;  %v5182_v21 = vld [vmem:[#allocation11_spill] sm:$0xff] }
  0x4b   :  { %826 = vmatpush.bf16.msra.mxu3 %v3450_v25  ;;  %v5183_v25 = vld [vmem:[#allocation12_spill] sm:$0xff] }
  0x4d   :  { %757 = vmatpush.bf16.msra.mxu0 %v3425_v16  ;;  %v5180_v16 = vld [vmem:[#allocation9_spill] sm:$0xff] }
  0x4e   :  { %780 = vmatpush.bf16.msra.mxu1 %v3427_v17  ;;  %804 = vmatpush.bf16.msra.mxu2 %v3477_v34  ;;  %v5181_v17 = vld [vmem:[#allocation10_spill] sm:$0xff] }
  0x4f   :  { %827 = vmatpush.bf16.msra.mxu3 %v3489_v38  ;;  %v5186_v34 = vld [vmem:[#allocation14_spill] sm:$0xff]  ;;  %v5187_v38 = vld [vmem:[#allocation16_spill] sm:$0xff] }
  0x51   :  { %758 = vmatpush.bf16.msra.mxu0 %v3462_v29  ;;  %v5184_v29 = vld [vmem:[#allocation13_spill] sm:$0xff] }
  0x52   :  { %781 = vmatpush.bf16.msra.mxu1 %v3475_v33  ;;  %805 = vmatpush.bf16.msra.mxu2 %v3513_v46  ;;  %v5185_v33 = vld [vmem:[#allocation15_spill] sm:$0xff]  ;;  %v5190_v46 = vld [vmem:[#allocation18_spill] sm:$0xff] }
  0x53   :  { %828 = vmatpush.bf16.msra.mxu3 %v3525_v50  ;;  %v5191_v50 = vld [vmem:[#allocation20_spill] sm:$0xff] }
  0x55   :  { %759 = vmatpush.bf16.msra.mxu0 %v3507_v44  ;;  %v5188_v44 = vld [vmem:[#allocation17_spill] sm:$0xff] }
  0x56   :  { %782 = vmatpush.bf16.msra.mxu1 %v3511_v45  ;;  %806 = vmatpush.bf16.msra.mxu2 %v3549_v58  ;;  %v5189_v45 = vld [vmem:[#allocation19_spill] sm:$0xff] }
  0x57   :  { %829 = vmatpush.bf16.msra.mxu3 %v3561_v62  ;;  %584 = vmatmul.bf16.vlgmr.msrb.gmra.mxu0 %v3709_v10  ;;  %v5194_v58 = vld [vmem:[#allocation23_spill] sm:$0xff]  ;;  %v5195_v62 = vld [vmem:[#allocation24_spill] sm:$0xff] }
  0x58   :  { %607 = vmatmul.bf16.vlgmr.msrb.gmra.mxu1 %v3723_v19  ;;  %630 = vmatmul.bf16.vlgmr.msrb.gmra.mxu2 %v3725_v20  ;;  %v3148_v10 = vld [vmem:[%s5125_s0 + $0x7c] sm:$0xf0]  ;;  %v2482_v19 = vld [vmem:[%s5125_s0 + $0x80] sm:$0xf0]  ;;  %v2488_v20 = vld [vmem:[%s5125_s0 + $0x78] sm:$0xf] }
  0x59   :  { %760 = vmatpush.bf16.msra.mxu0 %v3543_v56  ;;  %653 = vmatmul.bf16.vlgmr.msrb.gmra.mxu3 %v3735_v26  ;;  %v5192_v56 = vld [vmem:[#allocation21_spill] sm:$0xff] }
  0x5a   :  { %783 = vmatpush.bf16.msra.mxu1 %v3547_v57  ;;  %807 = vmatpush.bf16.msra.mxu2 %v3585_v9  ;;  %v5193_v57 = vld [vmem:[#allocation22_spill] sm:$0xff]  ;;  %v3142_v9 = vld [vmem:[%s5125_s0 + $0x54] sm:$0xf] }
  0x5b   :  { %830 = vmatpush.bf16.msra.mxu3 %v3597_v14  ;;  %v2466_v14 = vld [vmem:[%s5125_s0 + $0x60] sm:$0xf0]  ;;  %v3149_v26 = vld [vmem:[%s5125_s0 + $0x84] sm:$0xf0] }
  0x5d   :  { %761 = vmatpush.bf16.msra.mxu0 %v3579_v5  ;;  %v2464_v5 = vld [vmem:[%s5125_s0 + $0x50] sm:$0xf] }
  0x5e   :  { %784 = vmatpush.bf16.msra.mxu1 %v3583_v6  ;;  %808 = vmatpush.bf16.msra.mxu2 %v3633_v31  ;;  %v3144_v6 = vld [vmem:[%s5125_s0 + $0x5c] sm:$0xf0]  ;;  %v3143_v31 = vld [vmem:[%s5125_s0 + $0x5c] sm:$0xf] }
  0x5f   :  { %831 = vmatpush.bf16.msra.mxu3 %v3645_v37  ;;  %v2474_v37 = vld [vmem:[%s5125_s0 + $0x68] sm:$0xf0] }
  0x61   :  { %762 = vmatpush.bf16.msra.mxu0 %v3618_v24  ;;  %v2472_v24 = vld [vmem:[%s5125_s0 + $0x58] sm:$0xf] }
  0x62   :  { %785 = vmatpush.bf16.msra.mxu1 %v3631_v30  ;;  %809 = vmatpush.bf16.msra.mxu2 %v3684_v55  ;;  %v3145_v30 = vld [vmem:[%s5125_s0 + $0x64] sm:$0xf0] }
  0x63   :  { %832 = vmatpush.bf16.msra.mxu3 %v3696_v63  ;;  %v2473_v55 = vor.u32 %v3145_v30, %v2472_v24  ;;  %v2477_v63 = vor.u32 %v3143_v31, %v2474_v37 }
  0x65   :  { %763 = vmatpush.bf16.msra.mxu0 %v3669_v49  ;;  %v2465_v49 = vor.u32 %v3144_v6, %v2464_v5 }
  0x66   :  { %786 = vmatpush.bf16.msra.mxu1 %v3682_v54  ;;  %894 = vmatpush.bf16.msrb.mxu2 %v3698_v0  ;;  %v2469_v54 = vor.u32 %v3142_v9, %v2466_v14  ;;  %v2480_v0 = vld [vmem:[%s5125_s0 + $0x70] sm:$0xf] }
  0x67   :  { %917 = vmatpush.bf16.msrb.mxu3 %v3711_v11  ;;  %589 = vmatmul.bf16.gmra.mxu0 %v3890_v42  ;;  %v3146_v11 = vld [vmem:[%s5125_s0 + $0x74] sm:$0xf] }
  0x68   :  { %612 = vmatmul.bf16.gmra.mxu1 %v3904_v39  ;;  %635 = vmatmul.bf16.gmra.mxu2 %v3906_v23  ;;  %v2485_v36 = vor.u32 %v3146_v11, %v2482_v19  ;;  %v2489_v39 = vor.u32 %v3149_v26, %v2488_v20  ;;  %v2460_v42 = vld [vmem:[%s5125_s0 + $0x90] sm:$0x33]  ;;  %v2461_v23 = vld [vmem:[%s5125_s0 + $0x98] sm:$0x33] }
  0x69   :  { %848 = vmatpush.bf16.msrb.mxu0 %v3737_v27  ;;  %658 = vmatmul.bf16.gmra.mxu3 %v3914_v15  ;;  %v3147_v27 = vld [vmem:[%s5125_s0 + $0x7c] sm:$0xf]  ;;  %v728_v15 = vunpack.c.l.b16 %v2460_v42  ;;  %v731_v32 = vunpack.c.h.b16 %v2461_v23 }
  0x6a   :  { %871 = vmatpush.bf16.msrb.mxu1 %v5176_v3  ;;  %895 = vmatpush.bf16.msrb.mxu2 %v5177_v7 }
  0x6b   :  { %918 = vmatpush.bf16.msrb.mxu3 %v5179_v12  ;;  %v743_v43 = vpack.c.b16 %v731_v32, %v731_v32 }
  0x6d   :  { %849 = vmatpush.bf16.msrb.mxu0 %v5178_v8 }
  0x6e   :  { %872 = vmatpush.bf16.msrb.mxu1 %v5180_v16  ;;  %896 = vmatpush.bf16.msrb.mxu2 %v5181_v17 }
  0x6f   :  { %919 = vmatpush.bf16.msrb.mxu3 %v5182_v21 }
  0x71   :  { %850 = vmatpush.bf16.msrb.mxu0 %v3813_v22  ;;  %v2481_v22 = vor.u32 %v3148_v10, %v2480_v0 }
  0x72   :  { %873 = vmatpush.bf16.msrb.mxu1 %v5183_v25  ;;  %897 = vmatpush.bf16.msrb.mxu2 %v5184_v29 }
  0x73   :  { %920 = vmatpush.bf16.msrb.mxu3 %v5186_v34 }
  0x75   :  { %851 = vmatpush.bf16.msrb.mxu0 %v5185_v33 }
  0x76   :  { %874 = vmatpush.bf16.msrb.mxu1 %v5187_v38  ;;  %898 = vmatpush.bf16.msrb.mxu2 %v5188_v44 }
  0x77   :  { %921 = vmatpush.bf16.msrb.mxu3 %v5190_v46  ;;  %594 = vmatmul.bf16.gmra.mxu0 %v4029_v61 }
  0x78   :  { %617 = vmatmul.bf16.gmra.mxu1 %v4033_v53  ;;  %640 = vmatmul.bf16.gmra.mxu2 %v4035_v41 }
  0x79   :  { %852 = vmatpush.bf16.msrb.mxu0 %v5189_v45  ;;  %663 = vmatmul.bf16.gmra.mxu3 %v4038_v40 }
  0x7a   :  { %875 = vmatpush.bf16.msrb.mxu1 %v5191_v50  ;;  %899 = vmatpush.bf16.msrb.mxu2 %v5192_v56 }
  0x7b   :  { %922 = vmatpush.bf16.msrb.mxu3 %v5193_v57 }
  0x7d   :  { %853 = vmatpush.bf16.msrb.mxu0 %v3957_v2  ;;  %v740_v2 = vpack.c.b16 %v728_v15, %v728_v15 }
  0x7e   :  { %876 = vmatpush.bf16.msrb.mxu1 %v3961_v35  ;;  %900 = vmatpush.bf16.msrb.mxu2 %v5194_v58 }
  0x7f   :  { %923 = vmatpush.bf16.msrb.mxu3 %v5195_v62 }
  0x81   :  { %854 = vmatpush.bf16.msrb.mxu0 %v3999_v4  ;;  %v730_v4 = vunpack.c.l.b16 %v2461_v23 }
  0x82   :  { %877 = vmatpush.bf16.msrb.mxu1 %v4003_v48  ;;  %901 = vmatpush.bf16.msrb.mxu2 %v4005_v59  ;;  %v2493_v59 = vor.u32 %v3147_v27, %v2490_v52  ;;  %v729_v48 = vunpack.c.h.b16 %v2460_v42 }
  0x83   :  { %924 = vmatpush.bf16.msrb.mxu3 %v4014_v51  ;;  %v742_v53 = vpack.c.b16 %v730_v4, %v730_v4 }
  0x85   :  { %855 = vmatpush.bf16.msrb.mxu0 %v4023_v13  ;;  %v741_v13 = vpack.c.b16 %v729_v48, %v729_v48 }
  0x86   :  { %878 = vmatpush.bf16.msrb.mxu1 %v4027_v60 }
  0x87   :  { %764 = vmatmul.bf16.vlgmr.msra.gmra.mxu0 %v2465_v49 }
  0x88   :  { %787 = vmatmul.bf16.vlgmr.msra.gmra.mxu1 %v2469_v54  ;;  %810 = vmatmul.bf16.vlgmr.msra.gmra.mxu2 %v2473_v55 }
  0x89   :  { %833 = vmatmul.bf16.vlgmr.msra.gmra.mxu3 %v2477_v63 }
  0x97   :  { %769 = vmatmul.bf16.gmra.mxu0 %v2481_v22 }
  0x98   :  { %792 = vmatmul.bf16.gmra.mxu1 %v2485_v36  ;;  %815 = vmatmul.bf16.gmra.mxu2 %v2489_v39 }
  0x99   :  { %838 = vmatmul.bf16.gmra.mxu3 %v2493_v59 }
  0xa0   :  { %v493_v35 = vpop.f32.mrf.mxu0 }
  0xa1   :  { %v516_v51 = vpop.f32.mrf.mxu1 }
  0xa2   :  { %v517_v47 = vadd.f32 %v516_v51, %v493_v35 }
  0xa7   :  { %774 = vmatmul.bf16.gmra.mxu0 %v740_v2 }
  0xa8   :  { %797 = vmatmul.bf16.gmra.mxu1 %v741_v13  ;;  %820 = vmatmul.bf16.gmra.mxu2 %v742_v53  ;;  %v539_v28 = vpop.f32.mrf.mxu2  ;;  %v4174_v60 = vpop.f32.mrf.mxu0 }
  0xa9   :  { %843 = vmatmul.bf16.gmra.mxu3 %v743_v43  ;;  %v540_v1 = vadd.f32 %v539_v28, %v517_v47  ;;  %v562_v18 = vpop.f32.mrf.mxu3  ;;  %v4176_v61 = vpop.f32.mrf.mxu1 }
  0xab   :  { %v563_v41 = vadd.f32 %v562_v18, %v540_v1 }
  0xb0   :  { %v4178_v40 = vpop.f32.mrf.mxu2 }
  0xb1   :  { %v4180_v3 = vpop.f32.mrf.mxu3 }
  0xb4   :  { %v498_v7 = vpop.f32.mrf.mxu0 }
  0xb5   :  { %v521_v8 = vpop.f32.mrf.mxu1 }
  0xb6   :  { %v522_v12 = vadd.f32 %v521_v8, %v498_v7  ;;  %v2608_v7 = vld [vmem:[%s5129_s4 + $0xe0] sm:$0xf]  ;;  %v3180_v8 = vld [vmem:[%s5129_s4 + $0xec] sm:$0xf0] }
  0xb7   :  { %856 = vmatmul.bf16.vlgmr.msrb.gmra.mxu0 %v2465_v49 }
  0xb8   :  { %879 = vmatmul.bf16.vlgmr.msrb.gmra.mxu1 %v2469_v54  ;;  %902 = vmatmul.bf16.vlgmr.msrb.gmra.mxu2 %v2473_v55 }
  0xb9   :  { %925 = vmatmul.bf16.vlgmr.msrb.gmra.mxu3 %v2477_v63 }
  0xbb   :  { %v544_v16 = vpop.f32.mrf.mxu2 }
  0xbc   :  { %v545_v17 = vadd.f32 %v544_v16, %v522_v12  ;;  %v567_v21 = vpop.f32.mrf.mxu3  ;;  %v4182_v25 = vpop.f32.mrf.mxu0  ;;  %v3178_v12 = vld [vmem:[%s5129_s4 + $0xe4] sm:$0xf] }
  0xbd   :  { %v4184_v29 = vpop.f32.mrf.mxu1 }
  0xbe   :  { %v568_v33 = vadd.f32 %v567_v21, %v545_v17  ;;  %v2609_v17 = vor.u32 %v3180_v8, %v2608_v7  ;;  %v2610_v21 = vld [vmem:[%s5129_s4 + $0xf0] sm:$0xf0]  ;;  %v3156_v7 = vld [vmem:[%s5129_s4 + $0x2c] sm:$0xf0]  ;;  %v3154_v8 = vld [vmem:[%s5129_s4 + $0x24] sm:$0xf] }
  0xc0   :  { %v668_v34 = vmax.f32 %v563_v41, %v568_v33  ;;  %1379 = vmatpush.bf16.msra.mxu0 %v2609_v17  ;;  %v2514_v17 = vld [vmem:[%s5129_s4 + $0x30] sm:$0xf0] }
  0xc3   :  { %v4186_v38 = vpop.f32.mrf.mxu2 }
  0xc4   :  { %v4188_v44 = vpop.f32.mrf.mxu3  ;;  %v503_v45 = vpop.f32.mrf.mxu0 }
  0xc5   :  { %v526_v46 = vpop.f32.mrf.mxu1 }
  0xc6   :  { %v527_v50 = vadd.f32 %v526_v46, %v503_v45 }
  0xc7   :  { %861 = vmatmul.bf16.gmra.mxu0 %v2481_v22 }
  0xc8   :  { %884 = vmatmul.bf16.gmra.mxu1 %v2485_v36  ;;  %907 = vmatmul.bf16.gmra.mxu2 %v2489_v39 }
  0xc9   :  { %930 = vmatmul.bf16.gmra.mxu3 %v2493_v59 }
  0xcb   :  { %v549_v56 = vpop.f32.mrf.mxu2 }
  0xcc   :  { %v550_v57 = vadd.f32 %v549_v56, %v527_v50  ;;  %v572_v58 = vpop.f32.mrf.mxu3  ;;  %v505_v62 = vpop.f32.mrf.mxu0  ;;  %v2592_v50 = vld [vmem:[%s5129_s4 + $0xc0] sm:$0xf]  ;;  %v3176_v56 = vld [vmem:[%s5129_s4 + $0xcc] sm:$0xf0] }
  0xcd   :  { %v528_v5 = vpop.f32.mrf.mxu1  ;;  %v2593_v62 = vor.u32 %v3176_v56, %v2592_v50  ;;  %v2498_v56 = vld [vmem:[%s5129_s4 + $0x10] sm:$0xf0] }
  0xce   :  { %v573_v6 = vadd.f32 %v572_v58, %v550_v57  ;;  %v3174_v5 = vld [vmem:[%s5129_s4 + $0xc4] sm:$0xf] }
  0xcf   :  { %1380 = vmatpush.bf16.msra.mxu0 %v2593_v62 }
  0xd0   :  { %v671_v9 = vsel %vm670_vm0, %v573_v6, -inf  ;;  %v2594_v6 = vld [vmem:[%s5129_s4 + $0xd0] sm:$0xf0] }
  0xd1   :  { %v4191_v14 = vmax.f32 %v668_v34, %v671_v9  ;;  %v2613_v34 = vor.u32 %v3178_v12, %v2610_v21  ;;  %v2597_v9 = vor.u32 %v3174_v5, %v2594_v6  ;;  %v2517_v21 = vor.u32 %v3154_v8, %v2514_v17  ;;  %v3179_v6 = vld [vmem:[%s5129_s4 + $0xec] sm:$0xf]  ;;  %v2552_v17 = vld [vmem:[%s5129_s4 + $0x68] sm:$0xf] }
  0xd3   :  { %v551_v24 = vpop.f32.mrf.mxu2  ;;  %1405 = vmatpush.bf16.msra.mxu2 %v2613_v34  ;;  %v2496_v34 = vld [vmem:[%s5129_s4] sm:$0xf] }
  0xd4   :  { %v574_v30 = vpop.f32.mrf.mxu3  ;;  %v585_v31 = vpop.f32.mrf.mxu0 }
  0xd5   :  { %v608_v37 = vpop.f32.mrf.mxu1 }
  0xd6   :  { %v609_v49 = vadd.f32 %v608_v37, %v585_v31 }
  0xd7   :  { %866 = vmatmul.bf16.gmra.mxu0 %v740_v2  ;;  %1406 = vmatpush.bf16.msra.mxu2 %v2597_v9  ;;  %v2618_v9 = vld [vmem:[%s5129_s4 + $0xf8] sm:$0xf0] }
  0xd8   :  { %889 = vmatmul.bf16.gmra.mxu1 %v741_v13  ;;  %912 = vmatmul.bf16.gmra.mxu2 %v742_v53 }
  0xd9   :  { %935 = vmatmul.bf16.gmra.mxu3 %v743_v43 }
  0xdb   :  { %v631_v54 = vpop.f32.mrf.mxu2 }
  0xdc   :  { %v632_v55 = vadd.f32 %v631_v54, %v609_v49  ;;  %v654_v63 = vpop.f32.mrf.mxu3  ;;  %v587_v0 = vpop.f32.mrf.mxu0  ;;  %v2576_v49 = vld [vmem:[%s5129_s4 + $0xa0] sm:$0xf]  ;;  %v3172_v54 = vld [vmem:[%s5129_s4 + $0xac] sm:$0xf0] }
  0xdd   :  { %v610_v10 = vpop.f32.mrf.mxu1 }
  0xde   :  { %v655_v11 = vadd.f32 %v654_v63, %v632_v55  ;;  %v611_v43 = vadd.f32 %v610_v10, %v587_v0  ;;  %v3170_v55 = vld [vmem:[%s5129_s4 + $0xa4] sm:$0xf]  ;;  %v2577_v0 = vor.u32 %v3172_v54, %v2576_v49  ;;  %v2578_v10 = vld [vmem:[%s5129_s4 + $0xb0] sm:$0xf0] }
  0xe0   :  { %1381 = vmatpush.bf16.msra.mxu0 %v2577_v0  ;;  %v3175_v0 = vld [vmem:[%s5129_s4 + $0xcc] sm:$0xf] }
  0xe3   :  { %v633_v19 = vpop.f32.mrf.mxu2 }
  0xe4   :  { %v656_v20 = vpop.f32.mrf.mxu3  ;;  %v590_v26 = vpop.f32.mrf.mxu0  ;;  %v634_v47 = vadd.f32 %v633_v19, %v611_v43  ;;  %v2560_v19 = vld [vmem:[%s5129_s4 + $0x80] sm:$0xf]  ;;  %v2530_v43 = vld [vmem:[%s5129_s4 + $0x50] sm:$0xf0] }
  0xe5   :  { %v613_v27 = vpop.f32.mrf.mxu1 }
  0xe6   :  { %v614_v52 = vadd.f32 %v613_v27, %v590_v26  ;;  %v657_v45 = vadd.f32 %v656_v20, %v634_v47  ;;  %v3168_v20 = vld [vmem:[%s5129_s4 + $0x8c] sm:$0xf0]  ;;  %v3166_v26 = vld [vmem:[%s5129_s4 + $0x84] sm:$0xf] }
  0xe7   :  { %v2561_v27 = vor.u32 %v3168_v20, %v2560_v19 }
  0xe9   :  { %1382 = vmatpush.bf16.msra.mxu0 %v2561_v27  ;;  %v3173_v27 = vld [vmem:[%s5129_s4 + $0xb4] sm:$0xf0] }
  0xeb   :  { %v636_v22 = vpop.f32.mrf.mxu2 }
  0xec   :  { %v637_v36 = vadd.f32 %v636_v22, %v614_v52  ;;  %v659_v39 = vpop.f32.mrf.mxu3  ;;  %v592_v59 = vpop.f32.mrf.mxu0  ;;  %v2562_v52 = vld [vmem:[%s5129_s4 + $0x90] sm:$0xf0] }
  0xed   :  { %v615_v42 = vpop.f32.mrf.mxu1  ;;  %v2565_v22 = vor.u32 %v3166_v26, %v2562_v52  ;;  %v2584_v26 = vld [vmem:[%s5129_s4 + $0xa8] sm:$0xf] }
  0xee   :  { %v660_v23 = vadd.f32 %v659_v39, %v637_v36  ;;  %v616_v48 = vadd.f32 %v615_v42, %v592_v59  ;;  %v2544_v42 = vld [vmem:[%s5129_s4 + $0x60] sm:$0xf] }
  0xf0   :  { %v680_v15 = vmax.f32 %v655_v11, %v660_v23  ;;  %v2581_v11 = vor.u32 %v3170_v55, %v2578_v10  ;;  %v3164_v23 = vld [vmem:[%s5129_s4 + $0x6c] sm:$0xf0] }
  0xf2   :  { %1407 = vmatpush.bf16.msra.mxu2 %v2581_v11  ;;  %v2602_v11 = vld [vmem:[%s5129_s4 + $0xd8] sm:$0xf0] }
  0xf3   :  { %v638_v4 = vpop.f32.mrf.mxu2  ;;  %v2605_v19 = vor.u32 %v3175_v0, %v2602_v11  ;;  %v3206_v11 = vld [vmem:[%s5129_s4 + $0x1c4] sm:$0xf] }
  0xf4   :  { %v639_v32 = vadd.f32 %v638_v4, %v616_v48  ;;  %v661_v2 = vpop.f32.mrf.mxu3  ;;  %v595_v35 = vpop.f32.mrf.mxu0  ;;  %v2545_v4 = vor.u32 %v3164_v23, %v2544_v42 }
  0xf5   :  { %v618_v13 = vpop.f32.mrf.mxu1 }
  0xf6   :  { %v662_v53 = vadd.f32 %v661_v2, %v639_v32  ;;  %v619_v51 = vadd.f32 %v618_v13, %v595_v35  ;;  %1408 = vmatpush.bf16.msra.mxu2 %v2565_v22  ;;  %v2546_v32 = vld [vmem:[%s5129_s4 + $0x70] sm:$0xf0]  ;;  %1383 = vmatpush.bf16.msra.mxu0 %v2545_v4  ;;  %v2528_v35 = vld [vmem:[%s5129_s4 + $0x40] sm:$0xf]  ;;  %v3160_v13 = vld [vmem:[%s5129_s4 + $0x4c] sm:$0xf0]  ;;  %v2585_v22 = vor.u32 %v3173_v27, %v2584_v26 }
  0xf8   :  { %v681_v57 = vmax.f32 %v657_v45, %v662_v53  ;;  %v3158_v53 = vld [vmem:[%s5129_s4 + $0x44] sm:$0xf]  ;;  %v3152_v45 = vld [vmem:[%s5129_s4 + $0xc] sm:$0xf0] }
  0xf9   :  { %v2533_v47 = vor.u32 %v3158_v53, %v2530_v43  ;;  %v2497_v50 = vor.u32 %v3152_v45, %v2496_v34  ;;  %v2568_v53 = vld [vmem:[%s5129_s4 + $0x88] sm:$0xf]  ;;  %v2554_v34 = vld [vmem:[%s5129_s4 + $0x78] sm:$0xf0] }
  0xfb   :  { %v641_v28 = vpop.f32.mrf.mxu2 }
  0xfc   :  { %v642_v1 = vadd.f32 %v641_v28, %v619_v51  ;;  %v664_v18 = vpop.f32.mrf.mxu3  ;;  %v597_v41 = vpop.f32.mrf.mxu0  ;;  %v2529_v51 = vor.u32 %v3160_v13, %v2528_v35 }
  0xfd   :  { %v620_v16 = vpop.f32.mrf.mxu1  ;;  %v2512_v41 = vld [vmem:[%s5129_s4 + $0x20] sm:$0xf] }
  0xfe   :  { %v665_v33 = vadd.f32 %v664_v18, %v642_v1  ;;  %1384 = vmatpush.bf16.msra.mxu0 %v2529_v51  ;;  %v2513_v16 = vor.u32 %v3156_v7, %v2512_v41  ;;  %v3169_v51 = vld [vmem:[%s5129_s4 + $0x94] sm:$0xf0] }
  0xff   :  { %v2569_v43 = vor.u32 %v3169_v51, %v2568_v53  ;;  %v2704_v51 = vld [vmem:[%s5129_s4 + $0x1a0] sm:$0xf] }
 0x100   :  { %v682_v46 = vsel %vm670_vm0, %v665_v33, -inf  ;;  %v524_v33 = vadd.f32 %v4184_v29, %v4182_v25  ;;  %v2616_v25 = vld [vmem:[%s5129_s4 + $0xe8] sm:$0xf]  ;;  %v3181_v29 = vld [vmem:[%s5129_s4 + $0xf4] sm:$0xf0] }
 0x101   :  { %v683_v58 = vmax.f32 %v680_v15, %v682_v46  ;;  %v3162_v15 = vld [vmem:[%s5129_s4 + $0x64] sm:$0xf]  ;;  %v2617_v5 = vor.u32 %v3181_v29, %v2616_v25 }
 0x102   :  { %v2549_v2 = vor.u32 %v3162_v15, %v2546_v32  ;;  %1385 = vmatpush.bf16.msra.mxu0 %v2513_v16  ;;  %v3150_v46 = vld [vmem:[%s5129_s4 + $0x4] sm:$0xf] }
 0x103   :  { %v4218_v24 = vmax.f32 %v683_v58, %v681_v57  ;;  %v643_v30 = vpop.f32.mrf.mxu2  ;;  %v519_v57 = vadd.f32 %v4176_v61, %v4174_v60  ;;  %v547_v58 = vadd.f32 %v4186_v38, %v524_v33  ;;  %v2501_v62 = vor.u32 %v3150_v46, %v2498_v56  ;;  %v2600_v61 = vld [vmem:[%s5129_s4 + $0xc8] sm:$0xf]  ;;  %v3177_v38 = vld [vmem:[%s5129_s4 + $0xd4] sm:$0xf0]  ;;  %v3163_v33 = vld [vmem:[%s5129_s4 + $0x6c] sm:$0xf] }
 0x104   :  { %v666_v31 = vpop.f32.mrf.mxu3  ;;  %v4220_v37 = vpop.f32.mrf.mxu0  ;;  %1409 = vmatpush.bf16.msra.mxu2 %v2549_v2  ;;  %v2601_v10 = vor.u32 %v3177_v38, %v2600_v61  ;;  %v2557_v25 = vor.u32 %v3163_v33, %v2554_v34  ;;  %v3198_v34 = vld [vmem:[%s5129_s4 + $0x184] sm:$0xf] }
 0x105   :  { %v4231_v63 = vpop.f32.mrf.mxu1  ;;  %v2621_v31 = vor.u32 %v3179_v6, %v2618_v9  ;;  %v542_v49 = vadd.f32 %v4178_v40, %v519_v57  ;;  %v570_v40 = vadd.f32 %v4188_v44, %v547_v58  ;;  %v3171_v44 = vld [vmem:[%s5129_s4 + $0xac] sm:$0xf] }
 0x106   :  { %1386 = vmatpush.bf16.msra.mxu0 %v2497_v50  ;;  %v789_v35 = vadd.f32 %v4231_v63, %v4220_v37 }
 0x107   :  { %v565_v20 = vadd.f32 %v4180_v3, %v542_v49  ;;  %v2586_v3 = vld [vmem:[%s5129_s4 + $0xb8] sm:$0xf0]  ;;  %v3161_v49 = vld [vmem:[%s5129_s4 + $0x54] sm:$0xf0] }
 0x108   :  { %1410 = vmatpush.bf16.msra.mxu2 %v2533_v47  ;;  %v2589_v15 = vor.u32 %v3171_v44, %v2586_v3  ;;  %v2570_v47 = vld [vmem:[%s5129_s4 + $0x98] sm:$0xf0]  ;;  %v3208_v44 = vld [vmem:[%s5129_s4 + $0x1cc] sm:$0xf0]  ;;  %v3157_v3 = vld [vmem:[%s5129_s4 + $0x34] sm:$0xf0] }
 0x109   :  { %v669_v52 = vmax.f32 %v565_v20, %v570_v40 }
 0x10a   :  { %1431 = vmatpush.bf16.msrb.mxu0 %v2617_v5  ;;  %v3212_v5 = vld [vmem:[%s5129_s4 + $0x1ec] sm:$0xf0] }
 0x10b   :  { %v4248_v36 = vpop.f32.mrf.mxu2  ;;  %v673_v4 = vmax.f32 %v4191_v14, %v669_v52  ;;  %v3167_v14 = vld [vmem:[%s5129_s4 + $0x8c] sm:$0xf]  ;;  %v2520_v52 = vld [vmem:[%s5129_s4 + $0x28] sm:$0xf] }
 0x10c   :  { %v4250_v39 = vpop.f32.mrf.mxu3  ;;  %v4252_v59 = vpop.f32.mrf.mxu0  ;;  %1411 = vmatpush.bf16.msra.mxu2 %v2517_v21  ;;  %v812_v8 = vadd.f32 %v4248_v36, %v789_v35  ;;  %v3165_v21 = vld [vmem:[%s5129_s4 + $0x74] sm:$0xf0]  ;;  %v3210_v36 = vld [vmem:[%s5129_s4 + $0x1e4] sm:$0xf] }
 0x10d   :  { %v4263_v48 = vpop.f32.mrf.mxu1  ;;  %v674_v41 = vrot.slane %v673_v4, 4 }
 0x10e   :  { %1432 = vmatpush.bf16.msrb.mxu0 %v2601_v10  ;;  %v835_v6 = vadd.f32 %v4250_v39, %v812_v8  ;;  %v2538_v39 = vld [vmem:[%s5129_s4 + $0x58] sm:$0xf0]  ;;  %v3153_v8 = vld [vmem:[%s5129_s4 + $0x14] sm:$0xf0] }
 0x10f   :  { %v675_v61 = vmax.f32 %v673_v4, %v674_v41  ;;  %v2504_v41 = vld [vmem:[%s5129_s4 + $0x8] sm:$0xf] }
 0x110   :  { %1412 = vmatpush.bf16.msra.mxu2 %v2501_v62  ;;  %v2736_v62 = vld [vmem:[%s5129_s4 + $0x1e0] sm:$0xf]  ;;  %v2505_v33 = vor.u32 %v3153_v8, %v2504_v41  ;;  %v2744_v41 = vld [vmem:[%s5129_s4 + $0x1e8] sm:$0xf] }
 0x112   :  { %1433 = vmatpush.bf16.msrb.mxu0 %v2585_v22 }
 0x113   :  { %v4280_v28 = vpop.f32.mrf.mxu2 }
 0x114   :  { %v4282_v1 = vpop.f32.mrf.mxu3  ;;  %v770_v18 = vpop.f32.mrf.mxu0  ;;  %1457 = vmatpush.bf16.msrb.mxu2 %v2621_v31  ;;  %v2536_v31 = vld [vmem:[%s5129_s4 + $0x48] sm:$0xf] }
 0x115   :  { %v793_v12 = vpop.f32.mrf.mxu1 }
 0x116   :  { %v794_v42 = vadd.f32 %v793_v12, %v770_v18  ;;  %v2573_v18 = vor.u32 %v3167_v14, %v2570_v47  ;;  %1434 = vmatpush.bf16.msrb.mxu0 %v2569_v43  ;;  %v791_v12 = vadd.f32 %v4263_v48, %v4252_v59  ;;  %v2738_v59 = vld [vmem:[%s5129_s4 + $0x1f0] sm:$0xf0]  ;;  %v2553_v48 = vor.u32 %v3165_v21, %v2552_v17  ;;  %v3204_v14 = vld [vmem:[%s5129_s4 + $0x1ac] sm:$0xf0]  ;;  %v3202_v43 = vld [vmem:[%s5129_s4 + $0x1a4] sm:$0xf] }
 0x117   :  { %v2741_v56 = vor.u32 %v3210_v36, %v2738_v59  ;;  %v2688_v59 = vld [vmem:[%s5129_s4 + $0x180] sm:$0xf] }
 0x118   :  { %1458 = vmatpush.bf16.msrb.mxu2 %v2605_v19  ;;  %v814_v45 = vadd.f32 %v4280_v28, %v791_v12  ;;  %v2722_v19 = vld [vmem:[%s5129_s4 + $0x1d0] sm:$0xf0]  ;;  %v3151_v12 = vld [vmem:[%s5129_s4 + $0xc] sm:$0xf] }
 0x119   :  { %1418 = vmatpush.bf16.msra.mxu3 %v2741_v56  ;;  %v2725_v27 = vor.u32 %v3206_v11, %v2722_v19  ;;  %v3190_v11 = vld [vmem:[%s5129_s4 + $0x144] sm:$0xf] }
 0x11a   :  { %1435 = vmatpush.bf16.msrb.mxu0 %v2553_v48  ;;  %v837_v38 = vadd.f32 %v4282_v1, %v814_v45  ;;  %v2720_v1 = vld [vmem:[%s5129_s4 + $0x1c0] sm:$0xf]  ;;  %v3200_v48 = vld [vmem:[%s5129_s4 + $0x18c] sm:$0xf0] }
 0x11b   :  { %v816_v30 = vpop.f32.mrf.mxu2  ;;  %v2721_v22 = vor.u32 %v3208_v44, %v2720_v1 }
 0x11c   :  { %v839_v54 = vpop.f32.mrf.mxu3  ;;  %v772_v55 = vpop.f32.mrf.mxu0  ;;  %1459 = vmatpush.bf16.msrb.mxu2 %v2589_v15  ;;  %v817_v37 = vadd.f32 %v816_v30, %v794_v42  ;;  %v2737_v30 = vor.u32 %v3212_v5, %v2736_v62  ;;  %v3155_v42 = vld [vmem:[%s5129_s4 + $0x2c] sm:$0xf]  ;;  %v676_v15 = vrot.slane %v675_v61, 2  ;;  %v4484_v62 = vld [vmem:[%s5128_s3] sm:$0x3] }
 0x11d   :  { %v795_v60 = vpop.f32.mrf.mxu1  ;;  %1419 = vmatpush.bf16.msra.mxu3 %v2725_v27 }
 0x11e   :  { %v796_v63 = vadd.f32 %v795_v60, %v772_v55  ;;  %v840_v46 = vadd.f32 %v839_v54, %v817_v37  ;;  %v3159_v54 = vld [vmem:[%s5129_s4 + $0x4c] sm:$0xf]  ;;  %v2537_v60 = vor.u32 %v3161_v49, %v2536_v31  ;;  %1392 = vmatpush.bf16.msra.mxu1 %v2737_v30  ;;  %v677_v17 = vmax.f32 %v675_v61, %v676_v15  ;;  %v3194_v30 = vld [vmem:[%s5129_s4 + $0x164] sm:$0xf] }
 0x11f   :  { %v2541_v40 = vor.u32 %v3159_v54, %v2538_v39  ;;  %v3186_v15 = vld [vmem:[%s5129_s4 + $0x124] sm:$0xf] }
 0x120   :  { %1460 = vmatpush.bf16.msrb.mxu2 %v2573_v18  ;;  %v940_v0 = vmax.f32 %v835_v6, %v840_v46  ;;  %1436 = vmatpush.bf16.msrb.mxu0 %v2537_v60  ;;  %v2706_v18 = vld [vmem:[%s5129_s4 + $0x1b0] sm:$0xf0]  ;;  %v2689_v46 = vor.u32 %v3200_v48, %v2688_v59 }
 0x122   :  { %1393 = vmatpush.bf16.msra.mxu1 %v2721_v22 }
 0x123   :  { %v818_v23 = vpop.f32.mrf.mxu2 }
 0x124   :  { %v841_v32 = vpop.f32.mrf.mxu3  ;;  %v775_v2 = vpop.f32.mrf.mxu0  ;;  %v819_v16 = vadd.f32 %v818_v23, %v796_v63  ;;  %1461 = vmatpush.bf16.msrb.mxu2 %v2557_v25  ;;  %v2522_v23 = vld [vmem:[%s5129_s4 + $0x38] sm:$0xf0]  ;;  %v2705_v63 = vor.u32 %v3204_v14, %v2704_v51  ;;  %v678_v25 = vrot.slane %v677_v17, 1  ;;  %v2624_v14 = vld [vmem:[%s5129_s4 + $0x100] sm:$0xf] }
 0x125   :  { %v798_v13 = vpop.f32.mrf.mxu1  ;;  %v2525_v35 = vor.u32 %v3155_v42, %v2522_v23  ;;  %v2640_v42 = vld [vmem:[%s5129_s4 + $0x120] sm:$0xf]  ;;  %v3188_v23 = vld [vmem:[%s5129_s4 + $0x12c] sm:$0xf0] }
 0x126   :  { %v799_v7 = vadd.f32 %v798_v13, %v775_v2  ;;  %v842_v9 = vadd.f32 %v841_v32, %v819_v16  ;;  %v2521_v2 = vor.u32 %v3157_v3, %v2520_v52  ;;  %v2506_v16 = vld [vmem:[%s5129_s4 + $0x18] sm:$0xf0]  ;;  %1394 = vmatpush.bf16.msra.mxu1 %v2705_v63  ;;  %v679_v61 = vmax.f32 %v677_v17, %v678_v25 }
 0x127   :  { %v2509_v36 = vor.u32 %v3151_v12, %v2506_v16  ;;  %v3211_v16 = vld [vmem:[%s5129_s4 + $0x1ec] sm:$0xf]  ;;  %v2746_v17 = vld [vmem:[%s5129_s4 + $0x1f8] sm:$0xf0] }
 0x128   :  { %v941_v20 = vmax.f32 %v837_v38, %v842_v9  ;;  %1462 = vmatpush.bf16.msrb.mxu2 %v2541_v40  ;;  %1437 = vmatpush.bf16.msrb.mxu0 %v2521_v2  ;;  %v2672_v9 = vld [vmem:[%s5129_s4 + $0x160] sm:$0xf]  ;;  %v2642_v2 = vld [vmem:[%s5129_s4 + $0x130] sm:$0xf0] }
 0x129   :  { %v2656_v40 = vld [vmem:[%s5129_s4 + $0x140] sm:$0xf] }
 0x12a   :  { %1395 = vmatpush.bf16.msra.mxu1 %v2689_v46  ;;  %v3207_v46 = vld [vmem:[%s5129_s4 + $0x1cc] sm:$0xf] }
 0x12b   :  { %v821_v50 = vpop.f32.mrf.mxu2 }
 0x12c   :  { %v822_v29 = vadd.f32 %v821_v50, %v799_v7  ;;  %v844_v57 = vpop.f32.mrf.mxu3  ;;  %v777_v58 = vpop.f32.mrf.mxu0  ;;  %1463 = vmatpush.bf16.msrb.mxu2 %v2525_v35  ;;  %v2709_v7 = vor.u32 %v3202_v43, %v2706_v18  ;;  %1438 = vmatpush.bf16.msrb.mxu0 %v2505_v33  ;;  %v2690_v50 = vld [vmem:[%s5129_s4 + $0x190] sm:$0xf0]  ;;  %v3184_v43 = vld [vmem:[%s5129_s4 + $0x10c] sm:$0xf0]  ;;  %v2749_v33 = vor.u32 %v3211_v16, %v2746_v17  ;;  %v2648_v16 = vld [vmem:[%s5129_s4 + $0x128] sm:$0xf] }
 0x12d   :  { %v800_v28 = vpop.f32.mrf.mxu1  ;;  %v2693_v56 = vor.u32 %v3198_v34, %v2690_v50  ;;  %v4479_v58 = vld [vmem:[%s5127_s2] sm:$0x3]  ;;  %v2625_v63 = vor.u32 %v3184_v43, %v2624_v14  ;;  %v2626_v18 = vld [vmem:[%s5129_s4 + $0x110] sm:$0xf0]  ;;  %v2728_v34 = vld [vmem:[%s5129_s4 + $0x1c8] sm:$0xf] }
 0x12e   :  { %v845_v55 = vadd.f32 %v844_v57, %v822_v29  ;;  %1420 = vmatpush.bf16.msra.mxu3 %v2709_v7  ;;  %v3196_v28 = vld [vmem:[%s5129_s4 + $0x16c] sm:$0xf0]  ;;  %v967_v60 = vperm.slane %v4479_v58, 0  ;;  %v3213_v7 = vld [vmem:[%s5129_s4 + $0x1f4] sm:$0xf0] }
 0x12f   :  { %v2673_v54 = vor.u32 %v3196_v28, %v2672_v9  ;;  %v2745_v12 = vor.u32 %v3213_v7, %v2744_v41  ;;  %v3205_v9 = vld [vmem:[%s5129_s4 + $0x1b4] sm:$0xf0]  ;;  %v3203_v28 = vld [vmem:[%s5129_s4 + $0x1ac] sm:$0xf]  ;;  %v2666_v14 = vld [vmem:[%s5129_s4 + $0x158] sm:$0xf0] }
 0x130   :  { %v942_v10 = vsel %vm670_vm0, %v845_v55, -inf  ;;  %1464 = vmatpush.bf16.msrb.mxu2 %v2509_v36  ;;  %v2674_v55 = vld [vmem:[%s5129_s4 + $0x170] sm:$0xf0] }
 0x131   :  { %v943_v26 = vmax.f32 %v940_v0, %v942_v10  ;;  %v2677_v39 = vor.u32 %v3194_v30, %v2674_v55  ;;  %v975_v0 = vperm.slane %v4484_v62, 0  ;;  %1396 = vmatpush.bf16.msra.mxu1 %v2673_v54  ;;  %v3192_v10 = vld [vmem:[%s5129_s4 + $0x14c] sm:$0xf0]  ;;  %v2714_v30 = vld [vmem:[%s5129_s4 + $0x1b8] sm:$0xf0] }
 0x132   :  { %1421 = vmatpush.bf16.msra.mxu3 %v2693_v56  ;;  %v2730_v56 = vld [vmem:[%s5129_s4 + $0x1d8] sm:$0xf0]  ;;  %v2717_v54 = vor.u32 %v3203_v28, %v2714_v30  ;;  %v2696_v55 = vld [vmem:[%s5129_s4 + $0x188] sm:$0xf] }
 0x133   :  { %v944_v4 = vmax.f32 %v943_v26, %v941_v20  ;;  %v823_v32 = vpop.f32.mrf.mxu2  ;;  %v2657_v20 = vor.u32 %v3192_v10, %v2656_v40  ;;  %v2658_v26 = vld [vmem:[%s5129_s4 + $0x150] sm:$0xf0]  ;;  %v2733_v25 = vor.u32 %v3207_v46, %v2730_v56  ;;  %v2632_v56 = vld [vmem:[%s5129_s4 + $0x108] sm:$0xf] }
 0x134   :  { %v846_v13 = vpop.f32.mrf.mxu3  ;;  %v4434_v53 = vpop.f32.mrf.mxu0  ;;  %v2661_v1 = vor.u32 %v3190_v11, %v2658_v26  ;;  %v2641_v32 = vor.u32 %v3188_v23, %v2640_v42 }
 0x135   :  { %v945_v47 = vrot.slane %v944_v4, 4  ;;  %v4445_v37 = vpop.f32.mrf.mxu1  ;;  %1397 = vmatpush.bf16.msra.mxu1 %v2657_v20  ;;  %v2645_v13 = vor.u32 %v3186_v15, %v2642_v2  ;;  %v3195_v15 = vld [vmem:[%s5129_s4 + $0x16c] sm:$0xf]  ;;  %v685_v2 = vrot.slane %v4218_v24, 4 }
 0x136   :  { %1422 = vmatpush.bf16.msra.mxu3 %v2677_v39  ;;  %v3199_v39 = vld [vmem:[%s5129_s4 + $0x18c] sm:$0xf]  ;;  %v881_v11 = vadd.f32 %v4445_v37, %v4434_v53  ;;  %v2680_v53 = vld [vmem:[%s5129_s4 + $0x168] sm:$0xf]  ;;  %v3197_v37 = vld [vmem:[%s5129_s4 + $0x174] sm:$0xf0] }
 0x137   :  { %v946_v21 = vmax.f32 %v944_v4, %v945_v47  ;;  %v3182_v47 = vld [vmem:[%s5129_s4 + $0x104] sm:$0xf] }
 0x138   :  { %v2629_v8 = vor.u32 %v3182_v47, %v2626_v18 }
 0x139   :  { %v947_v45 = vrot.slane %v946_v21, 2  ;;  %1398 = vmatpush.bf16.msra.mxu1 %v2641_v32  ;;  %v3193_v32 = vld [vmem:[%s5129_s4 + $0x154] sm:$0xf0] }
 0x13a   :  { %1423 = vmatpush.bf16.msra.mxu3 %v2661_v1 }
 0x13b   :  { %v948_v29 = vmax.f32 %v946_v21, %v947_v45  ;;  %v4474_v57 = vpop.f32.mrf.mxu2  ;;  %v3209_v45 = vld [vmem:[%s5129_s4 + $0x1d4] sm:$0xf0] }
 0x13c   :  { %v4486_v5 = vpop.f32.mrf.mxu3  ;;  %v4488_v6 = vpop.f32.mrf.mxu0  ;;  %v2729_v50 = vor.u32 %v3209_v45, %v2728_v34 }
 0x13d   :  { %v949_v31 = vrot.slane %v948_v29, 1  ;;  %v4499_v49 = vpop.f32.mrf.mxu1  ;;  %1399 = vmatpush.bf16.msra.mxu1 %v2625_v63 }
 0x13e   :  { %1424 = vmatpush.bf16.msra.mxu3 %v2645_v13 }
 0x13f   :  { %v950_v38 = vmax.f32 %v948_v29, %v949_v31  ;;  %v2712_v29 = vld [vmem:[%s5129_s4 + $0x1a8] sm:$0xf] }
 0x140   :  { %v2713_v31 = vor.u32 %v3205_v9, %v2712_v29  ;;  %v2634_v29 = vld [vmem:[%s5129_s4 + $0x118] sm:$0xf0] }
 0x141   :  { %v963_v19 = vsel %vm962_vm1, %v679_v61, %v950_v38  ;;  %1444 = vmatpush.bf16.msrb.mxu1 %v2745_v12  ;;  %v2698_v61 = vld [vmem:[%s5129_s4 + $0x198] sm:$0xf0] }
 0x142   :  { %v971_v27 = vmul.f32 %v967_v60, %v963_v19  ;;  %1425 = vmatpush.bf16.msra.mxu3 %v2629_v8  ;;  %v3201_v60 = vld [vmem:[%s5129_s4 + $0x194] sm:$0xf0]  ;;  %v2701_v26 = vor.u32 %v3199_v39, %v2698_v61 }
 0x143   :  { %v4519_v44 = vpop.f32.mrf.mxu2  ;;  %v2697_v20 = vor.u32 %v3201_v60, %v2696_v55 }
 0x144   :  { %v4521_v52 = vpop.f32.mrf.mxu3  ;;  %v862_v22 = vpop.f32.mrf.mxu0  ;;  %v979_v3 = vadd.f32 %v975_v0, %v971_v27 }
 0x145   :  { %v885_v4 = vpop.f32.mrf.mxu1  ;;  %1445 = vmatpush.bf16.msrb.mxu1 %v2729_v50 }
 0x146   :  { %v981_v35 = vmax.f32 %v979_v3, 0.0  ;;  %1470 = vmatpush.bf16.msrb.mxu3 %v2749_v33  ;;  %v886_v38 = vadd.f32 %v885_v4, %v862_v22  ;;  %v883_v3 = vadd.f32 %v4499_v49, %v4488_v6  ;;  %v904_v22 = vadd.f32 %v4474_v57, %v881_v11  ;;  %v2682_v49 = vld [vmem:[%s5129_s4 + $0x178] sm:$0xf0]  ;;  %v2664_v4 = vld [vmem:[%s5129_s4 + $0x148] sm:$0xf] }
 0x147   :  { %v2681_v57 = vor.u32 %v3197_v37, %v2680_v53  ;;  %v2685_v13 = vor.u32 %v3195_v15, %v2682_v49  ;;  %v2665_v8 = vor.u32 %v3193_v32, %v2664_v4  ;;  %v3189_v33 = vld [vmem:[%s5129_s4 + $0x134] sm:$0xf0]  ;;  %v968_v11 = vperm.slane %v4479_v58, 1  ;;  %v3227_v37 = vld [vmem:[%s5131_s6 + $0x64] sm:$0xf0] }
 0x148   :  { %v4535_v51 = vpack.c.bf16 %v981_v35, %v981_v35  ;;  %v906_v6 = vadd.f32 %v4519_v44, %v883_v3  ;;  %v927_v41 = vadd.f32 %v4486_v5, %v904_v22  ;;  %v3187_v5 = vld [vmem:[%s5129_s4 + $0x12c] sm:$0xf]  ;;  %v2649_v46 = vor.u32 %v3189_v33, %v2648_v16  ;;  %v2808_v22 = vld [vmem:[%s5131_s6 + $0x70] sm:$0xf]  ;;  %v3229_v58 = vld [vmem:[%s5131_s6 + $0x74] sm:$0xf0] }
 0x149   :  { %1446 = vmatpush.bf16.msrb.mxu1 %v2713_v31  ;;  %v2809_v53 = vor.u32 %v3229_v58, %v2808_v22  ;;  %v2792_v4 = vld [vmem:[%s5131_s6 + $0x50] sm:$0xf]  ;;  %v3225_v32 = vld [vmem:[%s5131_s6 + $0x54] sm:$0xf0] }
 0x14a   :  { %1387 = vmatmul.bf16.vlgmr.msra.gmra.mxu0 %v4535_v51  ;;  %1413 = vmatmul.bf16.vlgmr.msra.gmra.mxu2 %v4535_v51  ;;  %v929_v17 = vadd.f32 %v4521_v52, %v906_v6  ;;  %v2872_v6 = vld [vmem:[%s5131_s6 + $0xf0] sm:$0xf]  ;;  %v3261_v16 = vld [vmem:[%s5131_s6 + $0x174] sm:$0xf0] }
 0x14b   :  { %v908_v21 = vpop.f32.mrf.mxu2  ;;  %1471 = vmatpush.bf16.msrb.mxu3 %v2733_v25  ;;  %v3185_v25 = vld [vmem:[%s5129_s4 + $0x114] sm:$0xf0]  ;;  %1881 = vmatpush.bf16.msra.mxu0 %v2809_v53  ;;  %v2984_v53 = vld [vmem:[%s5131_s6 + $0x1d0] sm:$0xf] }
 0x14c   :  { %v931_v36 = vpop.f32.mrf.mxu3  ;;  %v864_v59 = vpop.f32.mrf.mxu0  ;;  %v909_v1 = vadd.f32 %v908_v21, %v886_v38  ;;  %v2633_v55 = vor.u32 %v3185_v25, %v2632_v56  ;;  %v3000_v25 = vld [vmem:[%s5131_s6 + $0x1f0] sm:$0xf] }
 0x14d   :  { %v887_v48 = vpop.f32.mrf.mxu1  ;;  %1447 = vmatpush.bf16.msrb.mxu1 %v2697_v20 }
 0x14e   :  { %v888_v27 = vadd.f32 %v887_v48, %v864_v59  ;;  %v932_v44 = vadd.f32 %v931_v36, %v909_v1  ;;  %v2650_v36 = vld [vmem:[%s5129_s4 + $0x138] sm:$0xf0]  ;;  %v686_v59 = vmax.f32 %v4218_v24, %v685_v2  ;;  %v3183_v24 = vld [vmem:[%s5129_s4 + $0x10c] sm:$0xf]  ;;  %v2864_v2 = vld [vmem:[%s5131_s6 + $0xe0] sm:$0xf] }
 0x14f   :  { %1472 = vmatpush.bf16.msrb.mxu3 %v2717_v54  ;;  %v2653_v50 = vor.u32 %v3187_v5, %v2650_v36  ;;  %v2637_v60 = vor.u32 %v3183_v24, %v2634_v29  ;;  %v2768_v36 = vld [vmem:[%s5131_s6 + $0x20] sm:$0xf]  ;;  %v3277_v24 = vld [vmem:[%s5131_s6 + $0x1f4] sm:$0xf0]  ;;  %v2760_v29 = vld [vmem:[%s5131_s6 + $0x10] sm:$0xf] }
 0x150   :  { %v951_v48 = vmax.f32 %v927_v41, %v932_v44  ;;  %v687_v9 = vrot.slane %v686_v59, 2  ;;  %v2793_v44 = vor.u32 %v3225_v32, %v2792_v4  ;;  %v2776_v41 = vld [vmem:[%s5131_s6 + $0x30] sm:$0xf]  ;;  %v3226_v4 = vld [vmem:[%s5131_s6 + $0x64] sm:$0xf] }
 0x151   :  { %1448 = vmatpush.bf16.msrb.mxu1 %v2681_v57  ;;  %v3245_v57 = vld [vmem:[%s5131_s6 + $0xf4] sm:$0xf0]  ;;  %v2802_v32 = vld [vmem:[%s5131_s6 + $0x68] sm:$0xf0] }
 0x152   :  { %v688_v39 = vmax.f32 %v686_v59, %v687_v9  ;;  %v2873_v49 = vor.u32 %v3245_v57, %v2872_v6  ;;  %v3219_v59 = vld [vmem:[%s5131_s6 + $0x24] sm:$0xf0] }
 0x153   :  { %v910_v0 = vpop.f32.mrf.mxu2  ;;  %1473 = vmatpush.bf16.msrb.mxu3 %v2701_v26  ;;  %v976_v26 = vperm.slane %v4484_v62, 1  ;;  %v2800_v62 = vld [vmem:[%s5131_s6 + $0x60] sm:$0xf] }
 0x154   :  { %v933_v40 = vpop.f32.mrf.mxu3  ;;  %v867_v10 = vpop.f32.mrf.mxu0  ;;  %v911_v42 = vadd.f32 %v910_v0, %v888_v27  ;;  %v689_v0 = vrot.slane %v688_v39, 1  ;;  %v2801_v15 = vor.u32 %v3227_v37, %v2800_v62  ;;  %v3273_v62 = vld [vmem:[%s5131_s6 + $0x1d4] sm:$0xf0]  ;;  %v2904_v37 = vld [vmem:[%s5131_s6 + $0x130] sm:$0xf] }
 0x155   :  { %v890_v19 = vpop.f32.mrf.mxu1  ;;  %1449 = vmatpush.bf16.msrb.mxu1 %v2665_v8  ;;  %v2936_v8 = vld [vmem:[%s5131_s6 + $0x170] sm:$0xf]  ;;  %v2985_v57 = vor.u32 %v3273_v62, %v2984_v53  ;;  %v3218_v62 = vld [vmem:[%s5131_s6 + $0x24] sm:$0xf] }
 0x156   :  { %v891_v23 = vadd.f32 %v890_v19, %v867_v10  ;;  %v934_v43 = vadd.f32 %v933_v40, %v911_v42  ;;  %v690_v19 = vmax.f32 %v688_v39, %v689_v0  ;;  %1882 = vmatpush.bf16.msra.mxu0 %v2801_v15  ;;  %v2937_v33 = vor.u32 %v3261_v16, %v2936_v8  ;;  %v2832_v39 = vld [vmem:[%s5131_s6 + $0xa0] sm:$0xf]  ;;  %v3251_v8 = vld [vmem:[%s5131_s6 + $0x124] sm:$0xf0] }
 0x157   :  { %1474 = vmatpush.bf16.msrb.mxu3 %v2685_v13 }
 0x158   :  { %v952_v34 = vmax.f32 %v929_v17, %v934_v43  ;;  %v2848_v17 = vld [vmem:[%s5131_s6 + $0xc0] sm:$0xf]  ;;  %1907 = vmatpush.bf16.msra.mxu2 %v2937_v33  ;;  %v2794_v33 = vld [vmem:[%s5131_s6 + $0x58] sm:$0xf0] }
 0x159   :  { %1450 = vmatpush.bf16.msrb.mxu1 %v2649_v46  ;;  %v3237_v46 = vld [vmem:[%s5131_s6 + $0xb4] sm:$0xf0] }
 0x15a   :  { %1439 = vmatmul.bf16.vlgmr.msrb.gmra.mxu0 %v4535_v51  ;;  %1465 = vmatmul.bf16.vlgmr.msrb.gmra.mxu2 %v4535_v51  ;;  %v3191_v51 = vld [vmem:[%s5129_s4 + $0x14c] sm:$0xf] }
 0x15b   :  { %v913_v35 = vpop.f32.mrf.mxu2  ;;  %v2669_v12 = vor.u32 %v3191_v51, %v2666_v14  ;;  %1883 = vmatpush.bf16.msra.mxu0 %v2793_v44  ;;  %v2784_v51 = vld [vmem:[%s5131_s6 + $0x40] sm:$0xf]  ;;  %v3223_v14 = vld [vmem:[%s5131_s6 + $0x44] sm:$0xf0] }
 0x15c   :  { %v914_v47 = vadd.f32 %v913_v35, %v891_v23  ;;  %v936_v63 = vpop.f32.mrf.mxu3  ;;  %v869_v18 = vpop.f32.mrf.mxu0  ;;  %v3243_v35 = vld [vmem:[%s5131_s6 + $0xe4] sm:$0xf0]  ;;  %v2785_v43 = vor.u32 %v3223_v14, %v2784_v51  ;;  %v3244_v14 = vld [vmem:[%s5131_s6 + $0xf4] sm:$0xf] }
 0x15d   :  { %v892_v7 = vpop.f32.mrf.mxu1  ;;  %1475 = vmatpush.bf16.msrb.mxu3 %v2669_v12  ;;  %1451 = vmatpush.bf16.msrb.mxu1 %v2633_v55  ;;  %v2865_v13 = vor.u32 %v3243_v35, %v2864_v2  ;;  %v2816_v2 = vld [vmem:[%s5131_s6 + $0x80] sm:$0xf]  ;;  %v3231_v44 = vld [vmem:[%s5131_s6 + $0x84] sm:$0xf0] }
 0x15e   :  { %v937_v21 = vadd.f32 %v936_v63, %v914_v47  ;;  %v2856_v47 = vld [vmem:[%s5131_s6 + $0xd0] sm:$0xf]  ;;  %v3241_v63 = vld [vmem:[%s5131_s6 + $0xd4] sm:$0xf0]  ;;  %v2976_v35 = vld [vmem:[%s5131_s6 + $0x1c0] sm:$0xf] }
 0x15f   :  { %1884 = vmatpush.bf16.msra.mxu0 %v2785_v43  ;;  %v2857_v18 = vor.u32 %v3241_v63, %v2856_v47  ;;  %v3221_v7 = vld [vmem:[%s5131_s6 + $0x34] sm:$0xf0]  ;;  %v3271_v51 = vld [vmem:[%s5131_s6 + $0x1c4] sm:$0xf0]  ;;  %v2874_v43 = vld [vmem:[%s5131_s6 + $0xf8] sm:$0xf0]  ;;  %v2805_v63 = vor.u32 %v3226_v4, %v2802_v32 }
 0x160   :  { %v953_v45 = vsel %vm670_vm0, %v937_v21, -inf  ;;  %v2777_v12 = vor.u32 %v3221_v7, %v2776_v41  ;;  %v3239_v21 = vld [vmem:[%s5131_s6 + $0xc4] sm:$0xf0]  ;;  %v2977_v41 = vor.u32 %v3271_v51, %v2976_v35  ;;  %v2896_v7 = vld [vmem:[%s5131_s6 + $0x120] sm:$0xf] }
 0x161   :  { %v954_v52 = vmax.f32 %v951_v48, %v953_v45  ;;  %1476 = vmatpush.bf16.msrb.mxu3 %v2653_v50  ;;  %v2849_v5 = vor.u32 %v3239_v21, %v2848_v17  ;;  %v2928_v48 = vld [vmem:[%s5131_s6 + $0x160] sm:$0xf]  ;;  %v3259_v45 = vld [vmem:[%s5131_s6 + $0x164] sm:$0xf0]  ;;  %v2897_v16 = vor.u32 %v3251_v8, %v2896_v7  ;;  %v3224_v21 = vld [vmem:[%s5131_s6 + $0x54] sm:$0xf] }
 0x162   :  { %v2929_v50 = vor.u32 %v3259_v45, %v2928_v48  ;;  %v3242_v45 = vld [vmem:[%s5131_s6 + $0xe4] sm:$0xf]  ;;  %v2944_v4 = vld [vmem:[%s5131_s6 + $0x180] sm:$0xf]  ;;  %v3263_v32 = vld [vmem:[%s5131_s6 + $0x184] sm:$0xf0] }
 0x163   :  { %v955_v28 = vmax.f32 %v954_v52, %v952_v34  ;;  %v915_v30 = vpop.f32.mrf.mxu2  ;;  %1885 = vmatpush.bf16.msra.mxu0 %v2777_v12  ;;  %v2769_v34 = vor.u32 %v3219_v59, %v2768_v36  ;;  %v2840_v52 = vld [vmem:[%s5131_s6 + $0xb0] sm:$0xf]  ;;  %v2877_v12 = vor.u32 %v3244_v14, %v2874_v43  ;;  %v3269_v59 = vld [vmem:[%s5131_s6 + $0x1b4] sm:$0xf0]  ;;  %v3236_v35 = vld [vmem:[%s5131_s6 + $0xb4] sm:$0xf] }
 0x164   :  { %v938_v31 = vpop.f32.mrf.mxu3  ;;  %v2841_v56 = vor.u32 %v3237_v46, %v2840_v52  ;;  %v3217_v30 = vld [vmem:[%s5131_s6 + $0x14] sm:$0xf0]  ;;  %1908 = vmatpush.bf16.msra.mxu2 %v2929_v50  ;;  %v2968_v36 = vld [vmem:[%s5131_s6 + $0x1b0] sm:$0xf]  ;;  %v2866_v52 = vld [vmem:[%s5131_s6 + $0xe8] sm:$0xf0] }
 0x165   :  { %v956_v54 = vrot.slane %v955_v28, 4  ;;  %1477 = vmatpush.bf16.msrb.mxu3 %v2637_v60  ;;  %v2920_v31 = vld [vmem:[%s5131_s6 + $0x150] sm:$0xf]  ;;  %v2761_v55 = vor.u32 %v3217_v30, %v2760_v29  ;;  %v2869_v46 = vor.u32 %v3242_v45, %v2866_v52  ;;  %v2786_v29 = vld [vmem:[%s5131_s6 + $0x48] sm:$0xf0] }
 0x166   :  { %v2888_v50 = vld [vmem:[%s5131_s6 + $0x110] sm:$0xf]  ;;  %v2960_v30 = vld [vmem:[%s5131_s6 + $0x1a0] sm:$0xf]  ;;  %v3276_v51 = vld [vmem:[%s5131_s6 + $0x1f4] sm:$0xf] }
 0x167   :  { %v957_v61 = vmax.f32 %v955_v28, %v956_v54  ;;  %1886 = vmatpush.bf16.msra.mxu0 %v2769_v34  ;;  %v3001_v28 = vor.u32 %v3277_v24, %v3000_v25  ;;  %v3257_v54 = vld [vmem:[%s5131_s6 + $0x154] sm:$0xf0]  ;;  %v2969_v34 = vor.u32 %v3269_v59, %v2968_v36  ;;  %v3222_v24 = vld [vmem:[%s5131_s6 + $0x44] sm:$0xf]  ;;  %v3002_v43 = vld [vmem:[%s5131_s6 + $0x1f8] sm:$0xf0] }
 0x168   :  { %v2921_v60 = vor.u32 %v3257_v54, %v2920_v31  ;;  %v3267_v31 = vld [vmem:[%s5131_s6 + $0x1a4] sm:$0xf0]  ;;  %v3256_v7 = vld [vmem:[%s5131_s6 + $0x154] sm:$0xf]  ;;  %v2994_v36 = vld [vmem:[%s5131_s6 + $0x1e8] sm:$0xf0] }
 0x169   :  { %v958_v38 = vrot.slane %v957_v61, 2  ;;  %v2961_v54 = vor.u32 %v3267_v31, %v2960_v30  ;;  %v2754_v45 = vld [vmem:[%s5131_s6 + $0x8] sm:$0xf0]  ;;  %v3254_v52 = vld [vmem:[%s5131_s6 + $0x144] sm:$0xf] }
 0x16a   :  { %1909 = vmatpush.bf16.msra.mxu2 %v2921_v60  ;;  %v2858_v60 = vld [vmem:[%s5131_s6 + $0xd8] sm:$0xf0] }
 0x16b   :  { %v959_v40 = vmax.f32 %v957_v61, %v958_v38  ;;  %v3235_v61 = vld [vmem:[%s5131_s6 + $0xa4] sm:$0xf0]  ;;  %v2992_v38 = vld [vmem:[%s5131_s6 + $0x1e0] sm:$0xf]  ;;  %1887 = vmatpush.bf16.msra.mxu0 %v2761_v55  ;;  %v3240_v55 = vld [vmem:[%s5131_s6 + $0xd4] sm:$0xf] }
 0x16c   :  { %v2833_v0 = vor.u32 %v3235_v61, %v2832_v39  ;;  %v2861_v39 = vor.u32 %v3240_v55, %v2858_v60  ;;  %v2880_v61 = vld [vmem:[%s5131_s6 + $0x100] sm:$0xf]  ;;  %v2986_v30 = vld [vmem:[%s5131_s6 + $0x1d8] sm:$0xf0] }
 0x16d   :  { %v960_v10 = vrot.slane %v959_v40, 1  ;;  %v2906_v55 = vld [vmem:[%s5131_s6 + $0x138] sm:$0xf0]  ;;  %v5004_v60 = vld [vmem:[%s5130_s5] sm:$0xf] }
 0x16f   :  { %v961_v20 = vmax.f32 %v959_v40, %v960_v10  ;;  %v3275_v40 = vld [vmem:[%s5131_s6 + $0x1e4] sm:$0xf0]  ;;  %v2752_v10 = vld [vmem:[%s5131_s6] sm:$0xf] }
 0x171   :  { %v964_v27 = vsel %vm962_vm1, %v690_v19, %v961_v20  ;;  %v2993_v19 = vor.u32 %v3275_v40, %v2992_v38  ;;  %v2912_v20 = vld [vmem:[%s5131_s6 + $0x140] sm:$0xf]  ;;  %v3247_v38 = vld [vmem:[%s5131_s6 + $0x104] sm:$0xf0] }
 0x172   :  { %v972_v1 = vmul.f32 %v968_v11, %v964_v27  ;;  %v3215_v11 = vld [vmem:[%s5131_s6 + $0x4] sm:$0xf0]  ;;  %v3228_v27 = vld [vmem:[%s5131_s6 + $0x74] sm:$0xf]  ;;  %v2881_v40 = vor.u32 %v3247_v38, %v2880_v61  ;;  %v3230_v61 = vld [vmem:[%s5131_s6 + $0x84] sm:$0xf] }
 0x173   :  { %v2818_v38 = vld [vmem:[%s5131_s6 + $0x88] sm:$0xf0] }
 0x174   :  { %v980_v3 = vadd.f32 %v976_v26, %v972_v1  ;;  %v3255_v26 = vld [vmem:[%s5131_s6 + $0x144] sm:$0xf0]  ;;  %v2753_v1 = vor.u32 %v3215_v11, %v2752_v10  ;;  %v3220_v10 = vld [vmem:[%s5131_s6 + $0x34] sm:$0xf]  ;;  %v2778_v11 = vld [vmem:[%s5131_s6 + $0x38] sm:$0xf0] }
 0x175   :  { %v2913_v22 = vor.u32 %v3255_v26, %v2912_v20  ;;  %v2781_v20 = vor.u32 %v3220_v10, %v2778_v11  ;;  %v2938_v26 = vld [vmem:[%s5131_s6 + $0x178] sm:$0xf0]  ;;  %v2821_v10 = vor.u32 %v3230_v61, %v2818_v38  ;;  %v2978_v11 = vld [vmem:[%s5131_s6 + $0x1c8] sm:$0xf0]  ;;  %v3278_v38 = vld [vmem:[%s5133_s8] sm:$0xff] }
 0x176   :  { %v982_v42 = vmax.f32 %v980_v3, 0.0  ;;  %v2810_v3 = vld [vmem:[%s5131_s6 + $0x78] sm:$0xf0]  ;;  %1888 = vmatpush.bf16.msra.mxu0 %v2753_v1  ;;  %v3265_v1 = vld [vmem:[%s5131_s6 + $0x194] sm:$0xf0]  ;;  %v3291_v61 = vld [vmem:[%s5133_s8 + $0x68] sm:$0xff] }
 0x177   :  { %v2813_v58 = vor.u32 %v3228_v27, %v2810_v3  ;;  %1910 = vmatpush.bf16.msra.mxu2 %v2913_v22  ;;  %v2952_v27 = vld [vmem:[%s5131_s6 + $0x190] sm:$0xf]  ;;  %v3238_v22 = vld [vmem:[%s5131_s6 + $0xc4] sm:$0xf] }
 0x178   :  { %v984_v23 = vpack.c.bf16 %v982_v42, %v982_v42  ;;  %v2824_v42 = vld [vmem:[%s5131_s6 + $0x90] sm:$0xf] }
 0x17a   :  { %1400 = vmatmul.bf16.vlgmr.msra.gmra.mxu1 %v984_v23  ;;  %1426 = vmatmul.bf16.vlgmr.msra.gmra.mxu3 %v984_v23 }
 0x17b   :  { %1894 = vmatpush.bf16.msra.mxu1 %v2873_v49  ;;  %1920 = vmatpush.bf16.msra.mxu3 %v3001_v28  ;;  %v3253_v49 = vld [vmem:[%s5131_s6 + $0x134] sm:$0xf0]  ;;  %v2789_v28 = vor.u32 %v3222_v24, %v2786_v29  ;;  %v2826_v24 = vld [vmem:[%s5131_s6 + $0x98] sm:$0xf0]  ;;  %v3272_v29 = vld [vmem:[%s5131_s6 + $0x1d4] sm:$0xf] }
 0x17c   :  { %1933 = vmatpush.bf16.msrb.mxu0 %v2813_v58  ;;  %v2905_v47 = vor.u32 %v3253_v49, %v2904_v37  ;;  %v2850_v58 = vld [vmem:[%s5131_s6 + $0xc8] sm:$0xf0]  ;;  %v2989_v31 = vor.u32 %v3272_v29, %v2986_v30  ;;  %v3282_v30 = vld [vmem:[%s5133_s8 + $0x20] sm:$0xff] }
 0x17d   :  { %v2853_v53 = vor.u32 %v3238_v22, %v2850_v58  ;;  %v2770_v37 = vld [vmem:[%s5131_s6 + $0x28] sm:$0xf0]  ;;  %v3248_v22 = vld [vmem:[%s5131_s6 + $0x114] sm:$0xf]  ;;  %v2890_v58 = vld [vmem:[%s5131_s6 + $0x118] sm:$0xf0] }
 0x17e   :  { %1911 = vmatpush.bf16.msra.mxu2 %v2905_v47  ;;  %v2930_v49 = vld [vmem:[%s5131_s6 + $0x168] sm:$0xf0] }
 0x17f   :  { %1895 = vmatpush.bf16.msra.mxu1 %v2865_v13  ;;  %1921 = vmatpush.bf16.msra.mxu3 %v2993_v19  ;;  %v3260_v19 = vld [vmem:[%s5131_s6 + $0x174] sm:$0xf] }
 0x180   :  { %1934 = vmatpush.bf16.msrb.mxu0 %v2805_v63  ;;  %v3005_v63 = vor.u32 %v3276_v51, %v3002_v43 }
 0x182   :  { %1912 = vmatpush.bf16.msra.mxu2 %v2897_v16 }
 0x183   :  { %1896 = vmatpush.bf16.msra.mxu1 %v2857_v18  ;;  %1922 = vmatpush.bf16.msra.mxu3 %v2985_v57  ;;  %v2817_v18 = vor.u32 %v3231_v44, %v2816_v2  ;;  %v2773_v57 = vor.u32 %v3218_v62, %v2770_v37  ;;  %v2945_v44 = vor.u32 %v3263_v32, %v2944_v4 }
 0x184   :  { %v2893_v37 = vor.u32 %v3248_v22, %v2890_v58 }
 0x187   :  { %1897 = vmatpush.bf16.msra.mxu1 %v2849_v5  ;;  %1923 = vmatpush.bf16.msra.mxu3 %v2977_v41  ;;  %v2797_v5 = vor.u32 %v3224_v21, %v2794_v33  ;;  %v2762_v41 = vld [vmem:[%s5131_s6 + $0x18] sm:$0xf0]  ;;  %v2834_v21 = vld [vmem:[%s5131_s6 + $0xa8] sm:$0xf0]  ;;  %v3274_v33 = vld [vmem:[%s5131_s6 + $0x1e4] sm:$0xf] }
 0x188   :  { %v2997_v59 = vor.u32 %v3274_v33, %v2994_v36  ;;  %v1054_v36 = vperm.slane %v5004_v60, 3 }
 0x189   :  { %1935 = vmatpush.bf16.msrb.mxu0 %v2797_v5 }
 0x18a   :  { %1452 = vmatmul.bf16.vlgmr.msrb.gmra.mxu1 %v984_v23  ;;  %1478 = vmatmul.bf16.vlgmr.msrb.gmra.mxu3 %v984_v23  ;;  %v3233_v23 = vld [vmem:[%s5131_s6 + $0x94] sm:$0xf0] }
 0x18b   :  { %1898 = vmatpush.bf16.msra.mxu1 %v2841_v56  ;;  %v2825_v6 = vor.u32 %v3233_v23, %v2824_v42  ;;  %v3249_v56 = vld [vmem:[%s5131_s6 + $0x114] sm:$0xf0]  ;;  %1924 = vmatpush.bf16.msra.mxu3 %v2969_v34  ;;  %v2941_v42 = vor.u32 %v3260_v19, %v2938_v26  ;;  %v2953_v23 = vor.u32 %v3265_v1, %v2952_v27  ;;  %v3214_v34 = vld [vmem:[%s5131_s6 + $0x4] sm:$0xf]  ;;  %v2898_v26 = vld [vmem:[%s5131_s6 + $0x128] sm:$0xf0] }
 0x18c   :  { %v2889_v25 = vor.u32 %v3249_v56, %v2888_v50  ;;  %v2914_v50 = vld [vmem:[%s5131_s6 + $0x148] sm:$0xf0]  ;;  %v1051_v27 = vperm.slane %v5004_v60, 0 }
 0x18d   :  { %1936 = vmatpush.bf16.msrb.mxu0 %v2789_v28  ;;  %v2917_v56 = vor.u32 %v3254_v52, %v2914_v50 }
 0x18e   :  { %1913 = vmatpush.bf16.msra.mxu2 %v2889_v25  ;;  %v3232_v25 = vld [vmem:[%s5131_s6 + $0x94] sm:$0xf] }
 0x18f   :  { %1899 = vmatpush.bf16.msra.mxu1 %v2833_v0  ;;  %1925 = vmatpush.bf16.msra.mxu3 %v2961_v54  ;;  %v2829_v28 = vor.u32 %v3232_v25, %v2826_v24  ;;  %v3252_v54 = vld [vmem:[%s5131_s6 + $0x134] sm:$0xf] }
 0x191   :  { %1937 = vmatpush.bf16.msrb.mxu0 %v2781_v20  ;;  %v3250_v20 = vld [vmem:[%s5131_s6 + $0x124] sm:$0xf] }
 0x192   :  { %1914 = vmatpush.bf16.msra.mxu2 %v2881_v40  ;;  %v3270_v40 = vld [vmem:[%s5131_s6 + $0x1c4] sm:$0xf]  ;;  %v2901_v1 = vor.u32 %v3250_v20, %v2898_v26  ;;  %v3288_v20 = vld [vmem:[%s5133_s8 + $0x50] sm:$0xff] }
 0x193   :  { %1900 = vmatpush.bf16.msra.mxu1 %v2825_v6  ;;  %1926 = vmatpush.bf16.msra.mxu3 %v2953_v23  ;;  %v3258_v6 = vld [vmem:[%s5131_s6 + $0x164] sm:$0xf]  ;;  %v2981_v19 = vor.u32 %v3270_v40, %v2978_v11  ;;  %v3289_v11 = vld [vmem:[%s5133_s8 + $0x58] sm:$0xff] }
 0x194   :  { %v2933_v2 = vor.u32 %v3258_v6, %v2930_v49  ;;  %v2962_v6 = vld [vmem:[%s5131_s6 + $0x1a8] sm:$0xf0]  ;;  %v3290_v40 = vld [vmem:[%s5133_s8 + $0x60] sm:$0xff] }
 0x195   :  { %1938 = vmatpush.bf16.msrb.mxu0 %v2773_v57  ;;  %v3246_v57 = vld [vmem:[%s5131_s6 + $0x104] sm:$0xf]  ;;  %v2882_v49 = vld [vmem:[%s5131_s6 + $0x108] sm:$0xf0] }
 0x196   :  { %1959 = vmatpush.bf16.msrb.mxu2 %v2941_v42  ;;  %v2970_v42 = vld [vmem:[%s5131_s6 + $0x1b8] sm:$0xf0] }
 0x197   :  { %1901 = vmatpush.bf16.msra.mxu1 %v2817_v18  ;;  %1927 = vmatpush.bf16.msra.mxu3 %v2945_v44  ;;  %v3216_v18 = vld [vmem:[%s5131_s6 + $0x14] sm:$0xf] }
 0x198   :  { %v2765_v8 = vor.u32 %v3216_v18, %v2762_v41  ;;  %v3262_v41 = vld [vmem:[%s5131_s6 + $0x184] sm:$0xf] }
 0x19a   :  { %1960 = vmatpush.bf16.msrb.mxu2 %v2933_v2  ;;  %1939 = vmatpush.bf16.msrb.mxu0 %v2765_v8  ;;  %v1052_v2 = vperm.slane %v5004_v60, 1 }
 0x19b   :  { %1946 = vmatpush.bf16.msrb.mxu1 %v2877_v12  ;;  %v2922_v12 = vld [vmem:[%s5131_s6 + $0x158] sm:$0xf0]  ;;  %1972 = vmatpush.bf16.msrb.mxu3 %v3005_v63 }
 0x19c   :  { %v2925_v16 = vor.u32 %v3256_v7, %v2922_v12  ;;  %v2946_v7 = vld [vmem:[%s5131_s6 + $0x188] sm:$0xf0] }
 0x19d   :  { %v2949_v12 = vor.u32 %v3262_v41, %v2946_v7 }
 0x19e   :  { %1961 = vmatpush.bf16.msrb.mxu2 %v2925_v16 }
 0x19f   :  { %1947 = vmatpush.bf16.msrb.mxu1 %v2869_v46  ;;  %v2757_v46 = vor.u32 %v3214_v34, %v2754_v45  ;;  %1973 = vmatpush.bf16.msrb.mxu3 %v2997_v59 }
 0x1a1   :  { %1940 = vmatpush.bf16.msrb.mxu0 %v2757_v46 }
 0x1a2   :  { %1962 = vmatpush.bf16.msrb.mxu2 %v2917_v56 }
 0x1a3   :  { %1948 = vmatpush.bf16.msrb.mxu1 %v2861_v39  ;;  %v2909_v39 = vor.u32 %v3252_v54, %v2906_v55  ;;  %1974 = vmatpush.bf16.msrb.mxu3 %v2989_v31  ;;  %v3281_v31 = vld [vmem:[%s5133_s8 + $0x18] sm:$0xff]  ;;  %v3280_v55 = vld [vmem:[%s5133_s8 + $0x10] sm:$0xff] }
 0x1a4   :  { %v3293_v54 = vld [vmem:[%s5133_s8 + $0x78] sm:$0xff] }
 0x1a6   :  { %1963 = vmatpush.bf16.msrb.mxu2 %v2909_v39  ;;  %v3279_v39 = vld [vmem:[%s5133_s8 + $0x8] sm:$0xff] }
 0x1a7   :  { %1949 = vmatpush.bf16.msrb.mxu1 %v2853_v53  ;;  %1975 = vmatpush.bf16.msrb.mxu3 %v2981_v19  ;;  %v3266_v53 = vld [vmem:[%s5131_s6 + $0x1a4] sm:$0xf] }
 0x1a8   :  { %v2965_v32 = vor.u32 %v3266_v53, %v2962_v6 }
 0x1aa   :  { %1964 = vmatpush.bf16.msrb.mxu2 %v2901_v1 }
 0x1ae   :  { %1965 = vmatpush.bf16.msrb.mxu2 %v2893_v37 }
 0x1c7   :  { %v4750_v9 = vpop.f32.mrf.mxu0 }
 0x1c8   :  { %v1389_v62 = vadd.f32 %v4750_v9, %v1051_v27  ;;  %v3264_v9 = vld [vmem:[%s5131_s6 + $0x194] sm:$0xf]  ;;  %v3287_v27 = vld [vmem:[%s5133_s8 + $0x48] sm:$0xff] }
 0x1cd   :  { %v4806_v15 = vpop.f32.mrf.mxu2 }
 0x1ce   :  { %v1415_v43 = vadd.f32 %v4806_v15, %v1052_v2 }
 0x1cf   :  { %v1390_v13 = vpop.f32.mrf.mxu0 }
 0x1d0   :  { %v2842_v13 = vld [vmem:[%s5131_s6 + $0xb8] sm:$0xf0] }
 0x1d1   :  { %v2845_v14 = vor.u32 %v3236_v35, %v2842_v13  ;;  %v2954_v35 = vld [vmem:[%s5131_s6 + $0x198] sm:$0xf0]  ;;  %v2885_v13 = vor.u32 %v3246_v57, %v2882_v49 }
 0x1d3   :  { %1950 = vmatpush.bf16.msrb.mxu1 %v2845_v14  ;;  %v2957_v14 = vor.u32 %v3264_v9, %v2954_v35  ;;  %1966 = vmatpush.bf16.msrb.mxu2 %v2885_v13 }
 0x1d5   :  { %v1416_v17 = vpop.f32.mrf.mxu2 }
 0x1d6   :  { %v3234_v17 = vld [vmem:[%s5131_s6 + $0xa4] sm:$0xf] }
 0x1d7   :  { %v4853_v48 = vpop.f32.mrf.mxu0  ;;  %v2837_v5 = vor.u32 %v3234_v17, %v2834_v21  ;;  %v1053_v17 = vperm.slane %v5004_v60, 2  ;;  %v3292_v60 = vld [vmem:[%s5133_s8 + $0x70] sm:$0xff] }
 0x1d9   :  { %1951 = vmatpush.bf16.msrb.mxu1 %v2837_v5  ;;  %v1441_v33 = vadd.f32 %v4853_v48, %v1053_v17  ;;  %v3285_v48 = vld [vmem:[%s5133_s8 + $0x38] sm:$0xff] }
 0x1dd   :  { %v4891_v0 = vpop.f32.mrf.mxu2  ;;  %1952 = vmatpush.bf16.msrb.mxu1 %v2829_v28  ;;  %v3283_v28 = vld [vmem:[%s5133_s8 + $0x28] sm:$0xff] }
 0x1de   :  { %v1467_v45 = vadd.f32 %v4891_v0, %v1054_v36  ;;  %v3284_v0 = vld [vmem:[%s5133_s8 + $0x30] sm:$0xff] }
 0x1df   :  { %v1442_v3 = vpop.f32.mrf.mxu0 }
 0x1e0   :  { %v3268_v3 = vld [vmem:[%s5131_s6 + $0x1b4] sm:$0xf] }
 0x1e1   :  { %1953 = vmatpush.bf16.msrb.mxu1 %v2821_v10  ;;  %v2973_v23 = vor.u32 %v3268_v3, %v2970_v42  ;;  %v3286_v3 = vld [vmem:[%s5133_s8 + $0x40] sm:$0xff] }
 0x1e2   :  { %v1555_v42 = vld [vmem:[%s5132_s7] sm:$0x3] }
 0x1e3   :  { %1976 = vmatpush.bf16.msrb.mxu3 %v2973_v23  ;;  %v1557_v22 = vperm.slane %v1555_v42, 0  ;;  %v1558_v35 = vperm.slane %v1555_v42, 1 }
 0x1e5   :  { %v1468_v47 = vpop.f32.mrf.mxu2 }
 0x1e7   :  { %1977 = vmatpush.bf16.msrb.mxu3 %v2965_v32 }
 0x1eb   :  { %1978 = vmatpush.bf16.msrb.mxu3 %v2957_v14 }
 0x1ef   :  { %1979 = vmatpush.bf16.msrb.mxu3 %v2949_v12 }
 0x1f7   :  { %v1401_v4 = vpop.f32.mrf.mxu1 }
 0x1f8   :  { %v1402_v44 = vadd.f32 %v1401_v4, %v1389_v62 }
 0x1fa   :  { %v1483_v51 = vmax.f32 %v1402_v44, 0.0 }
 0x1fc   :  { %v1487_v47 = vpack.c.bf16 %v1483_v51, %v1483_v51 }
 0x1fd   :  { %v1427_v63 = vpop.f32.mrf.mxu3 }
 0x1fe   :  { %v1428_v18 = vadd.f32 %v1427_v63, %v1415_v43  ;;  %1889 = vmatmul.bf16.vlgmr.msra.gmra.mxu0 %v1487_v47 }
 0x1ff   :  { %v1403_v8 = vpop.f32.mrf.mxu1  ;;  %2121 = vmatpush.bf16.msra.mxu0 %v3285_v48 }
 0x200   :  { %v1484_v16 = vmax.f32 %v1428_v18, 0.0 }
 0x202   :  { %v1488_v15 = vpack.c.bf16 %v1484_v16, %v1484_v16 }
 0x203   :  { %2122 = vmatpush.bf16.msra.mxu0 %v3284_v0 }
 0x204   :  { %1902 = vmatmul.bf16.vlgmr.msra.gmra.mxu1 %v1488_v15 }
 0x205   :  { %v1429_v21 = vpop.f32.mrf.mxu3  ;;  %2134 = vmatpush.bf16.msra.mxu1 %v3293_v54 }
 0x207   :  { %v1453_v5 = vpop.f32.mrf.mxu1  ;;  %2123 = vmatpush.bf16.msra.mxu0 %v3283_v28 }
 0x208   :  { %v1454_v59 = vadd.f32 %v1453_v5, %v1441_v33 }
 0x209   :  { %2135 = vmatpush.bf16.msra.mxu1 %v3292_v60 }
 0x20a   :  { %v1485_v34 = vmax.f32 %v1454_v59, 0.0 }
 0x20b   :  { %2124 = vmatpush.bf16.msra.mxu0 %v3282_v30 }
 0x20c   :  { %v1489_v52 = vpack.c.bf16 %v1485_v34, %v1485_v34 }
 0x20d   :  { %v1479_v46 = vpop.f32.mrf.mxu3  ;;  %2136 = vmatpush.bf16.msra.mxu1 %v3291_v61 }
 0x20e   :  { %v1480_v50 = vadd.f32 %v1479_v46, %v1467_v45  ;;  %1915 = vmatmul.bf16.vlgmr.msra.gmra.mxu2 %v1489_v52  ;;  %1941 = vmatmul.bf16.vlgmr.msrb.gmra.mxu0 %v1487_v47 }
 0x20f   :  { %v1455_v56 = vpop.f32.mrf.mxu1  ;;  %2125 = vmatpush.bf16.msra.mxu0 %v3281_v31 }
 0x210   :  { %v1486_v25 = vmax.f32 %v1480_v50, 0.0 }
 0x211   :  { %2137 = vmatpush.bf16.msra.mxu1 %v3290_v40 }
 0x212   :  { %v1490_v24 = vpack.c.bf16 %v1486_v25, %v1486_v25 }
 0x213   :  { %2126 = vmatpush.bf16.msra.mxu0 %v3280_v55 }
 0x214   :  { %1928 = vmatmul.bf16.vlgmr.msra.gmra.mxu3 %v1490_v24  ;;  %1954 = vmatmul.bf16.vlgmr.msrb.gmra.mxu1 %v1488_v15  ;;  %v3295_v15 = vld [vmem:[%s5134_s9] ss:$0 sm:$0xff] }
 0x215   :  { %v1481_v29 = vpop.f32.mrf.mxu3  ;;  %2138 = vmatpush.bf16.msra.mxu1 %v3289_v11 }
 0x217   :  { %2127 = vmatpush.bf16.msra.mxu0 %v3279_v39 }
 0x219   :  { %2139 = vmatpush.bf16.msra.mxu1 %v3288_v20 }
 0x21b   :  { %2128 = vmatpush.bf16.msra.mxu0 %v3278_v38 }
 0x21d   :  { %2140 = vmatpush.bf16.msra.mxu1 %v3287_v27 }
 0x21e   :  { %1967 = vmatmul.bf16.vlgmr.msrb.gmra.mxu2 %v1489_v52 }
 0x221   :  { %2141 = vmatpush.bf16.msra.mxu1 %v3286_v3 }
 0x224   :  { %1980 = vmatmul.bf16.vlgmr.msrb.gmra.mxu3 %v1490_v24 }
 0x27b   :  { %v1890_v10 = vpop.f32.mrf.mxu0 }
 0x27c   :  { %v1891_v62 = vadd.f32 %v1890_v10, %v1557_v22 }
 0x281   :  { %v1903_v19 = vpop.f32.mrf.mxu1 }
 0x282   :  { %v1904_v6 = vadd.f32 %v1903_v19, %v1891_v62 }
 0x283   :  { %v1892_v26 = vpop.f32.mrf.mxu0 }
 0x289   :  { %v1905_v1 = vpop.f32.mrf.mxu1 }
 0x28b   :  { %v1942_v23 = vpop.f32.mrf.mxu0 }
 0x28c   :  { %v1943_v14 = vadd.f32 %v1942_v23, %v1558_v35 }
 0x291   :  { %v1916_v58 = vpop.f32.mrf.mxu2  ;;  %v1955_v53 = vpop.f32.mrf.mxu1 }
 0x292   :  { %v1917_v57 = vadd.f32 %v1916_v58, %v1904_v6  ;;  %v1956_v43 = vadd.f32 %v1955_v53, %v1943_v14 }
 0x293   :  { %v1944_v37 = vpop.f32.mrf.mxu0 }
 0x297   :  { %v1929_v49 = vpop.f32.mrf.mxu3 }
 0x298   :  { %v1930_v4 = vadd.f32 %v1929_v49, %v1917_v57 }
 0x299   :  { %v1918_v32 = vpop.f32.mrf.mxu2  ;;  %v1957_v2 = vpop.f32.mrf.mxu1 }
 0x29a   :  { %v1985_v44 = vmax.f32 %v1930_v4, 0.0 }
 0x29c   :  { %v1987_v9 = vpack.c.bf16 %v1985_v44, %v1985_v44 }
 0x29e   :  { %2129 = vmatmul.bf16.vlgmr.msra.gmra.mxu0 %v1987_v9 }
 0x29f   :  { %v1931_v13 = vpop.f32.mrf.mxu3 }
 0x2a1   :  { %v1968_v51 = vpop.f32.mrf.mxu2 }
 0x2a2   :  { %v1969_v47 = vadd.f32 %v1968_v51, %v1956_v43 }
 0x2a7   :  { %v1981_v63 = vpop.f32.mrf.mxu3 }
 0x2a8   :  { %v1982_v18 = vadd.f32 %v1981_v63, %v1969_v47 }
 0x2a9   :  { %v1970_v41 = vpop.f32.mrf.mxu2 }
 0x2aa   :  { %v1986_v7 = vmax.f32 %v1982_v18, 0.0 }
 0x2ac   :  { %v1988_v8 = vpack.c.bf16 %v1986_v7, %v1986_v7 }
 0x2ae   :  { %2142 = vmatmul.bf16.vlgmr.msra.gmra.mxu1 %v1988_v8 }
 0x2af   :  { %v1983_v12 = vpop.f32.mrf.mxu3 }
 0x31b   :  { %v2130_v16 = vpop.f32.mrf.mxu0 }
 0x31c   :  { %v2131_v21 = vadd.f32 %v3295_v15, %v2130_v16 }
 0x323   :  { %v2132_v17 = vpop.f32.mrf.mxu0 }
 0x32b   :  { %v2143_v33 = vpop.f32.mrf.mxu1 }
 0x32c   :  { %v2144_v5 = vadd.f32 %v2143_v33, %v2131_v21 }
 0x32e   :  { %2147 = vst [vmem:[#allocation2] sm:$0x3] %v2144_v5 }
 0x32f   :  { %2158 = dma.vmem_to_hbm [thread:$0]  %s2154_s17, 32, %s2156_s19, [#allocation3]  }
 0x333   :  { %v2145_v36 = vpop.f32.mrf.mxu1 }
 0x334   :  { %3320 = dma.done.wait [#allocation3], 32  }
 0x335   :  { %3321 = vsyncadd [#allocation3], 4294967264 }
 0x336   :  { %2163 = vsyncpa [#allocation3], 1 }

</bundles_post_ra>
